<compile_context>
chip_gen: v7x
topology: tpu7x:2x2x1
jax: 0.10.0
libtpu: 0.0.40
codegen_flags: <defaults>
</compile_context>

<pallas_src>
import numpy as np
import jax
import jax.numpy as jnp
from jax.experimental import pallas as pl
from jax.experimental.pallas import tpu as pltpu


# ---------------------------------------------------------------------------
# Fused Pallas kernel (one grid step == one image)
# ---------------------------------------------------------------------------
def _fused_forward_kernel(p1_ref, g2_ref, w1_ref, b1_ref, w2_ref, b2_ref,
                          w3_ref, b3_ref, w4_ref, b4_ref, o_ref):
    f32 = jnp.float32

    # conv1 (im2col matmul) + bias; rows ordered (pool-tap, 12x12 window)
    y1 = jnp.dot(p1_ref[...], w1_ref[...], preferred_element_type=f32)
    y1 = y1 + b1_ref[...]                                        # (576, 20)

    # pool1: max over the 4 pool taps (8-aligned 144-row slices)
    a1 = jnp.maximum(jnp.maximum(y1[0:144, :], y1[144:288, :]),
                     jnp.maximum(y1[288:432, :], y1[432:576, :]))  # (144, 20)

    # conv2 im2col as a selection matmul (gather -> MXU work)
    p2 = jnp.dot(g2_ref[...].astype(f32), a1,
                 preferred_element_type=f32)                     # (1600, 20)

    # conv2: accumulate the 25 kernel taps; rows ordered (pool-tap, 4x4)
    acc2 = jnp.zeros((64, 50), f32)
    for k in range(25):
        acc2 = acc2 + jnp.dot(p2[k * 64:(k + 1) * 64, :], w2_ref[k],
                              preferred_element_type=f32)
    y2 = acc2 + b2_ref[...]                                      # (64, 50)

    # pool2: max over the 4 pool taps (8-aligned 16-row slices)
    a2 = jnp.maximum(jnp.maximum(y2[0:16, :], y2[16:32, :]),
                     jnp.maximum(y2[32:48, :], y2[48:64, :]))     # (16, 50)

    # conv3 (4x4 kernel on 4x4 map == full contraction) + bias + ReLU
    acc3 = jnp.zeros((1, 500), f32)
    for s in range(16):
        acc3 = acc3 + jnp.dot(a2[s:s + 1, :], w3_ref[s],
                              preferred_element_type=f32)
    h = jnp.maximum(acc3 + b3_ref[...], 0.0)                     # (1, 500)

    # Linear + Softmax(dim=1)
    # TODO(synk): nn.Dropout(p=0.2) is the identity in eval mode; train-mode
    # random masking (PyTorch RNG parity) is not reproduced here.
    z = jnp.dot(h, w4_ref[...], preferred_element_type=f32) + b4_ref[...]
    z = z - jnp.max(z, axis=1, keepdims=True)
    e = jnp.exp(z)
    o_ref[...] = (e / jnp.sum(e, axis=1, keepdims=True)).astype(o_ref.dtype)


# ---------------------------------------------------------------------------
# Trace-time helpers (input patch layout + constant gather matrix)
# ---------------------------------------------------------------------------
def _conv1_patches(x):
    """x: (B, 28, 28) -> (B, 576, 25) im2col patches for the 5x5 VALID conv.
    Rows ordered (pool_tap = di*2+dj, window = p'*12+q'); cols (i*5+j)."""
    B = x.shape[0]
    taps = []
    for i in range(5):
        for j in range(5):
            taps.append(x[:, i:i + 24, j:j + 24])
    p = jnp.stack(taps, axis=-1)                    # (B, 24, 24, 25)
    p = p.reshape(B, 12, 2, 12, 2, 25)              # (B, p', di, q', dj, k)
    p = p.transpose(0, 2, 4, 1, 3, 5)               # (B, di, dj, p', q', k)
    return p.reshape(B, 576, 25)


def _build_g2():
    """(1600, 144) 0/1 matrix. Row (k, pool_tap, u, v) selects the pooled-conv1
    pixel (12x12 grid, row-major) feeding conv2 tap k at output (2u+di, 2v+dj)."""
    g = np.zeros((25 * 64, 144), np.float32)
    for k in range(25):
        i, j = divmod(k, 5)
        for t2 in range(4):
            di, dj = divmod(t2, 2)
            for u in range(4):
                for v in range(4):
                    r = k * 64 + t2 * 16 + u * 4 + v
                    s = (2 * u + di + i) * 12 + (2 * v + dj + j)
                    g[r, s] = 1.0
    return g


_G2_NP = _build_g2()


# ---------------------------------------------------------------------------
# Forward pass
# ---------------------------------------------------------------------------
def base_drop_forward(x_nchw, params):
    w1, b1, w2, b2, w3, b3, w4, b4 = params
    B = x_nchw.shape[0]

    x = x_nchw.reshape(B, 28, 28)                    # Cin == 1
    p1 = _conv1_patches(x)                           # (B, 576, 25)
    g2 = jnp.asarray(_G2_NP, dtype=jnp.bfloat16)     # 0/1 values: exact in bf16

    # PyTorch (Cout, Cin, KH, KW) -> per-tap (KH*KW, Cin, Cout) matching im2col
    w1m = jnp.transpose(w1, (2, 3, 1, 0)).reshape(25, 20)
    w2t = jnp.transpose(w2, (2, 3, 1, 0)).reshape(25, 20, 50)
    w3t = jnp.transpose(w3, (2, 3, 1, 0)).reshape(16, 50, 500)
    w4m = jnp.transpose(w4, (1, 0))                  # (500, 10)

    def full(shape):
        return pl.BlockSpec(shape, lambda b: (0,) * len(shape))

    out = pl.pallas_call(
        _fused_forward_kernel,
        out_shape=jax.ShapeDtypeStruct((B, 1, 10), x.dtype),
        grid=(B,),
        in_specs=[
            pl.BlockSpec((None, 576, 25), lambda b: (b, 0, 0)),  # per-image patches
            full((1600, 144)),                                   # conv2 gather matrix
            full((25, 20)), full((1, 20)),                       # conv1 w, b
            full((25, 20, 50)), full((1, 50)),                   # conv2 w, b
            full((16, 50, 500)), full((1, 500)),                 # conv3 w, b
            full((500, 10)), full((1, 10)),                      # linear w, b
        ],
        out_specs=pl.BlockSpec((None, 1, 10), lambda b: (b, 0, 0)),
        compiler_params=pltpu.CompilerParams(
            dimension_semantics=("parallel",),
            vmem_limit_bytes=32 * 1024 * 1024),
    )(p1, g2, w1m, b1.reshape(1, 20), w2t, b2.reshape(1, 50),
      w3t, b3.reshape(1, 500), w4m, b4.reshape(1, 10))
    return out.reshape(B, 10)


# ---------------------------------------------------------------------------
# Pure-JAX reference (for a correctness check against the fused kernel)
# ---------------------------------------------------------------------------
def _reference_forward(x_nchw, params):
    w1, b1, w2, b2, w3, b3, w4, b4 = params
    dn = ("NCHW", "OIHW", "NCHW")
    hi = jax.lax.Precision.HIGHEST

    def conv(x, w, b):
        y = jax.lax.conv_general_dilated(x, w, (1, 1), "VALID",
                                         dimension_numbers=dn, precision=hi)
        return y + b.reshape(1, -1, 1, 1)

    def pool(x):
        return jax.lax.reduce_window(x, -jnp.inf, jax.lax.max,
                                     (1, 1, 2, 2), (1, 1, 2, 2), "VALID")

    y = pool(conv(x_nchw, w1, b1))
    y = pool(conv(y, w2, b2))
    y = jax.nn.relu(conv(y, w3, b3))
    y = y.reshape(y.shape[0], -1)                    # (B, 500)
    z = jnp.dot(y, w4.T, precision=hi) + b4
    return jax.nn.softmax(z, axis=1)


# ---------------------------------------------------------------------------
# Deterministic parameter init (PyTorch-default-style uniform bounds)
# ---------------------------------------------------------------------------
def init_params(key):
    ks = jax.random.split(key, 8)

    def u(k, shape, fan_in):
        bound = 1.0 / jnp.sqrt(float(fan_in))
        return jax.random.uniform(k, shape, jnp.float32, -bound, bound)

    w1 = u(ks[0], (20, 1, 5, 5), 1 * 5 * 5);    b1 = u(ks[1], (20,), 1 * 5 * 5)
    w2 = u(ks[2], (50, 20, 5, 5), 20 * 5 * 5);  b2 = u(ks[3], (50,), 20 * 5 * 5)
    w3 = u(ks[4], (500, 50, 4, 4), 50 * 4 * 4); b3 = u(ks[5], (500,), 50 * 4 * 4)
    w4 = u(ks[6], (10, 500), 500);              b4 = u(ks[7], (10,), 500)
    return (w1, b1, w2, b2, w3, b3, w4, b4)


if __name__ == "__main__":
    key = jax.random.PRNGKey(0)
    pkey, xkey = jax.random.split(key)
    params = init_params(pkey)

    # Input must be 28x28 for Linear(500, 10) to line up (conv3 -> 1x1).
    x = jax.random.normal(xkey, (2, 1, 28, 28), jnp.float32)

    out = jax.block_until_ready(jax.jit(base_drop_forward)(x, params))
    ref = jax.block_until_ready(jax.jit(_reference_forward)(x, params))

    assert out.shape == (2, 10), out.shape
    assert bool(jnp.all(jnp.isfinite(out)))
    assert bool(jnp.allclose(jnp.sum(out, axis=1), 1.0, atol=1e-4))
    assert bool(jnp.allclose(out, ref, atol=1e-3, rtol=1e-3)), (
        float(jnp.max(jnp.abs(out - ref))))
    print("KERNEL_OK")
</pallas_src>

<mosaic_0001>
module attributes {stable_mosaic.version = 11 : i64} {
  func.func @_fused_forward_kernel(%arg0: i32, %arg1: memref<1x576x25xf32, #tpu.memory_space<vmem>>, %arg2: memref<1600x144xbf16, #tpu.memory_space<vmem>>, %arg3: memref<25x20xf32, #tpu.memory_space<vmem>>, %arg4: memref<1x20xf32, #tpu.memory_space<vmem>>, %arg5: memref<25x20x50xf32, #tpu.memory_space<vmem>>, %arg6: memref<1x50xf32, #tpu.memory_space<vmem>>, %arg7: memref<16x50x500xf32, #tpu.memory_space<vmem>>, %arg8: memref<1x500xf32, #tpu.memory_space<vmem>>, %arg9: memref<500x10xf32, #tpu.memory_space<vmem>>, %arg10: memref<1x10xf32, #tpu.memory_space<vmem>>, %arg11: memref<1x1x10xf32, #tpu.memory_space<vmem>>) attributes {dimension_semantics = [#tpu.dimension_semantics<parallel>], iteration_bounds = array<i64: 2>, scalar_prefetch = 0 : i64, scratch_operands = 0 : i64, tpu.core_type = #tpu.core_type<tc>, window_params = [{transform_indices = @transform_0, window_bounds = array<i64: 1, 576, 25>}, {pipeline_mode = #tpu.pipeline_mode<synchronous>, transform_indices = @transform_1, window_bounds = array<i64: 1600, 144>}, {pipeline_mode = #tpu.pipeline_mode<synchronous>, transform_indices = @transform_2, window_bounds = array<i64: 25, 20>}, {pipeline_mode = #tpu.pipeline_mode<synchronous>, transform_indices = @transform_3, window_bounds = array<i64: 1, 20>}, {pipeline_mode = #tpu.pipeline_mode<synchronous>, transform_indices = @transform_4, window_bounds = array<i64: 25, 20, 50>}, {pipeline_mode = #tpu.pipeline_mode<synchronous>, transform_indices = @transform_5, window_bounds = array<i64: 1, 50>}, {pipeline_mode = #tpu.pipeline_mode<synchronous>, transform_indices = @transform_6, window_bounds = array<i64: 16, 50, 500>}, {pipeline_mode = #tpu.pipeline_mode<synchronous>, transform_indices = @transform_7, window_bounds = array<i64: 1, 500>}, {pipeline_mode = #tpu.pipeline_mode<synchronous>, transform_indices = @transform_8, window_bounds = array<i64: 500, 10>}, {pipeline_mode = #tpu.pipeline_mode<synchronous>, transform_indices = @transform_9, window_bounds = array<i64: 1, 10>}, {transform_indices = @transform_10, window_bounds = array<i64: 1, 1, 10>}]} {
    %c0 = arith.constant 0 : index
    %c0_0 = arith.constant 0 : index
    %c0_1 = arith.constant 0 : index
    %0 = vector.load %arg1[%c0, %c0_0, %c0_1] : memref<1x576x25xf32, #tpu.memory_space<vmem>>, vector<1x576x25xf32>
    %1 = vector.shape_cast %0 : vector<1x576x25xf32> to vector<576x25xf32>
    %c0_2 = arith.constant 0 : index
    %c0_3 = arith.constant 0 : index
    %2 = vector.load %arg3[%c0_2, %c0_3] : memref<25x20xf32, #tpu.memory_space<vmem>>, vector<25x20xf32>
    %cst = arith.constant dense<0.000000e+00> : vector<576x20xf32>
    %3 = tpu.matmul %1, %2, %cst {dimension_numbers = #tpu.dot_dimension_numbers<[1], [0], [0], [1], [0, 0, 1, 1], [], []>} : vector<576x25xf32>, vector<25x20xf32>, vector<576x20xf32> -> vector<576x20xf32>
    %c0_4 = arith.constant 0 : index
    %c0_5 = arith.constant 0 : index
    %4 = vector.load %arg4[%c0_4, %c0_5] : memref<1x20xf32, #tpu.memory_space<vmem>>, vector<1x20xf32>
    %5 = vector.broadcast %4 : vector<1x20xf32> to vector<576x20xf32>
    %6 = arith.addf %3, %5 : vector<576x20xf32>
    %7 = vector.extract_strided_slice %6 {offsets = [0, 0], sizes = [144, 20], strides = [1, 1]} : vector<576x20xf32> to vector<144x20xf32>
    %8 = vector.extract_strided_slice %6 {offsets = [144, 0], sizes = [144, 20], strides = [1, 1]} : vector<576x20xf32> to vector<144x20xf32>
    %9 = arith.maximumf %7, %8 : vector<144x20xf32>
    %10 = vector.extract_strided_slice %6 {offsets = [288, 0], sizes = [144, 20], strides = [1, 1]} : vector<576x20xf32> to vector<144x20xf32>
    %11 = vector.extract_strided_slice %6 {offsets = [432, 0], sizes = [144, 20], strides = [1, 1]} : vector<576x20xf32> to vector<144x20xf32>
    %12 = arith.maximumf %10, %11 : vector<144x20xf32>
    %13 = arith.maximumf %9, %12 : vector<144x20xf32>
    %c0_6 = arith.constant 0 : index
    %c0_7 = arith.constant 0 : index
    %14 = vector.load %arg2[%c0_6, %c0_7] : memref<1600x144xbf16, #tpu.memory_space<vmem>>, vector<1600x144xbf16>
    %15 = arith.extf %14 : vector<1600x144xbf16> to vector<1600x144xf32>
    %cst_8 = arith.constant dense<0.000000e+00> : vector<1600x20xf32>
    %16 = tpu.matmul %15, %13, %cst_8 {dimension_numbers = #tpu.dot_dimension_numbers<[1], [0], [0], [1], [0, 0, 1, 1], [], []>} : vector<1600x144xf32>, vector<144x20xf32>, vector<1600x20xf32> -> vector<1600x20xf32>
    %cst_9 = arith.constant 0.000000e+00 : f32
    %17 = vector.broadcast %cst_9 : f32 to vector<64x50xf32>
    %18 = vector.extract_strided_slice %16 {offsets = [0, 0], sizes = [64, 20], strides = [1, 1]} : vector<1600x20xf32> to vector<64x20xf32>
    %c0_10 = arith.constant 0 : index
    %c0_11 = arith.constant 0 : index
    %c0_12 = arith.constant 0 : index
    %19 = vector.load %arg5[%c0_10, %c0_11, %c0_12] : memref<25x20x50xf32, #tpu.memory_space<vmem>>, vector<1x20x50xf32>
    %20 = vector.shape_cast %19 : vector<1x20x50xf32> to vector<20x50xf32>
    %cst_13 = arith.constant dense<0.000000e+00> : vector<64x50xf32>
    %21 = tpu.matmul %18, %20, %cst_13 {dimension_numbers = #tpu.dot_dimension_numbers<[1], [0], [0], [1], [0, 0, 1, 1], [], []>} : vector<64x20xf32>, vector<20x50xf32>, vector<64x50xf32> -> vector<64x50xf32>
    %22 = arith.addf %17, %21 : vector<64x50xf32>
    %23 = vector.extract_strided_slice %16 {offsets = [64, 0], sizes = [64, 20], strides = [1, 1]} : vector<1600x20xf32> to vector<64x20xf32>
    %c1 = arith.constant 1 : index
    %c0_14 = arith.constant 0 : index
    %c0_15 = arith.constant 0 : index
    %24 = vector.load %arg5[%c1, %c0_14, %c0_15] : memref<25x20x50xf32, #tpu.memory_space<vmem>>, vector<1x20x50xf32>
    %25 = vector.shape_cast %24 : vector<1x20x50xf32> to vector<20x50xf32>
    %cst_16 = arith.constant dense<0.000000e+00> : vector<64x50xf32>
    %26 = tpu.matmul %23, %25, %cst_16 {dimension_numbers = #tpu.dot_dimension_numbers<[1], [0], [0], [1], [0, 0, 1, 1], [], []>} : vector<64x20xf32>, vector<20x50xf32>, vector<64x50xf32> -> vector<64x50xf32>
    %27 = arith.addf %22, %26 : vector<64x50xf32>
    %28 = vector.extract_strided_slice %16 {offsets = [128, 0], sizes = [64, 20], strides = [1, 1]} : vector<1600x20xf32> to vector<64x20xf32>
    %c2 = arith.constant 2 : index
    %c0_17 = arith.constant 0 : index
    %c0_18 = arith.constant 0 : index
    %29 = vector.load %arg5[%c2, %c0_17, %c0_18] : memref<25x20x50xf32, #tpu.memory_space<vmem>>, vector<1x20x50xf32>
    %30 = vector.shape_cast %29 : vector<1x20x50xf32> to vector<20x50xf32>
    %cst_19 = arith.constant dense<0.000000e+00> : vector<64x50xf32>
    %31 = tpu.matmul %28, %30, %cst_19 {dimension_numbers = #tpu.dot_dimension_numbers<[1], [0], [0], [1], [0, 0, 1, 1], [], []>} : vector<64x20xf32>, vector<20x50xf32>, vector<64x50xf32> -> vector<64x50xf32>
    %32 = arith.addf %27, %31 : vector<64x50xf32>
    %33 = vector.extract_strided_slice %16 {offsets = [192, 0], sizes = [64, 20], strides = [1, 1]} : vector<1600x20xf32> to vector<64x20xf32>
    %c3 = arith.constant 3 : index
    %c0_20 = arith.constant 0 : index
    %c0_21 = arith.constant 0 : index
    %34 = vector.load %arg5[%c3, %c0_20, %c0_21] : memref<25x20x50xf32, #tpu.memory_space<vmem>>, vector<1x20x50xf32>
    %35 = vector.shape_cast %34 : vector<1x20x50xf32> to vector<20x50xf32>
    %cst_22 = arith.constant dense<0.000000e+00> : vector<64x50xf32>
    %36 = tpu.matmul %33, %35, %cst_22 {dimension_numbers = #tpu.dot_dimension_numbers<[1], [0], [0], [1], [0, 0, 1, 1], [], []>} : vector<64x20xf32>, vector<20x50xf32>, vector<64x50xf32> -> vector<64x50xf32>
    %37 = arith.addf %32, %36 : vector<64x50xf32>
    %38 = vector.extract_strided_slice %16 {offsets = [256, 0], sizes = [64, 20], strides = [1, 1]} : vector<1600x20xf32> to vector<64x20xf32>
    %c4 = arith.constant 4 : index
    %c0_23 = arith.constant 0 : index
    %c0_24 = arith.constant 0 : index
    %39 = vector.load %arg5[%c4, %c0_23, %c0_24] : memref<25x20x50xf32, #tpu.memory_space<vmem>>, vector<1x20x50xf32>
    %40 = vector.shape_cast %39 : vector<1x20x50xf32> to vector<20x50xf32>
    %cst_25 = arith.constant dense<0.000000e+00> : vector<64x50xf32>
    %41 = tpu.matmul %38, %40, %cst_25 {dimension_numbers = #tpu.dot_dimension_numbers<[1], [0], [0], [1], [0, 0, 1, 1], [], []>} : vector<64x20xf32>, vector<20x50xf32>, vector<64x50xf32> -> vector<64x50xf32>
    %42 = arith.addf %37, %41 : vector<64x50xf32>
    %43 = vector.extract_strided_slice %16 {offsets = [320, 0], sizes = [64, 20], strides = [1, 1]} : vector<1600x20xf32> to vector<64x20xf32>
    %c5 = arith.constant 5 : index
    %c0_26 = arith.constant 0 : index
    %c0_27 = arith.constant 0 : index
    %44 = vector.load %arg5[%c5, %c0_26, %c0_27] : memref<25x20x50xf32, #tpu.memory_space<vmem>>, vector<1x20x50xf32>
    %45 = vector.shape_cast %44 : vector<1x20x50xf32> to vector<20x50xf32>
    %cst_28 = arith.constant dense<0.000000e+00> : vector<64x50xf32>
    %46 = tpu.matmul %43, %45, %cst_28 {dimension_numbers = #tpu.dot_dimension_numbers<[1], [0], [0], [1], [0, 0, 1, 1], [], []>} : vector<64x20xf32>, vector<20x50xf32>, vector<64x50xf32> -> vector<64x50xf32>
    %47 = arith.addf %42, %46 : vector<64x50xf32>
    %48 = vector.extract_strided_slice %16 {offsets = [384, 0], sizes = [64, 20], strides = [1, 1]} : vector<1600x20xf32> to vector<64x20xf32>
    %c6 = arith.constant 6 : index
    %c0_29 = arith.constant 0 : index
    %c0_30 = arith.constant 0 : index
    %49 = vector.load %arg5[%c6, %c0_29, %c0_30] : memref<25x20x50xf32, #tpu.memory_space<vmem>>, vector<1x20x50xf32>
    %50 = vector.shape_cast %49 : vector<1x20x50xf32> to vector<20x50xf32>
    %cst_31 = arith.constant dense<0.000000e+00> : vector<64x50xf32>
    %51 = tpu.matmul %48, %50, %cst_31 {dimension_numbers = #tpu.dot_dimension_numbers<[1], [0], [0], [1], [0, 0, 1, 1], [], []>} : vector<64x20xf32>, vector<20x50xf32>, vector<64x50xf32> -> vector<64x50xf32>
    %52 = arith.addf %47, %51 : vector<64x50xf32>
    %53 = vector.extract_strided_slice %16 {offsets = [448, 0], sizes = [64, 20], strides = [1, 1]} : vector<1600x20xf32> to vector<64x20xf32>
    %c7 = arith.constant 7 : index
    %c0_32 = arith.constant 0 : index
    %c0_33 = arith.constant 0 : index
    %54 = vector.load %arg5[%c7, %c0_32, %c0_33] : memref<25x20x50xf32, #tpu.memory_space<vmem>>, vector<1x20x50xf32>
    %55 = vector.shape_cast %54 : vector<1x20x50xf32> to vector<20x50xf32>
    %cst_34 = arith.constant dense<0.000000e+00> : vector<64x50xf32>
    %56 = tpu.matmul %53, %55, %cst_34 {dimension_numbers = #tpu.dot_dimension_numbers<[1], [0], [0], [1], [0, 0, 1, 1], [], []>} : vector<64x20xf32>, vector<20x50xf32>, vector<64x50xf32> -> vector<64x50xf32>
    %57 = arith.addf %52, %56 : vector<64x50xf32>
    %58 = vector.extract_strided_slice %16 {offsets = [512, 0], sizes = [64, 20], strides = [1, 1]} : vector<1600x20xf32> to vector<64x20xf32>
    %c8 = arith.constant 8 : index
    %c0_35 = arith.constant 0 : index
    %c0_36 = arith.constant 0 : index
    %59 = vector.load %arg5[%c8, %c0_35, %c0_36] : memref<25x20x50xf32, #tpu.memory_space<vmem>>, vector<1x20x50xf32>
    %60 = vector.shape_cast %59 : vector<1x20x50xf32> to vector<20x50xf32>
    %cst_37 = arith.constant dense<0.000000e+00> : vector<64x50xf32>
    %61 = tpu.matmul %58, %60, %cst_37 {dimension_numbers = #tpu.dot_dimension_numbers<[1], [0], [0], [1], [0, 0, 1, 1], [], []>} : vector<64x20xf32>, vector<20x50xf32>, vector<64x50xf32> -> vector<64x50xf32>
    %62 = arith.addf %57, %61 : vector<64x50xf32>
    %63 = vector.extract_strided_slice %16 {offsets = [576, 0], sizes = [64, 20], strides = [1, 1]} : vector<1600x20xf32> to vector<64x20xf32>
    %c9 = arith.constant 9 : index
    %c0_38 = arith.constant 0 : index
    %c0_39 = arith.constant 0 : index
    %64 = vector.load %arg5[%c9, %c0_38, %c0_39] : memref<25x20x50xf32, #tpu.memory_space<vmem>>, vector<1x20x50xf32>
    %65 = vector.shape_cast %64 : vector<1x20x50xf32> to vector<20x50xf32>
    %cst_40 = arith.constant dense<0.000000e+00> : vector<64x50xf32>
    %66 = tpu.matmul %63, %65, %cst_40 {dimension_numbers = #tpu.dot_dimension_numbers<[1], [0], [0], [1], [0, 0, 1, 1], [], []>} : vector<64x20xf32>, vector<20x50xf32>, vector<64x50xf32> -> vector<64x50xf32>
    %67 = arith.addf %62, %66 : vector<64x50xf32>
    %68 = vector.extract_strided_slice %16 {offsets = [640, 0], sizes = [64, 20], strides = [1, 1]} : vector<1600x20xf32> to vector<64x20xf32>
    %c10 = arith.constant 10 : index
    %c0_41 = arith.constant 0 : index
    %c0_42 = arith.constant 0 : index
    %69 = vector.load %arg5[%c10, %c0_41, %c0_42] : memref<25x20x50xf32, #tpu.memory_space<vmem>>, vector<1x20x50xf32>
    %70 = vector.shape_cast %69 : vector<1x20x50xf32> to vector<20x50xf32>
    %cst_43 = arith.constant dense<0.000000e+00> : vector<64x50xf32>
    %71 = tpu.matmul %68, %70, %cst_43 {dimension_numbers = #tpu.dot_dimension_numbers<[1], [0], [0], [1], [0, 0, 1, 1], [], []>} : vector<64x20xf32>, vector<20x50xf32>, vector<64x50xf32> -> vector<64x50xf32>
    %72 = arith.addf %67, %71 : vector<64x50xf32>
    %73 = vector.extract_strided_slice %16 {offsets = [704, 0], sizes = [64, 20], strides = [1, 1]} : vector<1600x20xf32> to vector<64x20xf32>
    %c11 = arith.constant 11 : index
    %c0_44 = arith.constant 0 : index
    %c0_45 = arith.constant 0 : index
    %74 = vector.load %arg5[%c11, %c0_44, %c0_45] : memref<25x20x50xf32, #tpu.memory_space<vmem>>, vector<1x20x50xf32>
    %75 = vector.shape_cast %74 : vector<1x20x50xf32> to vector<20x50xf32>
    %cst_46 = arith.constant dense<0.000000e+00> : vector<64x50xf32>
    %76 = tpu.matmul %73, %75, %cst_46 {dimension_numbers = #tpu.dot_dimension_numbers<[1], [0], [0], [1], [0, 0, 1, 1], [], []>} : vector<64x20xf32>, vector<20x50xf32>, vector<64x50xf32> -> vector<64x50xf32>
    %77 = arith.addf %72, %76 : vector<64x50xf32>
    %78 = vector.extract_strided_slice %16 {offsets = [768, 0], sizes = [64, 20], strides = [1, 1]} : vector<1600x20xf32> to vector<64x20xf32>
    %c12 = arith.constant 12 : index
    %c0_47 = arith.constant 0 : index
    %c0_48 = arith.constant 0 : index
    %79 = vector.load %arg5[%c12, %c0_47, %c0_48] : memref<25x20x50xf32, #tpu.memory_space<vmem>>, vector<1x20x50xf32>
    %80 = vector.shape_cast %79 : vector<1x20x50xf32> to vector<20x50xf32>
    %cst_49 = arith.constant dense<0.000000e+00> : vector<64x50xf32>
    %81 = tpu.matmul %78, %80, %cst_49 {dimension_numbers = #tpu.dot_dimension_numbers<[1], [0], [0], [1], [0, 0, 1, 1], [], []>} : vector<64x20xf32>, vector<20x50xf32>, vector<64x50xf32> -> vector<64x50xf32>
    %82 = arith.addf %77, %81 : vector<64x50xf32>
    %83 = vector.extract_strided_slice %16 {offsets = [832, 0], sizes = [64, 20], strides = [1, 1]} : vector<1600x20xf32> to vector<64x20xf32>
    %c13 = arith.constant 13 : index
    %c0_50 = arith.constant 0 : index
    %c0_51 = arith.constant 0 : index
    %84 = vector.load %arg5[%c13, %c0_50, %c0_51] : memref<25x20x50xf32, #tpu.memory_space<vmem>>, vector<1x20x50xf32>
    %85 = vector.shape_cast %84 : vector<1x20x50xf32> to vector<20x50xf32>
    %cst_52 = arith.constant dense<0.000000e+00> : vector<64x50xf32>
    %86 = tpu.matmul %83, %85, %cst_52 {dimension_numbers = #tpu.dot_dimension_numbers<[1], [0], [0], [1], [0, 0, 1, 1], [], []>} : vector<64x20xf32>, vector<20x50xf32>, vector<64x50xf32> -> vector<64x50xf32>
    %87 = arith.addf %82, %86 : vector<64x50xf32>
    %88 = vector.extract_strided_slice %16 {offsets = [896, 0], sizes = [64, 20], strides = [1, 1]} : vector<1600x20xf32> to vector<64x20xf32>
    %c14 = arith.constant 14 : index
    %c0_53 = arith.constant 0 : index
    %c0_54 = arith.constant 0 : index
    %89 = vector.load %arg5[%c14, %c0_53, %c0_54] : memref<25x20x50xf32, #tpu.memory_space<vmem>>, vector<1x20x50xf32>
    %90 = vector.shape_cast %89 : vector<1x20x50xf32> to vector<20x50xf32>
    %cst_55 = arith.constant dense<0.000000e+00> : vector<64x50xf32>
    %91 = tpu.matmul %88, %90, %cst_55 {dimension_numbers = #tpu.dot_dimension_numbers<[1], [0], [0], [1], [0, 0, 1, 1], [], []>} : vector<64x20xf32>, vector<20x50xf32>, vector<64x50xf32> -> vector<64x50xf32>
    %92 = arith.addf %87, %91 : vector<64x50xf32>
    %93 = vector.extract_strided_slice %16 {offsets = [960, 0], sizes = [64, 20], strides = [1, 1]} : vector<1600x20xf32> to vector<64x20xf32>
    %c15 = arith.constant 15 : index
    %c0_56 = arith.constant 0 : index
    %c0_57 = arith.constant 0 : index
    %94 = vector.load %arg5[%c15, %c0_56, %c0_57] : memref<25x20x50xf32, #tpu.memory_space<vmem>>, vector<1x20x50xf32>
    %95 = vector.shape_cast %94 : vector<1x20x50xf32> to vector<20x50xf32>
    %cst_58 = arith.constant dense<0.000000e+00> : vector<64x50xf32>
    %96 = tpu.matmul %93, %95, %cst_58 {dimension_numbers = #tpu.dot_dimension_numbers<[1], [0], [0], [1], [0, 0, 1, 1], [], []>} : vector<64x20xf32>, vector<20x50xf32>, vector<64x50xf32> -> vector<64x50xf32>
    %97 = arith.addf %92, %96 : vector<64x50xf32>
    %98 = vector.extract_strided_slice %16 {offsets = [1024, 0], sizes = [64, 20], strides = [1, 1]} : vector<1600x20xf32> to vector<64x20xf32>
    %c16 = arith.constant 16 : index
    %c0_59 = arith.constant 0 : index
    %c0_60 = arith.constant 0 : index
    %99 = vector.load %arg5[%c16, %c0_59, %c0_60] : memref<25x20x50xf32, #tpu.memory_space<vmem>>, vector<1x20x50xf32>
    %100 = vector.shape_cast %99 : vector<1x20x50xf32> to vector<20x50xf32>
    %cst_61 = arith.constant dense<0.000000e+00> : vector<64x50xf32>
    %101 = tpu.matmul %98, %100, %cst_61 {dimension_numbers = #tpu.dot_dimension_numbers<[1], [0], [0], [1], [0, 0, 1, 1], [], []>} : vector<64x20xf32>, vector<20x50xf32>, vector<64x50xf32> -> vector<64x50xf32>
    %102 = arith.addf %97, %101 : vector<64x50xf32>
    %103 = vector.extract_strided_slice %16 {offsets = [1088, 0], sizes = [64, 20], strides = [1, 1]} : vector<1600x20xf32> to vector<64x20xf32>
    %c17 = arith.constant 17 : index
    %c0_62 = arith.constant 0 : index
    %c0_63 = arith.constant 0 : index
    %104 = vector.load %arg5[%c17, %c0_62, %c0_63] : memref<25x20x50xf32, #tpu.memory_space<vmem>>, vector<1x20x50xf32>
    %105 = vector.shape_cast %104 : vector<1x20x50xf32> to vector<20x50xf32>
    %cst_64 = arith.constant dense<0.000000e+00> : vector<64x50xf32>
    %106 = tpu.matmul %103, %105, %cst_64 {dimension_numbers = #tpu.dot_dimension_numbers<[1], [0], [0], [1], [0, 0, 1, 1], [], []>} : vector<64x20xf32>, vector<20x50xf32>, vector<64x50xf32> -> vector<64x50xf32>
    %107 = arith.addf %102, %106 : vector<64x50xf32>
    %108 = vector.extract_strided_slice %16 {offsets = [1152, 0], sizes = [64, 20], strides = [1, 1]} : vector<1600x20xf32> to vector<64x20xf32>
    %c18 = arith.constant 18 : index
    %c0_65 = arith.constant 0 : index
    %c0_66 = arith.constant 0 : index
    %109 = vector.load %arg5[%c18, %c0_65, %c0_66] : memref<25x20x50xf32, #tpu.memory_space<vmem>>, vector<1x20x50xf32>
    %110 = vector.shape_cast %109 : vector<1x20x50xf32> to vector<20x50xf32>
    %cst_67 = arith.constant dense<0.000000e+00> : vector<64x50xf32>
    %111 = tpu.matmul %108, %110, %cst_67 {dimension_numbers = #tpu.dot_dimension_numbers<[1], [0], [0], [1], [0, 0, 1, 1], [], []>} : vector<64x20xf32>, vector<20x50xf32>, vector<64x50xf32> -> vector<64x50xf32>
    %112 = arith.addf %107, %111 : vector<64x50xf32>
    %113 = vector.extract_strided_slice %16 {offsets = [1216, 0], sizes = [64, 20], strides = [1, 1]} : vector<1600x20xf32> to vector<64x20xf32>
    %c19 = arith.constant 19 : index
    %c0_68 = arith.constant 0 : index
    %c0_69 = arith.constant 0 : index
    %114 = vector.load %arg5[%c19, %c0_68, %c0_69] : memref<25x20x50xf32, #tpu.memory_space<vmem>>, vector<1x20x50xf32>
    %115 = vector.shape_cast %114 : vector<1x20x50xf32> to vector<20x50xf32>
    %cst_70 = arith.constant dense<0.000000e+00> : vector<64x50xf32>
    %116 = tpu.matmul %113, %115, %cst_70 {dimension_numbers = #tpu.dot_dimension_numbers<[1], [0], [0], [1], [0, 0, 1, 1], [], []>} : vector<64x20xf32>, vector<20x50xf32>, vector<64x50xf32> -> vector<64x50xf32>
    %117 = arith.addf %112, %116 : vector<64x50xf32>
    %118 = vector.extract_strided_slice %16 {offsets = [1280, 0], sizes = [64, 20], strides = [1, 1]} : vector<1600x20xf32> to vector<64x20xf32>
    %c20 = arith.constant 20 : index
    %c0_71 = arith.constant 0 : index
    %c0_72 = arith.constant 0 : index
    %119 = vector.load %arg5[%c20, %c0_71, %c0_72] : memref<25x20x50xf32, #tpu.memory_space<vmem>>, vector<1x20x50xf32>
    %120 = vector.shape_cast %119 : vector<1x20x50xf32> to vector<20x50xf32>
    %cst_73 = arith.constant dense<0.000000e+00> : vector<64x50xf32>
    %121 = tpu.matmul %118, %120, %cst_73 {dimension_numbers = #tpu.dot_dimension_numbers<[1], [0], [0], [1], [0, 0, 1, 1], [], []>} : vector<64x20xf32>, vector<20x50xf32>, vector<64x50xf32> -> vector<64x50xf32>
    %122 = arith.addf %117, %121 : vector<64x50xf32>
    %123 = vector.extract_strided_slice %16 {offsets = [1344, 0], sizes = [64, 20], strides = [1, 1]} : vector<1600x20xf32> to vector<64x20xf32>
    %c21 = arith.constant 21 : index
    %c0_74 = arith.constant 0 : index
    %c0_75 = arith.constant 0 : index
    %124 = vector.load %arg5[%c21, %c0_74, %c0_75] : memref<25x20x50xf32, #tpu.memory_space<vmem>>, vector<1x20x50xf32>
    %125 = vector.shape_cast %124 : vector<1x20x50xf32> to vector<20x50xf32>
    %cst_76 = arith.constant dense<0.000000e+00> : vector<64x50xf32>
    %126 = tpu.matmul %123, %125, %cst_76 {dimension_numbers = #tpu.dot_dimension_numbers<[1], [0], [0], [1], [0, 0, 1, 1], [], []>} : vector<64x20xf32>, vector<20x50xf32>, vector<64x50xf32> -> vector<64x50xf32>
    %127 = arith.addf %122, %126 : vector<64x50xf32>
    %128 = vector.extract_strided_slice %16 {offsets = [1408, 0], sizes = [64, 20], strides = [1, 1]} : vector<1600x20xf32> to vector<64x20xf32>
    %c22 = arith.constant 22 : index
    %c0_77 = arith.constant 0 : index
    %c0_78 = arith.constant 0 : index
    %129 = vector.load %arg5[%c22, %c0_77, %c0_78] : memref<25x20x50xf32, #tpu.memory_space<vmem>>, vector<1x20x50xf32>
    %130 = vector.shape_cast %129 : vector<1x20x50xf32> to vector<20x50xf32>
    %cst_79 = arith.constant dense<0.000000e+00> : vector<64x50xf32>
    %131 = tpu.matmul %128, %130, %cst_79 {dimension_numbers = #tpu.dot_dimension_numbers<[1], [0], [0], [1], [0, 0, 1, 1], [], []>} : vector<64x20xf32>, vector<20x50xf32>, vector<64x50xf32> -> vector<64x50xf32>
    %132 = arith.addf %127, %131 : vector<64x50xf32>
    %133 = vector.extract_strided_slice %16 {offsets = [1472, 0], sizes = [64, 20], strides = [1, 1]} : vector<1600x20xf32> to vector<64x20xf32>
    %c23 = arith.constant 23 : index
    %c0_80 = arith.constant 0 : index
    %c0_81 = arith.constant 0 : index
    %134 = vector.load %arg5[%c23, %c0_80, %c0_81] : memref<25x20x50xf32, #tpu.memory_space<vmem>>, vector<1x20x50xf32>
    %135 = vector.shape_cast %134 : vector<1x20x50xf32> to vector<20x50xf32>
    %cst_82 = arith.constant dense<0.000000e+00> : vector<64x50xf32>
    %136 = tpu.matmul %133, %135, %cst_82 {dimension_numbers = #tpu.dot_dimension_numbers<[1], [0], [0], [1], [0, 0, 1, 1], [], []>} : vector<64x20xf32>, vector<20x50xf32>, vector<64x50xf32> -> vector<64x50xf32>
    %137 = arith.addf %132, %136 : vector<64x50xf32>
    %138 = vector.extract_strided_slice %16 {offsets = [1536, 0], sizes = [64, 20], strides = [1, 1]} : vector<1600x20xf32> to vector<64x20xf32>
    %c24 = arith.constant 24 : index
    %c0_83 = arith.constant 0 : index
    %c0_84 = arith.constant 0 : index
    %139 = vector.load %arg5[%c24, %c0_83, %c0_84] : memref<25x20x50xf32, #tpu.memory_space<vmem>>, vector<1x20x50xf32>
    %140 = vector.shape_cast %139 : vector<1x20x50xf32> to vector<20x50xf32>
    %cst_85 = arith.constant dense<0.000000e+00> : vector<64x50xf32>
    %141 = tpu.matmul %138, %140, %cst_85 {dimension_numbers = #tpu.dot_dimension_numbers<[1], [0], [0], [1], [0, 0, 1, 1], [], []>} : vector<64x20xf32>, vector<20x50xf32>, vector<64x50xf32> -> vector<64x50xf32>
    %142 = arith.addf %137, %141 : vector<64x50xf32>
    %c0_86 = arith.constant 0 : index
    %c0_87 = arith.constant 0 : index
    %143 = vector.load %arg6[%c0_86, %c0_87] : memref<1x50xf32, #tpu.memory_space<vmem>>, vector<1x50xf32>
    %144 = vector.broadcast %143 : vector<1x50xf32> to vector<64x50xf32>
    %145 = arith.addf %142, %144 : vector<64x50xf32>
    %146 = vector.extract_strided_slice %145 {offsets = [0, 0], sizes = [16, 50], strides = [1, 1]} : vector<64x50xf32> to vector<16x50xf32>
    %147 = vector.extract_strided_slice %145 {offsets = [16, 0], sizes = [16, 50], strides = [1, 1]} : vector<64x50xf32> to vector<16x50xf32>
    %148 = arith.maximumf %146, %147 : vector<16x50xf32>
    %149 = vector.extract_strided_slice %145 {offsets = [32, 0], sizes = [16, 50], strides = [1, 1]} : vector<64x50xf32> to vector<16x50xf32>
    %150 = vector.extract_strided_slice %145 {offsets = [48, 0], sizes = [16, 50], strides = [1, 1]} : vector<64x50xf32> to vector<16x50xf32>
    %151 = arith.maximumf %149, %150 : vector<16x50xf32>
    %152 = arith.maximumf %148, %151 : vector<16x50xf32>
    %cst_88 = arith.constant 0.000000e+00 : f32
    %153 = vector.broadcast %cst_88 : f32 to vector<1x500xf32>
    %154 = vector.extract_strided_slice %152 {offsets = [0, 0], sizes = [1, 50], strides = [1, 1]} : vector<16x50xf32> to vector<1x50xf32>
    %c0_89 = arith.constant 0 : index
    %c0_90 = arith.constant 0 : index
    %c0_91 = arith.constant 0 : index
    %155 = vector.load %arg7[%c0_89, %c0_90, %c0_91] : memref<16x50x500xf32, #tpu.memory_space<vmem>>, vector<1x50x500xf32>
    %156 = vector.shape_cast %155 : vector<1x50x500xf32> to vector<50x500xf32>
    %cst_92 = arith.constant dense<0.000000e+00> : vector<1x500xf32>
    %157 = tpu.matmul %154, %156, %cst_92 {dimension_numbers = #tpu.dot_dimension_numbers<[1], [0], [0], [1], [0, 0, 1, 1], [], []>} : vector<1x50xf32>, vector<50x500xf32>, vector<1x500xf32> -> vector<1x500xf32>
    %158 = arith.addf %153, %157 : vector<1x500xf32>
    %159 = vector.extract_strided_slice %152 {offsets = [1, 0], sizes = [1, 50], strides = [1, 1]} : vector<16x50xf32> to vector<1x50xf32>
    %c1_93 = arith.constant 1 : index
    %c0_94 = arith.constant 0 : index
    %c0_95 = arith.constant 0 : index
    %160 = vector.load %arg7[%c1_93, %c0_94, %c0_95] : memref<16x50x500xf32, #tpu.memory_space<vmem>>, vector<1x50x500xf32>
    %161 = vector.shape_cast %160 : vector<1x50x500xf32> to vector<50x500xf32>
    %cst_96 = arith.constant dense<0.000000e+00> : vector<1x500xf32>
    %162 = tpu.matmul %159, %161, %cst_96 {dimension_numbers = #tpu.dot_dimension_numbers<[1], [0], [0], [1], [0, 0, 1, 1], [], []>} : vector<1x50xf32>, vector<50x500xf32>, vector<1x500xf32> -> vector<1x500xf32>
    %163 = arith.addf %158, %162 : vector<1x500xf32>
    %164 = vector.extract_strided_slice %152 {offsets = [2, 0], sizes = [1, 50], strides = [1, 1]} : vector<16x50xf32> to vector<1x50xf32>
    %c2_97 = arith.constant 2 : index
    %c0_98 = arith.constant 0 : index
    %c0_99 = arith.constant 0 : index
    %165 = vector.load %arg7[%c2_97, %c0_98, %c0_99] : memref<16x50x500xf32, #tpu.memory_space<vmem>>, vector<1x50x500xf32>
    %166 = vector.shape_cast %165 : vector<1x50x500xf32> to vector<50x500xf32>
    %cst_100 = arith.constant dense<0.000000e+00> : vector<1x500xf32>
    %167 = tpu.matmul %164, %166, %cst_100 {dimension_numbers = #tpu.dot_dimension_numbers<[1], [0], [0], [1], [0, 0, 1, 1], [], []>} : vector<1x50xf32>, vector<50x500xf32>, vector<1x500xf32> -> vector<1x500xf32>
    %168 = arith.addf %163, %167 : vector<1x500xf32>
    %169 = vector.extract_strided_slice %152 {offsets = [3, 0], sizes = [1, 50], strides = [1, 1]} : vector<16x50xf32> to vector<1x50xf32>
    %c3_101 = arith.constant 3 : index
    %c0_102 = arith.constant 0 : index
    %c0_103 = arith.constant 0 : index
    %170 = vector.load %arg7[%c3_101, %c0_102, %c0_103] : memref<16x50x500xf32, #tpu.memory_space<vmem>>, vector<1x50x500xf32>
    %171 = vector.shape_cast %170 : vector<1x50x500xf32> to vector<50x500xf32>
    %cst_104 = arith.constant dense<0.000000e+00> : vector<1x500xf32>
    %172 = tpu.matmul %169, %171, %cst_104 {dimension_numbers = #tpu.dot_dimension_numbers<[1], [0], [0], [1], [0, 0, 1, 1], [], []>} : vector<1x50xf32>, vector<50x500xf32>, vector<1x500xf32> -> vector<1x500xf32>
    %173 = arith.addf %168, %172 : vector<1x500xf32>
    %174 = vector.extract_strided_slice %152 {offsets = [4, 0], sizes = [1, 50], strides = [1, 1]} : vector<16x50xf32> to vector<1x50xf32>
    %c4_105 = arith.constant 4 : index
    %c0_106 = arith.constant 0 : index
    %c0_107 = arith.constant 0 : index
    %175 = vector.load %arg7[%c4_105, %c0_106, %c0_107] : memref<16x50x500xf32, #tpu.memory_space<vmem>>, vector<1x50x500xf32>
    %176 = vector.shape_cast %175 : vector<1x50x500xf32> to vector<50x500xf32>
    %cst_108 = arith.constant dense<0.000000e+00> : vector<1x500xf32>
    %177 = tpu.matmul %174, %176, %cst_108 {dimension_numbers = #tpu.dot_dimension_numbers<[1], [0], [0], [1], [0, 0, 1, 1], [], []>} : vector<1x50xf32>, vector<50x500xf32>, vector<1x500xf32> -> vector<1x500xf32>
    %178 = arith.addf %173, %177 : vector<1x500xf32>
    %179 = vector.extract_strided_slice %152 {offsets = [5, 0], sizes = [1, 50], strides = [1, 1]} : vector<16x50xf32> to vector<1x50xf32>
    %c5_109 = arith.constant 5 : index
    %c0_110 = arith.constant 0 : index
    %c0_111 = arith.constant 0 : index
    %180 = vector.load %arg7[%c5_109, %c0_110, %c0_111] : memref<16x50x500xf32, #tpu.memory_space<vmem>>, vector<1x50x500xf32>
    %181 = vector.shape_cast %180 : vector<1x50x500xf32> to vector<50x500xf32>
    %cst_112 = arith.constant dense<0.000000e+00> : vector<1x500xf32>
    %182 = tpu.matmul %179, %181, %cst_112 {dimension_numbers = #tpu.dot_dimension_numbers<[1], [0], [0], [1], [0, 0, 1, 1], [], []>} : vector<1x50xf32>, vector<50x500xf32>, vector<1x500xf32> -> vector<1x500xf32>
    %183 = arith.addf %178, %182 : vector<1x500xf32>
    %184 = vector.extract_strided_slice %152 {offsets = [6, 0], sizes = [1, 50], strides = [1, 1]} : vector<16x50xf32> to vector<1x50xf32>
    %c6_113 = arith.constant 6 : index
    %c0_114 = arith.constant 0 : index
    %c0_115 = arith.constant 0 : index
    %185 = vector.load %arg7[%c6_113, %c0_114, %c0_115] : memref<16x50x500xf32, #tpu.memory_space<vmem>>, vector<1x50x500xf32>
    %186 = vector.shape_cast %185 : vector<1x50x500xf32> to vector<50x500xf32>
    %cst_116 = arith.constant dense<0.000000e+00> : vector<1x500xf32>
    %187 = tpu.matmul %184, %186, %cst_116 {dimension_numbers = #tpu.dot_dimension_numbers<[1], [0], [0], [1], [0, 0, 1, 1], [], []>} : vector<1x50xf32>, vector<50x500xf32>, vector<1x500xf32> -> vector<1x500xf32>
    %188 = arith.addf %183, %187 : vector<1x500xf32>
    %189 = vector.extract_strided_slice %152 {offsets = [7, 0], sizes = [1, 50], strides = [1, 1]} : vector<16x50xf32> to vector<1x50xf32>
    %c7_117 = arith.constant 7 : index
    %c0_118 = arith.constant 0 : index
    %c0_119 = arith.constant 0 : index
    %190 = vector.load %arg7[%c7_117, %c0_118, %c0_119] : memref<16x50x500xf32, #tpu.memory_space<vmem>>, vector<1x50x500xf32>
    %191 = vector.shape_cast %190 : vector<1x50x500xf32> to vector<50x500xf32>
    %cst_120 = arith.constant dense<0.000000e+00> : vector<1x500xf32>
    %192 = tpu.matmul %189, %191, %cst_120 {dimension_numbers = #tpu.dot_dimension_numbers<[1], [0], [0], [1], [0, 0, 1, 1], [], []>} : vector<1x50xf32>, vector<50x500xf32>, vector<1x500xf32> -> vector<1x500xf32>
    %193 = arith.addf %188, %192 : vector<1x500xf32>
    %194 = vector.extract_strided_slice %152 {offsets = [8, 0], sizes = [1, 50], strides = [1, 1]} : vector<16x50xf32> to vector<1x50xf32>
    %c8_121 = arith.constant 8 : index
    %c0_122 = arith.constant 0 : index
    %c0_123 = arith.constant 0 : index
    %195 = vector.load %arg7[%c8_121, %c0_122, %c0_123] : memref<16x50x500xf32, #tpu.memory_space<vmem>>, vector<1x50x500xf32>
    %196 = vector.shape_cast %195 : vector<1x50x500xf32> to vector<50x500xf32>
    %cst_124 = arith.constant dense<0.000000e+00> : vector<1x500xf32>
    %197 = tpu.matmul %194, %196, %cst_124 {dimension_numbers = #tpu.dot_dimension_numbers<[1], [0], [0], [1], [0, 0, 1, 1], [], []>} : vector<1x50xf32>, vector<50x500xf32>, vector<1x500xf32> -> vector<1x500xf32>
    %198 = arith.addf %193, %197 : vector<1x500xf32>
    %199 = vector.extract_strided_slice %152 {offsets = [9, 0], sizes = [1, 50], strides = [1, 1]} : vector<16x50xf32> to vector<1x50xf32>
    %c9_125 = arith.constant 9 : index
    %c0_126 = arith.constant 0 : index
    %c0_127 = arith.constant 0 : index
    %200 = vector.load %arg7[%c9_125, %c0_126, %c0_127] : memref<16x50x500xf32, #tpu.memory_space<vmem>>, vector<1x50x500xf32>
    %201 = vector.shape_cast %200 : vector<1x50x500xf32> to vector<50x500xf32>
    %cst_128 = arith.constant dense<0.000000e+00> : vector<1x500xf32>
    %202 = tpu.matmul %199, %201, %cst_128 {dimension_numbers = #tpu.dot_dimension_numbers<[1], [0], [0], [1], [0, 0, 1, 1], [], []>} : vector<1x50xf32>, vector<50x500xf32>, vector<1x500xf32> -> vector<1x500xf32>
    %203 = arith.addf %198, %202 : vector<1x500xf32>
    %204 = vector.extract_strided_slice %152 {offsets = [10, 0], sizes = [1, 50], strides = [1, 1]} : vector<16x50xf32> to vector<1x50xf32>
    %c10_129 = arith.constant 10 : index
    %c0_130 = arith.constant 0 : index
    %c0_131 = arith.constant 0 : index
    %205 = vector.load %arg7[%c10_129, %c0_130, %c0_131] : memref<16x50x500xf32, #tpu.memory_space<vmem>>, vector<1x50x500xf32>
    %206 = vector.shape_cast %205 : vector<1x50x500xf32> to vector<50x500xf32>
    %cst_132 = arith.constant dense<0.000000e+00> : vector<1x500xf32>
    %207 = tpu.matmul %204, %206, %cst_132 {dimension_numbers = #tpu.dot_dimension_numbers<[1], [0], [0], [1], [0, 0, 1, 1], [], []>} : vector<1x50xf32>, vector<50x500xf32>, vector<1x500xf32> -> vector<1x500xf32>
    %208 = arith.addf %203, %207 : vector<1x500xf32>
    %209 = vector.extract_strided_slice %152 {offsets = [11, 0], sizes = [1, 50], strides = [1, 1]} : vector<16x50xf32> to vector<1x50xf32>
    %c11_133 = arith.constant 11 : index
    %c0_134 = arith.constant 0 : index
    %c0_135 = arith.constant 0 : index
    %210 = vector.load %arg7[%c11_133, %c0_134, %c0_135] : memref<16x50x500xf32, #tpu.memory_space<vmem>>, vector<1x50x500xf32>
    %211 = vector.shape_cast %210 : vector<1x50x500xf32> to vector<50x500xf32>
    %cst_136 = arith.constant dense<0.000000e+00> : vector<1x500xf32>
    %212 = tpu.matmul %209, %211, %cst_136 {dimension_numbers = #tpu.dot_dimension_numbers<[1], [0], [0], [1], [0, 0, 1, 1], [], []>} : vector<1x50xf32>, vector<50x500xf32>, vector<1x500xf32> -> vector<1x500xf32>
    %213 = arith.addf %208, %212 : vector<1x500xf32>
    %214 = vector.extract_strided_slice %152 {offsets = [12, 0], sizes = [1, 50], strides = [1, 1]} : vector<16x50xf32> to vector<1x50xf32>
    %c12_137 = arith.constant 12 : index
    %c0_138 = arith.constant 0 : index
    %c0_139 = arith.constant 0 : index
    %215 = vector.load %arg7[%c12_137, %c0_138, %c0_139] : memref<16x50x500xf32, #tpu.memory_space<vmem>>, vector<1x50x500xf32>
    %216 = vector.shape_cast %215 : vector<1x50x500xf32> to vector<50x500xf32>
    %cst_140 = arith.constant dense<0.000000e+00> : vector<1x500xf32>
    %217 = tpu.matmul %214, %216, %cst_140 {dimension_numbers = #tpu.dot_dimension_numbers<[1], [0], [0], [1], [0, 0, 1, 1], [], []>} : vector<1x50xf32>, vector<50x500xf32>, vector<1x500xf32> -> vector<1x500xf32>
    %218 = arith.addf %213, %217 : vector<1x500xf32>
    %219 = vector.extract_strided_slice %152 {offsets = [13, 0], sizes = [1, 50], strides = [1, 1]} : vector<16x50xf32> to vector<1x50xf32>
    %c13_141 = arith.constant 13 : index
    %c0_142 = arith.constant 0 : index
    %c0_143 = arith.constant 0 : index
    %220 = vector.load %arg7[%c13_141, %c0_142, %c0_143] : memref<16x50x500xf32, #tpu.memory_space<vmem>>, vector<1x50x500xf32>
    %221 = vector.shape_cast %220 : vector<1x50x500xf32> to vector<50x500xf32>
    %cst_144 = arith.constant dense<0.000000e+00> : vector<1x500xf32>
    %222 = tpu.matmul %219, %221, %cst_144 {dimension_numbers = #tpu.dot_dimension_numbers<[1], [0], [0], [1], [0, 0, 1, 1], [], []>} : vector<1x50xf32>, vector<50x500xf32>, vector<1x500xf32> -> vector<1x500xf32>
    %223 = arith.addf %218, %222 : vector<1x500xf32>
    %224 = vector.extract_strided_slice %152 {offsets = [14, 0], sizes = [1, 50], strides = [1, 1]} : vector<16x50xf32> to vector<1x50xf32>
    %c14_145 = arith.constant 14 : index
    %c0_146 = arith.constant 0 : index
    %c0_147 = arith.constant 0 : index
    %225 = vector.load %arg7[%c14_145, %c0_146, %c0_147] : memref<16x50x500xf32, #tpu.memory_space<vmem>>, vector<1x50x500xf32>
    %226 = vector.shape_cast %225 : vector<1x50x500xf32> to vector<50x500xf32>
    %cst_148 = arith.constant dense<0.000000e+00> : vector<1x500xf32>
    %227 = tpu.matmul %224, %226, %cst_148 {dimension_numbers = #tpu.dot_dimension_numbers<[1], [0], [0], [1], [0, 0, 1, 1], [], []>} : vector<1x50xf32>, vector<50x500xf32>, vector<1x500xf32> -> vector<1x500xf32>
    %228 = arith.addf %223, %227 : vector<1x500xf32>
    %229 = vector.extract_strided_slice %152 {offsets = [15, 0], sizes = [1, 50], strides = [1, 1]} : vector<16x50xf32> to vector<1x50xf32>
    %c15_149 = arith.constant 15 : index
    %c0_150 = arith.constant 0 : index
    %c0_151 = arith.constant 0 : index
    %230 = vector.load %arg7[%c15_149, %c0_150, %c0_151] : memref<16x50x500xf32, #tpu.memory_space<vmem>>, vector<1x50x500xf32>
    %231 = vector.shape_cast %230 : vector<1x50x500xf32> to vector<50x500xf32>
    %cst_152 = arith.constant dense<0.000000e+00> : vector<1x500xf32>
    %232 = tpu.matmul %229, %231, %cst_152 {dimension_numbers = #tpu.dot_dimension_numbers<[1], [0], [0], [1], [0, 0, 1, 1], [], []>} : vector<1x50xf32>, vector<50x500xf32>, vector<1x500xf32> -> vector<1x500xf32>
    %233 = arith.addf %228, %232 : vector<1x500xf32>
    %c0_153 = arith.constant 0 : index
    %c0_154 = arith.constant 0 : index
    %234 = vector.load %arg8[%c0_153, %c0_154] : memref<1x500xf32, #tpu.memory_space<vmem>>, vector<1x500xf32>
    %235 = arith.addf %233, %234 : vector<1x500xf32>
    %cst_155 = arith.constant 0.000000e+00 : f32
    %236 = vector.broadcast %cst_155 : f32 to vector<1x500xf32>
    %237 = arith.maximumf %235, %236 : vector<1x500xf32>
    %c0_156 = arith.constant 0 : index
    %c0_157 = arith.constant 0 : index
    %238 = vector.load %arg9[%c0_156, %c0_157] : memref<500x10xf32, #tpu.memory_space<vmem>>, vector<500x10xf32>
    %cst_158 = arith.constant dense<0.000000e+00> : vector<1x10xf32>
    %239 = tpu.matmul %237, %238, %cst_158 {dimension_numbers = #tpu.dot_dimension_numbers<[1], [0], [0], [1], [0, 0, 1, 1], [], []>} : vector<1x500xf32>, vector<500x10xf32>, vector<1x10xf32> -> vector<1x10xf32>
    %c0_159 = arith.constant 0 : index
    %c0_160 = arith.constant 0 : index
    %240 = vector.load %arg10[%c0_159, %c0_160] : memref<1x10xf32, #tpu.memory_space<vmem>>, vector<1x10xf32>
    %241 = arith.addf %239, %240 : vector<1x10xf32>
    %cst_161 = arith.constant dense<0xFF800000> : vector<1xf32>
    %242 = vector.multi_reduction <maximumf>, %241, %cst_161 [1] : vector<1x10xf32> to vector<1xf32>
    %243 = vector.shape_cast %242 : vector<1xf32> to vector<1x1xf32>
    %244 = vector.broadcast %243 : vector<1x1xf32> to vector<1x10xf32>
    %245 = arith.subf %241, %244 : vector<1x10xf32>
    %246 = math.exp %245 : vector<1x10xf32>
    %cst_162 = arith.constant dense<0.000000e+00> : vector<1xf32>
    %247 = vector.multi_reduction <add>, %246, %cst_162 [1] : vector<1x10xf32> to vector<1xf32>
    %248 = vector.shape_cast %247 : vector<1xf32> to vector<1x1xf32>
    %249 = vector.broadcast %248 : vector<1x1xf32> to vector<1x10xf32>
    %250 = arith.divf %246, %249 : vector<1x10xf32>
    %c0_163 = arith.constant 0 : index
    %c0_164 = arith.constant 0 : index
    %c0_165 = arith.constant 0 : index
    %251 = vector.load %arg11[%c0_163, %c0_164, %c0_165] : memref<1x1x10xf32, #tpu.memory_space<vmem>>, vector<1x1x10xf32>
    %252 = vector.shape_cast %251 : vector<1x1x10xf32> to vector<1x10xf32>
    %253 = vector.shape_cast %250 : vector<1x10xf32> to vector<1x1x10xf32>
    tpu.vector_store %arg11[%c0_163, %c0_164, %c0_165], %253 {strides = array<i32>} : memref<1x1x10xf32, #tpu.memory_space<vmem>>, vector<1x1x10xf32>,
    return
  }
  func.func @transform_0(%arg0: i32) -> (i32, i32, i32) {
    %c0_i32 = arith.constant 0 : i32
    %c0_i32_0 = arith.constant 0 : i32
    %c0_i32_1 = arith.constant 0 : i32
    return %arg0, %c0_i32, %c0_i32_0 : i32, i32, i32
  }
  func.func @transform_1(%arg0: i32) -> (i32, i32) {
    %c0_i32 = arith.constant 0 : i32
    %c0_i32_0 = arith.constant 0 : i32
    %c0_i32_1 = arith.constant 0 : i32
    return %c0_i32, %c0_i32_0 : i32, i32
  }
  func.func @transform_2(%arg0: i32) -> (i32, i32) {
    %c0_i32 = arith.constant 0 : i32
    %c0_i32_0 = arith.constant 0 : i32
    %c0_i32_1 = arith.constant 0 : i32
    return %c0_i32, %c0_i32_0 : i32, i32
  }
  func.func @transform_3(%arg0: i32) -> (i32, i32) {
    %c0_i32 = arith.constant 0 : i32
    %c0_i32_0 = arith.constant 0 : i32
    %c0_i32_1 = arith.constant 0 : i32
    return %c0_i32, %c0_i32_0 : i32, i32
  }
  func.func @transform_4(%arg0: i32) -> (i32, i32, i32) {
    %c0_i32 = arith.constant 0 : i32
    %c0_i32_0 = arith.constant 0 : i32
    %c0_i32_1 = arith.constant 0 : i32
    %c0_i32_2 = arith.constant 0 : i32
    return %c0_i32, %c0_i32_0, %c0_i32_1 : i32, i32, i32
  }
  func.func @transform_5(%arg0: i32) -> (i32, i32) {
    %c0_i32 = arith.constant 0 : i32
    %c0_i32_0 = arith.constant 0 : i32
    %c0_i32_1 = arith.constant 0 : i32
    return %c0_i32, %c0_i32_0 : i32, i32
  }
  func.func @transform_6(%arg0: i32) -> (i32, i32, i32) {
    %c0_i32 = arith.constant 0 : i32
    %c0_i32_0 = arith.constant 0 : i32
    %c0_i32_1 = arith.constant 0 : i32
    %c0_i32_2 = arith.constant 0 : i32
    return %c0_i32, %c0_i32_0, %c0_i32_1 : i32, i32, i32
  }
  func.func @transform_7(%arg0: i32) -> (i32, i32) {
    %c0_i32 = arith.constant 0 : i32
    %c0_i32_0 = arith.constant 0 : i32
    %c0_i32_1 = arith.constant 0 : i32
    return %c0_i32, %c0_i32_0 : i32, i32
  }
  func.func @transform_8(%arg0: i32) -> (i32, i32) {
    %c0_i32 = arith.constant 0 : i32
    %c0_i32_0 = arith.constant 0 : i32
    %c0_i32_1 = arith.constant 0 : i32
    return %c0_i32, %c0_i32_0 : i32, i32
  }
  func.func @transform_9(%arg0: i32) -> (i32, i32) {
    %c0_i32 = arith.constant 0 : i32
    %c0_i32_0 = arith.constant 0 : i32
    %c0_i32_1 = arith.constant 0 : i32
    return %c0_i32, %c0_i32_0 : i32, i32
  }
  func.func @transform_10(%arg0: i32) -> (i32, i32, i32) {
    %c0_i32 = arith.constant 0 : i32
    %c0_i32_0 = arith.constant 0 : i32
    %c0_i32_1 = arith.constant 0 : i32
    return %arg0, %c0_i32, %c0_i32_0 : i32, i32, i32
  }
}

</mosaic_0001>

<bundles_post_ra>
// kernel: base_drop_forward.1
= control target key start
LH: loop header
LB: loop body
LE: loop exit
PB: predicated region body
PF: predicated region fallthrough
CT: control target
= control target key end

     0   :  { %15 = vsyncpa [#allocation3], 0  ;;  %s17117_s0 = inlined_call_operand.vmem [shape: f32[2,576,25], index: 0, kind: input, shape index: {}]   ;;  %s17118_s1 = inlined_call_operand.vmem [shape: bf16[1600,144], index: 1, kind: input, shape index: {}]   ;;  %s17119_s2 = inlined_call_operand.vmem [shape: f32[25,20], index: 2, kind: input, shape index: {}]   ;;  %s17120_s3 = inlined_call_operand.vmem [shape: f32[1,20], index: 3, kind: input, shape index: {}]   ;;  %s17121_s4 = inlined_call_operand.vmem [shape: f32[25,20,50], index: 4, kind: input, shape index: {}]   ;;  %s17122_s5 = inlined_call_operand.vmem [shape: f32[1,50], index: 5, kind: input, shape index: {}]   ;;  %s17123_s6 = inlined_call_operand.vmem [shape: f32[16,50,500], index: 6, kind: input, shape index: {}]   ;;  %s17124_s7 = inlined_call_operand.vmem [shape: f32[1,500], index: 7, kind: input, shape index: {}]   ;;  %s17125_s8 = inlined_call_operand.vmem [shape: f32[500,10], index: 8, kind: input, shape index: {}]   ;;  %s17126_s9 = inlined_call_operand.vmem [shape: f32[1,10], index: 9, kind: input, shape index: {}]   ;;  %s17127_s10 = inlined_call_operand.hbm [shape: f32[2,1,10], index: 10, kind: output, shape index: {}]  }
   0x1   :  { %17 = vsyncpa [#allocation3 + $0x1], 0  ;;  %s13441_s13 = smov 0   ;;  %s13443_s14 = smov 0  }
   0x2   :  { %s13445_s15 = smov 0   ;;  %s13447_s16 = smov 0  }
   0x3 LB: > { %s13462_s17 = sadd.s32 4294967295, %s13380_s16   ;;  %s10367_s18 = sadd.s32 4294967294, %s13380_s16   ;;  %s13380_s16 = sphi %s13447_s16, %s17147_s16   ;;  %s13376_s15 = sphi %s13445_s15, %s17146_s15   ;;  %s13372_s14 = sphi %s13443_s14, %s17145_s14   ;;  %s13368_s13 = sphi %s13441_s13, %s17144_s13  }
   0x4   : > { %s13466_s19 = sadd.s32 1, %s13380_s16   ;;  %s245_s20 = sadd.s32 1, %s13376_s15 }
   0x5   : > { %s242_s21 = ssub.s32 %s13380_s16, %s13466_s19  ;;  %p255_p0 = scmp.ne.s32.totalorder %s13376_s15, %s13372_s14 }
   0x6   : > { %p243_p1 = scmp.eq.s32.totalorder %s242_s21, 0  ;;  %p256_p2 = scmp.eq.s32.totalorder %s13462_s17, 1 }
   0x7   : > { %p261_p3 = scmp.ne.s32.totalorder %s13372_s14, %s13368_s13  ;;  %p262_p4 = scmp.eq.s32.totalorder %s10367_s18, 1 }
   0x8   : > { %s13477_s22 = scalar_select %p243_p1, %s13376_s15, %s245_s20  }
   0x9   : > { %p13479_p5 = por %p256_p2, %p255_p0  ;;  %p13483_p6 = por %p262_p4, %p261_p3 }
   0xa   : > { %p10370_p7 = scmp.ge.s32.totalorder %s13380_s16, 1  ;;  %p315_p8 = scmp.lt.s32.totalorder %s13380_s16, 3 }
   0xc   : > { %p316_p9 = pnand %p10370_p7, %p315_p8 }
   0xd   : > { %v429_v0 = vld [vmem:[%s17119_s2] sm:$0xff] (!%p316_p9)  ;;  %v430_v1 = vld [vmem:[%s17119_s2 + $0x8] sm:$0xff] (!%p316_p9)  ;;  %v431_v2 = vld [vmem:[%s17119_s2 + $0x10] sm:$0xff] (!%p316_p9)  ;;  %vm657_vm0 = vcmask (!%p316_p9), 1040384   ;;  %p352_p10 = scmp.lt.s32.totalorder (!%p316_p9), %s13462_s17, 1  ;;  %vm13382_vm1 = vmmov (!%p316_p9), 1  }
   0xe   : > { %319 = sbr.rel (%p316_p9) target bundleno = 2827 (0xb0b), region = 60  ;;  %v12417_v3 = vpack.c.bf16 (!%p316_p9), %v430_v1, %v429_v0  ;;  %v432_v4 = vld [vmem:[%s17119_s2 + $0x18] sm:$0x1] (!%p316_p9)  ;;  %vm13502_vm2 = vmpackc.low (!%p316_p9), %vm657_vm0, %vm13382_vm1  ;;  %vm440_vm3 = vcmask (!%p316_p9), 203776   ;;  %vm1740_vm4 = vcmask (!%p316_p9), 130048   ;;  %vm3438_vm5 = vcmask (!%p316_p9), 1043456  }
   0xf   : > { %v12421_v5 = vpack.c.bf16 (!%p316_p9), %v432_v4, %v431_v2  ;;  %vm3413_vm6 = vcmask (!%p316_p9), 162816   ;;  %vm7074_vm7 = vcmask (!%p316_p9), 1041408   ;;  %vm7071_vm8 = vcmask (!%p316_p9), 408576   ;;  %s11462_s21 = sshll.u32 (!%p316_p9), %s13462_s17, 4 }
  0x10   : > { %12418 = vmatprep.subr.bf16.mxu0 (!%p316_p9), %v12417_v3  ;;  %13015 = vmatprep.subr.bf16.mxu1 (!%p316_p9), %v12417_v3  ;;  %vm10139_vm9 = vcmask (!%p316_p9), 949248   ;;  %vm10286_vm10 = vcmask (!%p316_p9), 73728   ;;  %s17074_s29 = scalar_lea.hbm (!%p316_p9), %s17127_s10, %s11462_s21 }
  0x11   : > { %12420 = vmatpush3.bf16.msra.mxu0 (!%p316_p9), %v12417_v3  ;;  %13017 = vmatpush3.bf16.msra.mxu1 (!%p316_p9), %v12417_v3 }
  0x12   : > { %12423 = vmatprep.subr.msk.bf16.mxu0 (!%p316_p9), %vm13502_vm2, %v12421_v5  ;;  %13016 = vmatprep.subr.msk.bf16.mxu1 (!%p316_p9), %vm13502_vm2, %v12421_v5 }
  0x15   : > { %s353_s18 = scalar_select %p352_p10, %s13462_s17, 1  ;;  %12426 = vmatpush3.bf16.msk.msra.mxu0 %vm13502_vm2, %v12421_v5  ;;  %13018 = vmatpush3.bf16.msk.msra.mxu1 %vm13502_vm2, %v12421_v5 }
  0x16   : > { %s13385_s17 = smov [#allocation2]  }
  0x17   : > { %s13271_s20 = smul.u32 576, %s353_s18  ;;  %s13322_s12 = sshll.u32 %s13385_s17, 4  ;;  %s13323_s12 = int_to_ptr.vmem [resolvable:$false] %s13322_s12 }
  0x18   : > { %s13324_s18 = scalar_lea.vmem %s13323_s12, 32 }
  0x19   : > { %s13514_s26 = scalar_lea.vmem %s17117_s0, %s13271_s20  ;;  %s350_s20 = sand.u32 1, %s13372_s14  }
  0x1a   : > { %v357_v7 = vld [vmem:[%s13514_s26] sm:$0xff]  ;;  %v358_v8 = vld [vmem:[%s13514_s26 + $0x8] sm:$0xff]  ;;  %v359_v9 = vld [vmem:[%s13514_s26 + $0x10] sm:$0xff]  ;;  %s351_s25 = scalar_lea.vmem [#allocation2], %s350_s20  ;;  %s10300_s30 = scalar_lea.sflag [#allocation3], %s350_s20 }
  0x1b   : > { %11859 = vmatprep.mubr.msk.f32.mxu0 %vm440_vm3, %v357_v7  ;;  %v401_v10 = vld [vmem:[%s13514_s26 + $0x160] sm:$0xff]  ;;  %v402_v11 = vld [vmem:[%s13514_s26 + $0x168] sm:$0xff]  ;;  %v403_v12 = vld [vmem:[%s13514_s26 + $0x170] sm:$0xff] }
  0x1c   : > { %11925 = vmatprep.mubr.msk.f32.mxu1 %vm440_vm3, %v401_v10  ;;  %11860 = vmatmul.mubr.msk.f32.vlgmr.msra.gmra.mrb[0].mxu0 %vm440_vm3, %v358_v8  ;;  %v360_v13 = vld [vmem:[%s13514_s26 + $0x18] sm:$0xff]  ;;  %v361_v14 = vld [vmem:[%s13514_s26 + $0x20] sm:$0xff]  ;;  %v362_v17 = vld [vmem:[%s13514_s26 + $0x28] sm:$0xff] }
  0x1d   : > { %11862 = vmatprep.mubr.msk.f32.mxu0 %vm440_vm3, %v359_v9  ;;  %11926 = vmatmul.mubr.msk.f32.vlgmr.msra.gmra.mrb[0].mxu1 %vm440_vm3, %v402_v11  ;;  %v404_v15 = vld [vmem:[%s13514_s26 + $0x178] sm:$0xff]  ;;  %v405_v16 = vld [vmem:[%s13514_s26 + $0x180] sm:$0xff]  ;;  %v363_v18 = vld [vmem:[%s13514_s26 + $0x30] sm:$0xff] }
  0x1e   : > { %11928 = vmatprep.mubr.msk.f32.mxu1 %vm440_vm3, %v403_v12  ;;  %v406_v19 = vld [vmem:[%s13514_s26 + $0x188] sm:$0xff]  ;;  %v407_v20 = vld [vmem:[%s13514_s26 + $0x190] sm:$0xff]  ;;  %v364_v21 = vld [vmem:[%s13514_s26 + $0x38] sm:$0xff] }
  0x1f   : > { %v365_v22 = vld [vmem:[%s13514_s26 + $0x40] sm:$0xff]  ;;  %v408_v23 = vld [vmem:[%s13514_s26 + $0x198] sm:$0xff]  ;;  %v366_v25 = vld [vmem:[%s13514_s26 + $0x48] sm:$0xff] }
  0x20   : > { %11863 = vmatmul.mubr.msk.f32.gmra.mrb[2].mxu0 %vm440_vm3, %v360_v13  ;;  %v409_v24 = vld [vmem:[%s13514_s26 + $0x1a0] sm:$0xff]  ;;  %v367_v26 = vld [vmem:[%s13514_s26 + $0x50] sm:$0xff]  ;;  %v410_v27 = vld [vmem:[%s13514_s26 + $0x1a8] sm:$0xff] }
  0x21   : > { %11865 = vmatprep.mubr.msk.f32.mxu0 %vm440_vm3, %v361_v14  ;;  %11929 = vmatmul.mubr.msk.f32.gmra.mrb[2].mxu1 %vm440_vm3, %v404_v15  ;;  %v411_v28 = vld [vmem:[%s13514_s26 + $0x1b0] sm:$0xff]  ;;  %v368_v29 = vld [vmem:[%s13514_s26 + $0x58] sm:$0xff]  ;;  %v369_v30 = vld [vmem:[%s13514_s26 + $0x60] sm:$0xff]  ;;  %v17128_v15 = vmov 0.0|0.0  }
  0x22   : > { %11931 = vmatprep.mubr.msk.f32.mxu1 %vm440_vm3, %v405_v16  ;;  %v412_v31 = vld [vmem:[%s13514_s26 + $0x1b8] sm:$0xff]  ;;  %v413_v32 = vld [vmem:[%s13514_s26 + $0x1c0] sm:$0xff]  ;;  %v370_v33 = vld [vmem:[%s13514_s26 + $0x68] sm:$0xff]  ;;  %12427 = vmatprep.subr.bf16.mxu1 %v17128_v15 }
  0x23   : > { %v371_v34 = vld [vmem:[%s13514_s26 + $0x70] sm:$0xff]  ;;  %v414_v35 = vld [vmem:[%s13514_s26 + $0x1c8] sm:$0xff]  ;;  %v372_v37 = vld [vmem:[%s13514_s26 + $0x78] sm:$0xff] }
  0x24   : > { %11866 = vmatmul.mubr.msk.f32.gmra.mrb[4].mxu0 %vm440_vm3, %v362_v17  ;;  %v415_v36 = vld [vmem:[%s13514_s26 + $0x1d0] sm:$0xff]  ;;  %v373_v38 = vld [vmem:[%s13514_s26 + $0x80] sm:$0xff]  ;;  %v416_v39 = vld [vmem:[%s13514_s26 + $0x1d8] sm:$0xff] }
  0x25   : > { %11868 = vmatprep.mubr.msk.f32.mxu0 %vm440_vm3, %v363_v18  ;;  %11932 = vmatmul.mubr.msk.f32.gmra.mrb[4].mxu1 %vm440_vm3, %v406_v19  ;;  %v417_v40 = vld [vmem:[%s13514_s26 + $0x1e0] sm:$0xff]  ;;  %v374_v41 = vld [vmem:[%s13514_s26 + $0x88] sm:$0xff]  ;;  %v375_v42 = vld [vmem:[%s13514_s26 + $0x90] sm:$0xff] }
  0x26   : > { %11934 = vmatprep.mubr.msk.f32.mxu1 %vm440_vm3, %v407_v20  ;;  %v418_v43 = vld [vmem:[%s13514_s26 + $0x1e8] sm:$0xff]  ;;  %v419_v44 = vld [vmem:[%s13514_s26 + $0x1f0] sm:$0xff]  ;;  %v376_v45 = vld [vmem:[%s13514_s26 + $0x98] sm:$0xff] }
  0x27   : > { %v377_v46 = vld [vmem:[%s13514_s26 + $0xa0] sm:$0xff]  ;;  %v420_v47 = vld [vmem:[%s13514_s26 + $0x1f8] sm:$0xff]  ;;  %v378_v49 = vld [vmem:[%s13514_s26 + $0xa8] sm:$0xff] }
  0x28   : > { %11869 = vmatmul.mubr.msk.f32.gmra.mrb[6].mxu0 %vm440_vm3, %v364_v21  ;;  %v421_v48 = vld [vmem:[%s13514_s26 + $0x200] sm:$0xff]  ;;  %v379_v50 = vld [vmem:[%s13514_s26 + $0xb0] sm:$0xff]  ;;  %v422_v51 = vld [vmem:[%s13514_s26 + $0x208] sm:$0xff] }
  0x29   : > { %11871 = vmatprep.mubr.msk.f32.mxu0 %vm440_vm3, %v365_v22  ;;  %11935 = vmatmul.mubr.msk.f32.gmra.mrb[6].mxu1 %vm440_vm3, %v408_v23  ;;  %v423_v52 = vld [vmem:[%s13514_s26 + $0x210] sm:$0xff]  ;;  %v380_v53 = vld [vmem:[%s13514_s26 + $0xb8] sm:$0xff]  ;;  %v381_v54 = vld [vmem:[%s13514_s26 + $0xc0] sm:$0xff] }
  0x2a   : > { %11937 = vmatprep.mubr.msk.f32.mxu1 %vm440_vm3, %v409_v24  ;;  %v424_v55 = vld [vmem:[%s13514_s26 + $0x218] sm:$0xff]  ;;  %v425_v56 = vld [vmem:[%s13514_s26 + $0x220] sm:$0xff]  ;;  %v382_v57 = vld [vmem:[%s13514_s26 + $0xc8] sm:$0xff] }
  0x2b   : > { %v383_v58 = vld [vmem:[%s13514_s26 + $0xd0] sm:$0xff]  ;;  %v426_v59 = vld [vmem:[%s13514_s26 + $0x228] sm:$0xff]  ;;  %v384_v61 = vld [vmem:[%s13514_s26 + $0xd8] sm:$0xff] }
  0x2c   : > { %11872 = vmatmul.mubr.msk.f32.gmra.mrb[8].mxu0 %vm440_vm3, %v366_v25  ;;  %v427_v60 = vld [vmem:[%s13514_s26 + $0x230] sm:$0xff]  ;;  %v385_v62 = vld [vmem:[%s13514_s26 + $0xe0] sm:$0xff]  ;;  %v428_v63 = vld [vmem:[%s13514_s26 + $0x238] sm:$0xff] }
  0x2d   : > { %11874 = vmatprep.mubr.msk.f32.mxu0 %vm440_vm3, %v367_v26  ;;  %11938 = vmatmul.mubr.msk.f32.gmra.mrb[8].mxu1 %vm440_vm3, %v410_v27  ;;  %v386_v0 = vld [vmem:[%s13514_s26 + $0xe8] sm:$0xff]  ;;  %v387_v1 = vld [vmem:[%s13514_s26 + $0xf0] sm:$0xff]  ;;  %v388_v2 = vld [vmem:[%s13514_s26 + $0xf8] sm:$0xff] }
  0x2e   : > { %11940 = vmatprep.mubr.msk.f32.mxu1 %vm440_vm3, %v411_v28  ;;  %v389_v3 = vld [vmem:[%s13514_s26 + $0x100] sm:$0xff]  ;;  %v390_v4 = vld [vmem:[%s13514_s26 + $0x108] sm:$0xff]  ;;  %v391_v5 = vld [vmem:[%s13514_s26 + $0x110] sm:$0xff] }
  0x2f   : > { %v392_v6 = vld [vmem:[%s13514_s26 + $0x118] sm:$0xff]  ;;  %v393_v7 = vld [vmem:[%s13514_s26 + $0x120] sm:$0xff]  ;;  %v394_v8 = vld [vmem:[%s13514_s26 + $0x128] sm:$0xff] }
  0x30   : > { %11875 = vmatmul.mubr.msk.f32.gmra.mrb[10].mxu0 %vm440_vm3, %v368_v29  ;;  %v395_v9 = vld [vmem:[%s13514_s26 + $0x130] sm:$0xff]  ;;  %v396_v10 = vld [vmem:[%s13514_s26 + $0x138] sm:$0xff]  ;;  %v397_v11 = vld [vmem:[%s13514_s26 + $0x140] sm:$0xff] }
  0x31   : > { %11877 = vmatprep.mubr.msk.f32.mxu0 %vm440_vm3, %v369_v30  ;;  %11941 = vmatmul.mubr.msk.f32.gmra.mrb[10].mxu1 %vm440_vm3, %v412_v31  ;;  %v398_v12 = vld [vmem:[%s13514_s26 + $0x148] sm:$0xff]  ;;  %v399_v13 = vld [vmem:[%s13514_s26 + $0x150] sm:$0xff]  ;;  %v400_v14 = vld [vmem:[%s13514_s26 + $0x158] sm:$0xff]  ;;  %s10312_s26 = sshll.u32 %s351_s25, 4  ;;  %s17076_s26 = int_to_ptr.vmem [resolvable:$true] %s10312_s26 }
  0x32   : > { %11943 = vmatprep.mubr.msk.f32.mxu1 %vm440_vm3, %v413_v32  ;;  %v13668_v16 = vld [vmem:[%s17118_s1] sm:$0xff]  ;;  %s13318_s11 = scalar_lea.vmem %s17076_s26, 16  ;;  %p13325_p0 = scmp.lt.s32.totalorder %s17076_s26, %s13323_s12 }
  0x33   : > { %v1341_v17 = vunpack.c.h.bf16 %v13668_v16  ;;  %p13319_p11 = scmp.ne.s32.totalorder %s17076_s26, %s13318_s11  ;;  %p13326_p1 = scmp.lt.s32.totalorder %s13324_s18, %s13318_s11 }
  0x34   : > { %11878 = vmatmul.mubr.msk.f32.gmra.mrb[12].mxu0 %vm440_vm3, %v370_v33 }
  0x35   : > { %11880 = vmatprep.mubr.msk.f32.mxu0 %vm440_vm3, %v371_v34  ;;  %11944 = vmatmul.mubr.msk.f32.gmra.mrb[12].mxu1 %vm440_vm3, %v414_v35  ;;  %p13320_p12 = pnand %p13319_p11, %p13479_p5  ;;  %p13327_p2 = por %p13326_p1, %p13325_p0 }
  0x36   : > { %11946 = vmatprep.mubr.msk.f32.mxu1 %vm440_vm3, %v415_v36 }
  0x37   : > { %p13321_p13 = pneg %p13320_p12 }
  0x38   : > { %11881 = vmatmul.mubr.msk.f32.gmra.mrb[14].mxu0 %vm440_vm3, %v372_v37 }
  0x39   : > { %11883 = vmatprep.mubr.msk.f32.mxu0 %vm440_vm3, %v373_v38  ;;  %11947 = vmatmul.mubr.msk.f32.gmra.mrb[14].mxu1 %vm440_vm3, %v416_v39  ;;  %p13328_p3 = pnand %p13327_p2, %p13321_p13 }
  0x3a   : > { %11949 = vmatprep.mubr.msk.f32.mxu1 %vm440_vm3, %v417_v40 }
  0x3c   : > { %11884 = vmatmul.mubr.msk.f32.gmra.mrb[16].mxu0 %vm440_vm3, %v374_v41 }
  0x3d   : > { %11886 = vmatprep.mubr.msk.f32.mxu0 %vm440_vm3, %v375_v42  ;;  %11950 = vmatmul.mubr.msk.f32.gmra.mrb[16].mxu1 %vm440_vm3, %v418_v43 }
  0x3e   : > { %11952 = vmatprep.mubr.msk.f32.mxu1 %vm440_vm3, %v419_v44 }
  0x40   : > { %11887 = vmatmul.mubr.msk.f32.gmra.mrb[18].mxu0 %vm440_vm3, %v376_v45 }
  0x41   : > { %11889 = vmatprep.mubr.msk.f32.mxu0 %vm440_vm3, %v377_v46  ;;  %11953 = vmatmul.mubr.msk.f32.gmra.mrb[18].mxu1 %vm440_vm3, %v420_v47 }
  0x42   : > { %11955 = vmatprep.mubr.msk.f32.mxu1 %vm440_vm3, %v421_v48 }
  0x44   : > { %11890 = vmatmul.mubr.msk.f32.gmra.mrb[20].mxu0 %vm440_vm3, %v378_v49 }
  0x45   : > { %11892 = vmatprep.mubr.msk.f32.mxu0 %vm440_vm3, %v379_v50  ;;  %11956 = vmatmul.mubr.msk.f32.gmra.mrb[20].mxu1 %vm440_vm3, %v422_v51 }
  0x46   : > { %11958 = vmatprep.mubr.msk.f32.mxu1 %vm440_vm3, %v423_v52 }
  0x48   : > { %11893 = vmatmul.mubr.msk.f32.gmra.mrb[22].mxu0 %vm440_vm3, %v380_v53  ;;  %v13723_v53 = vld [vmem:[%s17120_s3] ss:$0 sm:$0xff] }
  0x49   : > { %11895 = vmatprep.mubr.msk.f32.mxu0 %vm440_vm3, %v381_v54  ;;  %11959 = vmatmul.mubr.msk.f32.gmra.mrb[22].mxu1 %vm440_vm3, %v424_v55 }
  0x4a   : > { %11961 = vmatprep.mubr.msk.f32.mxu1 %vm440_vm3, %v425_v56 }
  0x4c   : > { %11896 = vmatmul.mubr.msk.f32.gmra.mrb[24].mxu0 %vm440_vm3, %v382_v57 }
  0x4d   : > { %11898 = vmatprep.mubr.msk.f32.mxu0 %vm440_vm3, %v383_v58  ;;  %11962 = vmatmul.mubr.msk.f32.gmra.mrb[24].mxu1 %vm440_vm3, %v426_v59 }
  0x4e   : > { %11964 = vmatprep.mubr.msk.f32.mxu1 %vm440_vm3, %v427_v60 }
  0x50   : > { %11899 = vmatmul.mubr.msk.f32.gmra.mrb[26].mxu0 %vm440_vm3, %v384_v61 }
  0x51   : > { %11901 = vmatprep.mubr.msk.f32.mxu0 %vm440_vm3, %v385_v62  ;;  %11965 = vmatmul.mubr.msk.f32.gmra.mrb[26].mxu1 %vm440_vm3, %v428_v63 }
  0x52   : > { %10446 = vmatprep.mubr.msk.f32.mxu1 %vm1740_vm4, %v1341_v17 }
  0x54   : > { %11902 = vmatmul.mubr.msk.f32.gmra.mrb[28].mxu0 %vm440_vm3, %v386_v0 }
  0x55   : > { %11904 = vmatprep.mubr.msk.f32.mxu0 %vm440_vm3, %v387_v1 }
  0x58   : > { %11905 = vmatmul.mubr.msk.f32.gmra.mrb[30].mxu0 %vm440_vm3, %v388_v2 }
  0x59   : > { %11907 = vmatprep.mubr.msk.f32.mxu0 %vm440_vm3, %v389_v3 }
  0x5c   : > { %11908 = vmatmul.mubr.msk.f32.gmra.mrb[32].mxu0 %vm440_vm3, %v390_v4 }
  0x5d   : > { %11910 = vmatprep.mubr.msk.f32.mxu0 %vm440_vm3, %v391_v5 }
  0x60   : > { %11911 = vmatmul.mubr.msk.f32.gmra.mrb[34].mxu0 %vm440_vm3, %v392_v6 }
  0x61   : > { %11913 = vmatprep.mubr.msk.f32.mxu0 %vm440_vm3, %v393_v7 }
  0x64   : > { %11914 = vmatmul.mubr.msk.f32.gmra.mrb[36].mxu0 %vm440_vm3, %v394_v8 }
  0x65   : > { %11916 = vmatprep.mubr.msk.f32.mxu0 %vm440_vm3, %v395_v9 }
  0x68   : > { %11917 = vmatmul.mubr.msk.f32.gmra.mrb[38].mxu0 %vm440_vm3, %v396_v10 }
  0x69   : > { %11919 = vmatprep.mubr.msk.f32.mxu0 %vm440_vm3, %v397_v11 }
  0x6c   : > { %11920 = vmatmul.mubr.msk.f32.gmra.mrb[40].mxu0 %vm440_vm3, %v398_v12 }
  0x6d   : > { %11922 = vmatprep.mubr.msk.f32.mxu0 %vm440_vm3, %v399_v13 }
  0x70   : > { %11923 = vmatmul.mubr.msk.f32.gmra.mrb[42].mxu0 %vm440_vm3, %v400_v14 }
  0xef   : > { %v11861_v18 = vpop.f32.mrb[0].mxu0 }
  0xf0   : > { %v727_v19 = vpop.f32.mrb[1].mxu0  ;;  %v11927_v20 = vpop.f32.mrb[0].mxu1  ;;  %v13731_v57 = vadd.f32 %v11861_v18, %v13723_v53 }
  0xf1   : > { %v947_v21 = vpop.f32.mrb[1].mxu1  ;;  %v13728_v55 = vadd.f32 %v11927_v20, %v13723_v53  ;;  %v13740_v62 = vadd.f32 %v13723_v53, %v727_v19 }
  0xf2   : > { %v13734_v58 = vadd.f32 %v13723_v53, %v947_v21 }
  0xf3   : > { %v11864_v22 = vpop.f32.mrb[2].mxu0 }
  0xf4   : > { %v737_v23 = vpop.f32.mrb[3].mxu0  ;;  %v11930_v24 = vpop.f32.mrb[2].mxu1  ;;  %v13761_v8 = vadd.f32 %v11864_v22, %v13723_v53 }
  0xf5   : > { %v957_v25 = vpop.f32.mrb[3].mxu1  ;;  %v13754_v4 = vadd.f32 %v11930_v24, %v13723_v53  ;;  %v13772_v14 = vadd.f32 %v13723_v53, %v737_v23 }
  0xf6   : > { %v13764_v9 = vadd.f32 %v13723_v53, %v957_v25 }
  0xf7   : > { %v11867_v26 = vpop.f32.mrb[4].mxu0 }
  0xf8   : > { %v13672_v27 = vpop.f32.mrb[5].mxu0  ;;  %v11933_v28 = vpop.f32.mrb[4].mxu1 }
  0xf9   : > { %v967_v29 = vpop.f32.mrb[5].mxu1  ;;  %v13786_v22 = vadd.f32 %v11933_v28, %v13723_v53 }
  0xfb   : > { %v13674_v30 = vpop.f32.mrb[6].mxu0 }
  0xfc   : > { %v13676_v31 = vpop.f32.mrb[7].mxu0  ;;  %v13678_v32 = vpop.f32.mrb[6].mxu1 }
  0xfd   : > { %v13680_v33 = vpop.f32.mrb[7].mxu1 }
  0xff   : > { %v13682_v34 = vpop.f32.mrb[8].mxu0 }
 0x100   : > { %v13684_v35 = vpop.f32.mrb[9].mxu0  ;;  %v13686_v36 = vpop.f32.mrb[8].mxu1 }
 0x101   : > { %v13688_v37 = vpop.f32.mrb[9].mxu1  ;;  %v13852_v15 = vadd.f32 %v13686_v36, %v13723_v53  ;;  %v768_v20 = vadd.f32 %v13723_v53, %v13684_v35 }
 0x103   : > { %v13690_v38 = vpop.f32.mrb[10].mxu0 }
 0x104   : > { %v13692_v39 = vpop.f32.mrb[11].mxu0  ;;  %v13694_v40 = vpop.f32.mrb[10].mxu1 }
 0x105   : > { %v13696_v41 = vpop.f32.mrb[11].mxu1 }
 0x107   : > { %v13698_v42 = vpop.f32.mrb[12].mxu0 }
 0x108   : > { %v13700_v43 = vpop.f32.mrb[13].mxu0  ;;  %v13702_v44 = vpop.f32.mrb[12].mxu1 }
 0x109   : > { %v13704_v45 = vpop.f32.mrb[13].mxu1 }
 0x10b   : > { %v13706_v46 = vpop.f32.mrb[14].mxu0 }
 0x10c   : > { %v13708_v47 = vpop.f32.mrb[15].mxu0  ;;  %v13710_v48 = vpop.f32.mrb[14].mxu1 }
 0x10d   : > { %v13712_v49 = vpop.f32.mrb[15].mxu1 }
 0x10f   : > { %v13714_v50 = vpop.f32.mrb[16].mxu0 }
 0x110   : > { %v13716_v51 = vpop.f32.mrb[17].mxu0  ;;  %v13718_v52 = vpop.f32.mrb[16].mxu1 }
 0x111   : > { %v13725_v54 = vpop.f32.mrb[17].mxu1 }
 0x113   : > { %v11888_v56 = vpop.f32.mrb[18].mxu0 }
 0x114   : > { %v13737_v59 = vadd.f32 %v11888_v56, %v13723_v53  ;;  %v817_v60 = vpop.f32.mrb[19].mxu0  ;;  %v11954_v61 = vpop.f32.mrb[18].mxu1  ;;  %v13793_v56 = vadd.f32 %v11867_v26, %v13723_v53 }
 0x115   : > { %v13743_v63 = vadd.f32 %v13723_v53, %v817_v60  ;;  %v13746_v0 = vadd.f32 %v11954_v61, %v13723_v53  ;;  %v1037_v1 = vpop.f32.mrb[19].mxu1  ;;  %v13796_v60 = vadd.f32 %v13723_v53, %v967_v29 }
 0x116   : > { %v13751_v3 = vadd.f32 %v13723_v53, %v1037_v1 }
 0x117   : > { %v11891_v6 = vpop.f32.mrb[20].mxu0  ;;  %v1113_v7 = vmax.f32 %v13728_v55, %v13746_v0 }
 0x118   : > { %v13767_v10 = vadd.f32 %v11891_v6, %v13723_v53  ;;  %v827_v11 = vpop.f32.mrb[21].mxu0  ;;  %v11957_v13 = vpop.f32.mrb[20].mxu1 }
 0x119   : > { %v13775_v17 = vadd.f32 %v13723_v53, %v827_v11  ;;  %v13778_v18 = vadd.f32 %v11957_v13, %v13723_v53  ;;  %v1047_v19 = vpop.f32.mrb[21].mxu1  ;;  %v13805_v11 = vadd.f32 %v13723_v53, %v13672_v27  ;;  %v13841_v13 = vadd.f32 %v13723_v53, %v13676_v31 }
 0x11a   : > { %v13783_v21 = vadd.f32 %v13723_v53, %v1047_v19 }
 0x11b   : > { %v11894_v24 = vpop.f32.mrb[22].mxu0  ;;  %v1115_v25 = vmax.f32 %v13754_v4, %v13778_v18 }
 0x11c   : > { %v13799_v61 = vadd.f32 %v11894_v24, %v13723_v53  ;;  %v837_v1 = vpop.f32.mrb[23].mxu0  ;;  %v1114_v28 = vmax.f32 %v13764_v9, %v13783_v21  ;;  %v11960_v6 = vpop.f32.mrb[22].mxu1  ;;  %v13820_v9 = vadd.f32 %v13678_v32, %v13723_v53  ;;  %v13828_v24 = vadd.f32 %v13674_v30, %v13723_v53 }
 0x11d   : > { %v13808_v4 = vadd.f32 %v13723_v53, %v837_v1  ;;  %v13811_v26 = vadd.f32 %v11960_v6, %v13723_v53  ;;  %v1057_v29 = vpop.f32.mrb[23].mxu1  ;;  %v13832_v1 = vadd.f32 %v13723_v53, %v13680_v33 }
 0x11e   : > { %v13816_v18 = vadd.f32 %v13723_v53, %v1057_v29 }
 0x11f   : > { %v11897_v19 = vpop.f32.mrb[24].mxu0  ;;  %v1117_v21 = vmax.f32 %v13786_v22, %v13811_v26 }
 0x120   : > { %v13835_v6 = vadd.f32 %v11897_v19, %v13723_v53  ;;  %v847_v32 = vpop.f32.mrb[25].mxu0  ;;  %v1116_v29 = vmax.f32 %v13796_v60, %v13816_v18  ;;  %v11963_v27 = vpop.f32.mrb[24].mxu1 }
 0x121   : > { %v13844_v22 = vadd.f32 %v13723_v53, %v847_v32  ;;  %v1073_v30 = vadd.f32 %v11963_v27, %v13723_v53  ;;  %v1067_v26 = vpop.f32.mrb[25].mxu1  ;;  %v773_v32 = vadd.f32 %v13682_v34, %v13723_v53  ;;  %v13861_v27 = vadd.f32 %v13723_v53, %v13688_v37 }
 0x122   : > { %v1068_v19 = vadd.f32 %v13723_v53, %v1067_v26 }
 0x123   : > { %v11900_v31 = vpop.f32.mrb[26].mxu0  ;;  %v1119_v18 = vmax.f32 %v13820_v9, %v1073_v30 }
 0x124   : > { %v863_v33 = vadd.f32 %v11900_v31, %v13723_v53  ;;  %v857_v26 = vpop.f32.mrb[27].mxu0  ;;  %v1118_v23 = vmax.f32 %v13832_v1, %v1068_v19  ;;  %v11966_v36 = vpop.f32.mrb[26].mxu1  ;;  %v783_v31 = vadd.f32 %v13690_v38, %v13723_v53 }
 0x125   : > { %v858_v60 = vadd.f32 %v13723_v53, %v857_v26  ;;  %v1083_v9 = vadd.f32 %v11966_v36, %v13723_v53  ;;  %v1077_v30 = vpop.f32.mrb[27].mxu1 }
 0x126   : > { %v1095_v5 = vmax.f32 %v773_v32, %v863_v33  ;;  %v1078_v34 = vadd.f32 %v13723_v53, %v1077_v30  ;;  %v778_v33 = vadd.f32 %v13723_v53, %v13692_v39 }
 0x127   : > { %v1094_v2 = vmax.f32 %v768_v20, %v858_v60  ;;  %v11903_v37 = vpop.f32.mrb[28].mxu0  ;;  %v1121_v12 = vmax.f32 %v13852_v15, %v1083_v9  ;;  %v17134_v20 = vmax.f32 %v13734_v58, %v13751_v3  ;;  %v788_v58 = vadd.f32 %v13723_v53, %v13700_v43 }
 0x128   : > { %v13876_v1 = vmax.f32 %v1095_v5, %v1113_v7  ;;  %v873_v35 = vadd.f32 %v11903_v37, %v13723_v53  ;;  %v867_v19 = vpop.f32.mrb[29].mxu0  ;;  %v1120_v26 = vmax.f32 %v13861_v27, %v1078_v34  ;;  %v793_v7 = vadd.f32 %v13698_v42, %v13723_v53 }
 0x129   : > { %v13885_v15 = vmax.f32 %v1094_v2, %v17134_v20  ;;  %v868_v38 = vadd.f32 %v13723_v53, %v867_v19  ;;  %v803_v42 = vadd.f32 %v13706_v46, %v13723_v53  ;;  %v798_v43 = vadd.f32 %v13723_v53, %v13708_v47 }
 0x12a   : > { %v1097_v60 = vmax.f32 %v783_v31, %v873_v35  ;;  %v813_v46 = vadd.f32 %v13714_v50, %v13723_v53  ;;  %v808_v47 = vadd.f32 %v13723_v53, %v13716_v51 }
 0x12b   : > { %v12440_v55 = vpack.c.bf16 %v13876_v1, %v13885_v15  ;;  %v1096_v0 = vmax.f32 %v778_v33, %v868_v38  ;;  %v11906_v5 = vpop.f32.mrb[30].mxu0  ;;  %v1143_v1 = vld [vmem:[%s17118_s1 + $0x18] sm:$0xff] }
 0x12c   : > { %v13892_v32 = vmax.f32 %v1097_v60, %v1115_v25  ;;  %v883_v39 = vadd.f32 %v11906_v5, %v13723_v53  ;;  %v877_v27 = vpop.f32.mrb[31].mxu0 }
 0x12d   : > { %v13897_v2 = vmax.f32 %v1096_v0, %v1114_v28  ;;  %v878_v3 = vadd.f32 %v13723_v53, %v877_v27  ;;  %v998_v27 = vadd.f32 %v13723_v53, %v13696_v41 }
 0x12e   : > { %v1099_v36 = vmax.f32 %v793_v7, %v883_v39  ;;  %v1003_v7 = vadd.f32 %v13694_v40, %v13723_v53 }
 0x12f   : > { %v12443_v9 = vpack.c.bf16 %v13892_v32, %v13897_v2  ;;  %v1098_v30 = vmax.f32 %v788_v58, %v878_v3  ;;  %v11909_v34 = vpop.f32.mrb[32].mxu0  ;;  %v1346_v32 = vunpack.c.l.bf16 %v1143_v1 }
 0x130   : > { %v13904_v25 = vmax.f32 %v1099_v36, %v1117_v21  ;;  %v893_v37 = vadd.f32 %v11909_v34, %v13723_v53  ;;  %v887_v31 = vpop.f32.mrb[33].mxu0  ;;  %v1013_v34 = vadd.f32 %v13702_v44, %v13723_v53 }
 0x131   : > { %v13909_v28 = vmax.f32 %v1098_v30, %v1116_v29  ;;  %v888_v35 = vadd.f32 %v13723_v53, %v887_v31 }
 0x132   : > { %v1101_v19 = vmax.f32 %v803_v42, %v893_v37  ;;  %v1008_v42 = vadd.f32 %v13723_v53, %v13704_v45 }
 0x133   : > { %v12446_v33 = vpack.c.bf16 %v13904_v25, %v13909_v28  ;;  %v1100_v20 = vmax.f32 %v798_v43, %v888_v35  ;;  %v11912_v38 = vpop.f32.mrb[34].mxu0  ;;  %v17135_v43 = vmax.f32 %v13731_v57, %v13737_v59  ;;  %v17137_v59 = vmax.f32 %v13761_v8, %v13767_v10 }
 0x134   : > { %v13916_v21 = vmax.f32 %v1101_v19, %v1119_v18  ;;  %v903_v60 = vadd.f32 %v11912_v38, %v13723_v53  ;;  %v897_v0 = vpop.f32.mrb[35].mxu0  ;;  %v1023_v38 = vadd.f32 %v13710_v48, %v13723_v53  ;;  %v1028_v8 = vadd.f32 %v13723_v53, %v13725_v54 }
 0x135   : > { %v13921_v29 = vmax.f32 %v1100_v20, %v1118_v23  ;;  %v898_v5 = vadd.f32 %v13723_v53, %v897_v0 }
 0x136   : > { %v1103_v39 = vmax.f32 %v813_v46, %v903_v60  ;;  %v1018_v46 = vadd.f32 %v13723_v53, %v13712_v49  ;;  %v1033_v49 = vadd.f32 %v13718_v52, %v13723_v53 }
 0x137   : > { %v12449_v50 = vpack.c.bf16 %v13916_v21, %v13921_v29  ;;  %v1102_v18 = vmax.f32 %v808_v47, %v898_v5  ;;  %v11915_v58 = vpop.f32.mrb[36].mxu0 }
 0x138   : > { %v1139_v3 = vmax.f32 %v1103_v39, %v1121_v12  ;;  %v913_v36 = vadd.f32 %v11915_v58, %v13723_v53  ;;  %v907_v51 = vpop.f32.mrb[37].mxu0 }
 0x139   : > { %v1138_v23 = vmax.f32 %v1102_v18, %v1120_v26  ;;  %v908_v30 = vadd.f32 %v13723_v53, %v907_v51  ;;  %v17136_v26 = vmax.f32 %v13740_v62, %v13743_v63  ;;  %v17138_v63 = vmax.f32 %v13772_v14, %v13775_v17 }
 0x13a   : > { %v1105_v40 = vmax.f32 %v913_v36, %v1003_v7  ;;  %v17139_v7 = vmov 0.0|0.0   ;;  %v17140_v18 = vmax.f32 %v13793_v56, %v13799_v61  ;;  %v17143_v61 = vmax.f32 %v13841_v13, %v13844_v22 }
 0x13b   : > { %v12452_v41 = vpack.c.bf16 %v1139_v3, %v1138_v23  ;;  %v1104_v37 = vmax.f32 %v908_v30, %v998_v27  ;;  %v11918_v31 = vpop.f32.mrb[38].mxu0  ;;  %v17141_v3 = vmax.f32 %v13805_v11, %v13808_v4  ;;  %v17142_v30 = vmax.f32 %v13828_v24, %v13835_v6  ;;  %v1142_v24 = vld [vmem:[%s17118_s1 + $0x10] sm:$0xff] }
 0x13c   : > { %v1123_v12 = vmax.f32 %v17135_v43, %v1105_v40  ;;  %v923_v35 = vadd.f32 %v11918_v31, %v13723_v53  ;;  %v917_v19 = vpop.f32.mrb[39].mxu0  ;;  %v1340_v4 = vunpack.c.l.bf16 %v13668_v16  ;;  %v1345_v22 = vunpack.c.h.bf16 %v1142_v24  ;;  %v1148_v31 = vld [vmem:[%s17118_s1 + $0x40] sm:$0xff] }
 0x13d   : > { %v1122_v20 = vmax.f32 %v17136_v26, %v1104_v37  ;;  %v918_v44 = vadd.f32 %v13723_v53, %v917_v19  ;;  %v1344_v15 = vunpack.c.l.bf16 %v1142_v24  ;;  %v1347_v16 = vunpack.c.h.bf16 %v1143_v1  ;;  %v1163_v24 = vld [vmem:[%s17118_s1 + $0xb8] sm:$0xff]  ;;  %v1164_v1 = vld [vmem:[%s17118_s1 + $0xc0] sm:$0xff] }
 0x13e   : > { %v1107_v45 = vmax.f32 %v923_v35, %v1013_v34  ;;  %v1149_v35 = vld [vmem:[%s17118_s1 + $0x48] sm:$0xff]  ;;  %v1356_v19 = vunpack.c.l.bf16 %v1148_v31 }
 0x13f   : > { %v12428_v21 = vpack.c.bf16 %v1123_v12, %v1122_v20  ;;  %v1106_v60 = vmax.f32 %v918_v44, %v1008_v42  ;;  %v11921_v57 = vpop.f32.mrb[40].mxu0  ;;  %v1147_v42 = vld [vmem:[%s17118_s1 + $0x38] sm:$0xff]  ;;  %v1357_v12 = vunpack.c.h.bf16 %v1148_v31  ;;  %v1359_v26 = vunpack.c.h.bf16 %v1149_v35  ;;  %v1150_v20 = vld [vmem:[%s17118_s1 + $0x50] sm:$0xff]  ;;  %v1169_v31 = vld [vmem:[%s17118_s1 + $0xe8] sm:$0xff] }
 0x140   : > { %v1125_v0 = vmax.f32 %v17137_v59, %v1107_v45  ;;  %v933_v47 = vadd.f32 %v11921_v57, %v13723_v53  ;;  %v927_v62 = vpop.f32.mrb[41].mxu0  ;;  %v1355_v37 = vunpack.c.h.bf16 %v1147_v42  ;;  %v1354_v43 = vunpack.c.l.bf16 %v1147_v42  ;;  %v1151_v45 = vld [vmem:[%s17118_s1 + $0x58] sm:$0xff]  ;;  %v1168_v42 = vld [vmem:[%s17118_s1 + $0xe0] sm:$0xff] }
 0x141   : > { %v1124_v29 = vmax.f32 %v17138_v63, %v1106_v60  ;;  %v928_v48 = vadd.f32 %v13723_v53, %v927_v62  ;;  %12429 = vmatpush1.bf16.msra.mxu1 %v12428_v21  ;;  %v1358_v44 = vunpack.c.l.bf16 %v1149_v35  ;;  %v1363_v21 = vunpack.c.h.bf16 %v1151_v45  ;;  %v1152_v60 = vld [vmem:[%s17118_s1 + $0x60] sm:$0xff]  ;;  %v1154_v63 = vld [vmem:[%s17118_s1 + $0x70] sm:$0xff] }
 0x142   : > { %v1109_v5 = vmax.f32 %v933_v47, %v1023_v38  ;;  %12430 = vmatprep.subr.bf16.mxu1 %v17139_v7  ;;  %v1361_v38 = vunpack.c.h.bf16 %v1150_v20  ;;  %v1362_v57 = vunpack.c.l.bf16 %v1151_v45  ;;  %v1365_v59 = vunpack.c.h.bf16 %v1152_v60  ;;  %v1170_v35 = vld [vmem:[%s17118_s1 + $0xf0] sm:$0xff]  ;;  %v1171_v45 = vld [vmem:[%s17118_s1 + $0xf8] sm:$0xff] }
 0x143   : > { %v12431_v10 = vpack.c.bf16 %v1125_v0, %v1124_v29  ;;  %v1108_v39 = vmax.f32 %v928_v48, %v1018_v46  ;;  %v11924_v27 = vpop.f32.mrb[42].mxu0  ;;  %v1360_v46 = vunpack.c.l.bf16 %v1150_v20  ;;  %v1153_v0 = vld [vmem:[%s17118_s1 + $0x68] sm:$0xff]  ;;  %v1364_v47 = vunpack.c.l.bf16 %v1152_v60 }
 0x144   : > { %v1127_v14 = vmax.f32 %v17140_v18, %v1109_v5  ;;  %v943_v17 = vadd.f32 %v11924_v27, %v13723_v53  ;;  %v937_v58 = vpop.f32.mrb[43].mxu0  ;;  %v1367_v62 = vunpack.c.h.bf16 %v1153_v0  ;;  %v1366_v29 = vunpack.c.l.bf16 %v1153_v0  ;;  %v1157_v18 = vld [vmem:[%s17118_s1 + $0x88] sm:$0xff] }
 0x145   : > { %v1126_v52 = vmax.f32 %v17141_v3, %v1108_v39  ;;  %v938_v36 = vadd.f32 %v13723_v53, %v937_v58  ;;  %12432 = vmatpush1.bf16.msra.mxu1 %v12431_v10  ;;  %v1141_v53 = vld [vmem:[%s17118_s1 + $0x8] sm:$0xff]  ;;  %v1369_v48 = vunpack.c.h.bf16 %v1154_v63  ;;  %v1368_v5 = vunpack.c.l.bf16 %v1154_v63  ;;  %v1156_v10 = vld [vmem:[%s17118_s1 + $0x80] sm:$0xff]  ;;  %v1158_v58 = vld [vmem:[%s17118_s1 + $0x90] sm:$0xff] }
 0x146   : > { %v1111_v51 = vmax.f32 %v943_v17, %v1033_v49  ;;  %12433 = vmatprep.subr.bf16.mxu1 %v17139_v7  ;;  %v1343_v13 = vunpack.c.h.bf16 %v1141_v53  ;;  %v1342_v6 = vunpack.c.l.bf16 %v1141_v53  ;;  %v1155_v49 = vld [vmem:[%s17118_s1 + $0x78] sm:$0xff]  ;;  %v1373_v27 = vunpack.c.h.bf16 %v1156_v10  ;;  %v1162_v53 = vld [vmem:[%s17118_s1 + $0xb0] sm:$0xff]  ;;  %v10648_v60 = vld [vmem:[%s17121_s4 + $0x28] sm:$0xf] }
 0x147   : > { %v12434_v54 = vpack.c.bf16 %v1127_v14, %v1126_v52  ;;  %v1110_v23 = vmax.f32 %v938_v36, %v1028_v8  ;;  %v1371_v8 = vunpack.c.h.bf16 %v1155_v49  ;;  %v1370_v39 = vunpack.c.l.bf16 %v1155_v49  ;;  %v1159_v36 = vld [vmem:[%s17118_s1 + $0x98] sm:$0xff] }
 0x148   : > { %v1129_v56 = vmax.f32 %v17142_v30, %v1111_v51  ;;  %v1372_v14 = vunpack.c.l.bf16 %v1156_v10  ;;  %v1375_v17 = vunpack.c.h.bf16 %v1157_v18  ;;  %v1374_v3 = vunpack.c.l.bf16 %v1157_v18 }
 0x149   : > { %v1128_v34 = vmax.f32 %v17143_v61, %v1110_v23  ;;  %12435 = vmatpush1.bf16.msra.mxu1 %v12434_v54  ;;  %v1377_v52 = vunpack.c.h.bf16 %v1158_v58  ;;  %v1376_v51 = vunpack.c.l.bf16 %v1158_v58  ;;  %v1379_v54 = vunpack.c.h.bf16 %v1159_v36  ;;  %v1160_v23 = vld [vmem:[%s17118_s1 + $0xa0] sm:$0xff]  ;;  %v1161_v61 = vld [vmem:[%s17118_s1 + $0xa8] sm:$0xff] }
 0x14a   : > { %12436 = vmatprep.subr.bf16.mxu1 %v17139_v7  ;;  %v1378_v30 = vunpack.c.l.bf16 %v1159_v36  ;;  %v1398_v20 = vunpack.c.l.bf16 %v1169_v31  ;;  %v3407_v58 = vld [vmem:[%s17121_s4 + $0x8] sm:$0xff] }
 0x14b   : > { %v12437_v11 = vpack.c.bf16 %v1129_v56, %v1128_v34  ;;  %v1381_v56 = vunpack.c.h.bf16 %v1160_v23  ;;  %v1380_v34 = vunpack.c.l.bf16 %v1160_v23 }
 0x14d   : > { %12438 = vmatpush1.bf16.msra.mxu1 %v12437_v11  ;;  %v1383_v11 = vunpack.c.h.bf16 %v1161_v61 }
 0x14e   : > { %12439 = vmatprep.subr.bf16.mxu1 %v17139_v7 }
 0x151   : > { %12441 = vmatpush1.bf16.msra.mxu1 %v12440_v55  ;;  %v1144_v55 = vld [vmem:[%s17118_s1 + $0x20] sm:$0xff] }
 0x152   : > { %12442 = vmatprep.subr.bf16.mxu1 %v17139_v7  ;;  %v1349_v2 = vunpack.c.h.bf16 %v1144_v55  ;;  %v1348_v25 = vunpack.c.l.bf16 %v1144_v55  ;;  %v1165_v55 = vld [vmem:[%s17118_s1 + $0xc8] sm:$0xff] }
 0x155   : > { %12444 = vmatpush1.bf16.msra.mxu1 %v12443_v9  ;;  %v1145_v9 = vld [vmem:[%s17118_s1 + $0x28] sm:$0xff] }
 0x156   : > { %12445 = vmatprep.subr.bf16.mxu1 %v17139_v7  ;;  %v1351_v28 = vunpack.c.h.bf16 %v1145_v9 }
 0x159   : > { %12447 = vmatpush1.bf16.msra.mxu1 %v12446_v33  ;;  %v1146_v33 = vld [vmem:[%s17118_s1 + $0x30] sm:$0xff] }
 0x15a   : > { %12448 = vmatprep.subr.bf16.mxu1 %v17139_v7  ;;  %v1353_v40 = vunpack.c.h.bf16 %v1146_v33 }
 0x15d   : > { %12450 = vmatpush1.bf16.msra.mxu1 %v12449_v50  ;;  %v1350_v50 = vunpack.c.l.bf16 %v1145_v9  ;;  %v1166_v9 = vld [vmem:[%s17118_s1 + $0xd0] sm:$0xff] }
 0x15e   : > { %12451 = vmatprep.subr.bf16.mxu1 %v17139_v7 }
 0x161   : > { %12453 = vmatpush1.bf16.msra.mxu1 %v12452_v41  ;;  %v1352_v41 = vunpack.c.l.bf16 %v1146_v33  ;;  %v1167_v33 = vld [vmem:[%s17118_s1 + $0xd8] sm:$0xff] }
 0x164   : > { %2406 = vmatmul.mubr.f32.vlgmr.msra.gmra.mrb[28].mxu1 %v1340_v4  ;;  %v1382_v4 = vunpack.c.l.bf16 %v1161_v61 }
 0x165   : > { %10447 = vmatprep.mubr.msk.f32.mxu1 %vm1740_vm4, %v1343_v13  ;;  %v1385_v13 = vunpack.c.h.bf16 %v1162_v53 }
 0x168   : > { %2411 = vmatmul.mubr.f32.gmra.mrb[30].mxu1 %v1342_v6  ;;  %v1384_v6 = vunpack.c.l.bf16 %v1162_v53 }
 0x169   : > { %10448 = vmatprep.mubr.msk.f32.mxu1 %vm1740_vm4, %v1345_v22  ;;  %v1387_v22 = vunpack.c.h.bf16 %v1163_v24 }
 0x16c   : > { %2416 = vmatmul.mubr.f32.gmra.mrb[32].mxu1 %v1344_v15  ;;  %v1386_v15 = vunpack.c.l.bf16 %v1163_v24 }
 0x16d   : > { %10449 = vmatprep.mubr.msk.f32.mxu1 %vm1740_vm4, %v1347_v16  ;;  %v1389_v16 = vunpack.c.h.bf16 %v1164_v1 }
 0x170   : > { %2421 = vmatmul.mubr.f32.gmra.mrb[34].mxu1 %v1346_v32  ;;  %v1388_v32 = vunpack.c.l.bf16 %v1164_v1 }
 0x171   : > { %10450 = vmatprep.mubr.msk.f32.mxu1 %vm1740_vm4, %v1349_v2  ;;  %v1391_v2 = vunpack.c.h.bf16 %v1165_v55 }
 0x174   : > { %2426 = vmatmul.mubr.f32.gmra.mrb[36].mxu1 %v1348_v25  ;;  %v1390_v25 = vunpack.c.l.bf16 %v1165_v55 }
 0x175   : > { %10451 = vmatprep.mubr.msk.f32.mxu1 %vm1740_vm4, %v1351_v28  ;;  %v1393_v28 = vunpack.c.h.bf16 %v1166_v9 }
 0x178   : > { %2431 = vmatmul.mubr.f32.gmra.mrb[38].mxu1 %v1350_v50  ;;  %v1392_v50 = vunpack.c.l.bf16 %v1166_v9 }
 0x179   : > { %10452 = vmatprep.mubr.msk.f32.mxu1 %vm1740_vm4, %v1353_v40  ;;  %v1395_v40 = vunpack.c.h.bf16 %v1167_v33 }
 0x17c   : > { %2436 = vmatmul.mubr.f32.gmra.mrb[40].mxu1 %v1352_v41  ;;  %v1394_v41 = vunpack.c.l.bf16 %v1167_v33 }
 0x17d   : > { %10453 = vmatprep.mubr.msk.f32.mxu1 %vm1740_vm4, %v1355_v37  ;;  %v1397_v37 = vunpack.c.h.bf16 %v1168_v42 }
 0x180   : > { %2441 = vmatmul.mubr.f32.gmra.mrb[42].mxu1 %v1354_v43  ;;  %v1396_v43 = vunpack.c.l.bf16 %v1168_v42 }
 0x181   : > { %10454 = vmatprep.mubr.msk.f32.mxu1 %vm1740_vm4, %v1357_v12  ;;  %v1399_v12 = vunpack.c.h.bf16 %v1169_v31 }
 0x184   : > { %2446 = vmatmul.mubr.f32.gmra.mrb[44].mxu1 %v1356_v19  ;;  %v10646_v19 = vld [vmem:[%s17121_s4 + $0x18] sm:$0xff] }
 0x185   : > { %10455 = vmatprep.mubr.msk.f32.mxu1 %vm1740_vm4, %v1359_v26  ;;  %v10647_v26 = vld [vmem:[%s17121_s4 + $0x20] sm:$0xff] }
 0x188   : > { %2451 = vmatmul.mubr.f32.gmra.mrb[46].mxu1 %v1358_v44  ;;  %v12454_v44 = vpack.c.bf16 %v10647_v26, %v10646_v19  ;;  %v1189_v19 = vld [vmem:[%s17118_s1 + $0x188] sm:$0xff] }
 0x189   : > { %10456 = vmatprep.mubr.msk.f32.mxu1 %vm1740_vm4, %v1361_v38  ;;  %v1401_v38 = vunpack.c.h.bf16 %v1170_v35 }
 0x18a   : > { %12455 = vmatprep.subr.bf16.mxu0 %v12454_v44 }
 0x18b   : > { %12457 = vmatpush3.bf16.msra.mxu0 %v12454_v44  ;;  %v1190_v44 = vld [vmem:[%s17118_s1 + $0x190] sm:$0xff] }
 0x18c   : > { %2456 = vmatmul.mubr.f32.gmra.mrb[48].mxu1 %v1360_v46  ;;  %v1400_v46 = vunpack.c.l.bf16 %v1170_v35  ;;  %11971 = vmatprep.subr.msk.mxu0 %vm3438_vm5, %v10648_v60 }
 0x18d   : > { %10457 = vmatprep.mubr.msk.f32.mxu1 %vm1740_vm4, %v1363_v21  ;;  %v1403_v21 = vunpack.c.h.bf16 %v1171_v45 }
 0x18f   : > { %11972 = vmatpush3.msk.msra.mxu0 %vm3438_vm5, %v10648_v60 }
 0x190   : > { %2461 = vmatmul.mubr.f32.gmra.mrb[50].mxu1 %v1362_v57  ;;  %v1172_v57 = vld [vmem:[%s17118_s1 + $0x100] sm:$0xff] }
 0x191   : > { %10458 = vmatprep.mubr.msk.f32.mxu1 %vm1740_vm4, %v1365_v59  ;;  %v1402_v59 = vunpack.c.l.bf16 %v1171_v45  ;;  %v1405_v0 = vunpack.c.h.bf16 %v1172_v57  ;;  %v1441_v45 = vunpack.c.h.bf16 %v1190_v44 }
 0x194   : > { %2466 = vmatmul.mubr.f32.gmra.mrb[52].mxu1 %v1364_v47  ;;  %v1173_v47 = vld [vmem:[%s17118_s1 + $0x108] sm:$0xff] }
 0x195   : > { %10459 = vmatprep.mubr.msk.f32.mxu1 %vm1740_vm4, %v1367_v62  ;;  %v1404_v62 = vunpack.c.l.bf16 %v1172_v57  ;;  %v1407_v63 = vunpack.c.h.bf16 %v1173_v47  ;;  %v1192_v57 = vld [vmem:[%s17118_s1 + $0x1a0] sm:$0xff] }
 0x198   : > { %2471 = vmatmul.mubr.f32.gmra.mrb[54].mxu1 %v1366_v29  ;;  %v1174_v29 = vld [vmem:[%s17118_s1 + $0x110] sm:$0xff] }
 0x199   : > { %10460 = vmatprep.mubr.msk.f32.mxu1 %vm1740_vm4, %v1369_v48  ;;  %v1406_v48 = vunpack.c.l.bf16 %v1173_v47  ;;  %v1409_v49 = vunpack.c.h.bf16 %v1174_v29  ;;  %v1193_v47 = vld [vmem:[%s17118_s1 + $0x1a8] sm:$0xff] }
 0x19c   : > { %2476 = vmatmul.mubr.f32.gmra.mrb[56].mxu1 %v1368_v5  ;;  %v1175_v5 = vld [vmem:[%s17118_s1 + $0x118] sm:$0xff] }
 0x19d   : > { %10461 = vmatprep.mubr.msk.f32.mxu1 %vm1740_vm4, %v1371_v8  ;;  %v1408_v8 = vunpack.c.l.bf16 %v1174_v29  ;;  %v1411_v10 = vunpack.c.h.bf16 %v1175_v5  ;;  %v1194_v29 = vld [vmem:[%s17118_s1 + $0x1b0] sm:$0xff] }
 0x1a0   : > { %2481 = vmatmul.mubr.f32.gmra.mrb[58].mxu1 %v1370_v39  ;;  %v1176_v39 = vld [vmem:[%s17118_s1 + $0x120] sm:$0xff] }
 0x1a1   : > { %10462 = vmatprep.mubr.msk.f32.mxu1 %vm1740_vm4, %v1373_v27  ;;  %v1410_v27 = vunpack.c.l.bf16 %v1175_v5  ;;  %v1413_v18 = vunpack.c.h.bf16 %v1176_v39  ;;  %v1195_v5 = vld [vmem:[%s17118_s1 + $0x1b8] sm:$0xff] }
 0x1a4   : > { %2486 = vmatmul.mubr.f32.gmra.mrb[60].mxu1 %v1372_v14  ;;  %v1177_v14 = vld [vmem:[%s17118_s1 + $0x128] sm:$0xff] }
 0x1a5   : > { %10463 = vmatprep.mubr.msk.f32.mxu1 %vm1740_vm4, %v1375_v17  ;;  %v3406_v17 = vld [vmem:[%s17121_s4] sm:$0xff]  ;;  %v1415_v36 = vunpack.c.h.bf16 %v1177_v14 }
 0x1a8   : > { %2491 = vmatmul.mubr.f32.gmra.mrb[62].mxu1 %v1374_v3  ;;  %v1412_v3 = vunpack.c.l.bf16 %v1176_v39 }
 0x1a9   : > { %10464 = vmatprep.mubr.msk.f32.mxu1 %vm1740_vm4, %v1377_v52  ;;  %v14155_v52 = vpack.c.bf16 %v3407_v58, %v3406_v17  ;;  %v1450_v17 = vunpack.c.l.bf16 %v1195_v5 }
 0x1ab   : > { %12459 = vmatprep.subr.bf16.mxu0 %v14155_v52 }
 0x1ac   : > { %2496 = vmatmul.mubr.f32.gmra.mrb[64].mxu1 %v1376_v51  ;;  %v1178_v51 = vld [vmem:[%s17118_s1 + $0x130] sm:$0xff] }
 0x1ad   : > { %10465 = vmatprep.mubr.msk.f32.mxu1 %vm1740_vm4, %v1379_v54  ;;  %v1414_v54 = vunpack.c.l.bf16 %v1177_v14  ;;  %v1417_v23 = vunpack.c.h.bf16 %v1178_v51 }
 0x1b0   : > { %2501 = vmatmul.mubr.f32.gmra.mrb[66].mxu1 %v1378_v30  ;;  %v1179_v30 = vld [vmem:[%s17118_s1 + $0x138] sm:$0xff] }
 0x1b1   : > { %10466 = vmatprep.mubr.msk.f32.mxu1 %vm1740_vm4, %v1381_v56  ;;  %v1416_v56 = vunpack.c.l.bf16 %v1178_v51  ;;  %v1419_v61 = vunpack.c.h.bf16 %v1179_v30 }
 0x1b4   : > { %2506 = vmatmul.mubr.f32.gmra.mrb[68].mxu1 %v1380_v34  ;;  %v1180_v34 = vld [vmem:[%s17118_s1 + $0x140] sm:$0xff] }
 0x1b5   : > { %10467 = vmatprep.mubr.msk.f32.mxu1 %vm1740_vm4, %v1383_v11  ;;  %v1418_v11 = vunpack.c.l.bf16 %v1179_v30  ;;  %v1421_v53 = vunpack.c.h.bf16 %v1180_v34 }
 0x1b8   : > { %2511 = vmatmul.mubr.f32.gmra.mrb[70].mxu1 %v1382_v4  ;;  %v1181_v4 = vld [vmem:[%s17118_s1 + $0x148] sm:$0xff] }
 0x1b9   : > { %10468 = vmatprep.mubr.msk.f32.mxu1 %vm1740_vm4, %v1385_v13  ;;  %v1420_v13 = vunpack.c.l.bf16 %v1180_v34  ;;  %v1423_v24 = vunpack.c.h.bf16 %v1181_v4 }
 0x1bc   : > { %2516 = vmatmul.mubr.f32.gmra.mrb[72].mxu1 %v1384_v6  ;;  %v1182_v6 = vld [vmem:[%s17118_s1 + $0x150] sm:$0xff] }
 0x1bd   : > { %10469 = vmatprep.mubr.msk.f32.mxu1 %vm1740_vm4, %v1387_v22  ;;  %v1422_v22 = vunpack.c.l.bf16 %v1181_v4  ;;  %v1425_v1 = vunpack.c.h.bf16 %v1182_v6  ;;  %v1199_v4 = vld [vmem:[%s17118_s1 + $0x1d8] sm:$0xff] }
 0x1c0   : > { %2521 = vmatmul.mubr.f32.gmra.mrb[74].mxu1 %v1386_v15  ;;  %v1183_v15 = vld [vmem:[%s17118_s1 + $0x158] sm:$0xff] }
 0x1c1   : > { %10470 = vmatprep.mubr.msk.f32.mxu1 %vm1740_vm4, %v1389_v16  ;;  %v1424_v16 = vunpack.c.l.bf16 %v1182_v6  ;;  %v1427_v55 = vunpack.c.h.bf16 %v1183_v15 }
 0x1c4   : > { %2526 = vmatmul.mubr.f32.gmra.mrb[76].mxu1 %v1388_v32  ;;  %v1184_v32 = vld [vmem:[%s17118_s1 + $0x160] sm:$0xff] }
 0x1c5   : > { %10471 = vmatprep.mubr.msk.f32.mxu1 %vm1740_vm4, %v1391_v2  ;;  %v1426_v2 = vunpack.c.l.bf16 %v1183_v15  ;;  %v1429_v9 = vunpack.c.h.bf16 %v1184_v32 }
 0x1c8   : > { %2531 = vmatmul.mubr.f32.gmra.mrb[78].mxu1 %v1390_v25  ;;  %v1185_v25 = vld [vmem:[%s17118_s1 + $0x168] sm:$0xff] }
 0x1c9   : > { %10472 = vmatprep.mubr.msk.f32.mxu1 %vm1740_vm4, %v1393_v28  ;;  %v1428_v28 = vunpack.c.l.bf16 %v1184_v32  ;;  %v1431_v33 = vunpack.c.h.bf16 %v1185_v25 }
 0x1cc   : > { %2536 = vmatmul.mubr.f32.gmra.mrb[80].mxu1 %v1392_v50  ;;  %v1186_v50 = vld [vmem:[%s17118_s1 + $0x170] sm:$0xff] }
 0x1cd   : > { %10473 = vmatprep.mubr.msk.f32.mxu1 %vm1740_vm4, %v1395_v40  ;;  %v1430_v40 = vunpack.c.l.bf16 %v1185_v25  ;;  %v1433_v42 = vunpack.c.h.bf16 %v1186_v50 }
 0x1d0   : > { %2541 = vmatmul.mubr.f32.gmra.mrb[82].mxu1 %v1394_v41  ;;  %v1187_v41 = vld [vmem:[%s17118_s1 + $0x178] sm:$0xff] }
 0x1d1   : > { %10474 = vmatprep.mubr.msk.f32.mxu1 %vm1740_vm4, %v1397_v37  ;;  %v1432_v37 = vunpack.c.l.bf16 %v1186_v50  ;;  %v1435_v31 = vunpack.c.h.bf16 %v1187_v41  ;;  %v1202_v50 = vld [vmem:[%s17118_s1 + $0x1f0] sm:$0xff] }
 0x1d4   : > { %2546 = vmatmul.mubr.f32.gmra.mrb[84].mxu1 %v1396_v43  ;;  %v1188_v43 = vld [vmem:[%s17118_s1 + $0x180] sm:$0xff] }
 0x1d5   : > { %10475 = vmatprep.mubr.msk.f32.mxu1 %vm1740_vm4, %v1399_v12  ;;  %v1434_v12 = vunpack.c.l.bf16 %v1187_v41  ;;  %v1437_v35 = vunpack.c.h.bf16 %v1188_v43  ;;  %v1436_v26 = vunpack.c.l.bf16 %v1188_v43 }
 0x1d8   : > { %2551 = vmatmul.mubr.f32.gmra.mrb[86].mxu1 %v1398_v20  ;;  %v1439_v20 = vunpack.c.h.bf16 %v1189_v19 }
 0x1d9   : > { %10476 = vmatprep.mubr.msk.f32.mxu1 %vm1740_vm4, %v1401_v38  ;;  %v1438_v38 = vunpack.c.l.bf16 %v1189_v19 }
 0x1dc   : > { %2556 = vmatmul.mubr.f32.gmra.mrb[88].mxu1 %v1400_v46  ;;  %v1191_v46 = vld [vmem:[%s17118_s1 + $0x198] sm:$0xff] }
 0x1dd   : > { %10477 = vmatprep.mubr.msk.f32.mxu1 %vm1740_vm4, %v1403_v21  ;;  %v1440_v21 = vunpack.c.l.bf16 %v1190_v44  ;;  %v1443_v60 = vunpack.c.h.bf16 %v1191_v46  ;;  %v3408_v44 = vld [vmem:[%s17121_s4 + $0x10] sm:$0xf] }
 0x1e0   : > { %2561 = vmatmul.mubr.f32.gmra.mrb[90].mxu1 %v1402_v59  ;;  %v1442_v59 = vunpack.c.l.bf16 %v1191_v46 }
 0x1e1   : > { %10478 = vmatprep.mubr.msk.f32.mxu1 %vm1740_vm4, %v1405_v0  ;;  %v1445_v0 = vunpack.c.h.bf16 %v1192_v57 }
 0x1e4   : > { %2566 = vmatmul.mubr.f32.gmra.mrb[92].mxu1 %v1404_v62  ;;  %v1444_v62 = vunpack.c.l.bf16 %v1192_v57  ;;  %v1205_v57 = vld [vmem:[%s17118_s1 + $0x208] sm:$0xff] }
 0x1e5   : > { %10479 = vmatprep.mubr.msk.f32.mxu1 %vm1740_vm4, %v1407_v63  ;;  %v1447_v63 = vunpack.c.h.bf16 %v1193_v47 }
 0x1e8   : > { %2571 = vmatmul.mubr.f32.gmra.mrb[94].mxu1 %v1406_v48  ;;  %v1446_v48 = vunpack.c.l.bf16 %v1193_v47 }
 0x1e9   : > { %10480 = vmatprep.mubr.msk.f32.mxu1 %vm1740_vm4, %v1409_v49  ;;  %v1449_v49 = vunpack.c.h.bf16 %v1194_v29 }
 0x1ec   : > { %2576 = vmatmul.mubr.f32.gmra.mrb[96].mxu1 %v1408_v8 }
 0x1ed   : > { %10481 = vmatprep.mubr.msk.f32.mxu1 %vm1740_vm4, %v1411_v10  ;;  %v1448_v10 = vunpack.c.l.bf16 %v1194_v29 }
 0x1f0   : > { %2581 = vmatmul.mubr.f32.gmra.mrb[98].mxu1 %v1410_v27  ;;  %v1451_v27 = vunpack.c.h.bf16 %v1195_v5 }
 0x1f1   : > { %10482 = vmatprep.mubr.msk.f32.mxu1 %vm1740_vm4, %v1413_v18  ;;  %v1196_v18 = vld [vmem:[%s17118_s1 + $0x1c0] sm:$0xff] }
 0x1f4   : > { %2586 = vmatmul.mubr.f32.gmra.mrb[100].mxu1 %v1412_v3  ;;  %v1453_v3 = vunpack.c.h.bf16 %v1196_v18 }
 0x1f5   : > { %10483 = vmatprep.mubr.msk.f32.mxu1 %vm1740_vm4, %v1415_v36  ;;  %v1197_v36 = vld [vmem:[%s17118_s1 + $0x1c8] sm:$0xff] }
 0x1f6   : > { %v1455_v30 = vunpack.c.h.bf16 %v1197_v36  ;;  %v1454_v34 = vunpack.c.l.bf16 %v1197_v36 }
 0x1f8   : > { %2591 = vmatmul.mubr.f32.gmra.mrb[102].mxu1 %v1414_v54  ;;  %v1452_v54 = vunpack.c.l.bf16 %v1196_v18 }
 0x1f9   : > { %10484 = vmatprep.mubr.msk.f32.mxu1 %vm1740_vm4, %v1417_v23 }
 0x1fc   : > { %2596 = vmatmul.mubr.f32.gmra.mrb[104].mxu1 %v1416_v56  ;;  %v1198_v56 = vld [vmem:[%s17118_s1 + $0x1d0] sm:$0xff] }
 0x1fd   : > { %10485 = vmatprep.mubr.msk.f32.mxu1 %vm1740_vm4, %v1419_v61 }
 0x200   : > { %2601 = vmatmul.mubr.f32.gmra.mrb[106].mxu1 %v1418_v11 }
 0x201   : > { %10486 = vmatprep.mubr.msk.f32.mxu1 %vm1740_vm4, %v1421_v53  ;;  %v1457_v53 = vunpack.c.h.bf16 %v1198_v56 }
 0x204   : > { %2606 = vmatmul.mubr.f32.gmra.mrb[108].mxu1 %v1420_v13 }
 0x205   : > { %10487 = vmatprep.mubr.msk.f32.mxu1 %vm1740_vm4, %v1423_v24  ;;  %v1456_v24 = vunpack.c.l.bf16 %v1198_v56 }
 0x208   : > { %2611 = vmatmul.mubr.f32.gmra.mrb[110].mxu1 %v1422_v22  ;;  %v1459_v22 = vunpack.c.h.bf16 %v1199_v4 }
 0x209   : > { %10488 = vmatprep.mubr.msk.f32.mxu1 %vm1740_vm4, %v1425_v1  ;;  %v1200_v1 = vld [vmem:[%s17118_s1 + $0x1e0] sm:$0xff] }
 0x20a   : > { %v1461_v32 = vunpack.c.h.bf16 %v1200_v1  ;;  %v1460_v25 = vunpack.c.l.bf16 %v1200_v1 }
 0x20c   : > { %2616 = vmatmul.mubr.f32.gmra.mrb[112].mxu1 %v1424_v16  ;;  %v1458_v16 = vunpack.c.l.bf16 %v1199_v4  ;;  %v1210_v4 = vld [vmem:[%s17118_s1 + $0x230] sm:$0xff] }
 0x20d   : > { %10489 = vmatprep.mubr.msk.f32.mxu1 %vm1740_vm4, %v1427_v55  ;;  %v1481_v1 = vunpack.c.h.bf16 %v1210_v4 }
 0x210   : > { %2621 = vmatmul.mubr.f32.gmra.mrb[114].mxu1 %v1426_v2  ;;  %v1201_v2 = vld [vmem:[%s17118_s1 + $0x1e8] sm:$0xff] }
 0x211   : > { %10490 = vmatprep.mubr.msk.f32.mxu1 %vm1740_vm4, %v1429_v9 }
 0x214   : > { %2626 = vmatmul.mubr.f32.gmra.mrb[116].mxu1 %v1428_v28 }
 0x215   : > { %10491 = vmatprep.mubr.msk.f32.mxu1 %vm1740_vm4, %v1431_v33  ;;  %v1463_v33 = vunpack.c.h.bf16 %v1201_v2 }
 0x218   : > { %2631 = vmatmul.mubr.f32.gmra.mrb[118].mxu1 %v1430_v40 }
 0x219   : > { %10492 = vmatprep.mubr.msk.f32.mxu1 %vm1740_vm4, %v1433_v42  ;;  %v1462_v42 = vunpack.c.l.bf16 %v1201_v2 }
 0x21c   : > { %2636 = vmatmul.mubr.f32.gmra.mrb[120].mxu1 %v1432_v37  ;;  %v1465_v37 = vunpack.c.h.bf16 %v1202_v50 }
 0x21d   : > { %10493 = vmatprep.mubr.msk.f32.mxu1 %vm1740_vm4, %v1435_v31  ;;  %v1203_v31 = vld [vmem:[%s17118_s1 + $0x1f8] sm:$0xff] }
 0x21e   : > { %v1467_v19 = vunpack.c.h.bf16 %v1203_v31  ;;  %v1466_v46 = vunpack.c.l.bf16 %v1203_v31  ;;  %v1213_v31 = vld [vmem:[%s17118_s1 + $0x248] sm:$0xff] }
 0x220   : > { %2641 = vmatmul.mubr.f32.gmra.mrb[122].mxu1 %v1434_v12  ;;  %v1464_v12 = vunpack.c.l.bf16 %v1202_v50 }
 0x221   : > { %10494 = vmatprep.mubr.msk.f32.mxu1 %vm1740_vm4, %v1437_v35 }
 0x224   : > { %2646 = vmatmul.mubr.f32.gmra.mrb[124].mxu1 %v1436_v26  ;;  %v1204_v26 = vld [vmem:[%s17118_s1 + $0x200] sm:$0xff] }
 0x225   : > { %10495 = vmatprep.mubr.msk.f32.mxu1 %vm1740_vm4, %v1439_v20  ;;  %v1468_v47 = vunpack.c.l.bf16 %v1204_v26 }
 0x228   : > { %2651 = vmatmul.mubr.f32.gmra.mrb[126].mxu1 %v1438_v38  ;;  %v10667_v38 = vld [vmem:[%s17121_s4 + $0x30] sm:$0xff] }
 0x229   : > { %10496 = vmatprep.mubr.msk.f32.mxu1 %vm1740_vm4, %v1441_v45  ;;  %v10668_v45 = vld [vmem:[%s17121_s4 + $0x38] sm:$0xff] }
 0x22c   : > { %2656 = vmatmul.mubr.f32.gmra.mrb[128].mxu1 %v1440_v21 }
 0x22d   : > { %10497 = vmatprep.mubr.msk.f32.mxu1 %vm1740_vm4, %v1443_v60  ;;  %v1469_v60 = vunpack.c.h.bf16 %v1204_v26  ;;  %v1486_v26 = vunpack.c.l.bf16 %v1213_v31 }
 0x230   : > { %2661 = vmatmul.mubr.f32.gmra.mrb[130].mxu1 %v1442_v59  ;;  %v14299_v59 = vpack.c.bf16 %v10668_v45, %v10667_v38 }
 0x231   : > { %10498 = vmatprep.mubr.msk.f32.mxu1 %vm1740_vm4, %v1445_v0 }
 0x234   : > { %2666 = vmatmul.mubr.f32.gmra.mrb[132].mxu1 %v1444_v62 }
 0x235   : > { %10499 = vmatprep.mubr.msk.f32.mxu1 %vm1740_vm4, %v1447_v63  ;;  %v1471_v63 = vunpack.c.h.bf16 %v1205_v57 }
 0x237   : > { %v14230_v8 = vpop.f32.mrb[28].mxu1 }
 0x238   : > { %2671 = vmatmul.mubr.f32.gmra.mrb[134].mxu1 %v1446_v48  ;;  %v2409_v39 = vpop.f32.mrb[29].mxu1  ;;  %v1470_v48 = vunpack.c.l.bf16 %v1205_v57  ;;  %v1216_v57 = vld [vmem:[%s17118_s1 + $0x260] sm:$0xff] }
 0x239   : > { %10500 = vmatprep.mubr.msk.f32.mxu1 %vm1740_vm4, %v1449_v49 }
 0x23b   : > { %v14236_v14 = vpop.f32.mrb[30].mxu1 }
 0x23c   : > { %2676 = vmatmul.mubr.f32.gmra.mrb[136].mxu1 %v1448_v10  ;;  %v2414_v58 = vpop.f32.mrb[31].mxu1  ;;  %v1207_v10 = vld [vmem:[%s17118_s1 + $0x218] sm:$0xff] }
 0x23d   : > { %10501 = vmatprep.mubr.msk.f32.mxu1 %vm1740_vm4, %v1451_v27  ;;  %v1208_v58 = vld [vmem:[%s17118_s1 + $0x220] sm:$0xff] }
 0x23f   : > { %v14242_v51 = vpop.f32.mrb[32].mxu1 }
 0x240   : > { %2681 = vmatmul.mubr.f32.gmra.mrb[138].mxu1 %v1450_v17  ;;  %v2419_v23 = vpop.f32.mrb[33].mxu1  ;;  %v1475_v17 = vunpack.c.h.bf16 %v1207_v10 }
 0x241   : > { %10502 = vmatprep.mubr.msk.f32.mxu1 %vm1740_vm4, %v1453_v3  ;;  %v1477_v23 = vunpack.c.h.bf16 %v1208_v58 }
 0x243   : > { %v14248_v61 = vpop.f32.mrb[34].mxu1 }
 0x244   : > { %2686 = vmatmul.mubr.f32.gmra.mrb[140].mxu1 %v1452_v54  ;;  %v2424_v11 = vpop.f32.mrb[35].mxu1  ;;  %v1474_v54 = vunpack.c.l.bf16 %v1207_v10  ;;  %v1218_v10 = vld [vmem:[%s17118_s1 + $0x270] sm:$0xff] }
 0x245   : > { %10503 = vmatprep.mubr.msk.f32.mxu1 %vm1740_vm4, %v1455_v30  ;;  %v1209_v30 = vld [vmem:[%s17118_s1 + $0x228] sm:$0xff]  ;;  %v1476_v11 = vunpack.c.l.bf16 %v1208_v58  ;;  %v1219_v58 = vld [vmem:[%s17118_s1 + $0x278] sm:$0xff] }
 0x247   : > { %v14254_v13 = vpop.f32.mrb[36].mxu1 }
 0x248   : > { %2691 = vmatmul.mubr.f32.gmra.mrb[142].mxu1 %v1454_v34  ;;  %v2429_v6 = vpop.f32.mrb[37].mxu1 }
 0x249   : > { %10504 = vmatprep.mubr.msk.f32.mxu1 %vm1740_vm4, %v1457_v53  ;;  %v1479_v53 = vunpack.c.h.bf16 %v1209_v30  ;;  %v1478_v6 = vunpack.c.l.bf16 %v1209_v30  ;;  %v1220_v30 = vld [vmem:[%s17118_s1 + $0x280] sm:$0xff] }
 0x24b   : > { %v14260_v15 = vpop.f32.mrb[38].mxu1 }
 0x24c   : > { %2696 = vmatmul.mubr.f32.gmra.mrb[144].mxu1 %v1456_v24  ;;  %v2434_v55 = vpop.f32.mrb[39].mxu1 }
 0x24d   : > { %10505 = vmatprep.mubr.msk.f32.mxu1 %vm1740_vm4, %v1459_v22 }
 0x24f   : > { %v14266_v9 = vpop.f32.mrb[40].mxu1 }
 0x250   : > { %2701 = vmatmul.mubr.f32.gmra.mrb[146].mxu1 %v1458_v16  ;;  %v2439_v28 = vpop.f32.mrb[41].mxu1  ;;  %v1211_v16 = vld [vmem:[%s17118_s1 + $0x238] sm:$0xff] }
 0x251   : > { %10506 = vmatprep.mubr.msk.f32.mxu1 %vm1740_vm4, %v1461_v32  ;;  %v1480_v32 = vunpack.c.l.bf16 %v1210_v4  ;;  %v10680_v28 = vld [vmem:[%s17121_s4 + $0x50] sm:$0xff]  ;;  %v1498_v4 = vunpack.c.l.bf16 %v1219_v58 }
 0x253   : > { %v14272_v40 = vpop.f32.mrb[42].mxu1 }
 0x254   : > { %2706 = vmatmul.mubr.f32.gmra.mrb[148].mxu1 %v1460_v25  ;;  %v2444_v41 = vpop.f32.mrb[43].mxu1  ;;  %v10669_v25 = vld [vmem:[%s17121_s4 + $0x40] sm:$0xf] }
 0x255   : > { %10507 = vmatprep.mubr.msk.f32.mxu1 %vm1740_vm4, %v1463_v33  ;;  %v1212_v33 = vld [vmem:[%s17118_s1 + $0x240] sm:$0xff]  ;;  %v1482_v41 = vunpack.c.l.bf16 %v1211_v16 }
 0x257   : > { %v2447_v43 = vpop.f32.mrb[44].mxu1 }
 0x258   : > { %2711 = vmatmul.mubr.f32.gmra.mrb[150].mxu1 %v1462_v42  ;;  %v2449_v35 = vpop.f32.mrb[45].mxu1  ;;  %11973 = vmatprep.mubr.msk.f32.mxu0 %vm3413_vm6, %v2447_v43 }
 0x259   : > { %10508 = vmatprep.mubr.msk.f32.mxu1 %vm1740_vm4, %v1465_v37  ;;  %v1214_v35 = vld [vmem:[%s17118_s1 + $0x250] sm:$0xff] }
 0x25a   : > { %v1488_v38 = vunpack.c.l.bf16 %v1214_v35 }
 0x25b   : > { %v2452_v20 = vpop.f32.mrb[46].mxu1 }
 0x25c   : > { %2716 = vmatmul.mubr.f32.gmra.mrb[152].mxu1 %v1464_v12  ;;  %v2454_v21 = vpop.f32.mrb[47].mxu1  ;;  %11974 = vmatmul.mubr.msk.f32.vlgmr.msra.gmra.mrb[44].mxu0 %vm3413_vm6, %v2452_v20 }
 0x25d   : > { %10509 = vmatprep.mubr.msk.f32.mxu1 %vm1740_vm4, %v1467_v19  ;;  %12461 = vmatpush3.bf16.msra.mxu0 %v14155_v52  ;;  %v1206_v52 = vld [vmem:[%s17118_s1 + $0x210] sm:$0xff]  ;;  %v10692_v21 = vld [vmem:[%s17121_s4 + $0x68] sm:$0xff] }
 0x25e   : > { %11989 = vmatprep.subr.msk.mxu0 %vm3438_vm5, %v3408_v44  ;;  %v1473_v5 = vunpack.c.h.bf16 %v1206_v52  ;;  %v1472_v27 = vunpack.c.l.bf16 %v1206_v52  ;;  %v1217_v52 = vld [vmem:[%s17118_s1 + $0x268] sm:$0xff] }
 0x25f   : > { %v2457_v0 = vpop.f32.mrb[48].mxu1 }
 0x260   : > { %2721 = vmatmul.mubr.f32.gmra.mrb[154].mxu1 %v1466_v46  ;;  %v2459_v62 = vpop.f32.mrb[49].mxu1  ;;  %11976 = vmatprep.mubr.msk.f32.mxu0 %vm3413_vm6, %v2457_v0  ;;  %v10691_v46 = vld [vmem:[%s17121_s4 + $0x60] sm:$0xff] }
 0x261   : > { %10510 = vmatprep.mubr.msk.f32.mxu1 %vm1740_vm4, %v1469_v60  ;;  %11990 = vmatpush3.msk.msra.mxu0 %vm3438_vm5, %v3408_v44  ;;  %v12470_v0 = vpack.c.bf16 %v10692_v21, %v10691_v46  ;;  %v1227_v46 = vld [vmem:[%s17118_s1 + $0x2b8] sm:$0xff] }
 0x262   : > { %12463 = vmatprep.subr.bf16.mxu0 %v14299_v59 }
 0x263   : > { %v2462_v29 = vpop.f32.mrb[50].mxu1 }
 0x264   : > { %2726 = vmatmul.mubr.f32.gmra.mrb[156].mxu1 %v1468_v47  ;;  %v2464_v49 = vpop.f32.mrb[51].mxu1  ;;  %11977 = vmatmul.mubr.msk.f32.gmra.mrb[46].mxu0 %vm3413_vm6, %v2462_v29 }
 0x265   : > { %10511 = vmatprep.mubr.msk.f32.mxu1 %vm1740_vm4, %v1471_v63  ;;  %v1493_v63 = vunpack.c.h.bf16 %v1216_v57 }
 0x267   : > { %v2467_v39 = vpop.f32.mrb[52].mxu1 }
 0x268   : > { %2731 = vmatmul.mubr.f32.gmra.mrb[158].mxu1 %v1470_v48  ;;  %v2469_v18 = vpop.f32.mrb[53].mxu1  ;;  %11979 = vmatprep.mubr.msk.f32.mxu0 %vm3413_vm6, %v2467_v39  ;;  %v1492_v48 = vunpack.c.l.bf16 %v1216_v57 }
 0x269   : > { %10512 = vmatprep.mubr.msk.f32.mxu1 %vm1740_vm4, %v1473_v5  ;;  %v1495_v5 = vunpack.c.h.bf16 %v1217_v52 }
 0x26b   : > { %v2472_v3 = vpop.f32.mrb[54].mxu1 }
 0x26c   : > { %2736 = vmatmul.mubr.f32.gmra.mrb[160].mxu1 %v1472_v27  ;;  %v2474_v36 = vpop.f32.mrb[55].mxu1  ;;  %11980 = vmatmul.mubr.msk.f32.gmra.mrb[48].mxu0 %vm3413_vm6, %v2472_v3  ;;  %v1494_v27 = vunpack.c.l.bf16 %v1217_v52  ;;  %v10716_v52 = vld [vmem:[%s17121_s4 + $0x98] sm:$0xff] }
 0x26d   : > { %10513 = vmatprep.mubr.msk.f32.mxu1 %vm1740_vm4, %v1475_v17  ;;  %v1497_v17 = vunpack.c.h.bf16 %v1218_v10  ;;  %v1496_v36 = vunpack.c.l.bf16 %v1218_v10 }
 0x26f   : > { %v2477_v56 = vpop.f32.mrb[56].mxu1 }
 0x270   : > { %2741 = vmatmul.mubr.f32.gmra.mrb[162].mxu1 %v1474_v54  ;;  %v2479_v34 = vpop.f32.mrb[57].mxu1  ;;  %11982 = vmatprep.mubr.msk.f32.mxu0 %vm3413_vm6, %v2477_v56 }
 0x271   : > { %10514 = vmatprep.mubr.msk.f32.mxu1 %vm1740_vm4, %v1477_v23  ;;  %v1499_v23 = vunpack.c.h.bf16 %v1219_v58  ;;  %v10693_v34 = vld [vmem:[%s17121_s4 + $0x70] sm:$0xf] }
 0x272   : > { %v1230_v58 = vld [vmem:[%s17118_s1 + $0x2d0] sm:$0xff] }
 0x273   : > { %v2482_v24 = vpop.f32.mrb[58].mxu1 }
 0x274   : > { %2746 = vmatmul.mubr.f32.gmra.mrb[164].mxu1 %v1476_v11  ;;  %11983 = vmatmul.mubr.msk.f32.gmra.mrb[50].mxu0 %vm3413_vm6, %v2482_v24  ;;  %v2484_v22 = vpop.f32.mrb[59].mxu1  ;;  %v10703_v11 = vld [vmem:[%s17121_s4 + $0x78] sm:$0xff] }
 0x275   : > { %11991 = vmatprep.mubr.msk.f32.mxu0 %vm3413_vm6, %v14230_v8  ;;  %10515 = vmatprep.mubr.msk.f32.mxu1 %vm1740_vm4, %v1479_v53  ;;  %v10679_v8 = vld [vmem:[%s17121_s4 + $0x48] sm:$0xff]  ;;  %v10704_v53 = vld [vmem:[%s17121_s4 + $0x80] sm:$0xff] }
 0x276   : > { %v12466_v42 = vpack.c.bf16 %v10680_v28, %v10679_v8  ;;  %v1221_v22 = vld [vmem:[%s17118_s1 + $0x288] sm:$0xff] }
 0x277   : > { %v2487_v55 = vpop.f32.mrb[60].mxu1  ;;  %v1502_v28 = vunpack.c.l.bf16 %v1221_v22 }
 0x278   : > { %2751 = vmatmul.mubr.f32.gmra.mrb[166].mxu1 %v1478_v6  ;;  %11992 = vmatmul.mubr.msk.f32.vlgmr.msra.gmra.mrb[44].mxu0 %vm3413_vm6, %v14236_v14  ;;  %v2489_v2 = vpop.f32.mrb[61].mxu1  ;;  %v1483_v14 = vunpack.c.h.bf16 %v1211_v16  ;;  %v1501_v6 = vunpack.c.h.bf16 %v1220_v30 }
 0x279   : > { %11994 = vmatprep.mubr.msk.f32.mxu0 %vm3413_vm6, %v14242_v51  ;;  %10516 = vmatprep.mubr.msk.f32.mxu1 %vm1740_vm4, %v1481_v1  ;;  %v1485_v51 = vunpack.c.h.bf16 %v1212_v33  ;;  %v14432_v1 = vpack.c.bf16 %v10704_v53, %v10703_v11  ;;  %v1503_v2 = vunpack.c.h.bf16 %v1221_v22 }
 0x27a   : > { %12465 = vmatpush3.bf16.msra.mxu0 %v14299_v59 }
 0x27b   : > { %v2492_v50 = vpop.f32.mrb[62].mxu1  ;;  %12007 = vmatprep.subr.msk.mxu0 %vm3438_vm5, %v10669_v25 }
 0x27c   : > { %2756 = vmatmul.mubr.f32.gmra.mrb[168].mxu1 %v1480_v32  ;;  %11995 = vmatmul.mubr.msk.f32.gmra.mrb[46].mxu0 %vm3413_vm6, %v14248_v61  ;;  %v2494_v37 = vpop.f32.mrb[63].mxu1  ;;  %v1484_v61 = vunpack.c.l.bf16 %v1212_v33 }
 0x27d   : > { %11997 = vmatprep.mubr.msk.f32.mxu0 %vm3413_vm6, %v14254_v13  ;;  %10517 = vmatprep.mubr.msk.f32.mxu1 %vm1740_vm4, %v1483_v14  ;;  %v1487_v13 = vunpack.c.h.bf16 %v1213_v31  ;;  %v1224_v31 = vld [vmem:[%s17118_s1 + $0x2a0] sm:$0xff] }
 0x27e   : > { %12008 = vmatpush3.msk.msra.mxu0 %vm3438_vm5, %v10669_v25  ;;  %v1222_v25 = vld [vmem:[%s17118_s1 + $0x290] sm:$0xff] }
 0x27f   : > { %v2497_v43 = vpop.f32.mrb[64].mxu1  ;;  %12467 = vmatprep.subr.bf16.mxu0 %v12466_v42  ;;  %v1505_v33 = vunpack.c.h.bf16 %v1222_v25 }
 0x280   : > { %2761 = vmatmul.mubr.f32.gmra.mrb[170].mxu1 %v1482_v41  ;;  %11998 = vmatmul.mubr.msk.f32.gmra.mrb[48].mxu0 %vm3413_vm6, %v14260_v15  ;;  %v2499_v12 = vpop.f32.mrb[65].mxu1  ;;  %v1489_v15 = vunpack.c.h.bf16 %v1214_v35  ;;  %v1504_v41 = vunpack.c.l.bf16 %v1222_v25  ;;  %v1225_v35 = vld [vmem:[%s17118_s1 + $0x2a8] sm:$0xff] }
 0x281   : > { %12000 = vmatprep.mubr.msk.f32.mxu0 %vm3413_vm6, %v14266_v9  ;;  %10518 = vmatprep.mubr.msk.f32.mxu1 %vm1740_vm4, %v1485_v51  ;;  %v1215_v9 = vld [vmem:[%s17118_s1 + $0x258] sm:$0xff] }
 0x282   : > { %v1491_v60 = vunpack.c.h.bf16 %v1215_v9  ;;  %v1490_v47 = vunpack.c.l.bf16 %v1215_v9  ;;  %v1226_v9 = vld [vmem:[%s17118_s1 + $0x2b0] sm:$0xff] }
 0x283   : > { %v2502_v19 = vpop.f32.mrb[66].mxu1 }
 0x284   : > { %2766 = vmatmul.mubr.f32.gmra.mrb[172].mxu1 %v1484_v61  ;;  %12001 = vmatmul.mubr.msk.f32.gmra.mrb[50].mxu0 %vm3413_vm6, %v14272_v40  ;;  %v2504_v20 = vpop.f32.mrb[67].mxu1  ;;  %v10681_v40 = vld [vmem:[%s17121_s4 + $0x58] sm:$0xf] }
 0x285   : > { %10519 = vmatprep.mubr.msk.f32.mxu1 %vm1740_vm4, %v1487_v13  ;;  %12009 = vmatprep.mubr.msk.f32.mxu0 %vm3413_vm6, %v2487_v55  ;;  %v1500_v55 = vunpack.c.l.bf16 %v1220_v30  ;;  %v1509_v13 = vunpack.c.h.bf16 %v1224_v31  ;;  %v1231_v30 = vld [vmem:[%s17118_s1 + $0x2d8] sm:$0xff] }
 0x286   : > { %v1523_v53 = vunpack.c.h.bf16 %v1231_v30 }
 0x287   : > { %v2507_v44 = vpop.f32.mrb[68].mxu1 }
 0x288   : > { %2771 = vmatmul.mubr.f32.gmra.mrb[174].mxu1 %v1486_v26  ;;  %12010 = vmatmul.mubr.msk.f32.vlgmr.msra.gmra.mrb[44].mxu0 %vm3413_vm6, %v2492_v50  ;;  %v2509_v45 = vpop.f32.mrb[69].mxu1  ;;  %v1223_v50 = vld [vmem:[%s17118_s1 + $0x298] sm:$0xff]  ;;  %v1508_v26 = vunpack.c.l.bf16 %v1224_v31 }
 0x289   : > { %10520 = vmatprep.mubr.msk.f32.mxu1 %vm1740_vm4, %v1489_v15  ;;  %12012 = vmatprep.mubr.msk.f32.mxu0 %vm3413_vm6, %v2497_v43  ;;  %v1507_v51 = vunpack.c.h.bf16 %v1223_v50  ;;  %v1506_v61 = vunpack.c.l.bf16 %v1223_v50  ;;  %v1511_v15 = vunpack.c.h.bf16 %v1225_v35 }
 0x28a   : > { %12469 = vmatpush3.bf16.msra.mxu0 %v12466_v42 }
 0x28b   : > { %v2512_v59 = vpop.f32.mrb[70].mxu1  ;;  %12025 = vmatprep.subr.msk.mxu0 %vm3438_vm5, %v10681_v40 }
 0x28c   : > { %2776 = vmatmul.mubr.f32.gmra.mrb[176].mxu1 %v1488_v38  ;;  %12013 = vmatmul.mubr.msk.f32.gmra.mrb[46].mxu0 %vm3413_vm6, %v2502_v19  ;;  %v2514_v62 = vpop.f32.mrb[71].mxu1  ;;  %v1510_v38 = vunpack.c.l.bf16 %v1225_v35  ;;  %v10728_v35 = vld [vmem:[%s17121_s4 + $0xb0] sm:$0xff] }
 0x28d   : > { %10521 = vmatprep.mubr.msk.f32.mxu1 %vm1740_vm4, %v1491_v60  ;;  %12015 = vmatprep.mubr.msk.f32.mxu0 %vm3413_vm6, %v2507_v44  ;;  %v1512_v60 = vunpack.c.l.bf16 %v1226_v9  ;;  %v10705_v62 = vld [vmem:[%s17121_s4 + $0x88] sm:$0xf] }
 0x28e   : > { %12026 = vmatpush3.msk.msra.mxu0 %vm3438_vm5, %v10681_v40  ;;  %v1513_v40 = vunpack.c.h.bf16 %v1226_v9 }
 0x28f   : > { %v2517_v29 = vpop.f32.mrb[72].mxu1  ;;  %12471 = vmatprep.subr.bf16.mxu0 %v12470_v0 }
 0x290   : > { %2781 = vmatmul.mubr.f32.gmra.mrb[178].mxu1 %v1490_v47  ;;  %12016 = vmatmul.mubr.msk.f32.gmra.mrb[48].mxu0 %vm3413_vm6, %v2512_v59  ;;  %v2519_v49 = vpop.f32.mrb[73].mxu1  ;;  %v1515_v59 = vunpack.c.h.bf16 %v1227_v46 }
 0x291   : > { %10522 = vmatprep.mubr.msk.f32.mxu1 %vm1740_vm4, %v1493_v63  ;;  %12018 = vmatprep.mubr.msk.f32.mxu0 %vm3413_vm6, %v2517_v29  ;;  %v10715_v63 = vld [vmem:[%s17121_s4 + $0x90] sm:$0xff]  ;;  %v1514_v29 = vunpack.c.l.bf16 %v1227_v46 }
 0x292   : > { %v14487_v10 = vpack.c.bf16 %v10716_v52, %v10715_v63  ;;  %v1238_v46 = vld [vmem:[%s17118_s1 + $0x310] sm:$0xff] }
 0x293   : > { %v2522_v39 = vpop.f32.mrb[74].mxu1 }
 0x294   : > { %2786 = vmatmul.mubr.f32.gmra.mrb[180].mxu1 %v1492_v48  ;;  %v2524_v18 = vpop.f32.mrb[75].mxu1  ;;  %12019 = vmatmul.mubr.msk.f32.gmra.mrb[50].mxu0 %vm3413_vm6, %v2522_v39 }
 0x295   : > { %10523 = vmatprep.mubr.msk.f32.mxu1 %vm1740_vm4, %v1495_v5  ;;  %v1229_v5 = vld [vmem:[%s17118_s1 + $0x2c8] sm:$0xff] }
 0x297   : > { %v2527_v3 = vpop.f32.mrb[76].mxu1 }
 0x298   : > { %2791 = vmatmul.mubr.f32.gmra.mrb[182].mxu1 %v1494_v27  ;;  %v2529_v54 = vpop.f32.mrb[77].mxu1  ;;  %12027 = vmatprep.mubr.msk.f32.mxu0 %vm3413_vm6, %v2527_v3 }
 0x299   : > { %10524 = vmatprep.mubr.msk.f32.mxu1 %vm1740_vm4, %v1497_v17  ;;  %v1519_v17 = vunpack.c.h.bf16 %v1229_v5 }
 0x29b   : > { %v2532_v56 = vpop.f32.mrb[78].mxu1 }
 0x29c   : > { %2796 = vmatmul.mubr.f32.gmra.mrb[184].mxu1 %v1496_v36  ;;  %v2534_v24 = vpop.f32.mrb[79].mxu1  ;;  %12028 = vmatmul.mubr.msk.f32.vlgmr.msra.gmra.mrb[44].mxu0 %vm3413_vm6, %v2532_v56  ;;  %v1518_v36 = vunpack.c.l.bf16 %v1229_v5 }
 0x29d   : > { %10525 = vmatprep.mubr.msk.f32.mxu1 %vm1740_vm4, %v1499_v23  ;;  %12473 = vmatpush3.bf16.msra.mxu0 %v12470_v0  ;;  %v1228_v0 = vld [vmem:[%s17118_s1 + $0x2c0] sm:$0xff]  ;;  %v1521_v23 = vunpack.c.h.bf16 %v1230_v58 }
 0x29e   : > { %12043 = vmatprep.subr.msk.mxu0 %vm3438_vm5, %v10693_v34  ;;  %v1517_v49 = vunpack.c.h.bf16 %v1228_v0  ;;  %v1516_v27 = vunpack.c.l.bf16 %v1228_v0  ;;  %v1239_v0 = vld [vmem:[%s17118_s1 + $0x318] sm:$0xff] }
 0x29f   : > { %v2537_v16 = vpop.f32.mrb[80].mxu1  ;;  %v1539_v52 = vunpack.c.h.bf16 %v1239_v0 }
 0x2a0   : > { %2801 = vmatmul.mubr.f32.gmra.mrb[186].mxu1 %v1498_v4  ;;  %v2539_v32 = vpop.f32.mrb[81].mxu1  ;;  %12030 = vmatprep.mubr.msk.f32.mxu0 %vm3413_vm6, %v2537_v16  ;;  %v1232_v4 = vld [vmem:[%s17118_s1 + $0x2e0] sm:$0xff]  ;;  %v1233_v16 = vld [vmem:[%s17118_s1 + $0x2e8] sm:$0xff] }
 0x2a1   : > { %10526 = vmatprep.mubr.msk.f32.mxu1 %vm1740_vm4, %v1501_v6  ;;  %12044 = vmatpush3.msk.msra.mxu0 %vm3438_vm5, %v10693_v34  ;;  %v1520_v34 = vunpack.c.l.bf16 %v1230_v58  ;;  %v1522_v6 = vunpack.c.l.bf16 %v1231_v30  ;;  %v1524_v32 = vunpack.c.l.bf16 %v1232_v4  ;;  %v1527_v25 = vunpack.c.h.bf16 %v1233_v16 }
 0x2a2   : > { %12475 = vmatprep.subr.bf16.mxu0 %v14432_v1 }
 0x2a3   : > { %v2542_v8 = vpop.f32.mrb[82].mxu1 }
 0x2a4   : > { %2806 = vmatmul.mubr.f32.gmra.mrb[188].mxu1 %v1500_v55  ;;  %v2544_v14 = vpop.f32.mrb[83].mxu1  ;;  %12031 = vmatmul.mubr.msk.f32.gmra.mrb[46].mxu0 %vm3413_vm6, %v2542_v8  ;;  %v1234_v8 = vld [vmem:[%s17118_s1 + $0x2f0] sm:$0xff] }
 0x2a5   : > { %10527 = vmatprep.mubr.msk.f32.mxu1 %vm1740_vm4, %v1503_v2  ;;  %v1526_v14 = vunpack.c.l.bf16 %v1233_v16  ;;  %v1529_v50 = vunpack.c.h.bf16 %v1234_v8  ;;  %v10740_v16 = vld [vmem:[%s17121_s4 + $0xc8] sm:$0xff] }
 0x2a7   : > { %v2547_v42 = vpop.f32.mrb[84].mxu1 }
 0x2a8   : > { %2811 = vmatmul.mubr.f32.gmra.mrb[190].mxu1 %v1502_v28  ;;  %v2549_v37 = vpop.f32.mrb[85].mxu1  ;;  %12033 = vmatprep.mubr.msk.f32.mxu0 %vm3413_vm6, %v2547_v42  ;;  %v1235_v42 = vld [vmem:[%s17118_s1 + $0x2f8] sm:$0xff] }
 0x2a9   : > { %10528 = vmatprep.mubr.msk.f32.mxu1 %vm1740_vm4, %v1505_v33  ;;  %v1528_v37 = vunpack.c.l.bf16 %v1234_v8  ;;  %v1531_v31 = vunpack.c.h.bf16 %v1235_v42 }
 0x2ab   : > { %v2552_v43 = vpop.f32.mrb[86].mxu1 }
 0x2ac   : > { %2816 = vmatmul.mubr.f32.gmra.mrb[192].mxu1 %v1504_v41  ;;  %v2554_v12 = vpop.f32.mrb[87].mxu1  ;;  %12034 = vmatmul.mubr.msk.f32.gmra.mrb[48].mxu0 %vm3413_vm6, %v2552_v43  ;;  %v1236_v43 = vld [vmem:[%s17118_s1 + $0x300] sm:$0xff] }
 0x2ad   : > { %10529 = vmatprep.mubr.msk.f32.mxu1 %vm1740_vm4, %v1507_v51  ;;  %v10717_v12 = vld [vmem:[%s17121_s4 + $0xa0] sm:$0xf] }
 0x2af   : > { %v2557_v19 = vpop.f32.mrb[88].mxu1 }
 0x2b0   : > { %2821 = vmatmul.mubr.f32.gmra.mrb[194].mxu1 %v1506_v61  ;;  %v2559_v20 = vpop.f32.mrb[89].mxu1  ;;  %12036 = vmatprep.mubr.msk.f32.mxu0 %vm3413_vm6, %v2557_v19  ;;  %v1530_v19 = vunpack.c.l.bf16 %v1235_v42  ;;  %v1246_v42 = vld [vmem:[%s17118_s1 + $0x350] sm:$0xff] }
 0x2b1   : > { %10530 = vmatprep.mubr.msk.f32.mxu1 %vm1740_vm4, %v1509_v13  ;;  %v10727_v13 = vld [vmem:[%s17121_s4 + $0xa8] sm:$0xff]  ;;  %v1533_v20 = vunpack.c.h.bf16 %v1236_v43 }
 0x2b2   : > { %v14542_v9 = vpack.c.bf16 %v10728_v35, %v10727_v13 }
 0x2b3   : > { %v2562_v44 = vpop.f32.mrb[90].mxu1 }
 0x2b4   : > { %2826 = vmatmul.mubr.f32.gmra.mrb[196].mxu1 %v1508_v26  ;;  %v2564_v45 = vpop.f32.mrb[91].mxu1  ;;  %12037 = vmatmul.mubr.msk.f32.gmra.mrb[50].mxu0 %vm3413_vm6, %v2562_v44 }
 0x2b5   : > { %10531 = vmatprep.mubr.msk.f32.mxu1 %vm1740_vm4, %v1511_v15  ;;  %v1237_v15 = vld [vmem:[%s17118_s1 + $0x308] sm:$0xff] }
 0x2b7   : > { %v2567_v21 = vpop.f32.mrb[92].mxu1 }
 0x2b8   : > { %2831 = vmatmul.mubr.f32.gmra.mrb[198].mxu1 %v1510_v38  ;;  %v2569_v57 = vpop.f32.mrb[93].mxu1  ;;  %12045 = vmatprep.mubr.msk.f32.mxu0 %vm3413_vm6, %v2567_v21  ;;  %v1532_v38 = vunpack.c.l.bf16 %v1236_v43  ;;  %v1247_v43 = vld [vmem:[%s17118_s1 + $0x358] sm:$0xff] }
 0x2b9   : > { %10532 = vmatprep.mubr.msk.f32.mxu1 %vm1740_vm4, %v1513_v40  ;;  %v1535_v40 = vunpack.c.h.bf16 %v1237_v15  ;;  %v1555_v35 = vunpack.c.h.bf16 %v1247_v43 }
 0x2bb   : > { %v2572_v47 = vpop.f32.mrb[94].mxu1 }
 0x2bc   : > { %2836 = vmatmul.mubr.f32.gmra.mrb[200].mxu1 %v1512_v60  ;;  %v2574_v48 = vpop.f32.mrb[95].mxu1  ;;  %12046 = vmatmul.mubr.msk.f32.vlgmr.msra.gmra.mrb[44].mxu0 %vm3413_vm6, %v2572_v47  ;;  %v1534_v60 = vunpack.c.l.bf16 %v1237_v15 }
 0x2bd   : > { %10533 = vmatprep.mubr.msk.f32.mxu1 %vm1740_vm4, %v1515_v59  ;;  %12477 = vmatpush3.bf16.msra.mxu0 %v14432_v1  ;;  %v1525_v1 = vunpack.c.h.bf16 %v1232_v4  ;;  %v1537_v59 = vunpack.c.h.bf16 %v1238_v46 }
 0x2be   : > { %12061 = vmatprep.subr.msk.mxu0 %vm3438_vm5, %v10705_v62 }
 0x2bf   : > { %v2577_v39 = vpop.f32.mrb[96].mxu1 }
 0x2c0   : > { %2841 = vmatmul.mubr.f32.gmra.mrb[202].mxu1 %v1514_v29  ;;  %v2579_v18 = vpop.f32.mrb[97].mxu1  ;;  %12048 = vmatprep.mubr.msk.f32.mxu0 %vm3413_vm6, %v2577_v39  ;;  %v1240_v29 = vld [vmem:[%s17118_s1 + $0x320] sm:$0xff]  ;;  %v1241_v39 = vld [vmem:[%s17118_s1 + $0x328] sm:$0xff] }
 0x2c1   : > { %10534 = vmatprep.mubr.msk.f32.mxu1 %vm1740_vm4, %v1517_v49  ;;  %12062 = vmatpush3.msk.msra.mxu0 %vm3438_vm5, %v10705_v62  ;;  %v1536_v62 = vunpack.c.l.bf16 %v1238_v46  ;;  %v1538_v49 = vunpack.c.l.bf16 %v1239_v0  ;;  %v1540_v18 = vunpack.c.l.bf16 %v1240_v29  ;;  %v1543_v58 = vunpack.c.h.bf16 %v1241_v39 }
 0x2c2   : > { %12479 = vmatprep.subr.bf16.mxu0 %v14487_v10 }
 0x2c3   : > { %v2582_v3 = vpop.f32.mrb[98].mxu1 }
 0x2c4   : > { %2846 = vmatmul.mubr.f32.gmra.mrb[204].mxu1 %v1516_v27  ;;  %v2584_v54 = vpop.f32.mrb[99].mxu1  ;;  %12049 = vmatmul.mubr.msk.f32.gmra.mrb[46].mxu0 %vm3413_vm6, %v2582_v3  ;;  %v1242_v3 = vld [vmem:[%s17118_s1 + $0x330] sm:$0xff] }
 0x2c5   : > { %10535 = vmatprep.mubr.msk.f32.mxu1 %vm1740_vm4, %v1519_v17  ;;  %v1542_v54 = vunpack.c.l.bf16 %v1241_v39  ;;  %v1545_v30 = vunpack.c.h.bf16 %v1242_v3  ;;  %v10752_v39 = vld [vmem:[%s17121_s4 + $0xe0] sm:$0xff] }
 0x2c7   : > { %v2587_v56 = vpop.f32.mrb[100].mxu1 }
 0x2c8   : > { %2851 = vmatmul.mubr.f32.gmra.mrb[206].mxu1 %v1518_v36  ;;  %v2589_v11 = vpop.f32.mrb[101].mxu1  ;;  %12051 = vmatprep.mubr.msk.f32.mxu0 %vm3413_vm6, %v2587_v56  ;;  %v1243_v56 = vld [vmem:[%s17118_s1 + $0x338] sm:$0xff] }
 0x2c9   : > { %10536 = vmatprep.mubr.msk.f32.mxu1 %vm1740_vm4, %v1521_v23  ;;  %v1544_v11 = vunpack.c.l.bf16 %v1242_v3  ;;  %v1547_v4 = vunpack.c.h.bf16 %v1243_v56 }
 0x2cb   : > { %v2592_v24 = vpop.f32.mrb[102].mxu1 }
 0x2cc   : > { %2856 = vmatmul.mubr.f32.gmra.mrb[208].mxu1 %v1520_v34  ;;  %v2594_v22 = vpop.f32.mrb[103].mxu1  ;;  %12052 = vmatmul.mubr.msk.f32.gmra.mrb[48].mxu0 %vm3413_vm6, %v2592_v24  ;;  %v1244_v24 = vld [vmem:[%s17118_s1 + $0x340] sm:$0xff] }
 0x2cd   : > { %10537 = vmatprep.mubr.msk.f32.mxu1 %vm1740_vm4, %v1523_v53  ;;  %v10729_v22 = vld [vmem:[%s17121_s4 + $0xb8] sm:$0xf] }
 0x2cf   : > { %v2597_v55 = vpop.f32.mrb[104].mxu1 }
 0x2d0   : > { %2861 = vmatmul.mubr.f32.gmra.mrb[210].mxu1 %v1522_v6  ;;  %v2599_v2 = vpop.f32.mrb[105].mxu1  ;;  %12054 = vmatprep.mubr.msk.f32.mxu0 %vm3413_vm6, %v2597_v55  ;;  %v1546_v55 = vunpack.c.l.bf16 %v1243_v56  ;;  %v1254_v56 = vld [vmem:[%s17118_s1 + $0x390] sm:$0xff] }
 0x2d1   : > { %10538 = vmatprep.mubr.msk.f32.mxu1 %vm1740_vm4, %v1525_v1  ;;  %v10739_v1 = vld [vmem:[%s17121_s4 + $0xc0] sm:$0xff]  ;;  %v1549_v2 = vunpack.c.h.bf16 %v1244_v24 }
 0x2d2   : > { %v14597_v8 = vpack.c.bf16 %v10740_v16, %v10739_v1 }
 0x2d3   : > { %v2602_v28 = vpop.f32.mrb[106].mxu1 }
 0x2d4   : > { %2866 = vmatmul.mubr.f32.gmra.mrb[212].mxu1 %v1524_v32  ;;  %v2604_v33 = vpop.f32.mrb[107].mxu1  ;;  %12055 = vmatmul.mubr.msk.f32.gmra.mrb[50].mxu0 %vm3413_vm6, %v2602_v28 }
 0x2d5   : > { %10539 = vmatprep.mubr.msk.f32.mxu1 %vm1740_vm4, %v1527_v25  ;;  %v1245_v25 = vld [vmem:[%s17118_s1 + $0x348] sm:$0xff] }
 0x2d7   : > { %v2607_v41 = vpop.f32.mrb[108].mxu1 }
 0x2d8   : > { %2871 = vmatmul.mubr.f32.gmra.mrb[214].mxu1 %v1526_v14  ;;  %v2609_v51 = vpop.f32.mrb[109].mxu1  ;;  %12063 = vmatprep.mubr.msk.f32.mxu0 %vm3413_vm6, %v2607_v41  ;;  %v1548_v14 = vunpack.c.l.bf16 %v1244_v24  ;;  %v1255_v24 = vld [vmem:[%s17118_s1 + $0x398] sm:$0xff] }
 0x2d9   : > { %10540 = vmatprep.mubr.msk.f32.mxu1 %vm1740_vm4, %v1529_v50  ;;  %v1551_v50 = vunpack.c.h.bf16 %v1245_v25  ;;  %v1571_v16 = vunpack.c.h.bf16 %v1255_v24 }
 0x2db   : > { %v2612_v61 = vpop.f32.mrb[110].mxu1 }
 0x2dc   : > { %2876 = vmatmul.mubr.f32.gmra.mrb[216].mxu1 %v1528_v37  ;;  %v2614_v26 = vpop.f32.mrb[111].mxu1  ;;  %12064 = vmatmul.mubr.msk.f32.vlgmr.msra.gmra.mrb[44].mxu0 %vm3413_vm6, %v2612_v61  ;;  %v1550_v37 = vunpack.c.l.bf16 %v1245_v25 }
 0x2dd   : > { %10541 = vmatprep.mubr.msk.f32.mxu1 %vm1740_vm4, %v1531_v31  ;;  %12481 = vmatpush3.bf16.msra.mxu0 %v14487_v10  ;;  %v1541_v10 = vunpack.c.h.bf16 %v1240_v29  ;;  %v1553_v31 = vunpack.c.h.bf16 %v1246_v42 }
 0x2de   : > { %12079 = vmatprep.subr.msk.mxu0 %vm3438_vm5, %v10717_v12 }
 0x2df   : > { %v2617_v44 = vpop.f32.mrb[112].mxu1 }
 0x2e0   : > { %2881 = vmatmul.mubr.f32.gmra.mrb[218].mxu1 %v1530_v19  ;;  %v2619_v45 = vpop.f32.mrb[113].mxu1  ;;  %12066 = vmatprep.mubr.msk.f32.mxu0 %vm3413_vm6, %v2617_v44  ;;  %v1248_v19 = vld [vmem:[%s17118_s1 + $0x360] sm:$0xff]  ;;  %v1249_v44 = vld [vmem:[%s17118_s1 + $0x368] sm:$0xff] }
 0x2e1   : > { %10542 = vmatprep.mubr.msk.f32.mxu1 %vm1740_vm4, %v1533_v20  ;;  %12080 = vmatpush3.msk.msra.mxu0 %vm3438_vm5, %v10717_v12  ;;  %v1552_v12 = vunpack.c.l.bf16 %v1246_v42  ;;  %v1554_v20 = vunpack.c.l.bf16 %v1247_v43  ;;  %v1556_v45 = vunpack.c.l.bf16 %v1248_v19  ;;  %v1559_v46 = vunpack.c.h.bf16 %v1249_v44 }
 0x2e2   : > { %12483 = vmatprep.subr.bf16.mxu0 %v14542_v9 }
 0x2e3   : > { %v2622_v21 = vpop.f32.mrb[114].mxu1 }
 0x2e4   : > { %2886 = vmatmul.mubr.f32.gmra.mrb[220].mxu1 %v1532_v38  ;;  %v2624_v57 = vpop.f32.mrb[115].mxu1  ;;  %12067 = vmatmul.mubr.msk.f32.gmra.mrb[46].mxu0 %vm3413_vm6, %v2622_v21  ;;  %v1250_v21 = vld [vmem:[%s17118_s1 + $0x370] sm:$0xff] }
 0x2e5   : > { %10543 = vmatprep.mubr.msk.f32.mxu1 %vm1740_vm4, %v1535_v40  ;;  %v1558_v57 = vunpack.c.l.bf16 %v1249_v44  ;;  %v1561_v0 = vunpack.c.h.bf16 %v1250_v21  ;;  %v10764_v44 = vld [vmem:[%s17121_s4 + $0xf8] sm:$0xff] }
 0x2e7   : > { %v2627_v47 = vpop.f32.mrb[116].mxu1 }
 0x2e8   : > { %2891 = vmatmul.mubr.f32.gmra.mrb[222].mxu1 %v1534_v60  ;;  %v2629_v63 = vpop.f32.mrb[117].mxu1  ;;  %12069 = vmatprep.mubr.msk.f32.mxu0 %vm3413_vm6, %v2627_v47  ;;  %v1251_v47 = vld [vmem:[%s17118_s1 + $0x378] sm:$0xff] }
 0x2e9   : > { %10544 = vmatprep.mubr.msk.f32.mxu1 %vm1740_vm4, %v1537_v59  ;;  %v1560_v63 = vunpack.c.l.bf16 %v1250_v21  ;;  %v1563_v29 = vunpack.c.h.bf16 %v1251_v47 }
 0x2eb   : > { %v2632_v48 = vpop.f32.mrb[118].mxu1 }
 0x2ec   : > { %2896 = vmatmul.mubr.f32.gmra.mrb[224].mxu1 %v1536_v62  ;;  %v2634_v5 = vpop.f32.mrb[119].mxu1  ;;  %12070 = vmatmul.mubr.msk.f32.gmra.mrb[48].mxu0 %vm3413_vm6, %v2632_v48  ;;  %v1252_v48 = vld [vmem:[%s17118_s1 + $0x380] sm:$0xff] }
 0x2ed   : > { %10545 = vmatprep.mubr.msk.f32.mxu1 %vm1740_vm4, %v1539_v52  ;;  %v10741_v5 = vld [vmem:[%s17121_s4 + $0xd0] sm:$0xf] }
 0x2ef   : > { %v2637_v27 = vpop.f32.mrb[120].mxu1 }
 0x2f0   : > { %2901 = vmatmul.mubr.f32.gmra.mrb[226].mxu1 %v1538_v49  ;;  %v2639_v17 = vpop.f32.mrb[121].mxu1  ;;  %12072 = vmatprep.mubr.msk.f32.mxu0 %vm3413_vm6, %v2637_v27  ;;  %v1562_v27 = vunpack.c.l.bf16 %v1251_v47  ;;  %v1262_v47 = vld [vmem:[%s17118_s1 + $0x3d0] sm:$0xff] }
 0x2f1   : > { %10546 = vmatprep.mubr.msk.f32.mxu1 %vm1740_vm4, %v1541_v10  ;;  %v10751_v10 = vld [vmem:[%s17121_s4 + $0xd8] sm:$0xff]  ;;  %v1565_v17 = vunpack.c.h.bf16 %v1252_v48 }
 0x2f2   : > { %v14652_v3 = vpack.c.bf16 %v10752_v39, %v10751_v10 }
 0x2f3   : > { %v2642_v36 = vpop.f32.mrb[122].mxu1 }
 0x2f4   : > { %2906 = vmatmul.mubr.f32.gmra.mrb[228].mxu1 %v1540_v18  ;;  %v2644_v23 = vpop.f32.mrb[123].mxu1  ;;  %12073 = vmatmul.mubr.msk.f32.gmra.mrb[50].mxu0 %vm3413_vm6, %v2642_v36 }
 0x2f5   : > { %10547 = vmatprep.mubr.msk.f32.mxu1 %vm1740_vm4, %v1543_v58  ;;  %v1253_v58 = vld [vmem:[%s17118_s1 + $0x388] sm:$0xff] }
 0x2f7   : > { %v2647_v34 = vpop.f32.mrb[124].mxu1 }
 0x2f8   : > { %2911 = vmatmul.mubr.f32.gmra.mrb[230].mxu1 %v1542_v54  ;;  %v2649_v53 = vpop.f32.mrb[125].mxu1  ;;  %12081 = vmatprep.mubr.msk.f32.mxu0 %vm3413_vm6, %v2647_v34  ;;  %v1564_v54 = vunpack.c.l.bf16 %v1252_v48  ;;  %v1263_v48 = vld [vmem:[%s17118_s1 + $0x3d8] sm:$0xff] }
 0x2f9   : > { %10548 = vmatprep.mubr.msk.f32.mxu1 %vm1740_vm4, %v1545_v30  ;;  %v1567_v30 = vunpack.c.h.bf16 %v1253_v58  ;;  %v1587_v39 = vunpack.c.h.bf16 %v1263_v48 }
 0x2fb   : > { %v2652_v6 = vpop.f32.mrb[126].mxu1 }
 0x2fc   : > { %2916 = vmatmul.mubr.f32.gmra.mrb[232].mxu1 %v1544_v11  ;;  %v2654_v32 = vpop.f32.mrb[127].mxu1  ;;  %12082 = vmatmul.mubr.msk.f32.vlgmr.msra.gmra.mrb[44].mxu0 %vm3413_vm6, %v2652_v6  ;;  %v1566_v11 = vunpack.c.l.bf16 %v1253_v58 }
 0x2fd   : > { %10549 = vmatprep.mubr.msk.f32.mxu1 %vm1740_vm4, %v1547_v4  ;;  %12485 = vmatpush3.bf16.msra.mxu0 %v14542_v9  ;;  %v1557_v9 = vunpack.c.h.bf16 %v1248_v19  ;;  %v1569_v4 = vunpack.c.h.bf16 %v1254_v56 }
 0x2fe   : > { %12097 = vmatprep.subr.msk.mxu0 %vm3438_vm5, %v10729_v22 }
 0x2ff   : > { %v2657_v28 = vpop.f32.mrb[128].mxu1 }
 0x300   : > { %2921 = vmatmul.mubr.f32.gmra.mrb[234].mxu1 %v1546_v55  ;;  %v2659_v33 = vpop.f32.mrb[129].mxu1  ;;  %12084 = vmatprep.mubr.msk.f32.mxu0 %vm3413_vm6, %v2657_v28  ;;  %v1256_v55 = vld [vmem:[%s17118_s1 + $0x3a0] sm:$0xff]  ;;  %v1257_v28 = vld [vmem:[%s17118_s1 + $0x3a8] sm:$0xff] }
 0x301   : > { %10550 = vmatprep.mubr.msk.f32.mxu1 %vm1740_vm4, %v1549_v2  ;;  %12098 = vmatpush3.msk.msra.mxu0 %vm3438_vm5, %v10729_v22  ;;  %v1568_v22 = vunpack.c.l.bf16 %v1254_v56  ;;  %v1570_v2 = vunpack.c.l.bf16 %v1255_v24  ;;  %v1572_v33 = vunpack.c.l.bf16 %v1256_v55  ;;  %v1575_v42 = vunpack.c.h.bf16 %v1257_v28 }
 0x302   : > { %12487 = vmatprep.subr.bf16.mxu0 %v14597_v8 }
 0x303   : > { %v2662_v41 = vpop.f32.mrb[130].mxu1 }
 0x304   : > { %2926 = vmatmul.mubr.f32.gmra.mrb[236].mxu1 %v1548_v14  ;;  %v2664_v51 = vpop.f32.mrb[131].mxu1  ;;  %12085 = vmatmul.mubr.msk.f32.gmra.mrb[46].mxu0 %vm3413_vm6, %v2662_v41  ;;  %v1258_v41 = vld [vmem:[%s17118_s1 + $0x3b0] sm:$0xff] }
 0x305   : > { %10551 = vmatprep.mubr.msk.f32.mxu1 %vm1740_vm4, %v1551_v50  ;;  %v1574_v51 = vunpack.c.l.bf16 %v1257_v28  ;;  %v1577_v43 = vunpack.c.h.bf16 %v1258_v41  ;;  %v10776_v28 = vld [vmem:[%s17121_s4 + $0x110] sm:$0xff] }
 0x307   : > { %v2667_v61 = vpop.f32.mrb[132].mxu1 }
 0x308   : > { %2931 = vmatmul.mubr.f32.gmra.mrb[238].mxu1 %v1550_v37  ;;  %v2669_v13 = vpop.f32.mrb[133].mxu1  ;;  %12087 = vmatprep.mubr.msk.f32.mxu0 %vm3413_vm6, %v2667_v61  ;;  %v1259_v61 = vld [vmem:[%s17118_s1 + $0x3b8] sm:$0xff] }
 0x309   : > { %10552 = vmatprep.mubr.msk.f32.mxu1 %vm1740_vm4, %v1553_v31  ;;  %v1576_v13 = vunpack.c.l.bf16 %v1258_v41  ;;  %v1579_v19 = vunpack.c.h.bf16 %v1259_v61 }
 0x30b   : > { %v2672_v26 = vpop.f32.mrb[134].mxu1 }
 0x30c   : > { %2936 = vmatmul.mubr.f32.gmra.mrb[240].mxu1 %v1552_v12  ;;  %v2674_v15 = vpop.f32.mrb[135].mxu1  ;;  %12088 = vmatmul.mubr.msk.f32.gmra.mrb[48].mxu0 %vm3413_vm6, %v2672_v26  ;;  %v1260_v26 = vld [vmem:[%s17118_s1 + $0x3c0] sm:$0xff] }
 0x30d   : > { %10553 = vmatprep.mubr.msk.f32.mxu1 %vm1740_vm4, %v1555_v35  ;;  %v10753_v15 = vld [vmem:[%s17121_s4 + $0xe8] sm:$0xf] }
 0x30f   : > { %v2677_v38 = vpop.f32.mrb[136].mxu1 }
 0x310   : > { %2941 = vmatmul.mubr.f32.gmra.mrb[242].mxu1 %v1554_v20  ;;  %v2679_v40 = vpop.f32.mrb[137].mxu1  ;;  %12090 = vmatprep.mubr.msk.f32.mxu0 %vm3413_vm6, %v2677_v38  ;;  %v1578_v38 = vunpack.c.l.bf16 %v1259_v61  ;;  %v1270_v61 = vld [vmem:[%s17118_s1 + $0x410] sm:$0xff] }
 0x311   : > { %10554 = vmatprep.mubr.msk.f32.mxu1 %vm1740_vm4, %v1557_v9  ;;  %v10763_v9 = vld [vmem:[%s17121_s4 + $0xf0] sm:$0xff]  ;;  %v1581_v40 = vunpack.c.h.bf16 %v1260_v26 }
 0x312   : > { %v14707_v21 = vpack.c.bf16 %v10764_v44, %v10763_v9 }
 0x313   : > { %v2682_v60 = vpop.f32.mrb[138].mxu1 }
 0x314   : > { %2946 = vmatmul.mubr.f32.gmra.mrb[244].mxu1 %v1556_v45  ;;  %v2684_v59 = vpop.f32.mrb[139].mxu1  ;;  %12091 = vmatmul.mubr.msk.f32.gmra.mrb[50].mxu0 %vm3413_vm6, %v2682_v60 }
 0x315   : > { %10555 = vmatprep.mubr.msk.f32.mxu1 %vm1740_vm4, %v1559_v46  ;;  %v1261_v46 = vld [vmem:[%s17118_s1 + $0x3c8] sm:$0xff] }
 0x317   : > { %v2687_v62 = vpop.f32.mrb[140].mxu1 }
 0x318   : > { %2951 = vmatmul.mubr.f32.gmra.mrb[246].mxu1 %v1558_v57  ;;  %v2689_v52 = vpop.f32.mrb[141].mxu1  ;;  %12099 = vmatprep.mubr.msk.f32.mxu0 %vm3413_vm6, %v2687_v62  ;;  %v1580_v57 = vunpack.c.l.bf16 %v1260_v26  ;;  %v1271_v26 = vld [vmem:[%s17118_s1 + $0x418] sm:$0xff] }
 0x319   : > { %10556 = vmatprep.mubr.msk.f32.mxu1 %vm1740_vm4, %v1561_v0  ;;  %v1583_v0 = vunpack.c.h.bf16 %v1261_v46  ;;  %v1603_v44 = vunpack.c.h.bf16 %v1271_v26 }
 0x31b   : > { %v2692_v49 = vpop.f32.mrb[142].mxu1 }
 0x31c   : > { %2956 = vmatmul.mubr.f32.gmra.mrb[248].mxu1 %v1560_v63  ;;  %v2694_v18 = vpop.f32.mrb[143].mxu1  ;;  %12100 = vmatmul.mubr.msk.f32.vlgmr.msra.gmra.mrb[44].mxu0 %vm3413_vm6, %v2692_v49  ;;  %v1582_v63 = vunpack.c.l.bf16 %v1261_v46 }
 0x31d   : > { %10557 = vmatprep.mubr.msk.f32.mxu1 %vm1740_vm4, %v1563_v29  ;;  %12489 = vmatpush3.bf16.msra.mxu0 %v14597_v8  ;;  %v1573_v8 = vunpack.c.h.bf16 %v1256_v55  ;;  %v1585_v29 = vunpack.c.h.bf16 %v1262_v47 }
 0x31e   : > { %12115 = vmatprep.subr.msk.mxu0 %vm3438_vm5, %v10741_v5 }
 0x31f   : > { %v2697_v36 = vpop.f32.mrb[144].mxu1 }
 0x320   : > { %2961 = vmatmul.mubr.f32.gmra.mrb[250].mxu1 %v1562_v27  ;;  %v2699_v23 = vpop.f32.mrb[145].mxu1  ;;  %12102 = vmatprep.mubr.msk.f32.mxu0 %vm3413_vm6, %v2697_v36  ;;  %v1264_v27 = vld [vmem:[%s17118_s1 + $0x3e0] sm:$0xff]  ;;  %v1265_v36 = vld [vmem:[%s17118_s1 + $0x3e8] sm:$0xff] }
 0x321   : > { %10558 = vmatprep.mubr.msk.f32.mxu1 %vm1740_vm4, %v1565_v17  ;;  %12116 = vmatpush3.msk.msra.mxu0 %vm3438_vm5, %v10741_v5  ;;  %v1584_v5 = vunpack.c.l.bf16 %v1262_v47  ;;  %v1586_v17 = vunpack.c.l.bf16 %v1263_v48  ;;  %v1588_v23 = vunpack.c.l.bf16 %v1264_v27  ;;  %v1591_v56 = vunpack.c.h.bf16 %v1265_v36 }
 0x322   : > { %12491 = vmatprep.subr.bf16.mxu0 %v14652_v3 }
 0x323   : > { %v2702_v34 = vpop.f32.mrb[146].mxu1 }
 0x324   : > { %2966 = vmatmul.mubr.f32.gmra.mrb[252].mxu1 %v1564_v54  ;;  %v2704_v53 = vpop.f32.mrb[147].mxu1  ;;  %12103 = vmatmul.mubr.msk.f32.gmra.mrb[46].mxu0 %vm3413_vm6, %v2702_v34  ;;  %v1266_v34 = vld [vmem:[%s17118_s1 + $0x3f0] sm:$0xff] }
 0x325   : > { %10559 = vmatprep.mubr.msk.f32.mxu1 %vm1740_vm4, %v1567_v30  ;;  %v1590_v53 = vunpack.c.l.bf16 %v1265_v36  ;;  %v1593_v24 = vunpack.c.h.bf16 %v1266_v34  ;;  %v10788_v36 = vld [vmem:[%s17121_s4 + $0x128] sm:$0xff] }
 0x327   : > { %v2707_v6 = vpop.f32.mrb[148].mxu1 }
 0x328   : > { %2971 = vmatmul.mubr.f32.gmra.mrb[254].mxu1 %v1566_v11  ;;  %v2709_v1 = vpop.f32.mrb[149].mxu1  ;;  %12105 = vmatprep.mubr.msk.f32.mxu0 %vm3413_vm6, %v2707_v6  ;;  %v1267_v6 = vld [vmem:[%s17118_s1 + $0x3f8] sm:$0xff] }
 0x329   : > { %10560 = vmatprep.mubr.msk.f32.mxu1 %vm1740_vm4, %v1569_v4  ;;  %v1592_v1 = vunpack.c.l.bf16 %v1266_v34  ;;  %v1595_v55 = vunpack.c.h.bf16 %v1267_v6 }
 0x32b   : > { %v2712_v32 = vpop.f32.mrb[150].mxu1 }
 0x32c   : > { %2976 = vmatmul.mubr.f32.gmra.mrb[0].mxu1 %v1568_v22  ;;  %v2714_v25 = vpop.f32.mrb[151].mxu1  ;;  %12106 = vmatmul.mubr.msk.f32.gmra.mrb[48].mxu0 %vm3413_vm6, %v2712_v32  ;;  %v1268_v32 = vld [vmem:[%s17118_s1 + $0x400] sm:$0xff] }
 0x32d   : > { %10561 = vmatprep.mubr.msk.f32.mxu1 %vm1740_vm4, %v1571_v16  ;;  %v10765_v25 = vld [vmem:[%s17121_s4 + $0x100] sm:$0xf] }
 0x32f   : > { %v2717_v14 = vpop.f32.mrb[152].mxu1 }
 0x330   : > { %2981 = vmatmul.mubr.f32.gmra.mrb[2].mxu1 %v1570_v2  ;;  %v2719_v50 = vpop.f32.mrb[153].mxu1  ;;  %12108 = vmatprep.mubr.msk.f32.mxu0 %vm3413_vm6, %v2717_v14  ;;  %v1594_v14 = vunpack.c.l.bf16 %v1267_v6  ;;  %v1278_v6 = vld [vmem:[%s17118_s1 + $0x450] sm:$0xff] }
 0x331   : > { %10562 = vmatprep.mubr.msk.f32.mxu1 %vm1740_vm4, %v1573_v8  ;;  %v10775_v8 = vld [vmem:[%s17121_s4 + $0x108] sm:$0xff]  ;;  %v1597_v50 = vunpack.c.h.bf16 %v1268_v32 }
 0x332   : > { %v14762_v41 = vpack.c.bf16 %v10776_v28, %v10775_v8 }
 0x333   : > { %v2722_v37 = vpop.f32.mrb[154].mxu1 }
 0x334   : > { %2986 = vmatmul.mubr.f32.gmra.mrb[4].mxu1 %v1572_v33  ;;  %v2724_v31 = vpop.f32.mrb[155].mxu1  ;;  %12109 = vmatmul.mubr.msk.f32.gmra.mrb[50].mxu0 %vm3413_vm6, %v2722_v37 }
 0x335   : > { %10563 = vmatprep.mubr.msk.f32.mxu1 %vm1740_vm4, %v1575_v42  ;;  %v1269_v42 = vld [vmem:[%s17118_s1 + $0x408] sm:$0xff] }
 0x337   : > { %v2727_v12 = vpop.f32.mrb[156].mxu1 }
 0x338   : > { %2991 = vmatmul.mubr.f32.gmra.mrb[6].mxu1 %v1574_v51  ;;  %v2729_v35 = vpop.f32.mrb[157].mxu1  ;;  %12117 = vmatprep.mubr.msk.f32.mxu0 %vm3413_vm6, %v2727_v12  ;;  %v1596_v51 = vunpack.c.l.bf16 %v1268_v32  ;;  %v1279_v32 = vld [vmem:[%s17118_s1 + $0x458] sm:$0xff] }
 0x339   : > { %10564 = vmatprep.mubr.msk.f32.mxu1 %vm1740_vm4, %v1577_v43  ;;  %v1599_v43 = vunpack.c.h.bf16 %v1269_v42  ;;  %v1619_v28 = vunpack.c.h.bf16 %v1279_v32 }
 0x33b   : > { %v2732_v20 = vpop.f32.mrb[158].mxu1 }
 0x33c   : > { %2996 = vmatmul.mubr.f32.gmra.mrb[8].mxu1 %v1576_v13  ;;  %v2734_v45 = vpop.f32.mrb[159].mxu1  ;;  %12118 = vmatmul.mubr.msk.f32.vlgmr.msra.gmra.mrb[44].mxu0 %vm3413_vm6, %v2732_v20  ;;  %v1598_v13 = vunpack.c.l.bf16 %v1269_v42 }
 0x33d   : > { %10565 = vmatprep.mubr.msk.f32.mxu1 %vm1740_vm4, %v1579_v19  ;;  %12493 = vmatpush3.bf16.msra.mxu0 %v14652_v3  ;;  %v1589_v3 = vunpack.c.h.bf16 %v1264_v27  ;;  %v1601_v19 = vunpack.c.h.bf16 %v1270_v61 }
 0x33e   : > { %12133 = vmatprep.subr.msk.mxu0 %vm3438_vm5, %v10753_v15 }
 0x33f   : > { %v2737_v60 = vpop.f32.mrb[160].mxu1 }
 0x340   : > { %3001 = vmatmul.mubr.f32.gmra.mrb[10].mxu1 %v1578_v38  ;;  %v2739_v59 = vpop.f32.mrb[161].mxu1  ;;  %12120 = vmatprep.mubr.msk.f32.mxu0 %vm3413_vm6, %v2737_v60  ;;  %v1272_v38 = vld [vmem:[%s17118_s1 + $0x420] sm:$0xff]  ;;  %v1273_v60 = vld [vmem:[%s17118_s1 + $0x428] sm:$0xff] }
 0x341   : > { %10566 = vmatprep.mubr.msk.f32.mxu1 %vm1740_vm4, %v1581_v40  ;;  %12134 = vmatpush3.msk.msra.mxu0 %vm3438_vm5, %v10753_v15  ;;  %v1600_v15 = vunpack.c.l.bf16 %v1270_v61  ;;  %v1602_v40 = vunpack.c.l.bf16 %v1271_v26  ;;  %v1604_v59 = vunpack.c.l.bf16 %v1272_v38  ;;  %v1607_v47 = vunpack.c.h.bf16 %v1273_v60 }
 0x342   : > { %12495 = vmatprep.subr.bf16.mxu0 %v14707_v21 }
 0x343   : > { %v2742_v62 = vpop.f32.mrb[162].mxu1 }
 0x344   : > { %3006 = vmatmul.mubr.f32.gmra.mrb[12].mxu1 %v1580_v57  ;;  %v2744_v52 = vpop.f32.mrb[163].mxu1  ;;  %12121 = vmatmul.mubr.msk.f32.gmra.mrb[46].mxu0 %vm3413_vm6, %v2742_v62  ;;  %v1274_v62 = vld [vmem:[%s17118_s1 + $0x430] sm:$0xff] }
 0x345   : > { %10567 = vmatprep.mubr.msk.f32.mxu1 %vm1740_vm4, %v1583_v0  ;;  %v1606_v52 = vunpack.c.l.bf16 %v1273_v60  ;;  %v1609_v48 = vunpack.c.h.bf16 %v1274_v62  ;;  %v10800_v60 = vld [vmem:[%s17121_s4 + $0x140] sm:$0xff] }
 0x347   : > { %v2747_v49 = vpop.f32.mrb[164].mxu1 }
 0x348   : > { %3011 = vmatmul.mubr.f32.gmra.mrb[14].mxu1 %v1582_v63  ;;  %v2749_v10 = vpop.f32.mrb[165].mxu1  ;;  %12123 = vmatprep.mubr.msk.f32.mxu0 %vm3413_vm6, %v2747_v49  ;;  %v1275_v49 = vld [vmem:[%s17118_s1 + $0x438] sm:$0xff] }
 0x349   : > { %10568 = vmatprep.mubr.msk.f32.mxu1 %vm1740_vm4, %v1585_v29  ;;  %v1608_v10 = vunpack.c.l.bf16 %v1274_v62  ;;  %v1611_v27 = vunpack.c.h.bf16 %v1275_v49 }
 0x34b   : > { %v2752_v18 = vpop.f32.mrb[166].mxu1 }
 0x34c   : > { %3016 = vmatmul.mubr.f32.gmra.mrb[16].mxu1 %v1584_v5  ;;  %v2754_v58 = vpop.f32.mrb[167].mxu1  ;;  %12124 = vmatmul.mubr.msk.f32.gmra.mrb[48].mxu0 %vm3413_vm6, %v2752_v18  ;;  %v1276_v18 = vld [vmem:[%s17118_s1 + $0x440] sm:$0xff] }
 0x34d   : > { %10569 = vmatprep.mubr.msk.f32.mxu1 %vm1740_vm4, %v1587_v39  ;;  %v10777_v58 = vld [vmem:[%s17121_s4 + $0x118] sm:$0xf] }
 0x34f   : > { %v2757_v54 = vpop.f32.mrb[168].mxu1 }
 0x350   : > { %3021 = vmatmul.mubr.f32.gmra.mrb[18].mxu1 %v1586_v17  ;;  %v2759_v30 = vpop.f32.mrb[169].mxu1  ;;  %12126 = vmatprep.mubr.msk.f32.mxu0 %vm3413_vm6, %v2757_v54  ;;  %v1610_v54 = vunpack.c.l.bf16 %v1275_v49  ;;  %v1286_v49 = vld [vmem:[%s17118_s1 + $0x490] sm:$0xff] }
 0x351   : > { %10570 = vmatprep.mubr.msk.f32.mxu1 %vm1740_vm4, %v1589_v3  ;;  %v10787_v3 = vld [vmem:[%s17121_s4 + $0x120] sm:$0xff]  ;;  %v1613_v30 = vunpack.c.h.bf16 %v1276_v18 }
 0x352   : > { %v14817_v34 = vpack.c.bf16 %v10788_v36, %v10787_v3 }
 0x353   : > { %v2762_v11 = vpop.f32.mrb[170].mxu1 }
 0x354   : > { %3026 = vmatmul.mubr.f32.gmra.mrb[20].mxu1 %v1588_v23  ;;  %v2764_v4 = vpop.f32.mrb[171].mxu1  ;;  %12127 = vmatmul.mubr.msk.f32.gmra.mrb[50].mxu0 %vm3413_vm6, %v2762_v11 }
 0x355   : > { %10571 = vmatprep.mubr.msk.f32.mxu1 %vm1740_vm4, %v1591_v56  ;;  %v1277_v56 = vld [vmem:[%s17118_s1 + $0x448] sm:$0xff] }
 0x357   : > { %v2767_v22 = vpop.f32.mrb[172].mxu1 }
 0x358   : > { %3031 = vmatmul.mubr.f32.gmra.mrb[22].mxu1 %v1590_v53  ;;  %v2769_v16 = vpop.f32.mrb[173].mxu1  ;;  %12135 = vmatprep.mubr.msk.f32.mxu0 %vm3413_vm6, %v2767_v22  ;;  %v1612_v53 = vunpack.c.l.bf16 %v1276_v18  ;;  %v1287_v18 = vld [vmem:[%s17118_s1 + $0x498] sm:$0xff] }
 0x359   : > { %10572 = vmatprep.mubr.msk.f32.mxu1 %vm1740_vm4, %v1593_v24  ;;  %v1615_v24 = vunpack.c.h.bf16 %v1277_v56  ;;  %v1635_v36 = vunpack.c.h.bf16 %v1287_v18 }
 0x35b   : > { %v2772_v2 = vpop.f32.mrb[174].mxu1 }
 0x35c   : > { %3036 = vmatmul.mubr.f32.gmra.mrb[24].mxu1 %v1592_v1  ;;  %v2774_v33 = vpop.f32.mrb[175].mxu1  ;;  %12136 = vmatmul.mubr.msk.f32.vlgmr.msra.gmra.mrb[44].mxu0 %vm3413_vm6, %v2772_v2  ;;  %v1614_v1 = vunpack.c.l.bf16 %v1277_v56 }
 0x35d   : > { %10573 = vmatprep.mubr.msk.f32.mxu1 %vm1740_vm4, %v1595_v55  ;;  %12497 = vmatpush3.bf16.msra.mxu0 %v14707_v21  ;;  %v1605_v21 = vunpack.c.h.bf16 %v1272_v38  ;;  %v1617_v55 = vunpack.c.h.bf16 %v1278_v6 }
 0x35e   : > { %12151 = vmatprep.subr.msk.mxu0 %vm3438_vm5, %v10765_v25 }
 0x35f   : > { %v2777_v37 = vpop.f32.mrb[176].mxu1 }
 0x360   : > { %3041 = vmatmul.mubr.f32.gmra.mrb[26].mxu1 %v1594_v14  ;;  %v2779_v31 = vpop.f32.mrb[177].mxu1  ;;  %12138 = vmatprep.mubr.msk.f32.mxu0 %vm3413_vm6, %v2777_v37  ;;  %v1280_v14 = vld [vmem:[%s17118_s1 + $0x460] sm:$0xff]  ;;  %v1281_v37 = vld [vmem:[%s17118_s1 + $0x468] sm:$0xff] }
 0x361   : > { %10574 = vmatprep.mubr.msk.f32.mxu1 %vm1740_vm4, %v1597_v50  ;;  %12152 = vmatpush3.msk.msra.mxu0 %vm3438_vm5, %v10765_v25  ;;  %v1616_v25 = vunpack.c.l.bf16 %v1278_v6  ;;  %v1618_v50 = vunpack.c.l.bf16 %v1279_v32  ;;  %v1620_v31 = vunpack.c.l.bf16 %v1280_v14  ;;  %v1623_v61 = vunpack.c.h.bf16 %v1281_v37 }
 0x362   : > { %12499 = vmatprep.subr.bf16.mxu0 %v14762_v41 }
 0x363   : > { %v2782_v12 = vpop.f32.mrb[178].mxu1 }
 0x364   : > { %3046 = vmatmul.mubr.f32.gmra.mrb[28].mxu1 %v1596_v51  ;;  %v2784_v35 = vpop.f32.mrb[179].mxu1  ;;  %12139 = vmatmul.mubr.msk.f32.gmra.mrb[46].mxu0 %vm3413_vm6, %v2782_v12  ;;  %v1282_v12 = vld [vmem:[%s17118_s1 + $0x470] sm:$0xff] }
 0x365   : > { %10575 = vmatprep.mubr.msk.f32.mxu1 %vm1740_vm4, %v1599_v43  ;;  %v1622_v35 = vunpack.c.l.bf16 %v1281_v37  ;;  %v1625_v26 = vunpack.c.h.bf16 %v1282_v12  ;;  %v10812_v37 = vld [vmem:[%s17121_s4 + $0x158] sm:$0xff] }
 0x367   : > { %v2787_v20 = vpop.f32.mrb[180].mxu1 }
 0x368   : > { %3051 = vmatmul.mubr.f32.gmra.mrb[30].mxu1 %v1598_v13  ;;  %v2789_v9 = vpop.f32.mrb[181].mxu1  ;;  %12141 = vmatprep.mubr.msk.f32.mxu0 %vm3413_vm6, %v2787_v20  ;;  %v1283_v20 = vld [vmem:[%s17118_s1 + $0x478] sm:$0xff] }
 0x369   : > { %10576 = vmatprep.mubr.msk.f32.mxu1 %vm1740_vm4, %v1601_v19  ;;  %v1624_v9 = vunpack.c.l.bf16 %v1282_v12  ;;  %v1627_v38 = vunpack.c.h.bf16 %v1283_v20 }
 0x36b   : > { %v2792_v45 = vpop.f32.mrb[182].mxu1 }
 0x36c   : > { %3056 = vmatmul.mubr.f32.gmra.mrb[32].mxu1 %v1600_v15  ;;  %v2794_v46 = vpop.f32.mrb[183].mxu1  ;;  %12142 = vmatmul.mubr.msk.f32.gmra.mrb[48].mxu0 %vm3413_vm6, %v2792_v45  ;;  %v1284_v45 = vld [vmem:[%s17118_s1 + $0x480] sm:$0xff] }
 0x36d   : > { %10577 = vmatprep.mubr.msk.f32.mxu1 %vm1740_vm4, %v1603_v44  ;;  %v10789_v46 = vld [vmem:[%s17121_s4 + $0x130] sm:$0xf] }
 0x36f   : > { %v2797_v57 = vpop.f32.mrb[184].mxu1 }
 0x370   : > { %3061 = vmatmul.mubr.f32.gmra.mrb[34].mxu1 %v1602_v40  ;;  %v2799_v0 = vpop.f32.mrb[185].mxu1  ;;  %12144 = vmatprep.mubr.msk.f32.mxu0 %vm3413_vm6, %v2797_v57  ;;  %v1626_v57 = vunpack.c.l.bf16 %v1283_v20  ;;  %v1294_v20 = vld [vmem:[%s17118_s1 + $0x4d0] sm:$0xff] }
 0x371   : > { %10578 = vmatprep.mubr.msk.f32.mxu1 %vm1740_vm4, %v1605_v21  ;;  %v10799_v21 = vld [vmem:[%s17121_s4 + $0x138] sm:$0xff]  ;;  %v1629_v0 = vunpack.c.h.bf16 %v1284_v45 }
 0x372   : > { %v14872_v62 = vpack.c.bf16 %v10800_v60, %v10799_v21 }
 0x373   : > { %v2802_v63 = vpop.f32.mrb[186].mxu1 }
 0x374   : > { %3066 = vmatmul.mubr.f32.gmra.mrb[36].mxu1 %v1604_v59  ;;  %v2804_v29 = vpop.f32.mrb[187].mxu1  ;;  %12145 = vmatmul.mubr.msk.f32.gmra.mrb[50].mxu0 %vm3413_vm6, %v2802_v63 }
 0x375   : > { %10579 = vmatprep.mubr.msk.f32.mxu1 %vm1740_vm4, %v1607_v47  ;;  %v1285_v47 = vld [vmem:[%s17118_s1 + $0x488] sm:$0xff] }
 0x377   : > { %v2807_v5 = vpop.f32.mrb[188].mxu1 }
 0x378   : > { %3071 = vmatmul.mubr.f32.gmra.mrb[38].mxu1 %v1606_v52  ;;  %v2809_v39 = vpop.f32.mrb[189].mxu1  ;;  %12153 = vmatprep.mubr.msk.f32.mxu0 %vm3413_vm6, %v2807_v5  ;;  %v1628_v52 = vunpack.c.l.bf16 %v1284_v45  ;;  %v1295_v45 = vld [vmem:[%s17118_s1 + $0x4d8] sm:$0xff] }
 0x379   : > { %10580 = vmatprep.mubr.msk.f32.mxu1 %vm1740_vm4, %v1609_v48  ;;  %v1631_v48 = vunpack.c.h.bf16 %v1285_v47  ;;  %v1651_v60 = vunpack.c.h.bf16 %v1295_v45 }
 0x37b   : > { %v2812_v17 = vpop.f32.mrb[190].mxu1 }
 0x37c   : > { %3076 = vmatmul.mubr.f32.gmra.mrb[40].mxu1 %v1608_v10  ;;  %v2814_v23 = vpop.f32.mrb[191].mxu1  ;;  %12154 = vmatmul.mubr.msk.f32.vlgmr.msra.gmra.mrb[44].mxu0 %vm3413_vm6, %v2812_v17  ;;  %v1630_v10 = vunpack.c.l.bf16 %v1285_v47 }
 0x37d   : > { %10581 = vmatprep.mubr.msk.f32.mxu1 %vm1740_vm4, %v1611_v27  ;;  %12501 = vmatpush3.bf16.msra.mxu0 %v14762_v41  ;;  %v1621_v41 = vunpack.c.h.bf16 %v1280_v14  ;;  %v1633_v27 = vunpack.c.h.bf16 %v1286_v49 }
 0x37e   : > { %12169 = vmatprep.subr.msk.mxu0 %vm3438_vm5, %v10777_v58 }
 0x37f   : > { %v2817_v11 = vpop.f32.mrb[192].mxu1 }
 0x380   : > { %3081 = vmatmul.mubr.f32.gmra.mrb[42].mxu1 %v1610_v54  ;;  %v2819_v4 = vpop.f32.mrb[193].mxu1  ;;  %12156 = vmatprep.mubr.msk.f32.mxu0 %vm3413_vm6, %v2817_v11  ;;  %v1288_v54 = vld [vmem:[%s17118_s1 + $0x4a0] sm:$0xff]  ;;  %v1289_v11 = vld [vmem:[%s17118_s1 + $0x4a8] sm:$0xff] }
 0x381   : > { %10582 = vmatprep.mubr.msk.f32.mxu1 %vm1740_vm4, %v1613_v30  ;;  %12170 = vmatpush3.msk.msra.mxu0 %vm3438_vm5, %v10777_v58  ;;  %v1632_v58 = vunpack.c.l.bf16 %v1286_v49  ;;  %v1634_v30 = vunpack.c.l.bf16 %v1287_v18  ;;  %v1636_v4 = vunpack.c.l.bf16 %v1288_v54  ;;  %v1639_v6 = vunpack.c.h.bf16 %v1289_v11 }
 0x382   : > { %12503 = vmatprep.subr.bf16.mxu0 %v14817_v34 }
 0x383   : > { %v2822_v22 = vpop.f32.mrb[194].mxu1 }
 0x384   : > { %3086 = vmatmul.mubr.f32.gmra.mrb[44].mxu1 %v1612_v53  ;;  %v2824_v16 = vpop.f32.mrb[195].mxu1  ;;  %12157 = vmatmul.mubr.msk.f32.gmra.mrb[46].mxu0 %vm3413_vm6, %v2822_v22  ;;  %v1290_v22 = vld [vmem:[%s17118_s1 + $0x4b0] sm:$0xff] }
 0x385   : > { %10583 = vmatprep.mubr.msk.f32.mxu1 %vm1740_vm4, %v1615_v24  ;;  %v1638_v16 = vunpack.c.l.bf16 %v1289_v11  ;;  %v1641_v32 = vunpack.c.h.bf16 %v1290_v22  ;;  %v10824_v11 = vld [vmem:[%s17121_s4 + $0x170] sm:$0xff] }
 0x387   : > { %v2827_v2 = vpop.f32.mrb[196].mxu1 }
 0x388   : > { %3091 = vmatmul.mubr.f32.gmra.mrb[46].mxu1 %v1614_v1  ;;  %v2829_v8 = vpop.f32.mrb[197].mxu1  ;;  %12159 = vmatprep.mubr.msk.f32.mxu0 %vm3413_vm6, %v2827_v2  ;;  %v1291_v2 = vld [vmem:[%s17118_s1 + $0x4b8] sm:$0xff] }
 0x389   : > { %10584 = vmatprep.mubr.msk.f32.mxu1 %vm1740_vm4, %v1617_v55  ;;  %v1640_v8 = vunpack.c.l.bf16 %v1290_v22  ;;  %v1643_v14 = vunpack.c.h.bf16 %v1291_v2 }
 0x38b   : > { %v2832_v33 = vpop.f32.mrb[198].mxu1 }
 0x38c   : > { %3096 = vmatmul.mubr.f32.gmra.mrb[48].mxu1 %v1616_v25  ;;  %v2834_v42 = vpop.f32.mrb[199].mxu1  ;;  %12160 = vmatmul.mubr.msk.f32.gmra.mrb[48].mxu0 %vm3413_vm6, %v2832_v33  ;;  %v1292_v33 = vld [vmem:[%s17118_s1 + $0x4c0] sm:$0xff] }
 0x38d   : > { %10585 = vmatprep.mubr.msk.f32.mxu1 %vm1740_vm4, %v1619_v28  ;;  %v10801_v42 = vld [vmem:[%s17121_s4 + $0x148] sm:$0xf] }
 0x38f   : > { %v2837_v51 = vpop.f32.mrb[200].mxu1 }
 0x390   : > { %3101 = vmatmul.mubr.f32.gmra.mrb[50].mxu1 %v1618_v50  ;;  %v2839_v43 = vpop.f32.mrb[201].mxu1  ;;  %12162 = vmatprep.mubr.msk.f32.mxu0 %vm3413_vm6, %v2837_v51  ;;  %v1642_v51 = vunpack.c.l.bf16 %v1291_v2  ;;  %v1302_v2 = vld [vmem:[%s17118_s1 + $0x510] sm:$0xff] }
 0x391   : > { %10586 = vmatprep.mubr.msk.f32.mxu1 %vm1740_vm4, %v1621_v41  ;;  %v10811_v41 = vld [vmem:[%s17121_s4 + $0x150] sm:$0xff]  ;;  %v1645_v43 = vunpack.c.h.bf16 %v1292_v33 }
 0x392   : > { %v14927_v12 = vpack.c.bf16 %v10812_v37, %v10811_v41 }
 0x393   : > { %v2842_v13 = vpop.f32.mrb[202].mxu1 }
 0x394   : > { %3106 = vmatmul.mubr.f32.gmra.mrb[52].mxu1 %v1620_v31  ;;  %v2844_v19 = vpop.f32.mrb[203].mxu1  ;;  %12163 = vmatmul.mubr.msk.f32.gmra.mrb[50].mxu0 %vm3413_vm6, %v2842_v13 }
 0x395   : > { %10587 = vmatprep.mubr.msk.f32.mxu1 %vm1740_vm4, %v1623_v61  ;;  %v1293_v61 = vld [vmem:[%s17118_s1 + $0x4c8] sm:$0xff] }
 0x397   : > { %v2847_v15 = vpop.f32.mrb[204].mxu1 }
 0x398   : > { %3111 = vmatmul.mubr.f32.gmra.mrb[54].mxu1 %v1622_v35  ;;  %v2849_v44 = vpop.f32.mrb[205].mxu1  ;;  %12171 = vmatprep.mubr.msk.f32.mxu0 %vm3413_vm6, %v2847_v15  ;;  %v1644_v35 = vunpack.c.l.bf16 %v1292_v33  ;;  %v1303_v33 = vld [vmem:[%s17118_s1 + $0x518] sm:$0xff] }
 0x399   : > { %10588 = vmatprep.mubr.msk.f32.mxu1 %vm1740_vm4, %v1625_v26  ;;  %v1647_v26 = vunpack.c.h.bf16 %v1293_v61  ;;  %v1667_v37 = vunpack.c.h.bf16 %v1303_v33 }
 0x39b   : > { %v2852_v40 = vpop.f32.mrb[206].mxu1 }
 0x39c   : > { %3116 = vmatmul.mubr.f32.gmra.mrb[56].mxu1 %v1624_v9  ;;  %v2854_v59 = vpop.f32.mrb[207].mxu1  ;;  %12172 = vmatmul.mubr.msk.f32.vlgmr.msra.gmra.mrb[44].mxu0 %vm3413_vm6, %v2852_v40  ;;  %v1646_v9 = vunpack.c.l.bf16 %v1293_v61 }
 0x39d   : > { %10589 = vmatprep.mubr.msk.f32.mxu1 %vm1740_vm4, %v1627_v38  ;;  %12505 = vmatpush3.bf16.msra.mxu0 %v14817_v34  ;;  %v1637_v34 = vunpack.c.h.bf16 %v1288_v54  ;;  %v1649_v38 = vunpack.c.h.bf16 %v1294_v20 }
 0x39e   : > { %12187 = vmatprep.subr.msk.mxu0 %vm3438_vm5, %v10789_v46 }
 0x39f   : > { %v2857_v63 = vpop.f32.mrb[208].mxu1 }
 0x3a0   : > { %3121 = vmatmul.mubr.f32.gmra.mrb[58].mxu1 %v1626_v57  ;;  %v2859_v29 = vpop.f32.mrb[209].mxu1  ;;  %12174 = vmatprep.mubr.msk.f32.mxu0 %vm3413_vm6, %v2857_v63  ;;  %v1296_v57 = vld [vmem:[%s17118_s1 + $0x4e0] sm:$0xff]  ;;  %v1297_v63 = vld [vmem:[%s17118_s1 + $0x4e8] sm:$0xff] }
 0x3a1   : > { %10590 = vmatprep.mubr.msk.f32.mxu1 %vm1740_vm4, %v1629_v0  ;;  %12188 = vmatpush3.msk.msra.mxu0 %vm3438_vm5, %v10789_v46  ;;  %v1648_v46 = vunpack.c.l.bf16 %v1294_v20  ;;  %v1650_v0 = vunpack.c.l.bf16 %v1295_v45  ;;  %v1652_v29 = vunpack.c.l.bf16 %v1296_v57  ;;  %v1655_v49 = vunpack.c.h.bf16 %v1297_v63 }
 0x3a2   : > { %12507 = vmatprep.subr.bf16.mxu0 %v14872_v62 }
 0x3a3   : > { %v2862_v5 = vpop.f32.mrb[210].mxu1 }
 0x3a4   : > { %3126 = vmatmul.mubr.f32.gmra.mrb[60].mxu1 %v1628_v52  ;;  %v2864_v39 = vpop.f32.mrb[211].mxu1  ;;  %12175 = vmatmul.mubr.msk.f32.gmra.mrb[46].mxu0 %vm3413_vm6, %v2862_v5  ;;  %v1298_v5 = vld [vmem:[%s17118_s1 + $0x4f0] sm:$0xff] }
 0x3a5   : > { %10591 = vmatprep.mubr.msk.f32.mxu1 %vm1740_vm4, %v1631_v48  ;;  %v1654_v39 = vunpack.c.l.bf16 %v1297_v63  ;;  %v1657_v18 = vunpack.c.h.bf16 %v1298_v5  ;;  %v10836_v63 = vld [vmem:[%s17121_s4 + $0x188] sm:$0xff] }
 0x3a7   : > { %v2867_v17 = vpop.f32.mrb[212].mxu1 }
 0x3a8   : > { %3131 = vmatmul.mubr.f32.gmra.mrb[62].mxu1 %v1630_v10  ;;  %v2869_v3 = vpop.f32.mrb[213].mxu1  ;;  %12177 = vmatprep.mubr.msk.f32.mxu0 %vm3413_vm6, %v2867_v17  ;;  %v1299_v17 = vld [vmem:[%s17118_s1 + $0x4f8] sm:$0xff] }
 0x3a9   : > { %10592 = vmatprep.mubr.msk.f32.mxu1 %vm1740_vm4, %v1633_v27  ;;  %v1656_v3 = vunpack.c.l.bf16 %v1298_v5  ;;  %v1659_v54 = vunpack.c.h.bf16 %v1299_v17 }
 0x3ab   : > { %v2872_v23 = vpop.f32.mrb[214].mxu1 }
 0x3ac   : > { %3136 = vmatmul.mubr.f32.gmra.mrb[64].mxu1 %v1632_v58  ;;  %v2874_v56 = vpop.f32.mrb[215].mxu1  ;;  %12178 = vmatmul.mubr.msk.f32.gmra.mrb[48].mxu0 %vm3413_vm6, %v2872_v23  ;;  %v1300_v23 = vld [vmem:[%s17118_s1 + $0x500] sm:$0xff] }
 0x3ad   : > { %10593 = vmatprep.mubr.msk.f32.mxu1 %vm1740_vm4, %v1635_v36  ;;  %v10813_v56 = vld [vmem:[%s17121_s4 + $0x160] sm:$0xf] }
 0x3af   : > { %v2877_v53 = vpop.f32.mrb[216].mxu1 }
 0x3b0   : > { %3141 = vmatmul.mubr.f32.gmra.mrb[66].mxu1 %v1634_v30  ;;  %v2879_v24 = vpop.f32.mrb[217].mxu1  ;;  %12180 = vmatprep.mubr.msk.f32.mxu0 %vm3413_vm6, %v2877_v53  ;;  %v1658_v53 = vunpack.c.l.bf16 %v1299_v17  ;;  %v1310_v17 = vld [vmem:[%s17118_s1 + $0x550] sm:$0xff] }
 0x3b1   : > { %10594 = vmatprep.mubr.msk.f32.mxu1 %vm1740_vm4, %v1637_v34  ;;  %v10823_v34 = vld [vmem:[%s17121_s4 + $0x168] sm:$0xff]  ;;  %v1661_v24 = vunpack.c.h.bf16 %v1300_v23 }
 0x3b2   : > { %v14982_v22 = vpack.c.bf16 %v10824_v11, %v10823_v34 }
 0x3b3   : > { %v2882_v1 = vpop.f32.mrb[218].mxu1 }
 0x3b4   : > { %3146 = vmatmul.mubr.f32.gmra.mrb[68].mxu1 %v1636_v4  ;;  %v2884_v55 = vpop.f32.mrb[219].mxu1  ;;  %12181 = vmatmul.mubr.msk.f32.gmra.mrb[50].mxu0 %vm3413_vm6, %v2882_v1 }
 0x3b5   : > { %10595 = vmatprep.mubr.msk.f32.mxu1 %vm1740_vm4, %v1639_v6  ;;  %v1301_v6 = vld [vmem:[%s17118_s1 + $0x508] sm:$0xff] }
 0x3b7   : > { %v2887_v25 = vpop.f32.mrb[220].mxu1 }
 0x3b8   : > { %3151 = vmatmul.mubr.f32.gmra.mrb[70].mxu1 %v1638_v16  ;;  %v2889_v28 = vpop.f32.mrb[221].mxu1  ;;  %12189 = vmatprep.mubr.msk.f32.mxu0 %vm3413_vm6, %v2887_v25  ;;  %v1660_v16 = vunpack.c.l.bf16 %v1300_v23  ;;  %v1311_v23 = vld [vmem:[%s17118_s1 + $0x558] sm:$0xff] }
 0x3b9   : > { %10596 = vmatprep.mubr.msk.f32.mxu1 %vm1740_vm4, %v1641_v32  ;;  %v1663_v32 = vunpack.c.h.bf16 %v1301_v6  ;;  %v1683_v11 = vunpack.c.h.bf16 %v1311_v23 }
 0x3bb   : > { %v2892_v50 = vpop.f32.mrb[222].mxu1 }
 0x3bc   : > { %3156 = vmatmul.mubr.f32.gmra.mrb[72].mxu1 %v1640_v8  ;;  %v2894_v31 = vpop.f32.mrb[223].mxu1  ;;  %12190 = vmatmul.mubr.msk.f32.vlgmr.msra.gmra.mrb[44].mxu0 %vm3413_vm6, %v2892_v50  ;;  %v1662_v8 = vunpack.c.l.bf16 %v1301_v6 }
 0x3bd   : > { %10597 = vmatprep.mubr.msk.f32.mxu1 %vm1740_vm4, %v1643_v14  ;;  %12509 = vmatpush3.bf16.msra.mxu0 %v14872_v62  ;;  %v1653_v62 = vunpack.c.h.bf16 %v1296_v57  ;;  %v1665_v14 = vunpack.c.h.bf16 %v1302_v2 }
 0x3be   : > { %12205 = vmatprep.subr.msk.mxu0 %vm3438_vm5, %v10801_v42 }
 0x3bf   : > { %v2897_v13 = vpop.f32.mrb[224].mxu1 }
 0x3c0   : > { %3161 = vmatmul.mubr.f32.gmra.mrb[74].mxu1 %v1642_v51  ;;  %v2899_v19 = vpop.f32.mrb[225].mxu1  ;;  %12192 = vmatprep.mubr.msk.f32.mxu0 %vm3413_vm6, %v2897_v13  ;;  %v1304_v51 = vld [vmem:[%s17118_s1 + $0x520] sm:$0xff]  ;;  %v1305_v13 = vld [vmem:[%s17118_s1 + $0x528] sm:$0xff] }
 0x3c1   : > { %10598 = vmatprep.mubr.msk.f32.mxu1 %vm1740_vm4, %v1645_v43  ;;  %12206 = vmatpush3.msk.msra.mxu0 %vm3438_vm5, %v10801_v42  ;;  %v1664_v42 = vunpack.c.l.bf16 %v1302_v2  ;;  %v1666_v43 = vunpack.c.l.bf16 %v1303_v33  ;;  %v1668_v19 = vunpack.c.l.bf16 %v1304_v51  ;;  %v1671_v20 = vunpack.c.h.bf16 %v1305_v13 }
 0x3c2   : > { %12511 = vmatprep.subr.bf16.mxu0 %v14927_v12 }
 0x3c3   : > { %v2902_v15 = vpop.f32.mrb[226].mxu1 }
 0x3c4   : > { %3166 = vmatmul.mubr.f32.gmra.mrb[76].mxu1 %v1644_v35  ;;  %v2904_v44 = vpop.f32.mrb[227].mxu1  ;;  %12193 = vmatmul.mubr.msk.f32.gmra.mrb[46].mxu0 %vm3413_vm6, %v2902_v15  ;;  %v1306_v15 = vld [vmem:[%s17118_s1 + $0x530] sm:$0xff] }
 0x3c5   : > { %10599 = vmatprep.mubr.msk.f32.mxu1 %vm1740_vm4, %v1647_v26  ;;  %v1670_v44 = vunpack.c.l.bf16 %v1305_v13  ;;  %v1673_v45 = vunpack.c.h.bf16 %v1306_v15  ;;  %v10848_v13 = vld [vmem:[%s17121_s4 + $0x1a0] sm:$0xff] }
 0x3c7   : > { %v2907_v40 = vpop.f32.mrb[228].mxu1 }
 0x3c8   : > { %3171 = vmatmul.mubr.f32.gmra.mrb[78].mxu1 %v1646_v9  ;;  %v2909_v21 = vpop.f32.mrb[229].mxu1  ;;  %12195 = vmatprep.mubr.msk.f32.mxu0 %vm3413_vm6, %v2907_v40  ;;  %v1307_v40 = vld [vmem:[%s17118_s1 + $0x538] sm:$0xff] }
 0x3c9   : > { %10600 = vmatprep.mubr.msk.f32.mxu1 %vm1740_vm4, %v1649_v38  ;;  %v1672_v21 = vunpack.c.l.bf16 %v1306_v15  ;;  %v1675_v57 = vunpack.c.h.bf16 %v1307_v40 }
 0x3cb   : > { %v2912_v59 = vpop.f32.mrb[230].mxu1 }
 0x3cc   : > { %3176 = vmatmul.mubr.f32.gmra.mrb[80].mxu1 %v1648_v46  ;;  %v2914_v47 = vpop.f32.mrb[231].mxu1  ;;  %12196 = vmatmul.mubr.msk.f32.gmra.mrb[48].mxu0 %vm3413_vm6, %v2912_v59  ;;  %v1308_v59 = vld [vmem:[%s17118_s1 + $0x540] sm:$0xff] }
 0x3cd   : > { %10601 = vmatprep.mubr.msk.f32.mxu1 %vm1740_vm4, %v1651_v60  ;;  %v10825_v47 = vld [vmem:[%s17121_s4 + $0x178] sm:$0xf] }
 0x3cf   : > { %v2917_v52 = vpop.f32.mrb[232].mxu1 }
 0x3d0   : > { %3181 = vmatmul.mubr.f32.gmra.mrb[82].mxu1 %v1650_v0  ;;  %v2919_v48 = vpop.f32.mrb[233].mxu1  ;;  %12198 = vmatprep.mubr.msk.f32.mxu0 %vm3413_vm6, %v2917_v52  ;;  %v1674_v52 = vunpack.c.l.bf16 %v1307_v40  ;;  %v1318_v40 = vld [vmem:[%s17118_s1 + $0x590] sm:$0xff] }
 0x3d1   : > { %10602 = vmatprep.mubr.msk.f32.mxu1 %vm1740_vm4, %v1653_v62  ;;  %v10835_v62 = vld [vmem:[%s17121_s4 + $0x180] sm:$0xff]  ;;  %v1677_v48 = vunpack.c.h.bf16 %v1308_v59 }
 0x3d2   : > { %v15037_v5 = vpack.c.bf16 %v10836_v63, %v10835_v62 }
 0x3d3   : > { %v2922_v10 = vpop.f32.mrb[234].mxu1 }
 0x3d4   : > { %3186 = vmatmul.mubr.f32.gmra.mrb[84].mxu1 %v1652_v29  ;;  %v2924_v27 = vpop.f32.mrb[235].mxu1  ;;  %12199 = vmatmul.mubr.msk.f32.gmra.mrb[50].mxu0 %vm3413_vm6, %v2922_v10 }
 0x3d5   : > { %10603 = vmatprep.mubr.msk.f32.mxu1 %vm1740_vm4, %v1655_v49  ;;  %v1309_v49 = vld [vmem:[%s17118_s1 + $0x548] sm:$0xff] }
 0x3d7   : > { %v2927_v58 = vpop.f32.mrb[236].mxu1 }
 0x3d8   : > { %3191 = vmatmul.mubr.f32.gmra.mrb[86].mxu1 %v1654_v39  ;;  %v2929_v36 = vpop.f32.mrb[237].mxu1  ;;  %12207 = vmatprep.mubr.msk.f32.mxu0 %vm3413_vm6, %v2927_v58  ;;  %v1676_v39 = vunpack.c.l.bf16 %v1308_v59  ;;  %v1319_v59 = vld [vmem:[%s17118_s1 + $0x598] sm:$0xff] }
 0x3d9   : > { %10604 = vmatprep.mubr.msk.f32.mxu1 %vm1740_vm4, %v1657_v18  ;;  %v1679_v18 = vunpack.c.h.bf16 %v1309_v49  ;;  %v1699_v63 = vunpack.c.h.bf16 %v1319_v59 }
 0x3db   : > { %v2932_v30 = vpop.f32.mrb[238].mxu1 }
 0x3dc   : > { %3196 = vmatmul.mubr.f32.gmra.mrb[88].mxu1 %v1656_v3  ;;  %v2934_v4 = vpop.f32.mrb[239].mxu1  ;;  %12208 = vmatmul.mubr.msk.f32.vlgmr.msra.gmra.mrb[44].mxu0 %vm3413_vm6, %v2932_v30  ;;  %v1678_v3 = vunpack.c.l.bf16 %v1309_v49 }
 0x3dd   : > { %10605 = vmatprep.mubr.msk.f32.mxu1 %vm1740_vm4, %v1659_v54  ;;  %12513 = vmatpush3.bf16.msra.mxu0 %v14927_v12  ;;  %v1669_v12 = vunpack.c.h.bf16 %v1304_v51  ;;  %v1681_v54 = vunpack.c.h.bf16 %v1310_v17 }
 0x3de   : > { %12223 = vmatprep.subr.msk.mxu0 %vm3438_vm5, %v10813_v56 }
 0x3df   : > { %v2937_v1 = vpop.f32.mrb[240].mxu1 }
 0x3e0   : > { %3201 = vmatmul.mubr.f32.gmra.mrb[90].mxu1 %v1658_v53  ;;  %v2939_v55 = vpop.f32.mrb[241].mxu1  ;;  %12210 = vmatprep.mubr.msk.f32.mxu0 %vm3413_vm6, %v2937_v1  ;;  %v1312_v53 = vld [vmem:[%s17118_s1 + $0x560] sm:$0xff]  ;;  %v1313_v1 = vld [vmem:[%s17118_s1 + $0x568] sm:$0xff] }
 0x3e1   : > { %10606 = vmatprep.mubr.msk.f32.mxu1 %vm1740_vm4, %v1661_v24  ;;  %12224 = vmatpush3.msk.msra.mxu0 %vm3438_vm5, %v10813_v56  ;;  %v1680_v56 = vunpack.c.l.bf16 %v1310_v17  ;;  %v1682_v24 = vunpack.c.l.bf16 %v1311_v23  ;;  %v1684_v55 = vunpack.c.l.bf16 %v1312_v53  ;;  %v1687_v2 = vunpack.c.h.bf16 %v1313_v1 }
 0x3e2   : > { %12515 = vmatprep.subr.bf16.mxu0 %v14982_v22 }
 0x3e3   : > { %v2942_v25 = vpop.f32.mrb[242].mxu1 }
 0x3e4   : > { %3206 = vmatmul.mubr.f32.gmra.mrb[92].mxu1 %v1660_v16  ;;  %v2944_v28 = vpop.f32.mrb[243].mxu1  ;;  %12211 = vmatmul.mubr.msk.f32.gmra.mrb[46].mxu0 %vm3413_vm6, %v2942_v25  ;;  %v1314_v25 = vld [vmem:[%s17118_s1 + $0x570] sm:$0xff] }
 0x3e5   : > { %10607 = vmatprep.mubr.msk.f32.mxu1 %vm1740_vm4, %v1663_v32  ;;  %v1686_v28 = vunpack.c.l.bf16 %v1313_v1  ;;  %v1689_v33 = vunpack.c.h.bf16 %v1314_v25  ;;  %v10860_v1 = vld [vmem:[%s17121_s4 + $0x1b8] sm:$0xff] }
 0x3e7   : > { %v2947_v50 = vpop.f32.mrb[244].mxu1 }
 0x3e8   : > { %3211 = vmatmul.mubr.f32.gmra.mrb[94].mxu1 %v1662_v8  ;;  %v2949_v41 = vpop.f32.mrb[245].mxu1  ;;  %12213 = vmatprep.mubr.msk.f32.mxu0 %vm3413_vm6, %v2947_v50  ;;  %v1315_v50 = vld [vmem:[%s17118_s1 + $0x578] sm:$0xff] }
 0x3e9   : > { %10608 = vmatprep.mubr.msk.f32.mxu1 %vm1740_vm4, %v1665_v14  ;;  %v1688_v41 = vunpack.c.l.bf16 %v1314_v25  ;;  %v1691_v51 = vunpack.c.h.bf16 %v1315_v50 }
 0x3eb   : > { %v2952_v31 = vpop.f32.mrb[246].mxu1 }
 0x3ec   : > { %3216 = vmatmul.mubr.f32.gmra.mrb[96].mxu1 %v1664_v42  ;;  %v2954_v61 = vpop.f32.mrb[247].mxu1  ;;  %12214 = vmatmul.mubr.msk.f32.gmra.mrb[48].mxu0 %vm3413_vm6, %v2952_v31  ;;  %v1316_v31 = vld [vmem:[%s17118_s1 + $0x580] sm:$0xff] }
 0x3ed   : > { %10609 = vmatprep.mubr.msk.f32.mxu1 %vm1740_vm4, %v1667_v37  ;;  %v10837_v61 = vld [vmem:[%s17121_s4 + $0x190] sm:$0xf] }
 0x3ef   : > { %v2957_v35 = vpop.f32.mrb[248].mxu1 }
 0x3f0   : > { %3221 = vmatmul.mubr.f32.gmra.mrb[98].mxu1 %v1666_v43  ;;  %v2959_v26 = vpop.f32.mrb[249].mxu1  ;;  %12216 = vmatprep.mubr.msk.f32.mxu0 %vm3413_vm6, %v2957_v35  ;;  %v1690_v35 = vunpack.c.l.bf16 %v1315_v50  ;;  %v1326_v50 = vld [vmem:[%s17118_s1 + $0x5d0] sm:$0xff] }
 0x3f1   : > { %10610 = vmatprep.mubr.msk.f32.mxu1 %vm1740_vm4, %v1669_v12  ;;  %v10847_v12 = vld [vmem:[%s17121_s4 + $0x198] sm:$0xff]  ;;  %v1693_v26 = vunpack.c.h.bf16 %v1316_v31 }
 0x3f2   : > { %v15092_v15 = vpack.c.bf16 %v10848_v13, %v10847_v12 }
 0x3f3   : > { %v2962_v9 = vpop.f32.mrb[250].mxu1 }
 0x3f4   : > { %3226 = vmatmul.mubr.f32.gmra.mrb[100].mxu1 %v1668_v19  ;;  %v2964_v38 = vpop.f32.mrb[251].mxu1  ;;  %12217 = vmatmul.mubr.msk.f32.gmra.mrb[50].mxu0 %vm3413_vm6, %v2962_v9 }
 0x3f5   : > { %10611 = vmatprep.mubr.msk.f32.mxu1 %vm1740_vm4, %v1671_v20  ;;  %v1317_v20 = vld [vmem:[%s17118_s1 + $0x588] sm:$0xff] }
 0x3f7   : > { %v2967_v46 = vpop.f32.mrb[252].mxu1 }
 0x3f8   : > { %3231 = vmatmul.mubr.f32.gmra.mrb[102].mxu1 %v1670_v44  ;;  %v2969_v60 = vpop.f32.mrb[253].mxu1  ;;  %12225 = vmatprep.mubr.msk.f32.mxu0 %vm3413_vm6, %v2967_v46  ;;  %v1692_v44 = vunpack.c.l.bf16 %v1316_v31  ;;  %v1327_v31 = vld [vmem:[%s17118_s1 + $0x5d8] sm:$0xff] }
 0x3f9   : > { %10612 = vmatprep.mubr.msk.f32.mxu1 %vm1740_vm4, %v1673_v45  ;;  %v1695_v45 = vunpack.c.h.bf16 %v1317_v20  ;;  %v1715_v13 = vunpack.c.h.bf16 %v1327_v31 }
 0x3fb   : > { %v2972_v0 = vpop.f32.mrb[254].mxu1 }
 0x3fc   : > { %3236 = vmatmul.mubr.f32.gmra.mrb[104].mxu1 %v1672_v21  ;;  %v2974_v29 = vpop.f32.mrb[255].mxu1  ;;  %12226 = vmatmul.mubr.msk.f32.vlgmr.msra.gmra.mrb[44].mxu0 %vm3413_vm6, %v2972_v0  ;;  %v1694_v21 = vunpack.c.l.bf16 %v1317_v20 }
 0x3fd   : > { %10613 = vmatprep.mubr.msk.f32.mxu1 %vm1740_vm4, %v1675_v57  ;;  %12517 = vmatpush3.bf16.msra.mxu0 %v14982_v22  ;;  %v1685_v22 = vunpack.c.h.bf16 %v1312_v53  ;;  %v1697_v57 = vunpack.c.h.bf16 %v1318_v40 }
 0x3fe   : > { %12241 = vmatprep.subr.msk.mxu0 %vm3438_vm5, %v10825_v47 }
 0x3ff   : > { %v2977_v10 = vpop.f32.mrb[0].mxu1 }
 0x400   : > { %3241 = vmatmul.mubr.f32.gmra.mrb[106].mxu1 %v1674_v52  ;;  %v2979_v27 = vpop.f32.mrb[1].mxu1  ;;  %12228 = vmatprep.mubr.msk.f32.mxu0 %vm3413_vm6, %v2977_v10  ;;  %v1320_v52 = vld [vmem:[%s17118_s1 + $0x5a0] sm:$0xff]  ;;  %v1321_v10 = vld [vmem:[%s17118_s1 + $0x5a8] sm:$0xff] }
 0x401   : > { %10614 = vmatprep.mubr.msk.f32.mxu1 %vm1740_vm4, %v1677_v48  ;;  %12242 = vmatpush3.msk.msra.mxu0 %vm3438_vm5, %v10825_v47  ;;  %v1696_v47 = vunpack.c.l.bf16 %v1318_v40  ;;  %v1698_v48 = vunpack.c.l.bf16 %v1319_v59  ;;  %v1700_v27 = vunpack.c.l.bf16 %v1320_v52  ;;  %v1703_v17 = vunpack.c.h.bf16 %v1321_v10 }
 0x402   : > { %12519 = vmatprep.subr.bf16.mxu0 %v15037_v5 }
 0x403   : > { %v2982_v58 = vpop.f32.mrb[2].mxu1 }
 0x404   : > { %3246 = vmatmul.mubr.f32.gmra.mrb[108].mxu1 %v1676_v39  ;;  %v2984_v36 = vpop.f32.mrb[3].mxu1  ;;  %12229 = vmatmul.mubr.msk.f32.gmra.mrb[46].mxu0 %vm3413_vm6, %v2982_v58  ;;  %v1322_v58 = vld [vmem:[%s17118_s1 + $0x5b0] sm:$0xff] }
 0x405   : > { %10615 = vmatprep.mubr.msk.f32.mxu1 %vm1740_vm4, %v1679_v18  ;;  %v1702_v36 = vunpack.c.l.bf16 %v1321_v10  ;;  %v1705_v23 = vunpack.c.h.bf16 %v1322_v58  ;;  %v10872_v10 = vld [vmem:[%s17121_s4 + $0x1d0] sm:$0xff] }
 0x407   : > { %v2987_v30 = vpop.f32.mrb[4].mxu1 }
 0x408   : > { %3251 = vmatmul.mubr.f32.gmra.mrb[110].mxu1 %v1678_v3  ;;  %v2989_v34 = vpop.f32.mrb[5].mxu1  ;;  %12231 = vmatprep.mubr.msk.f32.mxu0 %vm3413_vm6, %v2987_v30  ;;  %v1323_v30 = vld [vmem:[%s17118_s1 + $0x5b8] sm:$0xff] }
 0x409   : > { %10616 = vmatprep.mubr.msk.f32.mxu1 %vm1740_vm4, %v1681_v54  ;;  %v1704_v34 = vunpack.c.l.bf16 %v1322_v58  ;;  %v1707_v53 = vunpack.c.h.bf16 %v1323_v30 }
 0x40b   : > { %v2992_v4 = vpop.f32.mrb[6].mxu1 }
 0x40c   : > { %3256 = vmatmul.mubr.f32.gmra.mrb[112].mxu1 %v1680_v56  ;;  %v2994_v6 = vpop.f32.mrb[7].mxu1  ;;  %12232 = vmatmul.mubr.msk.f32.gmra.mrb[48].mxu0 %vm3413_vm6, %v2992_v4  ;;  %v1324_v4 = vld [vmem:[%s17118_s1 + $0x5c0] sm:$0xff] }
 0x40d   : > { %10617 = vmatprep.mubr.msk.f32.mxu1 %vm1740_vm4, %v1683_v11  ;;  %v10849_v6 = vld [vmem:[%s17121_s4 + $0x1a8] sm:$0xf] }
 0x40f   : > { %v2997_v16 = vpop.f32.mrb[8].mxu1 }
 0x410   : > { %3261 = vmatmul.mubr.f32.gmra.mrb[114].mxu1 %v1682_v24  ;;  %v2999_v32 = vpop.f32.mrb[9].mxu1  ;;  %12234 = vmatprep.mubr.msk.f32.mxu0 %vm3413_vm6, %v2997_v16  ;;  %v1706_v16 = vunpack.c.l.bf16 %v1323_v30  ;;  %v1334_v30 = vld [vmem:[%s17118_s1 + $0x610] sm:$0xff] }
 0x411   : > { %10618 = vmatprep.mubr.msk.f32.mxu1 %vm1740_vm4, %v1685_v22  ;;  %v10859_v22 = vld [vmem:[%s17121_s4 + $0x1b0] sm:$0xff]  ;;  %v1709_v32 = vunpack.c.h.bf16 %v1324_v4 }
 0x412   : > { %v15147_v25 = vpack.c.bf16 %v10860_v1, %v10859_v22 }
 0x413   : > { %v3002_v8 = vpop.f32.mrb[10].mxu1 }
 0x414   : > { %3266 = vmatmul.mubr.f32.gmra.mrb[116].mxu1 %v1684_v55  ;;  %v3004_v14 = vpop.f32.mrb[11].mxu1  ;;  %12235 = vmatmul.mubr.msk.f32.gmra.mrb[50].mxu0 %vm3413_vm6, %v3002_v8 }
 0x415   : > { %10619 = vmatprep.mubr.msk.f32.mxu1 %vm1740_vm4, %v1687_v2  ;;  %v1325_v2 = vld [vmem:[%s17118_s1 + $0x5c8] sm:$0xff] }
 0x417   : > { %v3007_v42 = vpop.f32.mrb[12].mxu1 }
 0x418   : > { %3271 = vmatmul.mubr.f32.gmra.mrb[118].mxu1 %v1686_v28  ;;  %v3009_v37 = vpop.f32.mrb[13].mxu1  ;;  %12243 = vmatprep.mubr.msk.f32.mxu0 %vm3413_vm6, %v3007_v42  ;;  %v1708_v28 = vunpack.c.l.bf16 %v1324_v4  ;;  %v1335_v4 = vld [vmem:[%s17118_s1 + $0x618] sm:$0xff] }
 0x419   : > { %10620 = vmatprep.mubr.msk.f32.mxu1 %vm1740_vm4, %v1689_v33  ;;  %v1711_v33 = vunpack.c.h.bf16 %v1325_v2  ;;  %v1731_v1 = vunpack.c.h.bf16 %v1335_v4 }
 0x41b   : > { %v3012_v43 = vpop.f32.mrb[14].mxu1 }
 0x41c   : > { %3276 = vmatmul.mubr.f32.gmra.mrb[120].mxu1 %v1688_v41  ;;  %v3014_v19 = vpop.f32.mrb[15].mxu1  ;;  %12244 = vmatmul.mubr.msk.f32.vlgmr.msra.gmra.mrb[44].mxu0 %vm3413_vm6, %v3012_v43  ;;  %v1710_v41 = vunpack.c.l.bf16 %v1325_v2 }
 0x41d   : > { %10621 = vmatprep.mubr.msk.f32.mxu1 %vm1740_vm4, %v1691_v51  ;;  %12521 = vmatpush3.bf16.msra.mxu0 %v15037_v5  ;;  %v1701_v5 = vunpack.c.h.bf16 %v1320_v52  ;;  %v1713_v51 = vunpack.c.h.bf16 %v1326_v50 }
 0x41e   : > { %12259 = vmatprep.subr.msk.mxu0 %vm3438_vm5, %v10837_v61 }
 0x41f   : > { %v3017_v9 = vpop.f32.mrb[16].mxu1 }
 0x420   : > { %3281 = vmatmul.mubr.f32.gmra.mrb[122].mxu1 %v1690_v35  ;;  %v3019_v38 = vpop.f32.mrb[17].mxu1  ;;  %12246 = vmatprep.mubr.msk.f32.mxu0 %vm3413_vm6, %v3017_v9  ;;  %v1328_v35 = vld [vmem:[%s17118_s1 + $0x5e0] sm:$0xff]  ;;  %v1329_v9 = vld [vmem:[%s17118_s1 + $0x5e8] sm:$0xff] }
 0x421   : > { %10622 = vmatprep.mubr.msk.f32.mxu1 %vm1740_vm4, %v1693_v26  ;;  %12260 = vmatpush3.msk.msra.mxu0 %vm3438_vm5, %v10837_v61  ;;  %v1712_v61 = vunpack.c.l.bf16 %v1326_v50  ;;  %v1714_v26 = vunpack.c.l.bf16 %v1327_v31  ;;  %v1716_v38 = vunpack.c.l.bf16 %v1328_v35  ;;  %v1719_v40 = vunpack.c.h.bf16 %v1329_v9 }
 0x422   : > { %12523 = vmatprep.subr.bf16.mxu0 %v15092_v15 }
 0x423   : > { %v3022_v46 = vpop.f32.mrb[18].mxu1 }
 0x424   : > { %3286 = vmatmul.mubr.f32.gmra.mrb[124].mxu1 %v1692_v44  ;;  %v3024_v60 = vpop.f32.mrb[19].mxu1  ;;  %12247 = vmatmul.mubr.msk.f32.gmra.mrb[46].mxu0 %vm3413_vm6, %v3022_v46  ;;  %v1330_v46 = vld [vmem:[%s17118_s1 + $0x5f0] sm:$0xff] }
 0x425   : > { %10623 = vmatprep.mubr.msk.f32.mxu1 %vm1740_vm4, %v1695_v45  ;;  %v1718_v60 = vunpack.c.l.bf16 %v1329_v9  ;;  %v1721_v59 = vunpack.c.h.bf16 %v1330_v46 }
 0x427   : > { %v3027_v0 = vpop.f32.mrb[20].mxu1 }
 0x428   : > { %3291 = vmatmul.mubr.f32.gmra.mrb[126].mxu1 %v1694_v21  ;;  %v3029_v62 = vpop.f32.mrb[21].mxu1  ;;  %12249 = vmatprep.mubr.msk.f32.mxu0 %vm3413_vm6, %v3027_v0  ;;  %v1331_v0 = vld [vmem:[%s17118_s1 + $0x5f8] sm:$0xff] }
 0x429   : > { %10624 = vmatprep.mubr.msk.f32.mxu1 %vm1740_vm4, %v1697_v57  ;;  %v1720_v62 = vunpack.c.l.bf16 %v1330_v46  ;;  %v1723_v52 = vunpack.c.h.bf16 %v1331_v0 }
 0x42b   : > { %v3032_v29 = vpop.f32.mrb[22].mxu1 }
 0x42c   : > { %3296 = vmatmul.mubr.f32.gmra.mrb[128].mxu1 %v1696_v47  ;;  %v3034_v49 = vpop.f32.mrb[23].mxu1  ;;  %12250 = vmatmul.mubr.msk.f32.gmra.mrb[48].mxu0 %vm3413_vm6, %v3032_v29  ;;  %v1332_v29 = vld [vmem:[%s17118_s1 + $0x600] sm:$0xff] }
 0x42d   : > { %10625 = vmatprep.mubr.msk.f32.mxu1 %vm1740_vm4, %v1699_v63  ;;  %v10861_v49 = vld [vmem:[%s17121_s4 + $0x1c0] sm:$0xf] }
 0x42f   : > { %v3037_v39 = vpop.f32.mrb[24].mxu1 }
 0x430   : > { %3301 = vmatmul.mubr.f32.gmra.mrb[130].mxu1 %v1698_v48  ;;  %v3039_v18 = vpop.f32.mrb[25].mxu1  ;;  %12252 = vmatprep.mubr.msk.f32.mxu0 %vm3413_vm6, %v3037_v39  ;;  %v1722_v39 = vunpack.c.l.bf16 %v1331_v0 }
 0x431   : > { %10626 = vmatprep.mubr.msk.f32.mxu1 %vm1740_vm4, %v1701_v5  ;;  %v10871_v5 = vld [vmem:[%s17121_s4 + $0x1c8] sm:$0xff]  ;;  %v1725_v18 = vunpack.c.h.bf16 %v1332_v29 }
 0x432   : > { %v15202_v58 = vpack.c.bf16 %v10872_v10, %v10871_v5  ;;  %v10885_v5 = vld [vmem:[%s17121_s4 + $0x1f0] sm:$0xf]  ;;  %v10895_v10 = vld [vmem:[%s17121_s4 + $0x1f8] sm:$0xff] }
 0x433   : > { %v3042_v3 = vpop.f32.mrb[26].mxu1 }
 0x434   : > { %3306 = vmatmul.mubr.f32.gmra.mrb[132].mxu1 %v1700_v27  ;;  %v3044_v54 = vpop.f32.mrb[27].mxu1  ;;  %12253 = vmatmul.mubr.msk.f32.gmra.mrb[50].mxu0 %vm3413_vm6, %v3042_v3 }
 0x435   : > { %10627 = vmatprep.mubr.msk.f32.mxu1 %vm1740_vm4, %v1703_v17  ;;  %v1333_v17 = vld [vmem:[%s17118_s1 + $0x608] sm:$0xff] }
 0x437   : > { %v3047_v56 = vpop.f32.mrb[28].mxu1 }
 0x438   : > { %3311 = vmatmul.mubr.f32.gmra.mrb[134].mxu1 %v1702_v36  ;;  %v3049_v11 = vpop.f32.mrb[29].mxu1  ;;  %12261 = vmatprep.mubr.msk.f32.mxu0 %vm3413_vm6, %v3047_v56  ;;  %v1724_v36 = vunpack.c.l.bf16 %v1332_v29 }
 0x439   : > { %10628 = vmatprep.mubr.msk.f32.mxu1 %vm1740_vm4, %v1705_v23  ;;  %v1727_v23 = vunpack.c.h.bf16 %v1333_v17 }
 0x43b   : > { %v3052_v24 = vpop.f32.mrb[30].mxu1 }
 0x43c   : > { %3316 = vmatmul.mubr.f32.gmra.mrb[136].mxu1 %v1704_v34  ;;  %v3054_v55 = vpop.f32.mrb[31].mxu1  ;;  %12262 = vmatmul.mubr.msk.f32.vlgmr.msra.gmra.mrb[44].mxu0 %vm3413_vm6, %v3052_v24  ;;  %v1726_v34 = vunpack.c.l.bf16 %v1333_v17 }
 0x43d   : > { %10629 = vmatprep.mubr.msk.f32.mxu1 %vm1740_vm4, %v1707_v53  ;;  %12525 = vmatpush3.bf16.msra.mxu0 %v15092_v15  ;;  %v1717_v15 = vunpack.c.h.bf16 %v1328_v35  ;;  %v1729_v53 = vunpack.c.h.bf16 %v1334_v30 }
 0x43e   : > { %12277 = vmatprep.subr.msk.mxu0 %vm3438_vm5, %v10849_v6 }
 0x43f   : > { %v3057_v8 = vpop.f32.mrb[32].mxu1 }
 0x440   : > { %3321 = vmatmul.mubr.f32.gmra.mrb[138].mxu1 %v1706_v16  ;;  %v3059_v14 = vpop.f32.mrb[33].mxu1  ;;  %12264 = vmatprep.mubr.msk.f32.mxu0 %vm3413_vm6, %v3057_v8  ;;  %v1336_v16 = vld [vmem:[%s17118_s1 + $0x620] sm:$0xff]  ;;  %v1337_v8 = vld [vmem:[%s17118_s1 + $0x628] sm:$0xff] }
 0x441   : > { %10630 = vmatprep.mubr.msk.f32.mxu1 %vm1740_vm4, %v1709_v32  ;;  %12278 = vmatpush3.msk.msra.mxu0 %vm3438_vm5, %v10849_v6  ;;  %v1728_v6 = vunpack.c.l.bf16 %v1334_v30  ;;  %v1730_v32 = vunpack.c.l.bf16 %v1335_v4  ;;  %v1732_v14 = vunpack.c.l.bf16 %v1336_v16  ;;  %v1735_v50 = vunpack.c.h.bf16 %v1337_v8 }
 0x442   : > { %12527 = vmatprep.subr.bf16.mxu0 %v15147_v25 }
 0x443   : > { %v3062_v42 = vpop.f32.mrb[34].mxu1 }
 0x444   : > { %3326 = vmatmul.mubr.f32.gmra.mrb[140].mxu1 %v1708_v28  ;;  %v3064_v37 = vpop.f32.mrb[35].mxu1  ;;  %12265 = vmatmul.mubr.msk.f32.gmra.mrb[46].mxu0 %vm3413_vm6, %v3062_v42  ;;  %v1338_v42 = vld [vmem:[%s17118_s1 + $0x630] sm:$0xff] }
 0x445   : > { %10631 = vmatprep.mubr.msk.f32.mxu1 %vm1740_vm4, %v1711_v33  ;;  %v1734_v37 = vunpack.c.l.bf16 %v1337_v8  ;;  %v1737_v31 = vunpack.c.h.bf16 %v1338_v42 }
 0x447   : > { %v3067_v43 = vpop.f32.mrb[36].mxu1 }
 0x448   : > { %3331 = vmatmul.mubr.f32.gmra.mrb[142].mxu1 %v1710_v41  ;;  %v3069_v12 = vpop.f32.mrb[37].mxu1  ;;  %12267 = vmatprep.mubr.msk.f32.mxu0 %vm3413_vm6, %v3067_v43  ;;  %v1339_v43 = vld [vmem:[%s17118_s1 + $0x638] sm:$0xff] }
 0x449   : > { %10632 = vmatprep.mubr.msk.f32.mxu1 %vm1740_vm4, %v1713_v51  ;;  %v1736_v12 = vunpack.c.l.bf16 %v1338_v42  ;;  %v1739_v35 = vunpack.c.h.bf16 %v1339_v43  ;;  %v1738_v9 = vunpack.c.l.bf16 %v1339_v43 }
 0x44b   : > { %v3072_v19 = vpop.f32.mrb[38].mxu1 }
 0x44c   : > { %3336 = vmatmul.mubr.f32.gmra.mrb[144].mxu1 %v1712_v61  ;;  %v3074_v20 = vpop.f32.mrb[39].mxu1  ;;  %12268 = vmatmul.mubr.msk.f32.gmra.mrb[48].mxu0 %vm3413_vm6, %v3072_v19 }
 0x44d   : > { %10633 = vmatprep.mubr.msk.f32.mxu1 %vm1740_vm4, %v1715_v13  ;;  %v10883_v20 = vld [vmem:[%s17121_s4 + $0x1e0] sm:$0xff] }
 0x44f   : > { %v3077_v44 = vpop.f32.mrb[40].mxu1 }
 0x450   : > { %3341 = vmatmul.mubr.f32.gmra.mrb[146].mxu1 %v1714_v26  ;;  %v3079_v45 = vpop.f32.mrb[41].mxu1  ;;  %12270 = vmatprep.mubr.msk.f32.mxu0 %vm3413_vm6, %v3077_v44  ;;  %v10873_v26 = vld [vmem:[%s17121_s4 + $0x1d8] sm:$0xf] }
 0x451   : > { %10634 = vmatprep.mubr.msk.f32.mxu1 %vm1740_vm4, %v1717_v15  ;;  %v10884_v15 = vld [vmem:[%s17121_s4 + $0x1e8] sm:$0xff] }
 0x453   : > { %v3082_v21 = vpop.f32.mrb[42].mxu1 }
 0x454   : > { %3346 = vmatmul.mubr.f32.gmra.mrb[148].mxu1 %v1716_v38  ;;  %v3084_v57 = vpop.f32.mrb[43].mxu1  ;;  %12271 = vmatmul.mubr.msk.f32.gmra.mrb[50].mxu0 %vm3413_vm6, %v3082_v21  ;;  %v12534_v38 = vpack.c.bf16 %v10884_v15, %v10883_v20  ;;  %v10094_v20 = vld [vmem:[%s17125_s8 + $0x98] sm:$0xff] }
 0x455   : > { %10635 = vmatprep.mubr.msk.f32.mxu1 %vm1740_vm4, %v1719_v40 }
 0x457   : > { %v3087_v47 = vpop.f32.mrb[44].mxu1 }
 0x458   : > { %3351 = vmatmul.mubr.f32.gmra.mrb[150].mxu1 %v1718_v60  ;;  %v3089_v63 = vpop.f32.mrb[45].mxu1  ;;  %12279 = vmatprep.mubr.msk.f32.mxu0 %vm3413_vm6, %v3087_v47 }
 0x459   : > { %10636 = vmatprep.mubr.msk.f32.mxu1 %vm1740_vm4, %v1721_v59 }
 0x45b   : > { %v3092_v48 = vpop.f32.mrb[46].mxu1 }
 0x45c   : > { %3356 = vmatmul.mubr.f32.gmra.mrb[152].mxu1 %v1720_v62  ;;  %v3094_v27 = vpop.f32.mrb[47].mxu1  ;;  %12280 = vmatmul.mubr.msk.f32.vlgmr.msra.gmra.mrb[44].mxu0 %vm3413_vm6, %v3092_v48 }
 0x45d   : > { %10637 = vmatprep.mubr.msk.f32.mxu1 %vm1740_vm4, %v1723_v52  ;;  %12529 = vmatpush3.bf16.msra.mxu0 %v15147_v25  ;;  %v1733_v25 = vunpack.c.h.bf16 %v1336_v16  ;;  %v10907_v16 = vld [vmem:[%s17121_s4 + $0x210] sm:$0xff] }
 0x45e   : > { %12295 = vmatprep.subr.msk.mxu0 %vm3438_vm5, %v10861_v49 }
 0x45f   : > { %v3097_v3 = vpop.f32.mrb[48].mxu1 }
 0x460   : > { %3361 = vmatmul.mubr.f32.gmra.mrb[154].mxu1 %v1722_v39  ;;  %v3099_v54 = vpop.f32.mrb[49].mxu1  ;;  %12282 = vmatprep.mubr.msk.f32.mxu0 %vm3413_vm6, %v3097_v3  ;;  %v10896_v39 = vld [vmem:[%s17121_s4 + $0x200] sm:$0xff] }
 0x461   : > { %10638 = vmatprep.mubr.msk.f32.mxu1 %vm1740_vm4, %v1725_v18  ;;  %12296 = vmatpush3.msk.msra.mxu0 %vm3438_vm5, %v10861_v49  ;;  %v12538_v18 = vpack.c.bf16 %v10896_v39, %v10895_v10 }
 0x462   : > { %12531 = vmatprep.subr.bf16.mxu0 %v15202_v58 }
 0x463   : > { %v3102_v56 = vpop.f32.mrb[50].mxu1 }
 0x464   : > { %3366 = vmatmul.mubr.f32.gmra.mrb[156].mxu1 %v1724_v36  ;;  %v3104_v11 = vpop.f32.mrb[51].mxu1  ;;  %12283 = vmatmul.mubr.msk.f32.gmra.mrb[46].mxu0 %vm3413_vm6, %v3102_v56 }
 0x465   : > { %10639 = vmatprep.mubr.msk.f32.mxu1 %vm1740_vm4, %v1727_v23 }
 0x467   : > { %v3107_v24 = vpop.f32.mrb[52].mxu1 }
 0x468   : > { %3371 = vmatmul.mubr.f32.gmra.mrb[158].mxu1 %v1726_v34  ;;  %v3109_v22 = vpop.f32.mrb[53].mxu1  ;;  %12285 = vmatprep.mubr.msk.f32.mxu0 %vm3413_vm6, %v3107_v24 }
 0x469   : > { %10640 = vmatprep.mubr.msk.f32.mxu1 %vm1740_vm4, %v1729_v53 }
 0x46b   : > { %v3112_v55 = vpop.f32.mrb[54].mxu1 }
 0x46c   : > { %3376 = vmatmul.mubr.f32.gmra.mrb[160].mxu1 %v1728_v6  ;;  %v3114_v2 = vpop.f32.mrb[55].mxu1  ;;  %12286 = vmatmul.mubr.msk.f32.gmra.mrb[48].mxu0 %vm3413_vm6, %v3112_v55  ;;  %v10908_v55 = vld [vmem:[%s17121_s4 + $0x218] sm:$0xff] }
 0x46d   : > { %10641 = vmatprep.mubr.msk.f32.mxu1 %vm1740_vm4, %v1731_v1  ;;  %v10897_v1 = vld [vmem:[%s17121_s4 + $0x208] sm:$0xf]  ;;  %v12542_v2 = vpack.c.bf16 %v10908_v55, %v10907_v16 }
 0x46f   : > { %v3117_v28 = vpop.f32.mrb[56].mxu1 }
 0x470   : > { %3381 = vmatmul.mubr.f32.gmra.mrb[162].mxu1 %v1730_v32  ;;  %v3119_v33 = vpop.f32.mrb[57].mxu1  ;;  %12288 = vmatprep.mubr.msk.f32.mxu0 %vm3413_vm6, %v3117_v28 }
 0x471   : > { %10642 = vmatprep.mubr.msk.f32.mxu1 %vm1740_vm4, %v1733_v25 }
 0x473   : > { %v3122_v41 = vpop.f32.mrb[58].mxu1 }
 0x474   : > { %3386 = vmatmul.mubr.f32.gmra.mrb[164].mxu1 %v1732_v14  ;;  %v3124_v51 = vpop.f32.mrb[59].mxu1  ;;  %12289 = vmatmul.mubr.msk.f32.gmra.mrb[50].mxu0 %vm3413_vm6, %v3122_v41 }
 0x475   : > { %10643 = vmatprep.mubr.msk.f32.mxu1 %vm1740_vm4, %v1735_v50 }
 0x477   : > { %v3127_v61 = vpop.f32.mrb[60].mxu1 }
 0x478   : > { %3391 = vmatmul.mubr.f32.gmra.mrb[166].mxu1 %v1734_v37  ;;  %v3129_v13 = vpop.f32.mrb[61].mxu1  ;;  %12297 = vmatprep.mubr.msk.f32.mxu0 %vm3413_vm6, %v3127_v61  ;;  %v10091_v61 = vld [vmem:[%s17125_s8 + $0x80] sm:$0xff] }
 0x479   : > { %10644 = vmatprep.mubr.msk.f32.mxu1 %vm1740_vm4, %v1737_v31  ;;  %v10075_v13 = vld [vmem:[%s17125_s8] sm:$0xff] }
 0x47b   : > { %v3132_v19 = vpop.f32.mrb[62].mxu1 }
 0x47c   : > { %3396 = vmatmul.mubr.f32.gmra.mrb[168].mxu1 %v1736_v12  ;;  %v3134_v44 = vpop.f32.mrb[63].mxu1  ;;  %12298 = vmatmul.mubr.msk.f32.vlgmr.msra.gmra.mrb[44].mxu0 %vm3413_vm6, %v3132_v19  ;;  %v10092_v12 = vld [vmem:[%s17125_s8 + $0x88] sm:$0xff] }
 0x47d   : > { %10645 = vmatprep.mubr.msk.f32.mxu1 %vm1740_vm4, %v1739_v35  ;;  %12533 = vmatpush3.bf16.msra.mxu0 %v15202_v58  ;;  %v12938_v35 = vpack.c.bf16 %v10092_v12, %v10091_v61  ;;  %v10076_v19 = vld [vmem:[%s17125_s8 + $0x8] sm:$0xff]  ;;  %v10077_v44 = vld [vmem:[%s17125_s8 + $0x10] sm:$0xff] }
 0x47e   : > { %12313 = vmatprep.subr.msk.mxu0 %vm3438_vm5, %v10873_v26  ;;  %v12940_v15 = vpack.c.bf16 %v10076_v19, %v10075_v13 }
 0x47f   : > { %v3137_v45 = vpop.f32.mrb[64].mxu1  ;;  %12939 = vmatprep.subr.bf16.mxu1 %v12938_v35 }
 0x480   : > { %3401 = vmatmul.mubr.f32.gmra.mrb[170].mxu1 %v1738_v9  ;;  %v3139_v40 = vpop.f32.mrb[65].mxu1  ;;  %12300 = vmatprep.mubr.msk.f32.mxu0 %vm3413_vm6, %v3137_v45 }
 0x481   : > { %12314 = vmatpush3.msk.msra.mxu0 %vm3438_vm5, %v10873_v26  ;;  %v10093_v26 = vld [vmem:[%s17125_s8 + $0x90] sm:$0xff]  ;;  %12941 = vmatpush3.bf16.msra.mxu1 %v12940_v15 }
 0x482   : > { %12535 = vmatprep.subr.bf16.mxu0 %v12534_v38  ;;  %v12942_v9 = vpack.c.bf16 %v10094_v20, %v10093_v26 }
 0x483   : > { %v3142_v46 = vpop.f32.mrb[66].mxu1 }
 0x484   : > { %v3144_v21 = vpop.f32.mrb[67].mxu1  ;;  %12301 = vmatmul.mubr.msk.f32.gmra.mrb[46].mxu0 %vm3413_vm6, %v3142_v46  ;;  %12943 = vmatprep.subr.bf16.mxu1 %v12942_v9 }
 0x487   : > { %v3147_v60 = vpop.f32.mrb[68].mxu1 }
 0x488   : > { %v3149_v57 = vpop.f32.mrb[69].mxu1  ;;  %12303 = vmatprep.mubr.msk.f32.mxu0 %vm3413_vm6, %v3147_v60  ;;  %v10909_v60 = vld [vmem:[%s17121_s4 + $0x220] sm:$0xf] }
 0x489   : > { %v10919_v57 = vld [vmem:[%s17121_s4 + $0x228] sm:$0xff] }
 0x48b   : > { %v3152_v59 = vpop.f32.mrb[70].mxu1 }
 0x48c   : > { %v3154_v0 = vpop.f32.mrb[71].mxu1  ;;  %12304 = vmatmul.mubr.msk.f32.gmra.mrb[48].mxu0 %vm3413_vm6, %v3152_v59  ;;  %v10920_v59 = vld [vmem:[%s17121_s4 + $0x230] sm:$0xff] }
 0x48f   : > { %v3157_v47 = vpop.f32.mrb[72].mxu1 }
 0x490   : > { %v3159_v62 = vpop.f32.mrb[73].mxu1  ;;  %12306 = vmatprep.mubr.msk.f32.mxu0 %vm3413_vm6, %v3157_v47  ;;  %v12546_v47 = vpack.c.bf16 %v10920_v59, %v10919_v57 }
 0x493   : > { %v3162_v63 = vpop.f32.mrb[74].mxu1 }
 0x494   : > { %v3164_v52 = vpop.f32.mrb[75].mxu1  ;;  %12307 = vmatmul.mubr.msk.f32.gmra.mrb[50].mxu0 %vm3413_vm6, %v3162_v63 }
 0x497   : > { %v3167_v29 = vpop.f32.mrb[76].mxu1 }
 0x498   : > { %v3169_v48 = vpop.f32.mrb[77].mxu1  ;;  %12315 = vmatprep.mubr.msk.f32.mxu0 %vm3413_vm6, %v3167_v29 }
 0x49b   : > { %v3172_v49 = vpop.f32.mrb[78].mxu1 }
 0x49c   : > { %v3174_v27 = vpop.f32.mrb[79].mxu1  ;;  %12316 = vmatmul.mubr.msk.f32.vlgmr.msra.gmra.mrb[44].mxu0 %vm3413_vm6, %v3172_v49 }
 0x49d   : > { %12537 = vmatpush3.bf16.msra.mxu0 %v12534_v38  ;;  %v10078_v38 = vld [vmem:[%s17125_s8 + $0x18] sm:$0xff] }
 0x49e   : > { %12331 = vmatprep.subr.msk.mxu0 %vm3438_vm5, %v10885_v5  ;;  %v12944_v46 = vpack.c.bf16 %v10078_v38, %v10077_v44 }
 0x49f   : > { %v3177_v17 = vpop.f32.mrb[80].mxu1 }
 0x4a0   : > { %v3179_v58 = vpop.f32.mrb[81].mxu1  ;;  %12318 = vmatprep.mubr.msk.f32.mxu0 %vm3413_vm6, %v3177_v17  ;;  %12945 = vmatpush3.bf16.msra.mxu1 %v12944_v46 }
 0x4a1   : > { %12332 = vmatpush3.msk.msra.mxu0 %vm3438_vm5, %v10885_v5 }
 0x4a2   : > { %12539 = vmatprep.subr.bf16.mxu0 %v12538_v18 }
 0x4a3   : > { %v3182_v3 = vpop.f32.mrb[82].mxu1 }
 0x4a4   : > { %v3184_v36 = vpop.f32.mrb[83].mxu1  ;;  %12319 = vmatmul.mubr.msk.f32.gmra.mrb[46].mxu0 %vm3413_vm6, %v3182_v3 }
 0x4a7   : > { %v3187_v54 = vpop.f32.mrb[84].mxu1 }
 0x4a8   : > { %v3189_v23 = vpop.f32.mrb[85].mxu1  ;;  %12321 = vmatprep.mubr.msk.f32.mxu0 %vm3413_vm6, %v3187_v54  ;;  %v10921_v54 = vld [vmem:[%s17121_s4 + $0x238] sm:$0xf] }
 0x4a9   : > { %v10931_v23 = vld [vmem:[%s17121_s4 + $0x240] sm:$0xff] }
 0x4ab   : > { %v3192_v30 = vpop.f32.mrb[86].mxu1 }
 0x4ac   : > { %v3194_v56 = vpop.f32.mrb[87].mxu1  ;;  %12322 = vmatmul.mubr.msk.f32.gmra.mrb[48].mxu0 %vm3413_vm6, %v3192_v30  ;;  %v10932_v30 = vld [vmem:[%s17121_s4 + $0x248] sm:$0xff] }
 0x4af   : > { %v3197_v34 = vpop.f32.mrb[88].mxu1 }
 0x4b0   : > { %v3199_v11 = vpop.f32.mrb[89].mxu1  ;;  %12324 = vmatprep.mubr.msk.f32.mxu0 %vm3413_vm6, %v3197_v34  ;;  %v12550_v34 = vpack.c.bf16 %v10932_v30, %v10931_v23  ;;  %v10960_v30 = vld [vmem:[%s17123_s6 + $0x160] sm:$0xff] }
 0x4b3   : > { %v3202_v53 = vpop.f32.mrb[90].mxu1 }
 0x4b4   : > { %v3204_v4 = vpop.f32.mrb[91].mxu1  ;;  %12325 = vmatmul.mubr.msk.f32.gmra.mrb[50].mxu0 %vm3413_vm6, %v3202_v53 }
 0x4b7   : > { %v3207_v24 = vpop.f32.mrb[92].mxu1 }
 0x4b8   : > { %v3209_v6 = vpop.f32.mrb[93].mxu1  ;;  %12333 = vmatprep.mubr.msk.f32.mxu0 %vm3413_vm6, %v3207_v24 }
 0x4bb   : > { %v3212_v22 = vpop.f32.mrb[94].mxu1 }
 0x4bc   : > { %v3214_v32 = vpop.f32.mrb[95].mxu1  ;;  %12334 = vmatmul.mubr.msk.f32.vlgmr.msra.gmra.mrb[44].mxu0 %vm3413_vm6, %v3212_v22 }
 0x4bd   : > { %12541 = vmatpush3.bf16.msra.mxu0 %v12538_v18 }
 0x4be   : > { %12349 = vmatprep.subr.msk.mxu0 %vm3438_vm5, %v10897_v1 }
 0x4bf   : > { %v3217_v25 = vpop.f32.mrb[96].mxu1 }
 0x4c0   : > { %v3219_v8 = vpop.f32.mrb[97].mxu1  ;;  %12336 = vmatprep.mubr.msk.f32.mxu0 %vm3413_vm6, %v3217_v25 }
 0x4c1   : > { %12350 = vmatpush3.msk.msra.mxu0 %vm3438_vm5, %v10897_v1 }
 0x4c2   : > { %12543 = vmatprep.subr.bf16.mxu0 %v12542_v2 }
 0x4c3   : > { %v3222_v28 = vpop.f32.mrb[98].mxu1 }
 0x4c4   : > { %v3224_v14 = vpop.f32.mrb[99].mxu1  ;;  %12337 = vmatmul.mubr.msk.f32.gmra.mrb[46].mxu0 %vm3413_vm6, %v3222_v28 }
 0x4c7   : > { %v3227_v33 = vpop.f32.mrb[100].mxu1 }
 0x4c8   : > { %v3229_v50 = vpop.f32.mrb[101].mxu1  ;;  %12339 = vmatprep.mubr.msk.f32.mxu0 %vm3413_vm6, %v3227_v33  ;;  %v10933_v33 = vld [vmem:[%s17121_s4 + $0x250] sm:$0xf] }
 0x4cb   : > { %v3232_v42 = vpop.f32.mrb[102].mxu1 }
 0x4cc   : > { %v3234_v41 = vpop.f32.mrb[103].mxu1  ;;  %12340 = vmatmul.mubr.msk.f32.gmra.mrb[48].mxu0 %vm3413_vm6, %v3232_v42 }
 0x4cf   : > { %v3237_v37 = vpop.f32.mrb[104].mxu1 }
 0x4d0   : > { %v3239_v51 = vpop.f32.mrb[105].mxu1  ;;  %12342 = vmatprep.mubr.msk.f32.mxu0 %vm3413_vm6, %v3237_v37 }
 0x4d3   : > { %v3242_v31 = vpop.f32.mrb[106].mxu1 }
 0x4d4   : > { %v3244_v43 = vpop.f32.mrb[107].mxu1  ;;  %12343 = vmatmul.mubr.msk.f32.gmra.mrb[50].mxu0 %vm3413_vm6, %v3242_v31 }
 0x4d7   : > { %v3247_v45 = vpop.f32.mrb[108].mxu1 }
 0x4d8   : > { %v3249_v40 = vpop.f32.mrb[109].mxu1  ;;  %12351 = vmatprep.mubr.msk.f32.mxu0 %vm3413_vm6, %v3247_v45 }
 0x4db   : > { %v3252_v21 = vpop.f32.mrb[110].mxu1 }
 0x4dc   : > { %v3254_v0 = vpop.f32.mrb[111].mxu1  ;;  %12352 = vmatmul.mubr.msk.f32.vlgmr.msra.gmra.mrb[44].mxu0 %vm3413_vm6, %v3252_v21 }
 0x4dd   : > { %12545 = vmatpush3.bf16.msra.mxu0 %v12542_v2 }
 0x4de   : > { %12367 = vmatprep.subr.msk.mxu0 %vm3438_vm5, %v10909_v60 }
 0x4df   : > { %v3257_v62 = vpop.f32.mrb[112].mxu1 }
 0x4e0   : > { %v3259_v63 = vpop.f32.mrb[113].mxu1  ;;  %12354 = vmatprep.mubr.msk.f32.mxu0 %vm3413_vm6, %v3257_v62 }
 0x4e1   : > { %12368 = vmatpush3.msk.msra.mxu0 %vm3438_vm5, %v10909_v60 }
 0x4e2   : > { %12547 = vmatprep.subr.bf16.mxu0 %v12546_v47 }
 0x4e3   : > { %v3262_v52 = vpop.f32.mrb[114].mxu1 }
 0x4e4   : > { %v3264_v29 = vpop.f32.mrb[115].mxu1  ;;  %12355 = vmatmul.mubr.msk.f32.gmra.mrb[46].mxu0 %vm3413_vm6, %v3262_v52  ;;  %v10945_v52 = vld [vmem:[%s17123_s6 + $0xe8] sm:$0xff] }
 0x4e5   : > { %v10949_v29 = vld [vmem:[%s17123_s6 + $0x108] sm:$0xff] }
 0x4e7   : > { %v3267_v48 = vpop.f32.mrb[116].mxu1 }
 0x4e8   : > { %v3269_v49 = vpop.f32.mrb[117].mxu1  ;;  %12357 = vmatprep.mubr.msk.f32.mxu0 %vm3413_vm6, %v3267_v48  ;;  %v12554_v48 = vpack.c.bf16 %v10949_v29, %v10945_v52  ;;  %v10967_v52 = vld [vmem:[%s17123_s6 + $0x198] sm:$0xff] }
 0x4e9   : > { %v10944_v49 = vld [vmem:[%s17123_s6 + $0xe0] sm:$0xff] }
 0x4eb   : > { %v3272_v5 = vpop.f32.mrb[118].mxu1 }
 0x4ec   : > { %v3274_v10 = vpop.f32.mrb[119].mxu1  ;;  %12358 = vmatmul.mubr.msk.f32.gmra.mrb[48].mxu0 %vm3413_vm6, %v3272_v5  ;;  %v10948_v5 = vld [vmem:[%s17123_s6 + $0x100] sm:$0xff] }
 0x4ed   : > { %v12556_v10 = vpack.c.bf16 %v10948_v5, %v10944_v49  ;;  %v10962_v49 = vld [vmem:[%s17123_s6 + $0x170] sm:$0xff] }
 0x4ee   : > { %v10966_v5 = vld [vmem:[%s17123_s6 + $0x190] sm:$0xff] }
 0x4ef   : > { %v3277_v39 = vpop.f32.mrb[120].mxu1 }
 0x4f0   : > { %v3279_v27 = vpop.f32.mrb[121].mxu1  ;;  %12360 = vmatprep.mubr.msk.f32.mxu0 %vm3413_vm6, %v3277_v39  ;;  %v10953_v39 = vld [vmem:[%s17123_s6 + $0x128] sm:$0xff] }
 0x4f1   : > { %v10957_v27 = vld [vmem:[%s17123_s6 + $0x148] sm:$0xff] }
 0x4f3   : > { %v3282_v18 = vpop.f32.mrb[122].mxu1 }
 0x4f4   : > { %v3284_v17 = vpop.f32.mrb[123].mxu1  ;;  %12361 = vmatmul.mubr.msk.f32.gmra.mrb[50].mxu0 %vm3413_vm6, %v3282_v18  ;;  %v12558_v18 = vpack.c.bf16 %v10957_v27, %v10953_v39  ;;  %v10971_v39 = vld [vmem:[%s17123_s6 + $0x1b8] sm:$0x3]  ;;  %v7013_v27 = vld [vmem:[%s17123_s6 + $0x8] sm:$0xff] }
 0x4f5   : > { %v10952_v17 = vld [vmem:[%s17123_s6 + $0x120] sm:$0xff] }
 0x4f7   : > { %v3287_v58 = vpop.f32.mrb[124].mxu1 }
 0x4f8   : > { %v3289_v3 = vpop.f32.mrb[125].mxu1  ;;  %12369 = vmatprep.mubr.msk.f32.mxu0 %vm3413_vm6, %v3287_v58  ;;  %v10956_v58 = vld [vmem:[%s17123_s6 + $0x140] sm:$0xff] }
 0x4f9   : > { %v12560_v3 = vpack.c.bf16 %v10956_v58, %v10952_v17  ;;  %v7012_v17 = vld [vmem:[%s17123_s6] sm:$0xff] }
 0x4fa   : > { %v7016_v58 = vld [vmem:[%s17123_s6 + $0x20] sm:$0xff] }
 0x4fb   : > { %v3292_v36 = vpop.f32.mrb[126].mxu1 }
 0x4fc   : > { %v3294_v56 = vpop.f32.mrb[127].mxu1  ;;  %12370 = vmatmul.mubr.msk.f32.vlgmr.msra.gmra.mrb[44].mxu0 %vm3413_vm6, %v3292_v36  ;;  %v10961_v36 = vld [vmem:[%s17123_s6 + $0x168] sm:$0xff] }
 0x4fd   : > { %12549 = vmatpush3.bf16.msra.mxu0 %v12546_v47  ;;  %v10964_v56 = vld [vmem:[%s17123_s6 + $0x180] sm:$0xff] }
 0x4fe   : > { %12385 = vmatprep.subr.msk.mxu0 %vm3438_vm5, %v10921_v54 }
 0x4ff   : > { %v3297_v11 = vpop.f32.mrb[128].mxu1 }
 0x500   : > { %v3299_v53 = vpop.f32.mrb[129].mxu1  ;;  %12372 = vmatprep.mubr.msk.f32.mxu0 %vm3413_vm6, %v3297_v11  ;;  %v10969_v11 = vld [vmem:[%s17123_s6 + $0x1a8] sm:$0x3] }
 0x501   : > { %12386 = vmatpush3.msk.msra.mxu0 %vm3438_vm5, %v10921_v54  ;;  %v10965_v54 = vld [vmem:[%s17123_s6 + $0x188] sm:$0xff]  ;;  %v10968_v53 = vld [vmem:[%s17123_s6 + $0x1a0] sm:$0x3] }
 0x502   : > { %12551 = vmatprep.subr.bf16.mxu0 %v12550_v34  ;;  %v12562_v23 = vpack.c.bf16 %v10965_v54, %v10961_v36  ;;  %v7025_v36 = vld [vmem:[%s17123_s6 + $0x68] sm:$0xff]  ;;  %v10970_v54 = vld [vmem:[%s17123_s6 + $0x1b0] sm:$0x3] }
 0x503   : > { %v3302_v4 = vpop.f32.mrb[130].mxu1 }
 0x504   : > { %v3304_v24 = vpop.f32.mrb[131].mxu1  ;;  %12373 = vmatmul.mubr.msk.f32.gmra.mrb[46].mxu0 %vm3413_vm6, %v3302_v4  ;;  %v13384_v4 = vmov 0.0  }
 0x505   : > { %v10947_v24 = vld [vmem:[%s17123_s6 + $0xf8] sm:$0xff] }
 0x507   : > { %v3307_v6 = vpop.f32.mrb[132].mxu1 }
 0x508   : > { %v3309_v22 = vpop.f32.mrb[133].mxu1  ;;  %12375 = vmatprep.mubr.msk.f32.mxu0 %vm3413_vm6, %v3307_v6  ;;  %v10951_v6 = vld [vmem:[%s17123_s6 + $0x118] sm:$0xff] }
 0x509   : > { %v12566_v22 = vpack.c.bf16 %v10951_v6, %v10947_v24  ;;  %v7033_v24 = vld [vmem:[%s17123_s6 + $0xa8] sm:$0xff] }
 0x50b   : > { %v3312_v1 = vpop.f32.mrb[134].mxu1 }
 0x50c   : > { %v3314_v16 = vpop.f32.mrb[135].mxu1  ;;  %12376 = vmatmul.mubr.msk.f32.gmra.mrb[48].mxu0 %vm3413_vm6, %v3312_v1  ;;  %v10095_v1 = vld [vmem:[%s17125_s8 + $0xa0] sm:$0xff] }
 0x50d   : > { %v10096_v16 = vld [vmem:[%s17125_s8 + $0xa8] sm:$0xff] }
 0x50f   : > { %v3317_v55 = vpop.f32.mrb[136].mxu1 }
 0x510   : > { %v3319_v32 = vpop.f32.mrb[137].mxu1  ;;  %12378 = vmatprep.mubr.msk.f32.mxu0 %vm3413_vm6, %v3317_v55  ;;  %v10079_v55 = vld [vmem:[%s17125_s8 + $0x20] sm:$0xff] }
 0x511   : > { %v12946_v32 = vpack.c.bf16 %v10096_v16, %v10095_v1  ;;  %v7028_v1 = vld [vmem:[%s17123_s6 + $0x80] sm:$0xff] }
 0x512   : > { %v7032_v16 = vld [vmem:[%s17123_s6 + $0xa0] sm:$0xff] }
 0x513   : > { %v3322_v2 = vpop.f32.mrb[138].mxu1  ;;  %12947 = vmatprep.subr.bf16.mxu1 %v12946_v32  ;;  %v7037_v32 = vld [vmem:[%s17123_s6 + $0xc8] sm:$0x3] }
 0x514   : > { %v3324_v25 = vpop.f32.mrb[139].mxu1  ;;  %12379 = vmatmul.mubr.msk.f32.gmra.mrb[50].mxu0 %vm3413_vm6, %v3322_v2  ;;  %v10080_v2 = vld [vmem:[%s17125_s8 + $0x28] sm:$0xff] }
 0x515   : > { %v12948_v25 = vpack.c.bf16 %v10080_v2, %v10079_v55  ;;  %v12588_v55 = vpack.c.bf16 %v7032_v16, %v7028_v1  ;;  %v7015_v2 = vld [vmem:[%s17123_s6 + $0x18] sm:$0xff]  ;;  %v10994_v16 = vld [vmem:[%s17123_s6 + $0x210] sm:$0xff] }
 0x517   : > { %v3327_v8 = vpop.f32.mrb[140].mxu1  ;;  %12949 = vmatpush3.bf16.msra.mxu1 %v12948_v25  ;;  %v7019_v25 = vld [vmem:[%s17123_s6 + $0x38] sm:$0xff] }
 0x518   : > { %v3329_v28 = vpop.f32.mrb[141].mxu1  ;;  %12387 = vmatprep.mubr.msk.f32.mxu0 %vm3413_vm6, %v3327_v8  ;;  %v10943_v8 = vld [vmem:[%s17122_s5] ss:$0 sm:$0xff] }
 0x51b   : > { %v3332_v14 = vpop.f32.mrb[142].mxu1 }
 0x51c   : > { %v3334_v50 = vpop.f32.mrb[143].mxu1  ;;  %12388 = vmatmul.mubr.msk.f32.vlgmr.msra.gmra.mrb[44].mxu0 %vm3413_vm6, %v3332_v14 }
 0x51d   : > { %12553 = vmatpush3.bf16.msra.mxu0 %v12550_v34  ;;  %v12564_v34 = vpack.c.bf16 %v10964_v56, %v10960_v30  ;;  %v12580_v30 = vpack.c.bf16 %v7016_v58, %v7012_v17  ;;  %v11000_v17 = vld [vmem:[%s17123_s6 + $0x240] sm:$0xff] }
 0x51e   : > { %12403 = vmatprep.subr.msk.mxu0 %vm3438_vm5, %v10933_v33  ;;  %v11004_v58 = vld [vmem:[%s17123_s6 + $0x260] sm:$0xff] }
 0x51f   : > { %v3337_v42 = vpop.f32.mrb[144].mxu1 }
 0x520   : > { %v3339_v41 = vpop.f32.mrb[145].mxu1  ;;  %12390 = vmatprep.mubr.msk.f32.mxu0 %vm3413_vm6, %v3337_v42 }
 0x521   : > { %12404 = vmatpush3.msk.msra.mxu0 %vm3438_vm5, %v10933_v33 }
 0x522   : > { %12555 = vmatprep.subr.bf16.mxu0 %v12554_v48 }
 0x523   : > { %v3342_v37 = vpop.f32.mrb[146].mxu1 }
 0x524   : > { %v3344_v51 = vpop.f32.mrb[147].mxu1  ;;  %12391 = vmatmul.mubr.msk.f32.gmra.mrb[46].mxu0 %vm3413_vm6, %v3342_v37 }
 0x527   : > { %v3347_v31 = vpop.f32.mrb[148].mxu1 }
 0x528   : > { %v3349_v43 = vpop.f32.mrb[149].mxu1  ;;  %12393 = vmatprep.mubr.msk.f32.mxu0 %vm3413_vm6, %v3347_v31 }
 0x52b   : > { %v3352_v61 = vpop.f32.mrb[150].mxu1 }
 0x52c   : > { %v3354_v12 = vpop.f32.mrb[151].mxu1  ;;  %12394 = vmatmul.mubr.msk.f32.gmra.mrb[48].mxu0 %vm3413_vm6, %v3352_v61 }
 0x52f   : > { %v3357_v13 = vpop.f32.mrb[152].mxu1 }
 0x530   : > { %v3359_v35 = vpop.f32.mrb[153].mxu1  ;;  %12396 = vmatprep.mubr.msk.f32.mxu0 %vm3413_vm6, %v3357_v13 }
 0x533   : > { %v3362_v19 = vpop.f32.mrb[154].mxu1 }
 0x534   : > { %v3364_v26 = vpop.f32.mrb[155].mxu1  ;;  %12397 = vmatmul.mubr.msk.f32.gmra.mrb[50].mxu0 %vm3413_vm6, %v3362_v19 }
 0x537   : > { %v3367_v20 = vpop.f32.mrb[156].mxu1 }
 0x538   : > { %v3369_v15 = vpop.f32.mrb[157].mxu1  ;;  %12405 = vmatprep.mubr.msk.f32.mxu0 %vm3413_vm6, %v3367_v20 }
 0x53b   : > { %v3372_v9 = vpop.f32.mrb[158].mxu1 }
 0x53c   : > { %12406 = vmatmul.mubr.msk.f32.vlgmr.msra.gmra.mrb[44].mxu0 %vm3413_vm6, %v3372_v9  ;;  %v3374_v44 = vpop.f32.mrb[159].mxu1 }
 0x53d   : > { %12557 = vmatpush1.bf16.msra.mxu0 %v12556_v10  ;;  %v12576_v10 = vpack.c.bf16 %v10966_v5, %v10962_v49  ;;  %v10992_v49 = vld [vmem:[%s17123_s6 + $0x200] sm:$0xff] }
 0x53e   : > { %12559 = vmatprep.subr.bf16.mxu0 %v12558_v18  ;;  %v7017_v18 = vld [vmem:[%s17123_s6 + $0x28] sm:$0xff]  ;;  %v10996_v5 = vld [vmem:[%s17123_s6 + $0x220] sm:$0xff] }
 0x53f   : > { %v3377_v38 = vpop.f32.mrb[160].mxu1 }
 0x540   : > { %v3379_v45 = vpop.f32.mrb[161].mxu1  ;;  %12408 = vmatprep.mubr.msk.f32.mxu0 %vm3413_vm6, %v3377_v38  ;;  %v10946_v38 = vld [vmem:[%s17123_s6 + $0xf0] sm:$0xff] }
 0x541   : > { %12561 = vmatpush1.bf16.msra.mxu0 %v12560_v3  ;;  %v10950_v45 = vld [vmem:[%s17123_s6 + $0x110] sm:$0xff]  ;;  %v7021_v3 = vld [vmem:[%s17123_s6 + $0x48] sm:$0xff] }
 0x542   : > { %12563 = vmatprep.subr.bf16.mxu0 %v12562_v23  ;;  %v12578_v23 = vpack.c.bf16 %v7017_v18, %v7013_v27  ;;  %v12582_v56 = vpack.c.bf16 %v7025_v36, %v7021_v3  ;;  %v12608_v27 = vpack.c.bf16 %v10996_v5, %v10992_v49  ;;  %v12612_v3 = vpack.c.bf16 %v11004_v58, %v11000_v17  ;;  %v11009_v36 = vld [vmem:[%s17123_s6 + $0x288] sm:$0x3] }
 0x543   : > { %v3382_v40 = vpop.f32.mrb[162].mxu1 }
 0x544   : > { %12409 = vmatmul.mubr.msk.f32.gmra.mrb[46].mxu0 %vm3413_vm6, %v3382_v40  ;;  %v3384_v46 = vpop.f32.mrb[163].mxu1 }
 0x545   : > { %12565 = vmatpush1.bf16.msra.mxu0 %v12564_v34  ;;  %v10955_v46 = vld [vmem:[%s17123_s6 + $0x138] sm:$0xff]  ;;  %v7020_v34 = vld [vmem:[%s17123_s6 + $0x40] sm:$0xff] }
 0x546   : > { %10972 = vmatprep.subr.msk.mxu0 %vm7074_vm7, %v10969_v11  ;;  %v7024_v11 = vld [vmem:[%s17123_s6 + $0x60] sm:$0xff] }
 0x547   : > { %v3387_v21 = vpop.f32.mrb[164].mxu1  ;;  %v12584_v6 = vpack.c.bf16 %v7024_v11, %v7020_v34  ;;  %v10995_v34 = vld [vmem:[%s17123_s6 + $0x218] sm:$0xff] }
 0x548   : > { %v3389_v60 = vpop.f32.mrb[165].mxu1  ;;  %12411 = vmatprep.mubr.msk.f32.mxu0 %vm3413_vm6, %v3387_v21  ;;  %v10959_v21 = vld [vmem:[%s17123_s6 + $0x158] sm:$0xff] }
 0x549   : > { %10973 = vmatpush1.msk.msra.mxu0 %vm7074_vm7, %v10968_v53  ;;  %v7029_v53 = vld [vmem:[%s17123_s6 + $0x88] sm:$0xff]  ;;  %v10999_v11 = vld [vmem:[%s17123_s6 + $0x238] sm:$0xff] }
 0x54a   : > { %12567 = vmatprep.subr.bf16.mxu0 %v12566_v22  ;;  %v12586_v22 = vpack.c.bf16 %v7033_v24, %v7029_v53  ;;  %v11008_v53 = vld [vmem:[%s17123_s6 + $0x280] sm:$0x3]  ;;  %v12618_v1 = vpack.c.bf16 %v10999_v11, %v10995_v34 }
 0x54b   : > { %v3392_v57 = vpop.f32.mrb[166].mxu1  ;;  %v11052_v34 = vld [vmem:[%s17123_s6 + $0x380] sm:$0xff] }
 0x54c   : > { %12412 = vmatmul.mubr.msk.f32.gmra.mrb[48].mxu0 %vm3413_vm6, %v3392_v57  ;;  %v3394_v59 = vpop.f32.mrb[167].mxu1  ;;  %v12568_v57 = vpack.c.bf16 %v10950_v45, %v10946_v38  ;;  %v11056_v11 = vld [vmem:[%s17123_s6 + $0x3a0] sm:$0xff] }
 0x54f   : > { %v3397_v0 = vpop.f32.mrb[168].mxu1 }
 0x550   : > { %v3399_v47 = vpop.f32.mrb[169].mxu1  ;;  %12414 = vmatprep.mubr.msk.f32.mxu0 %vm3413_vm6, %v3397_v0  ;;  %v12570_v0 = vpack.c.bf16 %v10959_v21, %v10955_v46  ;;  %v7039_v46 = vld [vmem:[%s17123_s6 + $0xd8] sm:$0x3]  ;;  %v10985_v21 = vld [vmem:[%s17123_s6 + $0x1c8] sm:$0xff] }
 0x551   : > { %v10954_v47 = vld [vmem:[%s17123_s6 + $0x130] sm:$0xff] }
 0x553   : > { %v3402_v62 = vpop.f32.mrb[170].mxu1 }
 0x554   : > { %12415 = vmatmul.mubr.msk.f32.gmra.mrb[50].mxu0 %vm3413_vm6, %v3402_v62  ;;  %v3404_v63 = vpop.f32.mrb[171].mxu1  ;;  %v10958_v62 = vld [vmem:[%s17123_s6 + $0x150] sm:$0xff] }
 0x555   : > { %7151 = vmatprep.mubr.f32.mxu0 %v13384_v4  ;;  %v10963_v63 = vld [vmem:[%s17123_s6 + $0x178] sm:$0xff]  ;;  %v12572_v29 = vpack.c.bf16 %v10958_v62, %v10954_v47  ;;  %v10993_v47 = vld [vmem:[%s17123_s6 + $0x208] sm:$0xff] }
 0x556   : > { %v12574_v48 = vpack.c.bf16 %v10967_v52, %v10963_v63  ;;  %v10997_v62 = vld [vmem:[%s17123_s6 + $0x228] sm:$0xff]  ;;  %v7038_v63 = vld [vmem:[%s17123_s6 + $0xd0] sm:$0x3] }
 0x60f   : > { %v12407_v28 = vpop.f32.mrb[44].mxu0 }
 0x610   : > { %v6999_v14 = vadd.f32 %v12407_v28, %v10943_v8  ;;  %v6944_v33 = vpop.f32.mrb[45].mxu0  ;;  %v7018_v28 = vld [vmem:[%s17123_s6 + $0x30] sm:$0xff] }
 0x611   : > { %v6998_v37 = vadd.f32 %v10943_v8, %v6944_v33  ;;  %v7027_v33 = vld [vmem:[%s17123_s6 + $0x78] sm:$0xff] }
 0x617   : > { %v12410_v50 = vpop.f32.mrb[46].mxu0 }
 0x618   : > { %v7001_v42 = vadd.f32 %v12410_v50, %v10943_v8  ;;  %v6954_v41 = vpop.f32.mrb[47].mxu0  ;;  %v7036_v50 = vld [vmem:[%s17123_s6 + $0xc0] sm:$0x3] }
 0x619   : > { %v7000_v51 = vadd.f32 %v10943_v8, %v6954_v41 }
 0x61a   : > { %v7007_v31 = vmax.f32 %v6999_v14, %v7001_v42  ;;  %v7023_v14 = vld [vmem:[%s17123_s6 + $0x58] sm:$0xff]  ;;  %v12590_v42 = vpack.c.bf16 %v7019_v25, %v7015_v2 }
 0x61b   : > { %v7006_v43 = vmax.f32 %v6998_v37, %v7000_v51  ;;  %v12594_v37 = vpack.c.bf16 %v7027_v33, %v7023_v14  ;;  %v7022_v51 = vld [vmem:[%s17123_s6 + $0x50] sm:$0xff]  ;;  %v11007_v2 = vld [vmem:[%s17123_s6 + $0x278] sm:$0xff] }
 0x61c   : > { %v11006_v14 = vld [vmem:[%s17123_s6 + $0x270] sm:$0xff] }
 0x61f   : > { %v12413_v61 = vpop.f32.mrb[48].mxu0 }
 0x620   : > { %v7003_v12 = vadd.f32 %v12413_v61, %v10943_v8  ;;  %v6964_v13 = vpop.f32.mrb[49].mxu0  ;;  %v7035_v61 = vld [vmem:[%s17123_s6 + $0xb8] sm:$0xff] }
 0x621   : > { %v7002_v20 = vadd.f32 %v10943_v8, %v6964_v13  ;;  %v10098_v13 = vld [vmem:[%s17125_s8 + $0xb8] sm:$0xff] }
 0x627   : > { %v12416_v35 = vpop.f32.mrb[50].mxu0 }
 0x628   : > { %v7005_v19 = vadd.f32 %v12416_v35, %v10943_v8  ;;  %v6974_v26 = vpop.f32.mrb[51].mxu0 }
 0x629   : > { %v7004_v15 = vadd.f32 %v10943_v8, %v6974_v26  ;;  %v7014_v8 = vld [vmem:[%s17123_s6 + $0x10] sm:$0xff] }
 0x62a   : > { %v7009_v9 = vmax.f32 %v7003_v12, %v7005_v19  ;;  %v12592_v41 = vpack.c.bf16 %v7018_v28, %v7014_v8  ;;  %v10097_v12 = vld [vmem:[%s17125_s8 + $0xb0] sm:$0xff] }
 0x62b   : > { %v7008_v44 = vmax.f32 %v7002_v20, %v7004_v15  ;;  %v12950_v19 = vpack.c.bf16 %v10098_v13, %v10097_v12  ;;  %v7030_v20 = vld [vmem:[%s17123_s6 + $0x90] sm:$0xff] }
 0x62c   : > { %v15451_v40 = vmax.f32 %v7007_v31, %v7009_v9  ;;  %v7026_v31 = vld [vmem:[%s17123_s6 + $0x70] sm:$0xff] }
 0x62d   : > { %v15459_v60 = vmax.f32 %v7006_v43, %v7008_v44  ;;  %v7031_v43 = vld [vmem:[%s17123_s6 + $0x98] sm:$0xff]  ;;  %v12596_v35 = vpack.c.bf16 %v7026_v31, %v7022_v51  ;;  %v7034_v15 = vld [vmem:[%s17123_s6 + $0xb0] sm:$0xff]  ;;  %12951 = vmatprep.subr.bf16.mxu1 %v12950_v19  ;;  %v11022_v51 = vld [vmem:[%s17123_s6 + $0x2c0] sm:$0xff] }
 0x62e   : > { %v12598_v26 = vpack.c.bf16 %v7035_v61, %v7031_v43  ;;  %v10081_v9 = vld [vmem:[%s17125_s8 + $0x30] sm:$0xff]  ;;  %v10082_v44 = vld [vmem:[%s17125_s8 + $0x38] sm:$0xff]  ;;  %v12600_v45 = vpack.c.bf16 %v7034_v15, %v7030_v20  ;;  %v11027_v31 = vld [vmem:[%s17123_s6 + $0x2e8] sm:$0xff] }
 0x62f   : > { %v7070_v59 = vrot.slane %v15459_v60, 1  ;;  %v12952_v38 = vpack.c.bf16 %v10082_v44, %v10081_v9  ;;  %v11002_v28 = vld [vmem:[%s17123_s6 + $0x250] sm:$0xff]  ;;  %v11031_v43 = vld [vmem:[%s17123_s6 + $0x308] sm:$0xff]  ;;  %v11026_v19 = vld [vmem:[%s17123_s6 + $0x2e0] sm:$0xff]  ;;  %v7604_v49 = vrot.slane %v15459_v60, 3 }
 0x630   : > { %v12624_v33 = vpack.c.bf16 %v11006_v14, %v11002_v28  ;;  %v11010_v61 = vld [vmem:[%s17123_s6 + $0x290] sm:$0x3]  ;;  %v11035_v20 = vld [vmem:[%s17123_s6 + $0x328] sm:$0xff]  ;;  %v11068_v14 = vld [vmem:[%s17123_s6 + $0x400] sm:$0xff] }
 0x631   : > { %10974 = vmatmul.mubr.msk.f32.vlgmr.msra.gmra.mrb[52].mxu0 %vm7071_vm8, %v7070_v59  ;;  %12953 = vmatpush3.bf16.msra.mxu1 %v12952_v38  ;;  %v11039_v15 = vld [vmem:[%s17123_s6 + $0x348] sm:$0xff]  ;;  %v11034_v38 = vld [vmem:[%s17123_s6 + $0x320] sm:$0xff] }
 0x632   : > { %12569 = vmatpush1.bf16.msra.mxu0 %v12568_v57  ;;  %7222 = vmatprep.mubr.f32.mxu0 %v13384_v4  ;;  %v10989_v57 = vld [vmem:[%s17123_s6 + $0x1e8] sm:$0xff]  ;;  %v12634_v44 = vpack.c.bf16 %v11039_v15, %v11035_v20  ;;  %v11062_v20 = vld [vmem:[%s17123_s6 + $0x3d0] sm:$0xff] }
 0x633   : > { %12571 = vmatprep.subr.bf16.mxu0 %v12570_v0  ;;  %v10988_v0 = vld [vmem:[%s17123_s6 + $0x1e0] sm:$0xff]  ;;  %v12602_v52 = vpack.c.bf16 %v10989_v57, %v10985_v21  ;;  %v11043_v21 = vld [vmem:[%s17123_s6 + $0x368] sm:$0x3]  ;;  %v11021_v57 = vld [vmem:[%s17123_s6 + $0x2b8] sm:$0xff] }
 0x634   : > { %v11066_v15 = vld [vmem:[%s17123_s6 + $0x3f0] sm:$0xff] }
 0x636   : > { %12573 = vmatpush1.bf16.msra.mxu0 %v12572_v29 }
 0x637   : > { %12575 = vmatprep.subr.bf16.mxu0 %v12574_v48  ;;  %v12606_v48 = vpack.c.bf16 %v10997_v62, %v10993_v47  ;;  %v11024_v47 = vld [vmem:[%s17123_s6 + $0x2d0] sm:$0xff]  ;;  %v11029_v62 = vld [vmem:[%s17123_s6 + $0x2f8] sm:$0xff] }
 0x63a   : > { %12577 = vmatpush1.bf16.msra.mxu0 %v12576_v10  ;;  %v11001_v10 = vld [vmem:[%s17123_s6 + $0x248] sm:$0xff] }
 0x63b   : > { %10975 = vmatprep.subr.msk.mxu0 %vm7074_vm7, %v10971_v39  ;;  %v11005_v39 = vld [vmem:[%s17123_s6 + $0x268] sm:$0xff] }
 0x63c   : > { %v12610_v18 = vpack.c.bf16 %v11005_v39, %v11001_v10  ;;  %v11028_v10 = vld [vmem:[%s17123_s6 + $0x2f0] sm:$0xff] }
 0x63d   : > { %v11032_v39 = vld [vmem:[%s17123_s6 + $0x310] sm:$0xff] }
 0x63e   : > { %10976 = vmatpush1.msk.msra.mxu0 %vm7074_vm7, %v10970_v54  ;;  %v10987_v54 = vld [vmem:[%s17123_s6 + $0x1d8] sm:$0xff]  ;;  %v12644_v17 = vpack.c.bf16 %v11032_v39, %v11028_v10  ;;  %v11094_v39 = vld [vmem:[%s17123_s6 + $0x4a0] sm:$0xff] }
 0x63f   : > { %10977 = vmatmul.mubr.msk.f32.vlgmr.msra.gmra.mrb[54].mxu0 %vm7071_vm8, %v7070_v59  ;;  %12579 = vmatprep.subr.bf16.mxu0 %v12578_v23  ;;  %v10984_v59 = vld [vmem:[%s17123_s6 + $0x1c0] sm:$0xff]  ;;  %v10991_v23 = vld [vmem:[%s17123_s6 + $0x1f8] sm:$0xff] }
 0x640   : > { %12581 = vmatpush1.bf16.msra.mxu0 %v12580_v30  ;;  %7307 = vmatprep.mubr.f32.mxu0 %v13384_v4  ;;  %v12604_v29 = vpack.c.bf16 %v10988_v0, %v10984_v59  ;;  %v10986_v30 = vld [vmem:[%s17123_s6 + $0x1d0] sm:$0xff]  ;;  %v12614_v24 = vpack.c.bf16 %v10991_v23, %v10987_v54  ;;  %v11025_v59 = vld [vmem:[%s17123_s6 + $0x2d8] sm:$0xff] }
 0x641   : > { %12583 = vmatprep.subr.bf16.mxu0 %v12582_v56  ;;  %v10990_v56 = vld [vmem:[%s17123_s6 + $0x1f0] sm:$0xff]  ;;  %v11045_v23 = vld [vmem:[%s17123_s6 + $0x378] sm:$0x3] }
 0x642   : > { %v11020_v0 = vld [vmem:[%s17123_s6 + $0x2b0] sm:$0xff] }
 0x644   : > { %12585 = vmatpush1.bf16.msra.mxu0 %v12584_v6  ;;  %v12616_v6 = vpack.c.bf16 %v10990_v56, %v10986_v30  ;;  %v11053_v30 = vld [vmem:[%s17123_s6 + $0x388] sm:$0xff] }
 0x645   : > { %12587 = vmatprep.subr.bf16.mxu0 %v12586_v22  ;;  %v7414_v22 = vrot.slane %v15459_v60, 2  ;;  %v11057_v56 = vld [vmem:[%s17123_s6 + $0x3a8] sm:$0xff] }
 0x648   : > { %12589 = vmatpush1.bf16.msra.mxu0 %v12588_v55  ;;  %v10998_v55 = vld [vmem:[%s17123_s6 + $0x230] sm:$0xff] }
 0x649   : > { %10978 = vmatprep.subr.msk.mxu0 %vm7074_vm7, %v7037_v32  ;;  %v11003_v32 = vld [vmem:[%s17123_s6 + $0x258] sm:$0xff]  ;;  %v12620_v25 = vpack.c.bf16 %v10998_v55, %v10994_v16  ;;  %v11060_v55 = vld [vmem:[%s17123_s6 + $0x3c0] sm:$0xff] }
 0x64a   : > { %v12622_v8 = vpack.c.bf16 %v11007_v2, %v11003_v32  ;;  %v11064_v32 = vld [vmem:[%s17123_s6 + $0x3e0] sm:$0xff]  ;;  %v11069_v2 = vld [vmem:[%s17123_s6 + $0x408] sm:$0xff] }
 0x64c   : > { %10979 = vmatpush1.msk.msra.mxu0 %vm7074_vm7, %v7036_v50  ;;  %v11011_v50 = vld [vmem:[%s17123_s6 + $0x298] sm:$0x3] }
 0x64d   : > { %10980 = vmatmul.mubr.msk.f32.vlgmr.msra.gmra.mrb[52].mxu0 %vm7071_vm8, %v15459_v60  ;;  %12591 = vmatprep.subr.bf16.mxu0 %v12590_v42  ;;  %v11019_v42 = vld [vmem:[%s17123_s6 + $0x2a8] sm:$0xff] }
 0x64e   : > { %12593 = vmatpush1.bf16.msra.mxu0 %v12592_v41  ;;  %7378 = vmatprep.mubr.f32.mxu0 %v13384_v4  ;;  %v11023_v41 = vld [vmem:[%s17123_s6 + $0x2c8] sm:$0xff] }
 0x64f   : > { %12595 = vmatprep.subr.bf16.mxu0 %v12594_v37  ;;  %v11018_v37 = vld [vmem:[%s17123_s6 + $0x2a0] sm:$0xff]  ;;  %v12626_v12 = vpack.c.bf16 %v11023_v41, %v11019_v42  ;;  %v11077_v42 = vld [vmem:[%s17123_s6 + $0x448] sm:$0x3]  ;;  %v11055_v41 = vld [vmem:[%s17123_s6 + $0x398] sm:$0xff] }
 0x650   : > { %v12628_v13 = vpack.c.bf16 %v11022_v51, %v11018_v37  ;;  %v11059_v37 = vld [vmem:[%s17123_s6 + $0x3b8] sm:$0xff]  ;;  %v11054_v51 = vld [vmem:[%s17123_s6 + $0x390] sm:$0xff] }
 0x652   : > { %12597 = vmatpush1.bf16.msra.mxu0 %v12596_v35  ;;  %v12630_v35 = vpack.c.bf16 %v11031_v43, %v11027_v31  ;;  %v11058_v31 = vld [vmem:[%s17123_s6 + $0x3b0] sm:$0xff]  ;;  %v11063_v43 = vld [vmem:[%s17123_s6 + $0x3d8] sm:$0xff] }
 0x653   : > { %12599 = vmatprep.subr.bf16.mxu0 %v12598_v26  ;;  %v11030_v26 = vld [vmem:[%s17123_s6 + $0x300] sm:$0xff] }
 0x654   : > { %v12632_v9 = vpack.c.bf16 %v11030_v26, %v11026_v19  ;;  %v7794_v19 = vrot.slane %v15459_v60, 4 }
 0x656   : > { %12601 = vmatpush1.bf16.msra.mxu0 %v12600_v45  ;;  %v11038_v45 = vld [vmem:[%s17123_s6 + $0x340] sm:$0xff] }
 0x657   : > { %10981 = vmatprep.subr.msk.mxu0 %vm7074_vm7, %v7039_v46  ;;  %v12636_v46 = vpack.c.bf16 %v11038_v45, %v11034_v38  ;;  %v12668_v38 = vpack.c.bf16 %v11066_v15, %v11062_v20  ;;  %v11124_v20 = vld [vmem:[%s17123_s6 + $0x560] sm:$0xff]  ;;  %v11129_v15 = vld [vmem:[%s17123_s6 + $0x588] sm:$0xff] }
 0x65a   : > { %10982 = vmatpush1.msk.msra.mxu0 %vm7074_vm7, %v7038_v63  ;;  %v11033_v63 = vld [vmem:[%s17123_s6 + $0x318] sm:$0xff] }
 0x65b   : > { %10983 = vmatmul.mubr.msk.f32.vlgmr.msra.gmra.mrb[54].mxu0 %vm7071_vm8, %v15459_v60  ;;  %12603 = vmatprep.subr.bf16.mxu0 %v12602_v52  ;;  %v11042_v52 = vld [vmem:[%s17123_s6 + $0x360] sm:$0x3]  ;;  %v12642_v5 = vpack.c.bf16 %v11033_v63, %v11029_v62 }
 0x65c   : > { %12605 = vmatpush1.bf16.msra.mxu0 %v12604_v29  ;;  %7493 = vmatprep.mubr.f32.mxu0 %v13384_v4  ;;  %v12638_v29 = vpack.c.bf16 %v11025_v59, %v11021_v57  ;;  %v11079_v59 = vld [vmem:[%s17123_s6 + $0x458] sm:$0x3]  ;;  %v11086_v62 = vld [vmem:[%s17123_s6 + $0x460] sm:$0xff] }
 0x65d   : > { %12607 = vmatprep.subr.bf16.mxu0 %v12606_v48  ;;  %v12640_v48 = vpack.c.bf16 %v11024_v47, %v11020_v0  ;;  %v11087_v0 = vld [vmem:[%s17123_s6 + $0x468] sm:$0xff]  ;;  %v11090_v63 = vld [vmem:[%s17123_s6 + $0x480] sm:$0xff] }
 0x65e   : > { %v11091_v47 = vld [vmem:[%s17123_s6 + $0x488] sm:$0xff] }
 0x660   : > { %12609 = vmatpush1.bf16.msra.mxu0 %v12608_v27  ;;  %v11037_v27 = vld [vmem:[%s17123_s6 + $0x338] sm:$0xff] }
 0x661   : > { %12611 = vmatprep.subr.bf16.mxu0 %v12610_v18  ;;  %v11041_v18 = vld [vmem:[%s17123_s6 + $0x358] sm:$0xff] }
 0x662   : > { %v12646_v58 = vpack.c.bf16 %v11041_v18, %v11037_v27  ;;  %v11098_v27 = vld [vmem:[%s17123_s6 + $0x4c0] sm:$0xff]  ;;  %v11103_v18 = vld [vmem:[%s17123_s6 + $0x4e8] sm:$0xff] }
 0x664   : > { %12613 = vmatpush1.bf16.msra.mxu0 %v12612_v3  ;;  %v11036_v3 = vld [vmem:[%s17123_s6 + $0x330] sm:$0xff] }
 0x665   : > { %11012 = vmatprep.subr.msk.mxu0 %vm7074_vm7, %v11009_v36  ;;  %v11040_v36 = vld [vmem:[%s17123_s6 + $0x350] sm:$0xff] }
 0x666   : > { %v12648_v54 = vpack.c.bf16 %v11040_v36, %v11036_v3  ;;  %v11102_v36 = vld [vmem:[%s17123_s6 + $0x4e0] sm:$0xff] }
 0x668   : > { %11013 = vmatpush1.msk.msra.mxu0 %vm7074_vm7, %v11008_v53  ;;  %v11061_v53 = vld [vmem:[%s17123_s6 + $0x3c8] sm:$0xff] }
 0x669   : > { %11014 = vmatmul.mubr.msk.f32.vlgmr.msra.gmra.mrb[52].mxu0 %vm7071_vm8, %v7414_v22  ;;  %12615 = vmatprep.subr.bf16.mxu0 %v12614_v24  ;;  %v11065_v24 = vld [vmem:[%s17123_s6 + $0x3e8] sm:$0xff] }
 0x66a   : > { %12617 = vmatpush1.bf16.msra.mxu0 %v12616_v6  ;;  %7564 = vmatprep.mubr.f32.mxu0 %v13384_v4  ;;  %v11044_v6 = vld [vmem:[%s17123_s6 + $0x370] sm:$0x3]  ;;  %v12654_v16 = vpack.c.bf16 %v11065_v24, %v11061_v53 }
 0x66b   : > { %12619 = vmatprep.subr.bf16.mxu0 %v12618_v1  ;;  %v12652_v1 = vpack.c.bf16 %v11056_v11, %v11052_v34  ;;  %v10084_v11 = vld [vmem:[%s17125_s8 + $0x48] sm:$0xff] }
 0x66e   : > { %12621 = vmatpush1.bf16.msra.mxu0 %v12620_v25  ;;  %v11073_v25 = vld [vmem:[%s17123_s6 + $0x428] sm:$0xff] }
 0x66f   : > { %12623 = vmatprep.subr.bf16.mxu0 %v12622_v8  ;;  %v12656_v8 = vpack.c.bf16 %v11064_v32, %v11060_v55  ;;  %v12658_v28 = vpack.c.bf16 %v11073_v25, %v11069_v2  ;;  %v11092_v55 = vld [vmem:[%s17123_s6 + $0x490] sm:$0xff]  ;;  %v11097_v32 = vld [vmem:[%s17123_s6 + $0x4b8] sm:$0xff]  ;;  %v11110_v25 = vld [vmem:[%s17123_s6 + $0x520] sm:$0x3] }
 0x670   : > { %v11101_v2 = vld [vmem:[%s17123_s6 + $0x4d8] sm:$0xff] }
 0x672   : > { %12625 = vmatpush1.bf16.msra.mxu0 %v12624_v33  ;;  %v11072_v33 = vld [vmem:[%s17123_s6 + $0x420] sm:$0xff] }
 0x673   : > { %11015 = vmatprep.subr.msk.mxu0 %vm7074_vm7, %v11011_v50  ;;  %v12660_v50 = vpack.c.bf16 %v11072_v33, %v11068_v14  ;;  %v7984_v14 = vrot.slane %v15459_v60, 5  ;;  %v12690_v33 = vpack.c.bf16 %v11101_v2, %v11097_v32  ;;  %v11154_v32 = vld [vmem:[%s17123_s6 + $0x620] sm:$0xff] }
 0x674   : > { %v11158_v2 = vld [vmem:[%s17123_s6 + $0x640] sm:$0xff] }
 0x676   : > { %11016 = vmatpush1.msk.msra.mxu0 %vm7074_vm7, %v11010_v61  ;;  %v11067_v61 = vld [vmem:[%s17123_s6 + $0x3f8] sm:$0xff] }
 0x677   : > { %11017 = vmatmul.mubr.msk.f32.vlgmr.msra.gmra.mrb[54].mxu0 %vm7071_vm8, %v7414_v22  ;;  %12627 = vmatprep.subr.bf16.mxu0 %v12626_v12  ;;  %v12650_v22 = vpack.c.bf16 %v11057_v56, %v11053_v30  ;;  %v11076_v12 = vld [vmem:[%s17123_s6 + $0x440] sm:$0x3]  ;;  %v12666_v26 = vpack.c.bf16 %v11067_v61, %v11063_v43  ;;  %v10100_v30 = vld [vmem:[%s17125_s8 + $0xc8] sm:$0xff]  ;;  %v11104_v43 = vld [vmem:[%s17123_s6 + $0x4f0] sm:$0xff] }
 0x678   : > { %12629 = vmatpush1.bf16.msra.mxu0 %v12628_v13  ;;  %7683 = vmatprep.mubr.f32.mxu0 %v13384_v4  ;;  %v12662_v13 = vpack.c.bf16 %v11059_v37, %v11055_v41  ;;  %v10083_v56 = vld [vmem:[%s17125_s8 + $0x40] sm:$0xff]  ;;  %v11105_v41 = vld [vmem:[%s17123_s6 + $0x4f8] sm:$0xff]  ;;  %v11108_v61 = vld [vmem:[%s17123_s6 + $0x510] sm:$0xff] }
 0x679   : > { %12631 = vmatprep.subr.bf16.mxu0 %v12630_v35  ;;  %v12664_v35 = vpack.c.bf16 %v11058_v31, %v11054_v51  ;;  %v12956_v24 = vpack.c.bf16 %v10084_v11, %v10083_v56  ;;  %v11109_v37 = vld [vmem:[%s17123_s6 + $0x518] sm:$0xff] }
 0x67a   : > { %v12694_v31 = vpack.c.bf16 %v11109_v37, %v11105_v41  ;;  %v11139_v56 = vld [vmem:[%s17123_s6 + $0x5d8] sm:$0xff]  ;;  %v11166_v41 = vld [vmem:[%s17123_s6 + $0x680] sm:$0xff]  ;;  %v11171_v37 = vld [vmem:[%s17123_s6 + $0x6a8] sm:$0xff] }
 0x67c   : > { %12633 = vmatpush1.bf16.msra.mxu0 %v12632_v9  ;;  %v11071_v9 = vld [vmem:[%s17123_s6 + $0x418] sm:$0xff] }
 0x67d   : > { %12635 = vmatprep.subr.bf16.mxu0 %v12634_v44  ;;  %v11075_v44 = vld [vmem:[%s17123_s6 + $0x438] sm:$0xff] }
 0x67e   : > { %v12670_v45 = vpack.c.bf16 %v11075_v44, %v11071_v9  ;;  %v11133_v9 = vld [vmem:[%s17123_s6 + $0x5a8] sm:$0xff]  ;;  %v11112_v44 = vld [vmem:[%s17123_s6 + $0x530] sm:$0x3] }
 0x680   : > { %12637 = vmatpush1.bf16.msra.mxu0 %v12636_v46  ;;  %v11070_v46 = vld [vmem:[%s17123_s6 + $0x410] sm:$0xff] }
 0x681   : > { %11046 = vmatprep.subr.msk.mxu0 %vm7074_vm7, %v11043_v21  ;;  %v11074_v21 = vld [vmem:[%s17123_s6 + $0x430] sm:$0xff] }
 0x682   : > { %v12672_v57 = vpack.c.bf16 %v11074_v21, %v11070_v46  ;;  %v12702_v46 = vpack.c.bf16 %v11133_v9, %v11129_v15  ;;  %v11128_v21 = vld [vmem:[%s17123_s6 + $0x580] sm:$0xff]  ;;  %v11160_v15 = vld [vmem:[%s17123_s6 + $0x650] sm:$0xff]  ;;  %v11165_v9 = vld [vmem:[%s17123_s6 + $0x678] sm:$0xff] }
 0x684   : > { %11047 = vmatpush1.msk.msra.mxu0 %vm7074_vm7, %v11042_v52  ;;  %v11095_v52 = vld [vmem:[%s17123_s6 + $0x4a8] sm:$0xff] }
 0x685   : > { %11048 = vmatmul.mubr.msk.f32.vlgmr.msra.gmra.mrb[52].mxu0 %vm7071_vm8, %v7604_v49  ;;  %12639 = vmatprep.subr.bf16.mxu0 %v12638_v29  ;;  %v11099_v29 = vld [vmem:[%s17123_s6 + $0x4c8] sm:$0xff] }
 0x686   : > { %12641 = vmatpush1.bf16.msra.mxu0 %v12640_v48  ;;  %7754 = vmatprep.mubr.f32.mxu0 %v13384_v4  ;;  %v11078_v48 = vld [vmem:[%s17123_s6 + $0x450] sm:$0x3]  ;;  %v12678_v10 = vpack.c.bf16 %v11099_v29, %v11095_v52  ;;  %v11140_v52 = vld [vmem:[%s17123_s6 + $0x5e0] sm:$0xff] }
 0x687   : > { %12643 = vmatprep.subr.bf16.mxu0 %v12642_v5  ;;  %v12676_v5 = vpack.c.bf16 %v11090_v63, %v11086_v62  ;;  %v11136_v63 = vld [vmem:[%s17123_s6 + $0x5c0] sm:$0xff] }
 0x688   : > { %v12708_v29 = vpack.c.bf16 %v11140_v52, %v11136_v63  ;;  %v11172_v52 = vld [vmem:[%s17123_s6 + $0x6b0] sm:$0xff] }
 0x68a   : > { %12645 = vmatpush1.bf16.msra.mxu0 %v12644_v17  ;;  %v11107_v17 = vld [vmem:[%s17123_s6 + $0x508] sm:$0xff] }
 0x68b   : > { %12647 = vmatprep.subr.bf16.mxu0 %v12646_v58  ;;  %v12680_v58 = vpack.c.bf16 %v11098_v27, %v11094_v39  ;;  %v12682_v3 = vpack.c.bf16 %v11107_v17, %v11103_v18  ;;  %v11126_v39 = vld [vmem:[%s17123_s6 + $0x570] sm:$0xff]  ;;  %v11131_v27 = vld [vmem:[%s17123_s6 + $0x598] sm:$0xff]  ;;  %v11144_v17 = vld [vmem:[%s17123_s6 + $0x600] sm:$0x3] }
 0x68c   : > { %v11135_v18 = vld [vmem:[%s17123_s6 + $0x5b8] sm:$0xff] }
 0x68e   : > { %12649 = vmatpush1.bf16.msra.mxu0 %v12648_v54  ;;  %v11106_v54 = vld [vmem:[%s17123_s6 + $0x500] sm:$0xff] }
 0x68f   : > { %11049 = vmatprep.subr.msk.mxu0 %vm7074_vm7, %v11045_v23  ;;  %v10099_v23 = vld [vmem:[%s17125_s8 + $0xc0] sm:$0xff]  ;;  %v12684_v53 = vpack.c.bf16 %v11106_v54, %v11102_v36  ;;  %v8174_v36 = vrot.slane %v15459_v60, 6  ;;  %v12714_v54 = vpack.c.bf16 %v11135_v18, %v11131_v27  ;;  %v11197_v18 = vld [vmem:[%s17123_s6 + $0x748] sm:$0xff] }
 0x690   : > { %v12954_v34 = vpack.c.bf16 %v10100_v30, %v10099_v23  ;;  %v11130_v23 = vld [vmem:[%s17123_s6 + $0x590] sm:$0xff]  ;;  %v11192_v27 = vld [vmem:[%s17123_s6 + $0x720] sm:$0xff] }
 0x691   : > { %v11134_v30 = vld [vmem:[%s17123_s6 + $0x5b0] sm:$0xff] }
 0x692   : > { %11050 = vmatpush1.msk.msra.mxu0 %vm7074_vm7, %v11044_v6  ;;  %12955 = vmatprep.subr.bf16.mxu1 %v12954_v34  ;;  %v11111_v6 = vld [vmem:[%s17123_s6 + $0x528] sm:$0x3]  ;;  %v11143_v34 = vld [vmem:[%s17123_s6 + $0x5f8] sm:$0xff]  ;;  %v12716_v11 = vpack.c.bf16 %v11134_v30, %v11130_v23  ;;  %v11196_v23 = vld [vmem:[%s17123_s6 + $0x740] sm:$0xff] }
 0x693   : > { %11051 = vmatmul.mubr.msk.f32.vlgmr.msra.gmra.mrb[54].mxu0 %vm7071_vm8, %v7604_v49  ;;  %12651 = vmatprep.subr.bf16.mxu0 %v12650_v22  ;;  %v12674_v49 = vpack.c.bf16 %v11091_v47, %v11087_v0  ;;  %v11089_v22 = vld [vmem:[%s17123_s6 + $0x478] sm:$0xff]  ;;  %v11141_v0 = vld [vmem:[%s17123_s6 + $0x5e8] sm:$0xff]  ;;  %v11200_v30 = vld [vmem:[%s17123_s6 + $0x760] sm:$0xff] }
 0x694   : > { %12653 = vmatpush1.bf16.msra.mxu0 %v12652_v1  ;;  %7873 = vmatprep.mubr.f32.mxu0 %v13384_v4  ;;  %v11093_v1 = vld [vmem:[%s17123_s6 + $0x498] sm:$0xff] }
 0x695   : > { %12655 = vmatprep.subr.bf16.mxu0 %v12654_v16  ;;  %12957 = vmatpush3.bf16.msra.mxu1 %v12956_v24  ;;  %v11088_v16 = vld [vmem:[%s17123_s6 + $0x470] sm:$0xff] }
 0x696   : > { %v11138_v24 = vld [vmem:[%s17123_s6 + $0x5d0] sm:$0xff] }
 0x698   : > { %12657 = vmatpush1.bf16.msra.mxu0 %v12656_v8  ;;  %v12686_v8 = vpack.c.bf16 %v11093_v1, %v11089_v22  ;;  %v11147_v1 = vld [vmem:[%s17123_s6 + $0x618] sm:$0x3] }
 0x699   : > { %12659 = vmatprep.subr.bf16.mxu0 %v12658_v28  ;;  %v12688_v28 = vpack.c.bf16 %v11092_v55, %v11088_v16  ;;  %v11155_v16 = vld [vmem:[%s17123_s6 + $0x628] sm:$0xff] }
 0x69a   : > { %v11159_v55 = vld [vmem:[%s17123_s6 + $0x648] sm:$0xff] }
 0x69c   : > { %12661 = vmatpush1.bf16.msra.mxu0 %v12660_v50  ;;  %v11096_v50 = vld [vmem:[%s17123_s6 + $0x4b0] sm:$0xff] }
 0x69d   : > { %11080 = vmatprep.subr.msk.mxu0 %vm7074_vm7, %v11077_v42  ;;  %v11100_v42 = vld [vmem:[%s17123_s6 + $0x4d0] sm:$0xff] }
 0x69e   : > { %v12692_v51 = vpack.c.bf16 %v11100_v42, %v11096_v50  ;;  %v11162_v42 = vld [vmem:[%s17123_s6 + $0x660] sm:$0xff] }
 0x6a0   : > { %11081 = vmatpush1.msk.msra.mxu0 %vm7074_vm7, %v11076_v12  ;;  %v12696_v12 = vpack.c.bf16 %v11108_v61, %v11104_v43  ;;  %v11170_v61 = vld [vmem:[%s17123_s6 + $0x6a0] sm:$0xff] }
 0x6a1   : > { %11082 = vmatmul.mubr.msk.f32.vlgmr.msra.gmra.mrb[52].mxu0 %vm7071_vm8, %v7794_v19  ;;  %12663 = vmatprep.subr.bf16.mxu0 %v12662_v13  ;;  %v11113_v13 = vld [vmem:[%s17123_s6 + $0x538] sm:$0x3] }
 0x6a2   : > { %12665 = vmatpush1.bf16.msra.mxu0 %v12664_v35  ;;  %7944 = vmatprep.mubr.f32.mxu0 %v13384_v4  ;;  %v11121_v35 = vld [vmem:[%s17123_s6 + $0x548] sm:$0xff] }
 0x6a3   : > { %12667 = vmatprep.subr.bf16.mxu0 %v12666_v26  ;;  %v11120_v26 = vld [vmem:[%s17123_s6 + $0x540] sm:$0xff] }
 0x6a6   : > { %12669 = vmatpush1.bf16.msra.mxu0 %v12668_v38 }
 0x6a7   : > { %12671 = vmatprep.subr.bf16.mxu0 %v12670_v45  ;;  %v12700_v45 = vpack.c.bf16 %v11124_v20, %v11120_v26  ;;  %v11161_v26 = vld [vmem:[%s17123_s6 + $0x658] sm:$0xff]  ;;  %v11156_v20 = vld [vmem:[%s17123_s6 + $0x630] sm:$0xff] }
 0x6aa   : > { %12673 = vmatpush1.bf16.msra.mxu0 %v12672_v57  ;;  %v11132_v57 = vld [vmem:[%s17123_s6 + $0x5a0] sm:$0xff] }
 0x6ab   : > { %11083 = vmatprep.subr.msk.mxu0 %vm7074_vm7, %v11079_v59  ;;  %v11137_v59 = vld [vmem:[%s17123_s6 + $0x5c8] sm:$0xff]  ;;  %v12704_v47 = vpack.c.bf16 %v11132_v57, %v11128_v21  ;;  %v8364_v21 = vrot.slane %v15459_v60, 7 }
 0x6ac   : > { %v12706_v62 = vpack.c.bf16 %v11141_v0, %v11137_v59  ;;  %v11164_v59 = vld [vmem:[%s17123_s6 + $0x670] sm:$0xff] }
 0x6ad   : > { %v11168_v0 = vld [vmem:[%s17123_s6 + $0x690] sm:$0xff] }
 0x6ae   : > { %11084 = vmatpush1.msk.msra.mxu0 %vm7074_vm7, %v11078_v48  ;;  %v11145_v48 = vld [vmem:[%s17123_s6 + $0x608] sm:$0x3]  ;;  %v12740_v60 = vpack.c.bf16 %v11168_v0, %v11164_v59  ;;  %v11214_v0 = vld [vmem:[%s17123_s6 + $0x7d0] sm:$0x3] }
 0x6af   : > { %11085 = vmatmul.mubr.msk.f32.vlgmr.msra.gmra.mrb[54].mxu0 %vm7071_vm8, %v7794_v19  ;;  %12675 = vmatprep.subr.bf16.mxu0 %v12674_v49  ;;  %v11125_v19 = vld [vmem:[%s17123_s6 + $0x568] sm:$0xff]  ;;  %v11123_v49 = vld [vmem:[%s17123_s6 + $0x558] sm:$0xff] }
 0x6b0   : > { %12677 = vmatpush1.bf16.msra.mxu0 %v12676_v5  ;;  %8063 = vmatprep.mubr.f32.mxu0 %v13384_v4  ;;  %v12698_v38 = vpack.c.bf16 %v11125_v19, %v11121_v35  ;;  %v11127_v5 = vld [vmem:[%s17123_s6 + $0x578] sm:$0xff]  ;;  %v11179_v35 = vld [vmem:[%s17123_s6 + $0x6e8] sm:$0x3] }
 0x6b1   : > { %12679 = vmatprep.subr.bf16.mxu0 %v12678_v10  ;;  %v11122_v10 = vld [vmem:[%s17123_s6 + $0x550] sm:$0xff]  ;;  %v11157_v19 = vld [vmem:[%s17123_s6 + $0x638] sm:$0xff]  ;;  %v11235_v59 = vld [vmem:[%s17123_s6 + $0x848] sm:$0xff] }
 0x6b4   : > { %12681 = vmatpush1.bf16.msra.mxu0 %v12680_v58  ;;  %v12710_v58 = vpack.c.bf16 %v11127_v5, %v11123_v49  ;;  %v11181_v49 = vld [vmem:[%s17123_s6 + $0x6f8] sm:$0x3]  ;;  %v11189_v5 = vld [vmem:[%s17123_s6 + $0x708] sm:$0xff] }
 0x6b5   : > { %12683 = vmatprep.subr.bf16.mxu0 %v12682_v3  ;;  %v12712_v3 = vpack.c.bf16 %v11126_v39, %v11122_v10  ;;  %v11193_v10 = vld [vmem:[%s17123_s6 + $0x728] sm:$0xff]  ;;  %v11188_v39 = vld [vmem:[%s17123_s6 + $0x700] sm:$0xff] }
 0x6b8   : > { %12685 = vmatpush1.bf16.msra.mxu0 %v12684_v53  ;;  %v12718_v53 = vpack.c.bf16 %v11143_v34, %v11139_v56  ;;  %v11205_v56 = vld [vmem:[%s17123_s6 + $0x788] sm:$0xff] }
 0x6b9   : > { %11114 = vmatprep.subr.msk.mxu0 %vm7074_vm7, %v11111_v6  ;;  %v11142_v6 = vld [vmem:[%s17123_s6 + $0x5f0] sm:$0xff]  ;;  %v11209_v34 = vld [vmem:[%s17123_s6 + $0x7a8] sm:$0xff] }
 0x6ba   : > { %v12720_v22 = vpack.c.bf16 %v11142_v6, %v11138_v24  ;;  %v11204_v24 = vld [vmem:[%s17123_s6 + $0x780] sm:$0xff] }
 0x6bb   : > { %v11208_v6 = vld [vmem:[%s17123_s6 + $0x7a0] sm:$0xff] }
 0x6bc   : > { %11115 = vmatpush1.msk.msra.mxu0 %vm7074_vm7, %v11110_v25  ;;  %v11163_v25 = vld [vmem:[%s17123_s6 + $0x668] sm:$0xff] }
 0x6bd   : > { %11116 = vmatmul.mubr.msk.f32.vlgmr.msra.gmra.mrb[52].mxu0 %vm7071_vm8, %v7984_v14  ;;  %12687 = vmatprep.subr.bf16.mxu0 %v12686_v8  ;;  %v11167_v8 = vld [vmem:[%s17123_s6 + $0x688] sm:$0xff] }
 0x6be   : > { %12689 = vmatpush1.bf16.msra.mxu0 %v12688_v28  ;;  %8134 = vmatprep.mubr.f32.mxu0 %v13384_v4  ;;  %v11146_v28 = vld [vmem:[%s17123_s6 + $0x610] sm:$0x3]  ;;  %v12726_v50 = vpack.c.bf16 %v11167_v8, %v11163_v25  ;;  %v11199_v25 = vld [vmem:[%s17123_s6 + $0x758] sm:$0xff] }
 0x6bf   : > { %12691 = vmatprep.subr.bf16.mxu0 %v12690_v33  ;;  %v12724_v33 = vpack.c.bf16 %v11158_v2, %v11154_v32  ;;  %v11190_v32 = vld [vmem:[%s17123_s6 + $0x710] sm:$0xff]  ;;  %v11203_v8 = vld [vmem:[%s17123_s6 + $0x778] sm:$0xff] }
 0x6c0   : > { %v11194_v2 = vld [vmem:[%s17123_s6 + $0x730] sm:$0xff] }
 0x6c2   : > { %12693 = vmatpush1.bf16.msra.mxu0 %v12692_v51  ;;  %v11175_v51 = vld [vmem:[%s17123_s6 + $0x6c8] sm:$0xff] }
 0x6c3   : > { %12695 = vmatprep.subr.bf16.mxu0 %v12694_v31  ;;  %v12728_v31 = vpack.c.bf16 %v11166_v41, %v11162_v42  ;;  %v12730_v43 = vpack.c.bf16 %v11175_v51, %v11171_v37  ;;  %v11198_v42 = vld [vmem:[%s17123_s6 + $0x750] sm:$0xff]  ;;  %v11207_v37 = vld [vmem:[%s17123_s6 + $0x798] sm:$0xff] }
 0x6c4   : > { %v11202_v41 = vld [vmem:[%s17123_s6 + $0x770] sm:$0xff]  ;;  %v11211_v51 = vld [vmem:[%s17123_s6 + $0x7b8] sm:$0xff] }
 0x6c6   : > { %12697 = vmatpush1.bf16.msra.mxu0 %v12696_v12  ;;  %v11174_v12 = vld [vmem:[%s17123_s6 + $0x6c0] sm:$0xff] }
 0x6c7   : > { %11117 = vmatprep.subr.msk.mxu0 %vm7074_vm7, %v11113_v13  ;;  %v12732_v13 = vpack.c.bf16 %v11174_v12, %v11170_v61  ;;  %v11206_v61 = vld [vmem:[%s17123_s6 + $0x790] sm:$0xff] }
 0x6c8   : > { %v11210_v12 = vld [vmem:[%s17123_s6 + $0x7b0] sm:$0xff] }
 0x6ca   : > { %11118 = vmatpush1.msk.msra.mxu0 %vm7074_vm7, %v11112_v44  ;;  %v11169_v44 = vld [vmem:[%s17123_s6 + $0x698] sm:$0xff] }
 0x6cb   : > { %11119 = vmatmul.mubr.msk.f32.vlgmr.msra.gmra.mrb[54].mxu0 %vm7071_vm8, %v7984_v14  ;;  %12699 = vmatprep.subr.bf16.mxu0 %v12698_v38  ;;  %v12722_v14 = vpack.c.bf16 %v11159_v55, %v11155_v16  ;;  %v11178_v38 = vld [vmem:[%s17123_s6 + $0x6e0] sm:$0x3]  ;;  %v12738_v57 = vpack.c.bf16 %v11169_v44, %v11165_v9  ;;  %v11191_v16 = vld [vmem:[%s17123_s6 + $0x718] sm:$0xff]  ;;  %v11227_v9 = vld [vmem:[%s17123_s6 + $0x808] sm:$0xff] }
 0x6cc   : > { %12701 = vmatpush1.bf16.msra.mxu0 %v12700_v45  ;;  %8253 = vmatprep.mubr.f32.mxu0 %v13384_v4  ;;  %v12734_v45 = vpack.c.bf16 %v11161_v26, %v11157_v19  ;;  %v11195_v55 = vld [vmem:[%s17123_s6 + $0x738] sm:$0xff]  ;;  %v12768_v19 = vpack.c.bf16 %v11210_v12, %v11206_v61  ;;  %v10085_v44 = vld [vmem:[%s17125_s8 + $0x50] sm:$0xff]  ;;  %v11264_v61 = vld [vmem:[%s17123_s6 + $0x900] sm:$0xff] }
 0x6cd   : > { %12703 = vmatprep.subr.bf16.mxu0 %v12702_v46  ;;  %v12736_v46 = vpack.c.bf16 %v11160_v15, %v11156_v20  ;;  %v11215_v20 = vld [vmem:[%s17123_s6 + $0x7d8] sm:$0x3]  ;;  %v11223_v15 = vld [vmem:[%s17123_s6 + $0x7e8] sm:$0xff]  ;;  %v11268_v12 = vld [vmem:[%s17123_s6 + $0x920] sm:$0xff] }
 0x6d0   : > { %12705 = vmatpush1.bf16.msra.mxu0 %v12704_v47  ;;  %v11173_v47 = vld [vmem:[%s17123_s6 + $0x6b8] sm:$0xff] }
 0x6d1   : > { %12707 = vmatprep.subr.bf16.mxu0 %v12706_v62  ;;  %v11177_v62 = vld [vmem:[%s17123_s6 + $0x6d8] sm:$0xff] }
 0x6d2   : > { %v12742_v63 = vpack.c.bf16 %v11177_v62, %v11173_v47  ;;  %v12770_v47 = vpack.c.bf16 %v11227_v9, %v11223_v15  ;;  %v11276_v15 = vld [vmem:[%s17123_s6 + $0x960] sm:$0xff] }
 0x6d4   : > { %12709 = vmatpush1.bf16.msra.mxu0 %v12708_v29  ;;  %v11176_v29 = vld [vmem:[%s17123_s6 + $0x6d0] sm:$0xff] }
 0x6d5   : > { %11148 = vmatprep.subr.msk.mxu0 %vm7074_vm7, %v11145_v48  ;;  %v12744_v48 = vpack.c.bf16 %v11176_v29, %v11172_v52  ;;  %v11234_v52 = vld [vmem:[%s17123_s6 + $0x840] sm:$0xff]  ;;  %v11239_v29 = vld [vmem:[%s17123_s6 + $0x868] sm:$0xff] }
 0x6d8   : > { %11149 = vmatpush1.msk.msra.mxu0 %vm7074_vm7, %v11144_v17  ;;  %v11201_v17 = vld [vmem:[%s17123_s6 + $0x768] sm:$0xff] }
 0x6d9   : > { %11150 = vmatmul.mubr.msk.f32.vlgmr.msra.gmra.mrb[52].mxu0 %vm7071_vm8, %v8174_v36  ;;  %12711 = vmatprep.subr.bf16.mxu0 %v12710_v58  ;;  %v11180_v58 = vld [vmem:[%s17123_s6 + $0x6f0] sm:$0x3] }
 0x6da   : > { %12713 = vmatpush1.bf16.msra.mxu0 %v12712_v3  ;;  %8324 = vmatprep.mubr.f32.mxu0 %v13384_v4  ;;  %v12746_v3 = vpack.c.bf16 %v11193_v10, %v11189_v5  ;;  %v11238_v10 = vld [vmem:[%s17123_s6 + $0x860] sm:$0xff] }
 0x6db   : > { %12715 = vmatprep.subr.bf16.mxu0 %v12714_v54  ;;  %v12750_v54 = vpack.c.bf16 %v11201_v17, %v11197_v18  ;;  %v11247_v18 = vld [vmem:[%s17123_s6 + $0x8a8] sm:$0x3]  ;;  %v11225_v17 = vld [vmem:[%s17123_s6 + $0x7f8] sm:$0xff] }
 0x6de   : > { %12717 = vmatpush1.bf16.msra.mxu0 %v12716_v11  ;;  %v12752_v11 = vpack.c.bf16 %v11200_v30, %v11196_v23  ;;  %v11237_v23 = vld [vmem:[%s17123_s6 + $0x858] sm:$0xff]  ;;  %v11246_v30 = vld [vmem:[%s17123_s6 + $0x8a0] sm:$0x3] }
 0x6df   : > { %12719 = vmatprep.subr.bf16.mxu0 %v12718_v53  ;;  %v12754_v53 = vpack.c.bf16 %v11209_v34, %v11205_v56 }
 0x6e2   : > { %12721 = vmatpush1.bf16.msra.mxu0 %v12720_v22  ;;  %v12756_v22 = vpack.c.bf16 %v11208_v6, %v11204_v24  ;;  %v11232_v24 = vld [vmem:[%s17123_s6 + $0x830] sm:$0xff] }
 0x6e3   : > { %11151 = vmatprep.subr.msk.mxu0 %vm7074_vm7, %v11147_v1  ;;  %v11213_v1 = vld [vmem:[%s17123_s6 + $0x7c8] sm:$0x3]  ;;  %v11236_v6 = vld [vmem:[%s17123_s6 + $0x850] sm:$0xff] }
 0x6e6   : > { %11152 = vmatpush1.msk.msra.mxu0 %vm7074_vm7, %v11146_v28  ;;  %v11212_v28 = vld [vmem:[%s17123_s6 + $0x7c0] sm:$0x3] }
 0x6e7   : > { %11153 = vmatmul.mubr.msk.f32.vlgmr.msra.gmra.mrb[54].mxu0 %vm7071_vm8, %v8174_v36  ;;  %12723 = vmatprep.subr.bf16.mxu0 %v12722_v14  ;;  %v12748_v36 = vpack.c.bf16 %v11192_v27, %v11188_v39  ;;  %v12758_v14 = vpack.c.bf16 %v11195_v55, %v11191_v16  ;;  %v11242_v39 = vld [vmem:[%s17123_s6 + $0x880] sm:$0xff]  ;;  %v12788_v16 = vpack.c.bf16 %v11236_v6, %v11232_v24 }
 0x6e8   : > { %12725 = vmatpush1.bf16.msra.mxu0 %v12724_v33  ;;  %8443 = vmatprep.mubr.f32.mxu0 %v13384_v4  ;;  %v12760_v33 = vpack.c.bf16 %v11194_v2, %v11190_v32  ;;  %v12780_v27 = vpack.c.bf16 %v11242_v39, %v11238_v10  ;;  %v11240_v32 = vld [vmem:[%s17123_s6 + $0x870] sm:$0xff]  ;;  %v11298_v24 = vld [vmem:[%s17123_s6 + $0x9e0] sm:$0xff] }
 0x6e9   : > { %12727 = vmatprep.subr.bf16.mxu0 %v12726_v50  ;;  %v12762_v50 = vpack.c.bf16 %v11203_v8, %v11199_v25  ;;  %v11244_v2 = vld [vmem:[%s17123_s6 + $0x890] sm:$0xff]  ;;  %v11249_v8 = vld [vmem:[%s17123_s6 + $0x8b8] sm:$0x3]  ;;  %v11302_v6 = vld [vmem:[%s17123_s6 + $0xa00] sm:$0xff] }
 0x6ea   : > { %v12792_v25 = vpack.c.bf16 %v11244_v2, %v11240_v32  ;;  %v11274_v39 = vld [vmem:[%s17123_s6 + $0x950] sm:$0xff]  ;;  %v11306_v32 = vld [vmem:[%s17123_s6 + $0xa20] sm:$0xff] }
 0x6eb   : > { %v11310_v2 = vld [vmem:[%s17123_s6 + $0xa40] sm:$0xff] }
 0x6ec   : > { %12729 = vmatpush1.bf16.msra.mxu0 %v12728_v31  ;;  %v12764_v31 = vpack.c.bf16 %v11202_v41, %v11198_v42  ;;  %v11265_v42 = vld [vmem:[%s17123_s6 + $0x908] sm:$0xff] }
 0x6ed   : > { %12731 = vmatprep.subr.bf16.mxu0 %v12730_v43  ;;  %v12766_v43 = vpack.c.bf16 %v11211_v51, %v11207_v37  ;;  %v11269_v41 = vld [vmem:[%s17123_s6 + $0x928] sm:$0xff]  ;;  %v11248_v37 = vld [vmem:[%s17123_s6 + $0x8b0] sm:$0x3] }
 0x6f0   : > { %12733 = vmatpush1.bf16.msra.mxu0 %v12732_v13  ;;  %v10101_v13 = vld [vmem:[%s17125_s8 + $0xd0] sm:$0xff] }
 0x6f1   : > { %11182 = vmatprep.subr.msk.mxu0 %vm7074_vm7, %v11179_v35  ;;  %v10102_v35 = vld [vmem:[%s17125_s8 + $0xd8] sm:$0xff] }
 0x6f2   : > { %v12958_v26 = vpack.c.bf16 %v10102_v35, %v10101_v13  ;;  %v11273_v13 = vld [vmem:[%s17123_s6 + $0x948] sm:$0xff] }
 0x6f3   : > { %v11277_v35 = vld [vmem:[%s17123_s6 + $0x968] sm:$0xff] }
 0x6f4   : > { %11183 = vmatpush1.msk.msra.mxu0 %vm7074_vm7, %v11178_v38  ;;  %12959 = vmatprep.subr.bf16.mxu1 %v12958_v26  ;;  %v10086_v38 = vld [vmem:[%s17125_s8 + $0x58] sm:$0xff]  ;;  %v12802_v26 = vpack.c.bf16 %v11277_v35, %v11273_v13  ;;  %v9124_v35 = vrot.slane %v15451_v40, 3 }
 0x6f5   : > { %11184 = vmatmul.mubr.msk.f32.vlgmr.msra.gmra.mrb[52].mxu0 %vm7071_vm8, %v8364_v21  ;;  %12735 = vmatprep.subr.bf16.mxu0 %v12734_v45  ;;  %v11222_v45 = vld [vmem:[%s17123_s6 + $0x7e0] sm:$0xff]  ;;  %v11313_v13 = vld [vmem:[%s17123_s6 + $0xa58] sm:$0xff] }
 0x6f6   : > { %12737 = vmatpush1.bf16.msra.mxu0 %v12736_v46  ;;  %8514 = vmatprep.mubr.f32.mxu0 %v13384_v4  ;;  %v11226_v46 = vld [vmem:[%s17123_s6 + $0x800] sm:$0xff] }
 0x6f7   : > { %12739 = vmatprep.subr.bf16.mxu0 %v12738_v57  ;;  %v11231_v57 = vld [vmem:[%s17123_s6 + $0x828] sm:$0xff]  ;;  %v12772_v62 = vpack.c.bf16 %v11226_v46, %v11222_v45  ;;  %v11263_v45 = vld [vmem:[%s17123_s6 + $0x8f8] sm:$0xff]  ;;  %v11258_v46 = vld [vmem:[%s17123_s6 + $0x8d0] sm:$0xff] }
 0x6fa   : > { %12741 = vmatpush1.bf16.msra.mxu0 %v12740_v60  ;;  %v12774_v60 = vpack.c.bf16 %v11235_v59, %v11231_v57  ;;  %v11267_v57 = vld [vmem:[%s17123_s6 + $0x918] sm:$0xff] }
 0x6fb   : > { %12743 = vmatprep.subr.bf16.mxu0 %v12742_v63  ;;  %v11230_v63 = vld [vmem:[%s17123_s6 + $0x820] sm:$0xff]  ;;  %v11271_v59 = vld [vmem:[%s17123_s6 + $0x938] sm:$0xff] }
 0x6fe   : > { %12745 = vmatpush1.bf16.msra.mxu0 %v12744_v48  ;;  %v11243_v48 = vld [vmem:[%s17123_s6 + $0x888] sm:$0xff] }
 0x6ff   : > { %11185 = vmatprep.subr.msk.mxu0 %vm7074_vm7, %v11181_v49  ;;  %v12776_v49 = vpack.c.bf16 %v11234_v52, %v11230_v63  ;;  %v12778_v5 = vpack.c.bf16 %v11243_v48, %v11239_v29  ;;  %v12810_v63 = vpack.c.bf16 %v11271_v59, %v11267_v57  ;;  %v11266_v52 = vld [vmem:[%s17123_s6 + $0x910] sm:$0xff]  ;;  %v11275_v48 = vld [vmem:[%s17123_s6 + $0x958] sm:$0xff] }
 0x700   : > { %v11270_v29 = vld [vmem:[%s17123_s6 + $0x930] sm:$0xff]  ;;  %v10090_v59 = vld [vmem:[%s17125_s8 + $0x78] sm:$0xff] }
 0x701   : > { %v10089_v57 = vld [vmem:[%s17125_s8 + $0x70] sm:$0xff] }
 0x702   : > { %11186 = vmatpush1.msk.msra.mxu0 %vm7074_vm7, %v11180_v58  ;;  %v11229_v58 = vld [vmem:[%s17123_s6 + $0x818] sm:$0xff] }
 0x703   : > { %11187 = vmatmul.mubr.msk.f32.vlgmr.msra.gmra.mrb[54].mxu0 %vm7071_vm8, %v8364_v21  ;;  %12747 = vmatprep.subr.bf16.mxu0 %v12746_v3  ;;  %v12960_v21 = vpack.c.bf16 %v10086_v38, %v10085_v44  ;;  %v11224_v3 = vld [vmem:[%s17123_s6 + $0x7f0] sm:$0xff]  ;;  %v12782_v56 = vpack.c.bf16 %v11229_v58, %v11225_v17  ;;  %v11281_v44 = vld [vmem:[%s17123_s6 + $0x988] sm:$0x3]  ;;  %v11259_v38 = vld [vmem:[%s17123_s6 + $0x8d8] sm:$0xff] }
 0x704   : > { %12749 = vmatpush1.bf16.msra.mxu0 %v12748_v36  ;;  %8633 = vmatprep.mubr.f32.mxu0 %v13384_v4  ;;  %v11228_v36 = vld [vmem:[%s17123_s6 + $0x810] sm:$0xff]  ;;  %v11283_v17 = vld [vmem:[%s17123_s6 + $0x998] sm:$0x3]  ;;  %v11291_v58 = vld [vmem:[%s17123_s6 + $0x9a8] sm:$0xff] }
 0x705   : > { %12751 = vmatprep.subr.bf16.mxu0 %v12750_v54  ;;  %12961 = vmatpush3.bf16.msra.mxu1 %v12960_v21  ;;  %v11233_v54 = vld [vmem:[%s17123_s6 + $0x838] sm:$0xff]  ;;  %v12784_v34 = vpack.c.bf16 %v11228_v36, %v11224_v3  ;;  %v11262_v21 = vld [vmem:[%s17123_s6 + $0x8f0] sm:$0xff]  ;;  %v11295_v3 = vld [vmem:[%s17123_s6 + $0x9c8] sm:$0xff] }
 0x706   : > { %v11290_v36 = vld [vmem:[%s17123_s6 + $0x9a0] sm:$0xff] }
 0x708   : > { %12753 = vmatpush1.bf16.msra.mxu0 %v12752_v11  ;;  %v8744_v11 = vrot.slane %v15451_v40, 1 }
 0x709   : > { %12755 = vmatprep.subr.bf16.mxu0 %v12754_v53  ;;  %v12786_v53 = vpack.c.bf16 %v11237_v23, %v11233_v54  ;;  %v11294_v54 = vld [vmem:[%s17123_s6 + $0x9c0] sm:$0xff]  ;;  %v11299_v23 = vld [vmem:[%s17123_s6 + $0x9e8] sm:$0xff] }
 0x70c   : > { %12757 = vmatpush1.bf16.msra.mxu0 %v12756_v22  ;;  %v11241_v22 = vld [vmem:[%s17123_s6 + $0x878] sm:$0xff] }
 0x70d   : > { %11216 = vmatprep.subr.msk.mxu0 %vm7074_vm7, %v11213_v1  ;;  %v11245_v1 = vld [vmem:[%s17123_s6 + $0x898] sm:$0xff] }
 0x70e   : > { %v12790_v55 = vpack.c.bf16 %v11245_v1, %v11241_v22  ;;  %v11307_v22 = vld [vmem:[%s17123_s6 + $0xa28] sm:$0xff] }
 0x70f   : > { %v11311_v1 = vld [vmem:[%s17123_s6 + $0xa48] sm:$0xff] }
 0x710   : > { %11217 = vmatpush1.msk.msra.mxu0 %vm7074_vm7, %v11212_v28  ;;  %v11257_v28 = vld [vmem:[%s17123_s6 + $0x8c8] sm:$0xff] }
 0x711   : > { %11218 = vmatmul.mubr.msk.f32.vlgmr.msra.gmra.mrb[52].mxu0 %vm7071_vm8, %v15451_v40  ;;  %12759 = vmatprep.subr.bf16.mxu0 %v12758_v14  ;;  %v11261_v14 = vld [vmem:[%s17123_s6 + $0x8e8] sm:$0xff] }
 0x712   : > { %12761 = vmatpush1.bf16.msra.mxu0 %v12760_v33  ;;  %8704 = vmatprep.mubr.f32.mxu0 %v13384_v4  ;;  %v11256_v33 = vld [vmem:[%s17123_s6 + $0x8c0] sm:$0xff]  ;;  %v12794_v51 = vpack.c.bf16 %v11261_v14, %v11257_v28  ;;  %v11293_v28 = vld [vmem:[%s17123_s6 + $0x9b8] sm:$0xff] }
 0x713   : > { %12763 = vmatprep.subr.bf16.mxu0 %v12762_v50  ;;  %v11260_v50 = vld [vmem:[%s17123_s6 + $0x8e0] sm:$0xff]  ;;  %v11297_v14 = vld [vmem:[%s17123_s6 + $0x9d8] sm:$0xff] }
 0x716   : > { %12765 = vmatpush1.bf16.msra.mxu0 %v12764_v31  ;;  %v12796_v31 = vpack.c.bf16 %v11260_v50, %v11256_v33  ;;  %v11292_v33 = vld [vmem:[%s17123_s6 + $0x9b0] sm:$0xff] }
 0x717   : > { %12767 = vmatprep.subr.bf16.mxu0 %v12766_v43  ;;  %v12798_v43 = vpack.c.bf16 %v11269_v41, %v11265_v42  ;;  %v11296_v50 = vld [vmem:[%s17123_s6 + $0x9d0] sm:$0xff]  ;;  %v11301_v42 = vld [vmem:[%s17123_s6 + $0x9f8] sm:$0xff] }
 0x718   : > { %v11305_v41 = vld [vmem:[%s17123_s6 + $0xa18] sm:$0xff] }
 0x71a   : > { %12769 = vmatpush1.bf16.msra.mxu0 %v12768_v19  ;;  %v12800_v19 = vpack.c.bf16 %v11268_v12, %v11264_v61  ;;  %v11304_v61 = vld [vmem:[%s17123_s6 + $0xa10] sm:$0xff]  ;;  %v11309_v12 = vld [vmem:[%s17123_s6 + $0xa38] sm:$0xff] }
 0x71b   : > { %11219 = vmatprep.subr.msk.mxu0 %vm7074_vm7, %v11215_v20  ;;  %v11272_v20 = vld [vmem:[%s17123_s6 + $0x940] sm:$0xff] }
 0x71c   : > { %v12804_v9 = vpack.c.bf16 %v11276_v15, %v11272_v20  ;;  %v10104_v20 = vld [vmem:[%s17125_s8 + $0xe8] sm:$0xff]  ;;  %v10087_v15 = vld [vmem:[%s17125_s8 + $0x60] sm:$0xff] }
 0x71e   : > { %11220 = vmatpush1.msk.msra.mxu0 %vm7074_vm7, %v11214_v0  ;;  %v11280_v0 = vld [vmem:[%s17123_s6 + $0x980] sm:$0x3] }
 0x71f   : > { %11221 = vmatmul.mubr.msk.f32.vlgmr.msra.gmra.mrb[54].mxu0 %vm7071_vm8, %v15451_v40  ;;  %12771 = vmatprep.subr.bf16.mxu0 %v12770_v47  ;;  %v12806_v47 = vpack.c.bf16 %v11263_v45, %v11259_v38  ;;  %v10105_v38 = vld [vmem:[%s17125_s8 + $0xf0] sm:$0xff]  ;;  %v10106_v45 = vld [vmem:[%s17125_s8 + $0xf8] sm:$0xff] }
 0x720   : > { %12773 = vmatpush1.bf16.msra.mxu0 %v12772_v62  ;;  %8823 = vmatprep.mubr.f32.mxu0 %v13384_v4  ;;  %v12808_v62 = vpack.c.bf16 %v11262_v21, %v11258_v46  ;;  %v12966_v21 = vpack.c.bf16 %v10106_v45, %v10105_v38 }
 0x721   : > { %12775 = vmatprep.subr.bf16.mxu0 %v12774_v60  ;;  %v8934_v60 = vrot.slane %v15451_v40, 2 }
 0x724   : > { %12777 = vmatpush1.bf16.msra.mxu0 %v12776_v49  ;;  %v11279_v49 = vld [vmem:[%s17123_s6 + $0x978] sm:$0xff] }
 0x725   : > { %12779 = vmatprep.subr.bf16.mxu0 %v12778_v5  ;;  %v12812_v5 = vpack.c.bf16 %v11270_v29, %v11266_v52  ;;  %v12814_v10 = vpack.c.bf16 %v11279_v49, %v11275_v48  ;;  %v11317_v29 = vld [vmem:[%s17123_s6 + $0xa78] sm:$0x3]  ;;  %v11325_v48 = vld [vmem:[%s17123_s6 + $0xa88] sm:$0xff] }
 0x726   : > { %v11329_v49 = vld [vmem:[%s17123_s6 + $0xaa8] sm:$0xff] }
 0x728   : > { %12781 = vmatpush1.bf16.msra.mxu0 %v12780_v27  ;;  %v11278_v27 = vld [vmem:[%s17123_s6 + $0x970] sm:$0xff] }
 0x729   : > { %11250 = vmatprep.subr.msk.mxu0 %vm7074_vm7, %v11247_v18  ;;  %v12816_v18 = vpack.c.bf16 %v11278_v27, %v11274_v39  ;;  %v11333_v39 = vld [vmem:[%s17123_s6 + $0xac8] sm:$0xff] }
 0x72a   : > { %v11337_v27 = vld [vmem:[%s17123_s6 + $0xae8] sm:$0xff] }
 0x72c   : > { %11251 = vmatpush1.msk.msra.mxu0 %vm7074_vm7, %v11246_v30  ;;  %v11303_v30 = vld [vmem:[%s17123_s6 + $0xa08] sm:$0xff] }
 0x72d   : > { %11252 = vmatmul.mubr.msk.f32.vlgmr.msra.gmra.mrb[52].mxu0 %vm7071_vm8, %v8744_v11  ;;  %12783 = vmatprep.subr.bf16.mxu0 %v12782_v56  ;;  %v11282_v56 = vld [vmem:[%s17123_s6 + $0x990] sm:$0x3] }
 0x72e   : > { %12785 = vmatpush1.bf16.msra.mxu0 %v12784_v34  ;;  %8894 = vmatprep.mubr.f32.mxu0 %v13384_v4  ;;  %v12818_v34 = vpack.c.bf16 %v11295_v3, %v11291_v58  ;;  %v12846_v3 = vpack.c.bf16 %v11337_v27, %v11333_v39  ;;  %v11369_v39 = vld [vmem:[%s17123_s6 + $0xbb8] sm:$0xff] }
 0x72f   : > { %12787 = vmatprep.subr.bf16.mxu0 %v12786_v53  ;;  %v12822_v53 = vpack.c.bf16 %v11303_v30, %v11299_v23  ;;  %v11341_v23 = vld [vmem:[%s17123_s6 + $0xb08] sm:$0xff]  ;;  %v11373_v27 = vld [vmem:[%s17123_s6 + $0xbd8] sm:$0xff] }
 0x730   : > { %v11345_v30 = vld [vmem:[%s17123_s6 + $0xb28] sm:$0xff] }
 0x732   : > { %12789 = vmatpush1.bf16.msra.mxu0 %v12788_v16  ;;  %v12824_v16 = vpack.c.bf16 %v11302_v6, %v11298_v24  ;;  %v11349_v6 = vld [vmem:[%s17123_s6 + $0xb48] sm:$0x3] }
 0x733   : > { %12791 = vmatprep.subr.bf16.mxu0 %v12790_v55  ;;  %v12826_v55 = vpack.c.bf16 %v11311_v1, %v11307_v22  ;;  %v11327_v22 = vld [vmem:[%s17123_s6 + $0xa98] sm:$0xff] }
 0x734   : > { %v11331_v1 = vld [vmem:[%s17123_s6 + $0xab8] sm:$0xff] }
 0x736   : > { %12793 = vmatpush1.bf16.msra.mxu0 %v12792_v25  ;;  %v12828_v25 = vpack.c.bf16 %v11310_v2, %v11306_v32  ;;  %v11335_v32 = vld [vmem:[%s17123_s6 + $0xad8] sm:$0xff] }
 0x737   : > { %11253 = vmatprep.subr.msk.mxu0 %vm7074_vm7, %v11249_v8  ;;  %v11315_v8 = vld [vmem:[%s17123_s6 + $0xa68] sm:$0x3]  ;;  %v11339_v2 = vld [vmem:[%s17123_s6 + $0xaf8] sm:$0xff] }
 0x73a   : > { %11254 = vmatpush1.msk.msra.mxu0 %vm7074_vm7, %v11248_v37  ;;  %v11314_v37 = vld [vmem:[%s17123_s6 + $0xa60] sm:$0x3] }
 0x73b   : > { %11255 = vmatmul.mubr.msk.f32.vlgmr.msra.gmra.mrb[54].mxu0 %vm7071_vm8, %v8744_v11  ;;  %12795 = vmatprep.subr.bf16.mxu0 %v12794_v51  ;;  %v12820_v11 = vpack.c.bf16 %v11294_v54, %v11290_v36  ;;  %v12830_v51 = vpack.c.bf16 %v11297_v14, %v11293_v28  ;;  %v11332_v36 = vld [vmem:[%s17123_s6 + $0xac0] sm:$0xff]  ;;  %v9314_v14 = vrot.slane %v15451_v40, 4 }
 0x73c   : > { %12797 = vmatpush1.bf16.msra.mxu0 %v12796_v31  ;;  %9013 = vmatprep.mubr.f32.mxu0 %v13384_v4  ;;  %v11300_v31 = vld [vmem:[%s17123_s6 + $0x9f0] sm:$0xff]  ;;  %v11336_v54 = vld [vmem:[%s17123_s6 + $0xae0] sm:$0xff] }
 0x73d   : > { %12799 = vmatprep.subr.bf16.mxu0 %v12798_v43  ;;  %v12832_v43 = vpack.c.bf16 %v11296_v50, %v11292_v33  ;;  %v12858_v33 = vpack.c.bf16 %v11339_v2, %v11335_v32  ;;  %v11334_v50 = vld [vmem:[%s17123_s6 + $0xad0] sm:$0xff]  ;;  %v11396_v32 = vld [vmem:[%s17123_s6 + $0xc60] sm:$0xff]  ;;  %v11401_v2 = vld [vmem:[%s17123_s6 + $0xc88] sm:$0xff] }
 0x740   : > { %12801 = vmatpush1.bf16.msra.mxu0 %v12800_v19  ;;  %v12834_v19 = vpack.c.bf16 %v11305_v41, %v11301_v42  ;;  %v11338_v42 = vld [vmem:[%s17123_s6 + $0xaf0] sm:$0xff]  ;;  %v11343_v41 = vld [vmem:[%s17123_s6 + $0xb18] sm:$0xff] }
 0x741   : > { %12803 = vmatprep.subr.bf16.mxu0 %v12802_v26  ;;  %v10103_v26 = vld [vmem:[%s17125_s8 + $0xe0] sm:$0xff] }
 0x744   : > { %12805 = vmatpush1.bf16.msra.mxu0 %v12804_v9  ;;  %v12962_v9 = vpack.c.bf16 %v10104_v20, %v10103_v26  ;;  %v11358_v26 = vld [vmem:[%s17123_s6 + $0xb60] sm:$0xff] }
 0x745   : > { %11284 = vmatprep.subr.msk.mxu0 %vm7074_vm7, %v11281_v44  ;;  %v10088_v44 = vld [vmem:[%s17125_s8 + $0x68] sm:$0xff]  ;;  %v11362_v20 = vld [vmem:[%s17123_s6 + $0xb80] sm:$0xff] }
 0x746   : > { %v12964_v46 = vpack.c.bf16 %v10088_v44, %v10087_v15  ;;  %12963 = vmatprep.subr.bf16.mxu1 %v12962_v9  ;;  %v11367_v15 = vld [vmem:[%s17123_s6 + $0xba8] sm:$0xff]  ;;  %v11350_v44 = vld [vmem:[%s17123_s6 + $0xb50] sm:$0x3]  ;;  %v12868_v45 = vpack.c.bf16 %v11362_v20, %v11358_v26 }
 0x747   : > { %v11371_v9 = vld [vmem:[%s17123_s6 + $0xbc8] sm:$0xff]  ;;  %v11394_v26 = vld [vmem:[%s17123_s6 + $0xc50] sm:$0xff] }
 0x748   : > { %11285 = vmatpush1.msk.msra.mxu0 %vm7074_vm7, %v11280_v0  ;;  %v12836_v0 = vpack.c.bf16 %v11304_v61, %v11300_v31  ;;  %12965 = vmatpush3.bf16.msra.mxu1 %v12964_v46  ;;  %v11346_v61 = vld [vmem:[%s17123_s6 + $0xb30] sm:$0xff]  ;;  %v12870_v46 = vpack.c.bf16 %v11371_v9, %v11367_v15  ;;  %v11403_v15 = vld [vmem:[%s17123_s6 + $0xc98] sm:$0xff] }
 0x749   : > { %11286 = vmatmul.mubr.msk.f32.vlgmr.msra.gmra.mrb[52].mxu0 %vm7071_vm8, %v8934_v60  ;;  %12807 = vmatprep.subr.bf16.mxu0 %v12806_v47  ;;  %v12838_v47 = vpack.c.bf16 %v11313_v13, %v11309_v12  ;;  %v11351_v13 = vld [vmem:[%s17123_s6 + $0xb58] sm:$0x3]  ;;  %v11398_v20 = vld [vmem:[%s17123_s6 + $0xc70] sm:$0xff] }
 0x74a   : > { %12809 = vmatpush1.bf16.msra.mxu0 %v12808_v62  ;;  %9084 = vmatprep.mubr.f32.mxu0 %v13384_v4  ;;  %v11308_v62 = vld [vmem:[%s17123_s6 + $0xa30] sm:$0xff]  ;;  %v11407_v9 = vld [vmem:[%s17123_s6 + $0xcb8] sm:$0xff] }
 0x74b   : > { %12811 = vmatprep.subr.bf16.mxu0 %v12810_v63  ;;  %v12968_v63 = vpack.c.bf16 %v10090_v59, %v10089_v57  ;;  %12967 = vmatprep.subr.bf16.mxu1 %v12966_v21  ;;  %v11366_v21 = vld [vmem:[%s17123_s6 + $0xba0] sm:$0xff]  ;;  %v11375_v59 = vld [vmem:[%s17123_s6 + $0xbe8] sm:$0xff] }
 0x74c   : > { %v11370_v57 = vld [vmem:[%s17123_s6 + $0xbc0] sm:$0xff] }
 0x74d   : > { %12969 = vmatpush3.bf16.msra.mxu1 %v12968_v63  ;;  %v11378_v63 = vld [vmem:[%s17123_s6 + $0xc00] sm:$0xff] }
 0x74e   : > { %12813 = vmatpush1.bf16.msra.mxu0 %v12812_v5  ;;  %v11324_v5 = vld [vmem:[%s17123_s6 + $0xa80] sm:$0xff]  ;;  %12970 = vmatprep.subr.bf16.mxu1 %v17139_v7 }
 0x74f   : > { %12815 = vmatprep.subr.bf16.mxu0 %v12814_v10  ;;  %v11328_v10 = vld [vmem:[%s17123_s6 + $0xaa0] sm:$0xff] }
 0x750   : > { %v12844_v58 = vpack.c.bf16 %v11328_v10, %v11324_v5  ;;  %v11360_v5 = vld [vmem:[%s17123_s6 + $0xb70] sm:$0xff] }
 0x751   : > { %v11364_v10 = vld [vmem:[%s17123_s6 + $0xb90] sm:$0xff] }
 0x752   : > { %12817 = vmatpush1.bf16.msra.mxu0 %v12816_v18  ;;  %v11316_v18 = vld [vmem:[%s17123_s6 + $0xa70] sm:$0x3] }
 0x753   : > { %11287 = vmatprep.subr.msk.mxu0 %vm7074_vm7, %v11283_v17  ;;  %v12842_v17 = vpack.c.bf16 %v11329_v49, %v11325_v48  ;;  %v11361_v48 = vld [vmem:[%s17123_s6 + $0xb78] sm:$0xff] }
 0x754   : > { %v11365_v49 = vld [vmem:[%s17123_s6 + $0xb98] sm:$0xff] }
 0x756   : > { %11288 = vmatpush1.msk.msra.mxu0 %vm7074_vm7, %v11282_v56  ;;  %v12848_v56 = vpack.c.bf16 %v11336_v54, %v11332_v36  ;;  %v12882_v36 = vpack.c.bf16 %v11373_v27, %v11369_v39  ;;  %v11368_v54 = vld [vmem:[%s17123_s6 + $0xbb0] sm:$0xff]  ;;  %v11430_v39 = vld [vmem:[%s17123_s6 + $0xd40] sm:$0xff]  ;;  %v11435_v27 = vld [vmem:[%s17123_s6 + $0xd68] sm:$0xff] }
 0x757   : > { %11289 = vmatmul.mubr.msk.f32.vlgmr.msra.gmra.mrb[54].mxu0 %vm7071_vm8, %v8934_v60  ;;  %12819 = vmatprep.subr.bf16.mxu0 %v12818_v34  ;;  %v11312_v60 = vld [vmem:[%s17123_s6 + $0xa50] sm:$0xff]  ;;  %v12850_v34 = vpack.c.bf16 %v11345_v30, %v11341_v23  ;;  %v11377_v30 = vld [vmem:[%s17123_s6 + $0xbf8] sm:$0xff] }
 0x758   : > { %12821 = vmatpush1.bf16.msra.mxu0 %v12820_v11  ;;  %9203 = vmatprep.mubr.f32.mxu0 %v13384_v4  ;;  %v12840_v52 = vpack.c.bf16 %v11312_v60, %v11308_v62  ;;  %v11340_v11 = vld [vmem:[%s17123_s6 + $0xb00] sm:$0xff]  ;;  %v11372_v23 = vld [vmem:[%s17123_s6 + $0xbd0] sm:$0xff] }
 0x759   : > { %12823 = vmatprep.subr.bf16.mxu0 %v12822_v53  ;;  %v11344_v53 = vld [vmem:[%s17123_s6 + $0xb20] sm:$0xff] }
 0x75a   : > { %v12852_v24 = vpack.c.bf16 %v11344_v53, %v11340_v11  ;;  %v11374_v60 = vld [vmem:[%s17123_s6 + $0xbe0] sm:$0xff]  ;;  %v11376_v53 = vld [vmem:[%s17123_s6 + $0xbf0] sm:$0xff] }
 0x75c   : > { %12825 = vmatpush1.bf16.msra.mxu0 %v12824_v16  ;;  %v11326_v16 = vld [vmem:[%s17123_s6 + $0xa90] sm:$0xff] }
 0x75d   : > { %12827 = vmatprep.subr.bf16.mxu0 %v12826_v55  ;;  %v11330_v55 = vld [vmem:[%s17123_s6 + $0xab0] sm:$0xff] }
 0x75e   : > { %v12856_v28 = vpack.c.bf16 %v11330_v55, %v11326_v16  ;;  %v11397_v16 = vld [vmem:[%s17123_s6 + $0xc68] sm:$0xff]  ;;  %v11392_v55 = vld [vmem:[%s17123_s6 + $0xc40] sm:$0xff] }
 0x760   : > { %12829 = vmatpush1.bf16.msra.mxu0 %v12828_v25  ;;  %v11348_v25 = vld [vmem:[%s17123_s6 + $0xb40] sm:$0x3] }
 0x761   : > { %11318 = vmatprep.subr.msk.mxu0 %vm7074_vm7, %v11315_v8  ;;  %v12854_v8 = vpack.c.bf16 %v11331_v1, %v11327_v22  ;;  %v11385_v22 = vld [vmem:[%s17123_s6 + $0xc38] sm:$0x3]  ;;  %v11393_v1 = vld [vmem:[%s17123_s6 + $0xc48] sm:$0xff] }
 0x764   : > { %11319 = vmatpush1.msk.msra.mxu0 %vm7074_vm7, %v11314_v37  ;;  %v11347_v37 = vld [vmem:[%s17123_s6 + $0xb38] sm:$0xff] }
 0x765   : > { %11320 = vmatmul.mubr.msk.f32.vlgmr.msra.gmra.mrb[52].mxu0 %vm7071_vm8, %v9124_v35  ;;  %12831 = vmatprep.subr.bf16.mxu0 %v12830_v51  ;;  %v12860_v51 = vpack.c.bf16 %v11338_v42, %v11334_v50  ;;  %v12862_v31 = vpack.c.bf16 %v11347_v37, %v11343_v41  ;;  %v11400_v50 = vld [vmem:[%s17123_s6 + $0xc80] sm:$0xff]  ;;  %v11409_v41 = vld [vmem:[%s17123_s6 + $0xcc8] sm:$0xff] }
 0x766   : > { %12833 = vmatpush1.bf16.msra.mxu0 %v12832_v43  ;;  %9274 = vmatprep.mubr.f32.mxu0 %v13384_v4  ;;  %v11342_v43 = vld [vmem:[%s17123_s6 + $0xb10] sm:$0xff]  ;;  %v11404_v42 = vld [vmem:[%s17123_s6 + $0xca0] sm:$0xff]  ;;  %v11413_v37 = vld [vmem:[%s17123_s6 + $0xce8] sm:$0xff] }
 0x767   : > { %12835 = vmatprep.subr.bf16.mxu0 %v12834_v19  ;;  %v12864_v12 = vpack.c.bf16 %v11346_v61, %v11342_v43  ;;  %v11363_v19 = vld [vmem:[%s17123_s6 + $0xb88] sm:$0xff]  ;;  %v11408_v43 = vld [vmem:[%s17123_s6 + $0xcc0] sm:$0xff] }
 0x768   : > { %v11412_v61 = vld [vmem:[%s17123_s6 + $0xce0] sm:$0xff] }
 0x76a   : > { %12837 = vmatpush1.bf16.msra.mxu0 %v12836_v0  ;;  %v11379_v0 = vld [vmem:[%s17123_s6 + $0xc08] sm:$0xff] }
 0x76b   : > { %12839 = vmatprep.subr.bf16.mxu0 %v12838_v47  ;;  %v12872_v47 = vpack.c.bf16 %v11370_v57, %v11366_v21  ;;  %v12874_v62 = vpack.c.bf16 %v11379_v0, %v11375_v59  ;;  %v12906_v21 = vpack.c.bf16 %v11407_v9, %v11403_v15  ;;  %v11402_v57 = vld [vmem:[%s17123_s6 + $0xc90] sm:$0xff]  ;;  %v11411_v0 = vld [vmem:[%s17123_s6 + $0xcd8] sm:$0xff]  ;;  %v10045_v15 = vld [vmem:[%s17124_s7] sm:$0xf] }
 0x76c   : > { %v11406_v59 = vld [vmem:[%s17123_s6 + $0xcb0] sm:$0xff] }
 0x76e   : > { %12841 = vmatpush1.bf16.msra.mxu0 %v12840_v52  ;;  %v12876_v52 = vpack.c.bf16 %v11378_v63, %v11374_v60  ;;  %v11410_v63 = vld [vmem:[%s17123_s6 + $0xcd0] sm:$0xff] }
 0x76f   : > { %11321 = vmatprep.subr.msk.mxu0 %vm7074_vm7, %v11317_v29  ;;  %v11383_v29 = vld [vmem:[%s17123_s6 + $0xc28] sm:$0x3] }
 0x772   : > { %11322 = vmatpush1.msk.msra.mxu0 %vm7074_vm7, %v11316_v18  ;;  %v11382_v18 = vld [vmem:[%s17123_s6 + $0xc20] sm:$0x3] }
 0x773   : > { %11323 = vmatmul.mubr.msk.f32.vlgmr.msra.gmra.mrb[54].mxu0 %vm7071_vm8, %v9124_v35  ;;  %12843 = vmatprep.subr.bf16.mxu0 %v12842_v17  ;;  %v11359_v35 = vld [vmem:[%s17123_s6 + $0xb68] sm:$0xff]  ;;  %v12878_v17 = vpack.c.bf16 %v11365_v49, %v11361_v48  ;;  %v11419_v48 = vld [vmem:[%s17123_s6 + $0xd18] sm:$0x3] }
 0x774   : > { %12845 = vmatpush1.bf16.msra.mxu0 %v12844_v58  ;;  %9393 = vmatprep.mubr.f32.mxu0 %v13384_v4  ;;  %v12866_v38 = vpack.c.bf16 %v11363_v19, %v11359_v35  ;;  %v12880_v58 = vpack.c.bf16 %v11364_v10, %v11360_v5  ;;  %v11395_v35 = vld [vmem:[%s17123_s6 + $0xc58] sm:$0xff]  ;;  %v11427_v49 = vld [vmem:[%s17123_s6 + $0xd28] sm:$0xff]  ;;  %v11426_v10 = vld [vmem:[%s17123_s6 + $0xd20] sm:$0xff] }
 0x775   : > { %12847 = vmatprep.subr.bf16.mxu0 %v12846_v3  ;;  %v9504_v3 = vrot.slane %v15451_v40, 5  ;;  %v11399_v19 = vld [vmem:[%s17123_s6 + $0xc78] sm:$0xff]  ;;  %v11431_v5 = vld [vmem:[%s17123_s6 + $0xd48] sm:$0xff] }
 0x778   : > { %12849 = vmatpush1.bf16.msra.mxu0 %v12848_v56  ;;  %v11381_v56 = vld [vmem:[%s17123_s6 + $0xc18] sm:$0xff] }
 0x779   : > { %12851 = vmatprep.subr.bf16.mxu0 %v12850_v34  ;;  %v12884_v34 = vpack.c.bf16 %v11372_v23, %v11368_v54  ;;  %v12886_v11 = vpack.c.bf16 %v11381_v56, %v11377_v30  ;;  %v11434_v54 = vld [vmem:[%s17123_s6 + $0xd60] sm:$0xff]  ;;  %v11443_v30 = vld [vmem:[%s17123_s6 + $0xda8] sm:$0xff] }
 0x77a   : > { %v11438_v23 = vld [vmem:[%s17123_s6 + $0xd80] sm:$0xff]  ;;  %v11447_v56 = vld [vmem:[%s17123_s6 + $0xdc8] sm:$0xff] }
 0x77c   : > { %12853 = vmatpush1.bf16.msra.mxu0 %v12852_v24  ;;  %v11380_v24 = vld [vmem:[%s17123_s6 + $0xc10] sm:$0xff] }
 0x77d   : > { %11352 = vmatprep.subr.msk.mxu0 %vm7074_vm7, %v11349_v6  ;;  %v12888_v6 = vpack.c.bf16 %v11380_v24, %v11376_v53  ;;  %v11442_v53 = vld [vmem:[%s17123_s6 + $0xda0] sm:$0xff] }
 0x77e   : > { %v11446_v24 = vld [vmem:[%s17123_s6 + $0xdc0] sm:$0xff] }
 0x780   : > { %11353 = vmatpush1.msk.msra.mxu0 %vm7074_vm7, %v11348_v25  ;;  %v11405_v25 = vld [vmem:[%s17123_s6 + $0xca8] sm:$0xff] }
 0x781   : > { %11354 = vmatmul.mubr.msk.f32.vlgmr.msra.gmra.mrb[52].mxu0 %vm7071_vm8, %v9314_v14  ;;  %12855 = vmatprep.subr.bf16.mxu0 %v12854_v8  ;;  %v11384_v8 = vld [vmem:[%s17123_s6 + $0xc30] sm:$0x3] }
 0x782   : > { %12857 = vmatpush1.bf16.msra.mxu0 %v12856_v28  ;;  %9464 = vmatprep.mubr.f32.mxu0 %v13384_v4  ;;  %v12890_v28 = vpack.c.bf16 %v11397_v16, %v11393_v1  ;;  %v11429_v1 = vld [vmem:[%s17123_s6 + $0xd38] sm:$0xff] }
 0x783   : > { %12859 = vmatprep.subr.bf16.mxu0 %v12858_v33  ;;  %v12894_v33 = vpack.c.bf16 %v11405_v25, %v11401_v2  ;;  %v11433_v16 = vld [vmem:[%s17123_s6 + $0xd58] sm:$0xff] }
 0x784   : > { %v11437_v2 = vld [vmem:[%s17123_s6 + $0xd78] sm:$0xff] }
 0x785   : > { %v11441_v25 = vld [vmem:[%s17123_s6 + $0xd98] sm:$0xff] }
 0x786   : > { %12861 = vmatpush1.bf16.msra.mxu0 %v12860_v51  ;;  %v12896_v51 = vpack.c.bf16 %v11404_v42, %v11400_v50  ;;  %v12930_v50 = vpack.c.bf16 %v11441_v25, %v11437_v2  ;;  %v11436_v42 = vld [vmem:[%s17123_s6 + $0xd70] sm:$0xff]  ;;  %v10122_v2 = vld [vmem:[%s17125_s8 + $0x178] sm:$0xff] }
 0x787   : > { %12863 = vmatprep.subr.bf16.mxu0 %v12862_v31  ;;  %v12898_v31 = vpack.c.bf16 %v11413_v37, %v11409_v41  ;;  %v11440_v41 = vld [vmem:[%s17123_s6 + $0xd90] sm:$0xff]  ;;  %v11445_v37 = vld [vmem:[%s17123_s6 + $0xdb8] sm:$0xff] }
 0x78a   : > { %12865 = vmatpush1.bf16.msra.mxu0 %v12864_v12  ;;  %v12900_v12 = vpack.c.bf16 %v11412_v61, %v11408_v43  ;;  %v11444_v43 = vld [vmem:[%s17123_s6 + $0xdb0] sm:$0xff] }
 0x78b   : > { %11355 = vmatprep.subr.msk.mxu0 %vm7074_vm7, %v11351_v13  ;;  %v11417_v13 = vld [vmem:[%s17123_s6 + $0xd08] sm:$0x3]  ;;  %v11448_v61 = vld [vmem:[%s17123_s6 + $0xdd0] sm:$0xff] }
 0x78e   : > { %11356 = vmatpush1.msk.msra.mxu0 %vm7074_vm7, %v11350_v44  ;;  %v11416_v44 = vld [vmem:[%s17123_s6 + $0xd00] sm:$0x3] }
 0x78f   : > { %11357 = vmatmul.mubr.msk.f32.vlgmr.msra.gmra.mrb[54].mxu0 %vm7071_vm8, %v9314_v14  ;;  %12867 = vmatprep.subr.bf16.mxu0 %v12866_v38  ;;  %v12892_v14 = vpack.c.bf16 %v11396_v32, %v11392_v55  ;;  %v12902_v38 = vpack.c.bf16 %v11399_v19, %v11395_v35  ;;  %v11428_v55 = vld [vmem:[%s17123_s6 + $0xd30] sm:$0xff]  ;;  %v10047_v19 = vlaneseq }
 0x790   : > { %12869 = vmatpush1.bf16.msra.mxu0 %v12868_v45  ;;  %9583 = vmatprep.mubr.f32.mxu0 %v13384_v4  ;;  %v12904_v45 = vpack.c.bf16 %v11398_v20, %v11394_v26  ;;  %v11432_v32 = vld [vmem:[%s17123_s6 + $0xd50] sm:$0xff] }
 0x791   : > { %12871 = vmatprep.subr.bf16.mxu0 %v12870_v46  ;;  %v9694_v46 = vrot.slane %v15451_v40, 6  ;;  %v11452_v35 = vld [vmem:[%s17123_s6 + $0xdf0] sm:$0x3]  ;;  %v10048_v26 = vshrl.u32 %v10047_v19, 7  ;;  %v10134_v19 = vld [vmem:[%s17125_s8 + $0x1d8] sm:$0xff] }
 0x793   : > { %v10049_v20 = vsub.s32 0, %v10048_v26  ;;  %v10053_v9 = vsub.s32 1, %v10048_v26 }
 0x794   : > { %12873 = vmatpush1.bf16.msra.mxu0 %v12872_v47  ;;  %v11415_v47 = vld [vmem:[%s17123_s6 + $0xcf8] sm:$0xff] }
 0x795   : > { %12875 = vmatprep.subr.bf16.mxu0 %v12874_v62  ;;  %v12908_v62 = vpack.c.bf16 %v11406_v59, %v11402_v57  ;;  %v12910_v60 = vpack.c.bf16 %v11415_v47, %v11411_v0  ;;  %v10107_v57 = vld [vmem:[%s17125_s8 + $0x100] sm:$0xff]  ;;  %v10108_v59 = vld [vmem:[%s17125_s8 + $0x108] sm:$0xff] }
 0x798   : > { %12877 = vmatpush1.bf16.msra.mxu0 %v12876_v52  ;;  %v11414_v52 = vld [vmem:[%s17123_s6 + $0xcf0] sm:$0xff] }
 0x799   : > { %11386 = vmatprep.subr.msk.mxu0 %vm7074_vm7, %v11383_v29  ;;  %v12912_v29 = vpack.c.bf16 %v11414_v52, %v11410_v63  ;;  %v10109_v63 = vld [vmem:[%s17125_s8 + $0x110] sm:$0xff]  ;;  %v10110_v52 = vld [vmem:[%s17125_s8 + $0x118] sm:$0xff] }
 0x79c   : > { %11387 = vmatpush1.msk.msra.mxu0 %vm7074_vm7, %v11382_v18  ;;  %v11439_v18 = vld [vmem:[%s17123_s6 + $0xd88] sm:$0xff] }
 0x79d   : > { %11388 = vmatmul.mubr.msk.f32.vlgmr.msra.gmra.mrb[52].mxu0 %vm7071_vm8, %v9504_v3  ;;  %12879 = vmatprep.subr.bf16.mxu0 %v12878_v17  ;;  %v11418_v17 = vld [vmem:[%s17123_s6 + $0xd10] sm:$0x3] }
 0x79e   : > { %12881 = vmatpush1.bf16.msra.mxu0 %v12880_v58  ;;  %9654 = vmatprep.mubr.f32.mxu0 %v13384_v4  ;;  %v12914_v58 = vpack.c.bf16 %v11431_v5, %v11427_v49  ;;  %v10061_v49 = vsub.s32 3, %v10048_v26  ;;  %v10111_v5 = vld [vmem:[%s17125_s8 + $0x120] sm:$0xff] }
 0x79f   : > { %12883 = vmatprep.subr.bf16.mxu0 %v12882_v36  ;;  %v12918_v36 = vpack.c.bf16 %v11439_v18, %v11435_v27 }
 0x7a0   : > { %v10062_v27 = vrot.slane %v10045_v15, %v10061_v49 }
 0x7a2   : > { %12885 = vmatpush1.bf16.msra.mxu0 %v12884_v34  ;;  %v12920_v34 = vpack.c.bf16 %v11438_v23, %v11434_v54 }
 0x7a3   : > { %12887 = vmatprep.subr.bf16.mxu0 %v12886_v11  ;;  %v12922_v11 = vpack.c.bf16 %v11447_v56, %v11443_v30  ;;  %v10115_v56 = vld [vmem:[%s17125_s8 + $0x140] sm:$0xff] }
 0x7a6   : > { %12889 = vmatpush1.bf16.msra.mxu0 %v12888_v6  ;;  %v12924_v6 = vpack.c.bf16 %v11446_v24, %v11442_v53  ;;  %v10117_v24 = vld [vmem:[%s17125_s8 + $0x150] sm:$0xff] }
 0x7a7   : > { %11389 = vmatprep.subr.msk.mxu0 %vm7074_vm7, %v11385_v22  ;;  %v11451_v22 = vld [vmem:[%s17123_s6 + $0xde8] sm:$0x3] }
 0x7aa   : > { %11390 = vmatpush1.msk.msra.mxu0 %vm7074_vm7, %v11384_v8  ;;  %v11450_v8 = vld [vmem:[%s17123_s6 + $0xde0] sm:$0x3] }
 0x7ab   : > { %11391 = vmatmul.mubr.msk.f32.vlgmr.msra.gmra.mrb[54].mxu0 %vm7071_vm8, %v9504_v3  ;;  %12891 = vmatprep.subr.bf16.mxu0 %v12890_v28  ;;  %v12916_v3 = vpack.c.bf16 %v11430_v39, %v11426_v10  ;;  %v12926_v28 = vpack.c.bf16 %v11433_v16, %v11429_v1  ;;  %v10112_v10 = vld [vmem:[%s17125_s8 + $0x128] sm:$0xff]  ;;  %v10119_v1 = vld [vmem:[%s17125_s8 + $0x160] sm:$0xff] }
 0x7ac   : > { %12893 = vmatpush1.bf16.msra.mxu0 %v12892_v14  ;;  %9773 = vmatprep.mubr.f32.mxu0 %v13384_v4  ;;  %v12928_v14 = vpack.c.bf16 %v11432_v32, %v11428_v55  ;;  %v12977_v18 = vpack.c.bf16 %v10112_v10, %v10111_v5  ;;  %v10120_v16 = vld [vmem:[%s17125_s8 + $0x168] sm:$0xff]  ;;  %v10121_v32 = vld [vmem:[%s17125_s8 + $0x170] sm:$0xff] }
 0x7ad   : > { %12895 = vmatprep.subr.bf16.mxu0 %v12894_v33  ;;  %v9884_v33 = vrot.slane %v15451_v40, 7  ;;  %v12932_v40 = vpack.c.bf16 %v11440_v41, %v11436_v42  ;;  %v12989_v55 = vpack.c.bf16 %v10120_v16, %v10119_v1  ;;  %v12992_v25 = vpack.c.bf16 %v10122_v2, %v10121_v32  ;;  %v10127_v41 = vld [vmem:[%s17125_s8 + $0x1a0] sm:$0xff] }
 0x7b0   : > { %12897 = vmatpush1.bf16.msra.mxu0 %v12896_v51  ;;  %v11449_v51 = vld [vmem:[%s17123_s6 + $0xdd8] sm:$0xff] }
 0x7b1   : > { %12899 = vmatprep.subr.bf16.mxu0 %v12898_v31  ;;  %v12934_v31 = vpack.c.bf16 %v11449_v51, %v11445_v37  ;;  %v10128_v37 = vld [vmem:[%s17125_s8 + $0x1a8] sm:$0xff] }
 0x7b2   : > { %v13001_v51 = vpack.c.bf16 %v10128_v37, %v10127_v41 }
 0x7b4   : > { %12901 = vmatpush1.bf16.msra.mxu0 %v12900_v12  ;;  %v12936_v12 = vpack.c.bf16 %v11448_v61, %v11444_v43  ;;  %v10131_v61 = vld [vmem:[%s17125_s8 + $0x1c0] sm:$0xff] }
 0x7b5   : > { %11420 = vmatprep.subr.msk.mxu0 %vm7074_vm7, %v11417_v13  ;;  %v11453_v13 = vld [vmem:[%s17123_s6 + $0xdf8] sm:$0x3] }
 0x7b8   : > { %11421 = vmatpush1.msk.msra.mxu0 %vm7074_vm7, %v11416_v44  ;;  %v10050_v44 = vrot.slane %v10045_v15, %v10049_v20  ;;  %v10135_v20 = vld [vmem:[%s17125_s8 + $0x1e0] sm:$0xff] }
 0x7b9   : > { %11422 = vmatmul.mubr.msk.f32.vlgmr.msra.gmra.mrb[52].mxu0 %vm7071_vm8, %v9694_v46  ;;  %12903 = vmatprep.subr.bf16.mxu0 %v12902_v38  ;;  %v10054_v38 = vrot.slane %v10045_v15, %v10053_v9 }
 0x7ba   : > { %12905 = vmatpush1.bf16.msra.mxu0 %v12904_v45  ;;  %9844 = vmatprep.mubr.f32.mxu0 %v13384_v4 }
 0x7bb   : > { %12907 = vmatprep.subr.bf16.mxu0 %v12906_v21 }
 0x7be   : > { %12909 = vmatpush1.bf16.msra.mxu0 %v12908_v62  ;;  %v12971_v62 = vpack.c.bf16 %v10108_v59, %v10107_v57  ;;  %v10138_v57 = vld [vmem:[%s17126_s9] sm:$0x1] }
 0x7bf   : > { %12911 = vmatprep.subr.bf16.mxu0 %v12910_v60 }
 0x7c2   : > { %12913 = vmatpush1.bf16.msra.mxu0 %v12912_v29  ;;  %v10057_v29 = vsub.s32 2, %v10048_v26 }
 0x7c3   : > { %11423 = vmatprep.subr.msk.mxu0 %vm7074_vm7, %v11419_v48  ;;  %v12974_v48 = vpack.c.bf16 %v10110_v52, %v10109_v63 }
 0x7c4   : > { %v10058_v39 = vrot.slane %v10045_v15, %v10057_v29  ;;  %v10136_v15 = vld [vmem:[%s17125_s8 + $0x1e8] sm:$0xff] }
 0x7c5   : > { %v13013_v9 = vpack.c.bf16 %v10136_v15, %v10135_v20 }
 0x7c6   : > { %11424 = vmatpush1.msk.msra.mxu0 %vm7074_vm7, %v11418_v17  ;;  %v10113_v17 = vld [vmem:[%s17125_s8 + $0x130] sm:$0xff] }
 0x7c7   : > { %11425 = vmatmul.mubr.msk.f32.vlgmr.msra.gmra.mrb[54].mxu0 %vm7071_vm8, %v9694_v46  ;;  %12915 = vmatprep.subr.bf16.mxu0 %v12914_v58  ;;  %v10114_v58 = vld [vmem:[%s17125_s8 + $0x138] sm:$0xff] }
 0x7c8   : > { %12917 = vmatpush1.bf16.msra.mxu0 %v12916_v3  ;;  %9963 = vmatprep.mubr.f32.mxu0 %v13384_v4  ;;  %v12980_v30 = vpack.c.bf16 %v10114_v58, %v10113_v17 }
 0x7c9   : > { %12919 = vmatprep.subr.bf16.mxu0 %v12918_v36 }
 0x7cc   : > { %12921 = vmatpush1.bf16.msra.mxu0 %v12920_v34  ;;  %v10116_v34 = vld [vmem:[%s17125_s8 + $0x148] sm:$0xff] }
 0x7cd   : > { %12923 = vmatprep.subr.bf16.mxu0 %v12922_v11  ;;  %v12983_v53 = vpack.c.bf16 %v10116_v34, %v10115_v56 }
 0x7d0   : > { %12925 = vmatpush1.bf16.msra.mxu0 %v12924_v6  ;;  %v10118_v6 = vld [vmem:[%s17125_s8 + $0x158] sm:$0xff] }
 0x7d1   : > { %11454 = vmatprep.subr.msk.mxu0 %vm7074_vm7, %v11451_v22  ;;  %v12986_v22 = vpack.c.bf16 %v10118_v6, %v10117_v24 }
 0x7d4   : > { %11455 = vmatpush1.msk.msra.mxu0 %vm7074_vm7, %v11450_v8  ;;  %v10123_v8 = vld [vmem:[%s17125_s8 + $0x180] sm:$0xff] }
 0x7d5   : > { %11456 = vmatmul.mubr.msk.f32.vlgmr.msra.gmra.mrb[52].mxu0 %vm7071_vm8, %v9884_v33  ;;  %12927 = vmatprep.subr.bf16.mxu0 %v12926_v28  ;;  %v10124_v28 = vld [vmem:[%s17125_s8 + $0x188] sm:$0xff] }
 0x7d6   : > { %12929 = vmatpush1.bf16.msra.mxu0 %v12928_v14  ;;  %10034 = vmatprep.mubr.f32.mxu0 %v13384_v4  ;;  %v12995_v14 = vpack.c.bf16 %v10124_v28, %v10123_v8 }
 0x7d7   : > { %12931 = vmatprep.subr.bf16.mxu0 %v12930_v50  ;;  %v10126_v50 = vld [vmem:[%s17125_s8 + $0x198] sm:$0xff] }
 0x7da   : > { %12933 = vmatpush1.bf16.msra.mxu0 %v12932_v40  ;;  %v10129_v40 = vld [vmem:[%s17125_s8 + $0x1b0] sm:$0xff] }
 0x7db   : > { %12935 = vmatprep.subr.bf16.mxu0 %v12934_v31  ;;  %v10130_v31 = vld [vmem:[%s17125_s8 + $0x1b8] sm:$0xff] }
 0x7dc   : > { %v13004_v43 = vpack.c.bf16 %v10130_v31, %v10129_v40 }
 0x7de   : > { %12937 = vmatpush1.bf16.msra.mxu0 %v12936_v12  ;;  %v10132_v12 = vld [vmem:[%s17125_s8 + $0x1c8] sm:$0xff] }
 0x7df   : > { %11457 = vmatprep.subr.msk.mxu0 %vm7074_vm7, %v11453_v13  ;;  %v13007_v13 = vpack.c.bf16 %v10132_v12, %v10131_v61 }
 0x7e2   : > { %11458 = vmatpush1.msk.msra.mxu0 %vm7074_vm7, %v11452_v35  ;;  %v10133_v35 = vld [vmem:[%s17125_s8 + $0x1d0] sm:$0xff] }
 0x7e3   : > { %11459 = vmatmul.mubr.msk.f32.vlgmr.msra.gmra.mrb[54].mxu0 %vm7071_vm8, %v9884_v33  ;;  %v10125_v33 = vld [vmem:[%s17125_s8 + $0x190] sm:$0xff]  ;;  %v13010_v26 = vpack.c.bf16 %v10134_v19, %v10133_v35 }
 0x7e4   : > { %v12998_v42 = vpack.c.bf16 %v10126_v50, %v10125_v33 }
 0x8a8   : > { %v9965_v45 = vpop.f32.mrb[52].mxu0 }
 0x8a9   : > { %v10067_v46 = vadd.f32 %v10050_v44, %v9965_v45  ;;  %v9967_v21 = vpop.f32.mrb[53].mxu0  ;;  %v10137_v44 = vld [vmem:[%s17125_s8 + $0x1f0] sm:$0xf] }
 0x8aa   : > { %v10068_v0 = vadd.f32 %v10054_v38, %v9967_v21 }
 0x8ab   : > { %v10071_v60 = vmax.f32 %v10067_v46, 0.0 }
 0x8ac   : > { %v10072_v47 = vmax.f32 %v10068_v0, 0.0 }
 0x8ae   : > { %10210 = vmatprep.mubr.f32.mxu1 %v10072_v47 }
 0x8af   : > { %10211 = vmatmul.mubr.f32.vlgmr.msra.gmra.mrb[172].mxu1 %v10071_v60 }
 0x8b0   : > { %12972 = vmatpush1.bf16.msra.mxu1 %v12971_v62 }
 0x8b1   : > { %12973 = vmatprep.subr.bf16.mxu1 %v17139_v7 }
 0x8b4   : > { %12975 = vmatpush1.bf16.msra.mxu1 %v12974_v48 }
 0x8b5   : > { %12976 = vmatprep.subr.bf16.mxu1 %v17139_v7 }
 0x8b6   : > { %v10036_v3 = vpop.f32.mrb[54].mxu0 }
 0x8b7   : > { %v16978_v36 = vadd.f32 %v10058_v39, %v10036_v3  ;;  %v10038_v54 = vpop.f32.mrb[55].mxu0 }
 0x8b8   : > { %v10070_v23 = vadd.f32 %v10062_v27, %v10038_v54  ;;  %12978 = vmatpush1.bf16.msra.mxu1 %v12977_v18 }
 0x8b9   : > { %12979 = vmatprep.subr.bf16.mxu1 %v17139_v7  ;;  %v10073_v38 = vmax.f32 %v16978_v36, 0.0 }
 0x8ba   : > { %v10074_v11 = vmax.f32 %v10070_v23, 0.0 }
 0x8bc   : > { %12981 = vmatpush1.bf16.msra.mxu1 %v12980_v30  ;;  %11461 = vmatprep.mubr.msk.f32.mxu1 %vm10139_vm9, %v10074_v11 }
 0x8bd   : > { %12982 = vmatprep.subr.bf16.mxu1 %v17139_v7 }
 0x8c0   : > { %12984 = vmatpush1.bf16.msra.mxu1 %v12983_v53 }
 0x8c1   : > { %12985 = vmatprep.subr.bf16.mxu1 %v17139_v7 }
 0x8c4   : > { %12987 = vmatpush1.bf16.msra.mxu1 %v12986_v22 }
 0x8c5   : > { %12988 = vmatprep.subr.bf16.mxu1 %v17139_v7 }
 0x8c8   : > { %12990 = vmatpush1.bf16.msra.mxu1 %v12989_v55 }
 0x8c9   : > { %12991 = vmatprep.subr.bf16.mxu1 %v17139_v7 }
 0x8cc   : > { %12993 = vmatpush1.bf16.msra.mxu1 %v12992_v25 }
 0x8cd   : > { %12994 = vmatprep.subr.bf16.mxu1 %v17139_v7 }
 0x8d0   : > { %12996 = vmatpush1.bf16.msra.mxu1 %v12995_v14 }
 0x8d1   : > { %12997 = vmatprep.subr.bf16.mxu1 %v17139_v7 }
 0x8d4   : > { %12999 = vmatpush1.bf16.msra.mxu1 %v12998_v42 }
 0x8d5   : > { %13000 = vmatprep.subr.bf16.mxu1 %v17139_v7 }
 0x8d8   : > { %13002 = vmatpush1.bf16.msra.mxu1 %v13001_v51 }
 0x8d9   : > { %13003 = vmatprep.subr.bf16.mxu1 %v17139_v7 }
 0x8dc   : > { %13005 = vmatpush1.bf16.msra.mxu1 %v13004_v43 }
 0x8dd   : > { %13006 = vmatprep.subr.bf16.mxu1 %v17139_v7 }
 0x8e0   : > { %13008 = vmatpush1.bf16.msra.mxu1 %v13007_v13 }
 0x8e1   : > { %13009 = vmatprep.subr.bf16.mxu1 %v17139_v7 }
 0x8e4   : > { %13011 = vmatpush1.bf16.msra.mxu1 %v13010_v26 }
 0x8e5   : > { %13012 = vmatprep.subr.bf16.mxu1 %v17139_v7 }
 0x8e8   : > { %13014 = vmatpush1.bf16.msra.mxu1 %v13013_v9 }
 0x8e9   : > { %10276 = vmatprep.subr.mxu1 %v13384_v4 }
 0x8ec   : > { %11460 = vmatpush1.msk.msra.mxu1 %vm3438_vm5, %v10137_v44 }
 0x8ed   : > { %10281 = vmatmul.mubr.f32.vlgmr.msra.gmra.mrb[174].mxu1 %v10073_v38 }
 0x982   : > { %v11848_v45 = vpop.f32.mrb[172].mxu1 }
 0x983   : > { %v11849_v46 = vpop.f32.mrb[173].mxu1 }
 0x984   : > { %v11850_v21 = vadd.f32 %v11849_v46, %v11848_v45 }
 0x986   : > { %v10213_v7 = vadd.f32 %v11850_v21, %v10138_v57 }
 0x9c0   : > { %v10282_v59 = vpop.f32.mrb[174].mxu1 }
 0x9c1   : > { %v10283_v4 = vadd.f32 %v10282_v59, %v10213_v7  ;;  %v10284_v0 = vpop.f32.mrb[175].mxu1 }
 0x9c3   : > { %v10287_v47 = vsel %vm10286_vm10, %v10283_v4, -inf }
 0x9c4   : > { %10288 = vmax.xlane.f32.xlu0 %v10287_v47 }
 0xa51   : > { %v10289_v62 = vpop.xlane.xlu0 %10288 }
 0xa52   : > { %v10290_v60 = vsub.f32 %v10283_v4, %v10289_v62 }
 0xa54   : > { %v10291_v63 = vmul.f32 1.442695, %v10290_v60 }
 0xa56   : > { %13314 = vpow2.f32 %v10291_v63 }
 0xa60   : > { %v13315_v52 = vpop.eup %13314 }
 0xa61   : > { %v10293_v29 = vsel %vm10286_vm10, %v13315_v52, 0.0 }
 0xa62   : > { %10294 = vadd.xlane.f32.xlu0 %v10293_v29 }
 0xaef   : > { %v10295_v48 = vpop.xlane.xlu0 %10294 }
 0xaf0   : > { %13316 = vrcp.f32 %v10295_v48 }
 0xafa   : > { %v13317_v49 = vpop.eup %13316 }
 0xafb   : > { %v10297_v5 = vmul.f32 %v13317_v49, %v13315_v52 }
 0xafd   : > { %10298 = vst.msk [vmem:[%s351_s25] sm:$0x1] %vm10286_vm10, %v10297_v5 }
 0xafe   : > { %13331 = shalt.err (!%p13328_p3)
}
 0xaff   : > { %s13332_s20 = scalar_lea.hbm %s17074_s29, 16  ;;  %s13336_s27 = scalar_lea.hbm %s17127_s10, 32 }
 0xb00   : > { %p13333_p4 = scmp.ne.s32.totalorder %s17074_s29, %s13332_s20  ;;  %p13337_p9 = scmp.lt.u32.totalorder %s17074_s29, %s17127_s10 }
 0xb01   : > { %p13338_p10 = scmp.lt.u32.totalorder %s13336_s27, %s13332_s20  ;;  %p13340_p12 = scmp.lt.u32.totalorder %s13332_s20, %s17074_s29 }
 0xb02   : > { %p13334_p7 = pnand %p13333_p4, %p13479_p5 }
 0xb03   : > { %p13339_p11 = por %p13338_p10, %p13337_p9 }
 0xb04   : > { %p13335_p8 = pneg %p13334_p7 }
 0xb05   : > { %p13341_p13 = por %p13340_p12, %p13339_p11 }
 0xb07   : > { %p13342_p0 = pnand %p13341_p13, %p13335_p8 }
 0xb09   : > { %13345 = shalt.err (!%p13342_p0)
}
 0xb0a   : > { %13272 = dma.vmem_to_hbm [thread:$0]  (%p13479_p5), %s17076_s26, 16, %s17074_s29, %s10300_s30  }
 0xb0b PF: > { %p13278_p1 = scmp.ge.s32.totalorder %s13380_s16, 2  ;;  %s10324_s11 = sand.u32 1, %s13368_s13  }
 0xb0c   : > { %s10325_s12 = scalar_lea.sflag [#allocation3], %s10324_s11 }
 0xb0d   : > { %p13275_p2 = pnand %p13278_p1, %p13483_p6 }
 0xb0f   : > { %13363 = dma.done.wait (!%p13275_p2), %s10325_s12, 16  }
 0xb10   : > { %13365 = vsyncadd (!%p13275_p2), %s10325_s12, 4294967280  ;;  %p20_p3 = scmp.ge.s32.totalorder %s13466_s19, 4   ;;  %s17144_s13 = smov %s13372_s14 }
 0xb11   : > { %s17145_s14 = smov %s13376_s15  ;;  %s17146_s15 = smov %s13477_s22 }
 0xb12   : > { %s17147_s16 = smov %s13466_s19  ;;  %22 = sbr.rel (!%p20_p3) target bundleno = 3 (0x3), region = 134 }
 0xb19   :  { %10329 = vsyncpa [#allocation3], 1 }
 0xb1a   :  { %10331 = vsyncpa [#allocation3 + $0x1], 1 }

</bundles_post_ra>
